<compile_context>
chip_gen: v6e
topology: v6e:2x2x1
jax: 0.10.0
libtpu: 0.0.40
codegen_flags: <defaults>
</compile_context>

<pallas_src>
import functools

import jax
import jax.numpy as jnp
from jax import lax
from jax.experimental import pallas as pl
from jax.experimental.pallas import tpu as pltpu


def _round_up(x, m):
    return (x + m - 1) // m * m


# --------------------------------------------------------------------------
# Kernel 1: hoisted layer-0 input projection (one batched GEMM, row tiled)
# --------------------------------------------------------------------------
def _input_proj_kernel(x_ref, w_ref, b_ref, gi_ref):
    # gi0 = x @ W_ih0 + (b_ih0 with b_hh0 folded in for the r/z gates)
    gi_ref[...] = (
        jnp.dot(x_ref[...], w_ref[...], preferred_element_type=jnp.float32)
        + jnp.broadcast_to(b_ref[...], gi_ref.shape)
    )


# --------------------------------------------------------------------------
# Kernel 2: reverse-time 2-layer GRU recurrence + linear head
# --------------------------------------------------------------------------
def _gru_recurrence_kernel(
    gi0_ref,          # (TC, Bb, 3*Hp) pre-projected layer-0 gate inputs (chunk)
    whh0_ref,         # (Hp, 3*Hp)
    bhn0_ref,         # (1, Hp)
    wih1_ref,         # (Hp, 3*Hp)
    whh1_ref,         # (Hp, 3*Hp)
    bi1_ref,          # (1, 3*Hp)
    bhn1_ref,         # (1, Hp)
    wout_ref,         # (Hp, Lp)
    bout_ref,         # (1, Lp)
    out_ref,          # (Bb, Lp)
    h0_ref, h1_ref,   # VMEM scratch (Bb, Hp), carried across time chunks
    *, unroll,
):
    c = pl.program_id(1)
    num_chunks = pl.num_programs(1)
    TC, Bb, G = gi0_ref.shape
    Hp = whh0_ref.shape[0]

    @pl.when(c == 0)
    def _():
        h0_ref[...] = jnp.zeros_like(h0_ref)
        h1_ref[...] = jnp.zeros_like(h1_ref)

    whh0 = whh0_ref[...]
    wih1 = wih1_ref[...]
    whh1 = whh1_ref[...]
    # Hoist bias broadcasts out of the time loop (JAX does not CSE them).
    bi1 = jnp.broadcast_to(bi1_ref[...], (Bb, G))
    bhn0 = jnp.broadcast_to(bhn0_ref[...], (Bb, Hp))
    bhn1 = jnp.broadcast_to(bhn1_ref[...], (Bb, Hp))

    def cell(gi, h, whh, bhn):
        # gi already contains b_ih (+ b_hh folded in for the r/z gates).
        gh = jnp.dot(h, whh, preferred_element_type=jnp.float32)
        rz = jax.nn.sigmoid(gi[:, :2 * Hp] + gh[:, :2 * Hp])   # one (Bb,2Hp) call
        r = rz[:, :Hp]
        z = rz[:, Hp:]
        n = jnp.tanh(gi[:, 2 * Hp:] + r * (gh[:, 2 * Hp:] + bhn))
        return (1.0 - z) * n + z * h

    def step(s, carry):
        h0, h1 = carry
        t_local = TC - 1 - s            # walk the chunk's timesteps in reverse
        gi0 = gi0_ref[t_local]          # (Bb, 3*Hp), already projected + biased
        h0 = cell(gi0, h0, whh0, bhn0)
        gi1 = jnp.dot(h0, wih1, preferred_element_type=jnp.float32) + bi1
        h1 = cell(gi1, h1, whh1, bhn1)
        return h0, h1

    h0, h1 = lax.fori_loop(0, TC, step, (h0_ref[...], h1_ref[...]),
                           unroll=unroll)
    h0_ref[...] = h0
    h1_ref[...] = h1

    @pl.when(c == num_chunks - 1)
    def _():
        out_ref[...] = (
            jnp.dot(h1, wout_ref[...], preferred_element_type=jnp.float32)
            + jnp.broadcast_to(bout_ref[...], out_ref.shape)
        )


# --------------------------------------------------------------------------
# Wrapper: padding / gate packing / bias folding / chunking / pallas_calls
# --------------------------------------------------------------------------
def _pack_gates(w, H, Hp):
    """(rows, 3H) in PyTorch gate order r|z|n -> (rows, 3*Hp), each gate block
    starting at a 128-lane boundary; padded columns are zero."""
    rows = w.shape[0]
    out = jnp.zeros((rows, 3 * Hp), jnp.float32)
    for g in range(3):
        out = out.at[:, g * Hp:g * Hp + H].set(w[:, g * H:(g + 1) * H])
    return out


def _pad_rows(w, rows_p):
    return jnp.pad(w, ((0, rows_p - w.shape[0]), (0, 0)))


@jax.jit
def reverse_gru_encoder(x, params):
    """x: (B, T, D_in) batch-first (PyTorch convention). Returns (B, latent)."""
    B, T, D = x.shape
    H = params["whh0"].shape[0]
    L = params["wout"].shape[1]

    Bb = 8                               # batch rows per grid block (sublane tile)
    B_pad = _round_up(B, Bb)
    Hp = _round_up(H, 128)               # lane-aligned hidden size
    Lp = _round_up(L, 128)               # lane-dense output
    G = 3 * Hp

    # ---- pack / pad parameters (lane-aligned gate blocks, biases pre-folded) --
    bih0, bhh0 = params["bih0"], params["bhh0"]
    bih1, bhh1 = params["bih1"], params["bhh1"]
    # r/z gates: b_ih + b_hh can be folded; n gate: b_hh_n must stay inside r*(.)
    bi0_fold = jnp.concatenate(
        [bih0[:, :2 * H] + bhh0[:, :2 * H], bih0[:, 2 * H:]], axis=1)
    bi1_fold = jnp.concatenate(
        [bih1[:, :2 * H] + bhh1[:, :2 * H], bih1[:, 2 * H:]], axis=1)

    wih0_p = _pack_gates(params["wih0"], H, Hp)                   # (D,  G)
    whh0_p = _pad_rows(_pack_gates(params["whh0"], H, Hp), Hp)    # (Hp, G)
    wih1_p = _pad_rows(_pack_gates(params["wih1"], H, Hp), Hp)    # (Hp, G)
    whh1_p = _pad_rows(_pack_gates(params["whh1"], H, Hp), Hp)    # (Hp, G)
    bi0_p = _pack_gates(bi0_fold, H, Hp)                          # (1,  G)
    bi1_p = _pack_gates(bi1_fold, H, Hp)                          # (1,  G)
    bhn0_p = jnp.pad(bhh0[:, 2 * H:], ((0, 0), (0, Hp - H)))      # (1, Hp)
    bhn1_p = jnp.pad(bhh1[:, 2 * H:], ((0, 0), (0, Hp - H)))      # (1, Hp)
    wout_p = jnp.pad(params["wout"], ((0, Hp - H), (0, Lp - L)))  # (Hp, Lp)
    bout_p = jnp.pad(params["bout"], ((0, 0), (0, Lp - L)))       # (1, Lp)

    # ---- lane-dense time-major input slab -------------------------------------
    x_tm = jnp.transpose(x, (1, 0, 2)).astype(jnp.float32)        # (T, B, D)
    x_tm = jnp.pad(x_tm, ((0, 0), (0, B_pad - B), (0, 0)))        # (T, B_pad, D)
    x2d = x_tm.reshape(T * B_pad, D)                              # (T*B_pad, D)

    # ---- time-chunk size: largest divisor of T that fits the VMEM budget ------
    bytes_per_step = 2 * Bb * G * 4          # double-buffered gi0 chunk rows
    chunk_budget = 16 * 2**20                # headroom even on v7x (64 MiB VMEM)
    max_tc = max(1, min(T, 64, chunk_budget // bytes_per_step))
    TC = 1
    for d in range(1, T + 1):
        if T % d == 0 and d <= max_tc:
            TC = d
    num_chunks = T // TC
    num_bblocks = B_pad // Bb

    # ---- kernel 1: hoisted layer-0 projection (one pipelined GEMM) ------------
    rows = T * B_pad
    RT = TC * B_pad                          # row tile; divides rows exactly
    gi0_flat = pl.pallas_call(
        _input_proj_kernel,
        out_shape=jax.ShapeDtypeStruct((rows, G), jnp.float32),
        grid=(rows // RT,),
        in_specs=[
            pl.BlockSpec((RT, D), lambda i: (i, 0)),
            pl.BlockSpec((D, G), lambda i: (0, 0)),
            pl.BlockSpec((1, G), lambda i: (0, 0)),
        ],
        out_specs=pl.BlockSpec((RT, G), lambda i: (i, 0)),
        compiler_params=pltpu.CompilerParams(
            dimension_semantics=("parallel",)),
    )(x2d, wih0_p, bi0_p)
    gi0 = gi0_flat.reshape(T, B_pad, G)      # (T, B_pad, 3*Hp), lane-dense

    # ---- kernel 2: reverse-time recurrence, chunk-pipelined --------------------
    resident = 2 * 4 * (whh0_p.size + wih1_p.size + whh1_p.size + wout_p.size
                        + bi1_p.size + bhn0_p.size + bhn1_p.size + bout_p.size)
    est = (resident
           + 2 * TC * Bb * G * 4             # gi0 chunk double buffer
           + 4 * Bb * Lp * 4                 # out double buffer
           + 2 * Bb * Hp * 4                 # h scratch
           + 8 * Bb * G * 4)                 # gate temporaries
    vmem_limit = int(min(32 * 2**20, max(16 * 2**20, 2 * est)))

    kernel = functools.partial(
        _gru_recurrence_kernel, unroll=True if TC <= 16 else 4)

    out_pad = pl.pallas_call(
        kernel,
        out_shape=jax.ShapeDtypeStruct((B_pad, Lp), jnp.float32),
        grid=(num_bblocks, num_chunks),
        in_specs=[
            # torch.flip over time: walk the time chunks in reversed order.
            pl.BlockSpec((TC, Bb, G), lambda b, c: (num_chunks - 1 - c, b, 0)),
            pl.BlockSpec((Hp, G), lambda b, c: (0, 0)),
            pl.BlockSpec((1, Hp), lambda b, c: (0, 0)),
            pl.BlockSpec((Hp, G), lambda b, c: (0, 0)),
            pl.BlockSpec((Hp, G), lambda b, c: (0, 0)),
            pl.BlockSpec((1, G), lambda b, c: (0, 0)),
            pl.BlockSpec((1, Hp), lambda b, c: (0, 0)),
            pl.BlockSpec((Hp, Lp), lambda b, c: (0, 0)),
            pl.BlockSpec((1, Lp), lambda b, c: (0, 0)),
        ],
        out_specs=pl.BlockSpec((Bb, Lp), lambda b, c: (b, 0)),
        scratch_shapes=[
            pltpu.VMEM((Bb, Hp), jnp.float32),   # h0 carried across chunks
            pltpu.VMEM((Bb, Hp), jnp.float32),   # h1 carried across chunks
        ],
        compiler_params=pltpu.CompilerParams(
            # batch blocks are independent -> shardable across TCs on v7x;
            # the time axis carries the recurrence -> "arbitrary".
            dimension_semantics=("parallel", "arbitrary"),
            vmem_limit_bytes=vmem_limit,
        ),
    )(gi0, whh0_p, bhn0_p, wih1_p, whh1_p, bi1_p, bhn1_p, wout_p, bout_p)

    return out_pad[:B, :L]


# --------------------------------------------------------------------------
# Synthetic parameters + pure-JAX reference of the PyTorch forward pass
# --------------------------------------------------------------------------
def make_params(key, d_in, hidden, latent):
    """Shapes match nn.GRU(d_in, hidden, 2) + nn.Linear(hidden, latent); weights
    stored pre-transposed for x @ W, gate order r|z|n along columns."""
    ks = jax.random.split(key, 11)
    scale = 1.0 / jnp.sqrt(hidden)

    def u(k, shape):
        return jax.random.uniform(k, shape, jnp.float32, -scale, scale)

    xav = jnp.sqrt(6.0 / (hidden + latent))
    return {
        "wih0": u(ks[0], (d_in, 3 * hidden)),
        "whh0": u(ks[1], (hidden, 3 * hidden)),
        "bih0": u(ks[2], (1, 3 * hidden)),
        "bhh0": u(ks[3], (1, 3 * hidden)),
        "wih1": u(ks[4], (hidden, 3 * hidden)),
        "whh1": u(ks[5], (hidden, 3 * hidden)),
        "bih1": u(ks[6], (1, 3 * hidden)),
        "bhh1": u(ks[7], (1, 3 * hidden)),
        "wout": jax.random.uniform(ks[8], (hidden, latent), jnp.float32, -xav, xav),
        "bout": u(ks[9], (1, latent)),
    }


def reference(x, params):
    """Pure-JAX reference of ReverseGRUEncoder.forward."""
    B, T, D = x.shape
    H = params["whh0"].shape[0]
    x_rev = jnp.flip(x, axis=1)                     # torch.flip(x, (1,))

    def cell(xt, h, wih, whh, bih, bhh):
        gi = xt @ wih + bih
        gh = h @ whh + bhh
        r = jax.nn.sigmoid(gi[:, :H] + gh[:, :H])
        z = jax.nn.sigmoid(gi[:, H:2 * H] + gh[:, H:2 * H])
        n = jnp.tanh(gi[:, 2 * H:] + r * gh[:, 2 * H:])
        return (1.0 - z) * n + z * h

    def scan_fn(carry, xt):
        h0, h1 = carry
        h0 = cell(xt, h0, params["wih0"], params["whh0"],
                  params["bih0"], params["bhh0"])
        h1 = cell(h0, h1, params["wih1"], params["whh1"],
                  params["bih1"], params["bhh1"])
        return (h0, h1), None

    h0 = jnp.zeros((B, H), jnp.float32)
    h1 = jnp.zeros((B, H), jnp.float32)
    (h0, h1), _ = lax.scan(scan_fn, (h0, h1), jnp.transpose(x_rev, (1, 0, 2)))
    return h1 @ params["wout"] + params["bout"]


if __name__ == "__main__":
    # Module config: dimension_in=3, encode_obs_time=True -> GRU input dim = 4
    # (forward expects observed_data to already carry the time feature).
    B, T, D_IN, HIDDEN, LATENT = 2, 8, 4, 32, 8

    key = jax.random.PRNGKey(0)
    k_x, k_p = jax.random.split(key)
    x = jax.random.normal(k_x, (B, T, D_IN), jnp.float32)
    params = make_params(k_p, D_IN, HIDDEN, LATENT)

    out = reverse_gru_encoder(x, params)
    out = jax.block_until_ready(out)

    ref = reference(x, params)
    assert out.shape == (B, LATENT), out.shape
    assert jnp.allclose(out, ref, atol=1e-4, rtol=1e-4), (out, ref)

    print("KERNEL_OK")
</pallas_src>

<mosaic_0001>
module attributes {stable_mosaic.version = 11 : i64} {
  func.func @_input_proj_kernel(%arg0: i32, %arg1: memref<64x4xf32, #tpu.memory_space<vmem>>, %arg2: memref<4x384xf32, #tpu.memory_space<vmem>>, %arg3: memref<1x384xf32, #tpu.memory_space<vmem>>, %arg4: memref<64x384xf32, #tpu.memory_space<vmem>>) attributes {dimension_semantics = [#tpu.dimension_semantics<parallel>], iteration_bounds = array<i64: 1>, scalar_prefetch = 0 : i64, scratch_operands = 0 : i64, tpu.core_type = #tpu.core_type<tc>, window_params = [{transform_indices = @transform_0, window_bounds = array<i64: 64, 4>}, {pipeline_mode = #tpu.pipeline_mode<synchronous>, transform_indices = @transform_1, window_bounds = array<i64: 4, 384>}, {pipeline_mode = #tpu.pipeline_mode<synchronous>, transform_indices = @transform_2, window_bounds = array<i64: 1, 384>}, {transform_indices = @transform_3, window_bounds = array<i64: 64, 384>}]} {
    %c0 = arith.constant 0 : index
    %c0_0 = arith.constant 0 : index
    %0 = vector.load %arg1[%c0, %c0_0] : memref<64x4xf32, #tpu.memory_space<vmem>>, vector<64x4xf32>
    %c0_1 = arith.constant 0 : index
    %c0_2 = arith.constant 0 : index
    %1 = vector.load %arg2[%c0_1, %c0_2] : memref<4x384xf32, #tpu.memory_space<vmem>>, vector<4x384xf32>
    %cst = arith.constant dense<0.000000e+00> : vector<64x384xf32>
    %2 = tpu.matmul %0, %1, %cst {dimension_numbers = #tpu.dot_dimension_numbers<[1], [0], [0], [1], [0, 0, 1, 1], [], []>} : vector<64x4xf32>, vector<4x384xf32>, vector<64x384xf32> -> vector<64x384xf32>
    %c0_3 = arith.constant 0 : index
    %c0_4 = arith.constant 0 : index
    %3 = vector.load %arg3[%c0_3, %c0_4] : memref<1x384xf32, #tpu.memory_space<vmem>>, vector<1x384xf32>
    %4 = vector.shape_cast %3 : vector<1x384xf32> to vector<1x384xf32>
    %5 = vector.broadcast %4 : vector<1x384xf32> to vector<64x384xf32>
    %6 = arith.addf %2, %5 : vector<64x384xf32>
    %c0_5 = arith.constant 0 : index
    %c0_6 = arith.constant 0 : index
    %7 = vector.load %arg4[%c0_5, %c0_6] : memref<64x384xf32, #tpu.memory_space<vmem>>, vector<64x384xf32>
    tpu.vector_store %arg4[%c0_5, %c0_6], %6 {strides = array<i32>} : memref<64x384xf32, #tpu.memory_space<vmem>>, vector<64x384xf32>,
    return
  }
  func.func @transform_0(%arg0: i32) -> (i32, i32) {
    %c0_i32 = arith.constant 0 : i32
    %c0_i32_0 = arith.constant 0 : i32
    return %arg0, %c0_i32 : i32, i32
  }
  func.func @transform_1(%arg0: i32) -> (i32, i32) {
    %c0_i32 = arith.constant 0 : i32
    %c0_i32_0 = arith.constant 0 : i32
    %c0_i32_1 = arith.constant 0 : i32
    return %c0_i32, %c0_i32_0 : i32, i32
  }
  func.func @transform_2(%arg0: i32) -> (i32, i32) {
    %c0_i32 = arith.constant 0 : i32
    %c0_i32_0 = arith.constant 0 : i32
    %c0_i32_1 = arith.constant 0 : i32
    return %c0_i32, %c0_i32_0 : i32, i32
  }
  func.func @transform_3(%arg0: i32) -> (i32, i32) {
    %c0_i32 = arith.constant 0 : i32
    %c0_i32_0 = arith.constant 0 : i32
    return %arg0, %c0_i32 : i32, i32
  }
}

module attributes {stable_mosaic.version = 11 : i64} {
  func.func @_gru_recurrence_kernel(%arg0: i32, %arg1: i32, %arg2: memref<8x8x384xf32, #tpu.memory_space<vmem>>, %arg3: memref<128x384xf32, #tpu.memory_space<vmem>>, %arg4: memref<1x128xf32, #tpu.memory_space<vmem>>, %arg5: memref<128x384xf32, #tpu.memory_space<vmem>>, %arg6: memref<128x384xf32, #tpu.memory_space<vmem>>, %arg7: memref<1x384xf32, #tpu.memory_space<vmem>>, %arg8: memref<1x128xf32, #tpu.memory_space<vmem>>, %arg9: memref<128x128xf32, #tpu.memory_space<vmem>>, %arg10: memref<1x128xf32, #tpu.memory_space<vmem>>, %arg11: memref<8x128xf32, #tpu.memory_space<vmem>>, %arg12: memref<8x128xf32, #tpu.memory_space<vmem>>, %arg13: memref<8x128xf32, #tpu.memory_space<vmem>>) attributes {dimension_semantics = [#tpu.dimension_semantics<parallel>, #tpu.dimension_semantics<arbitrary>], iteration_bounds = array<i64: 1, 1>, scalar_prefetch = 0 : i64, scratch_operands = 2 : i64, tpu.core_type = #tpu.core_type<tc>, window_params = [{transform_indices = @transform_0, window_bounds = array<i64: 8, 8, 384>}, {pipeline_mode = #tpu.pipeline_mode<synchronous>, transform_indices = @transform_1, window_bounds = array<i64: 128, 384>}, {pipeline_mode = #tpu.pipeline_mode<synchronous>, transform_indices = @transform_2, window_bounds = array<i64: 1, 128>}, {pipeline_mode = #tpu.pipeline_mode<synchronous>, transform_indices = @transform_3, window_bounds = array<i64: 128, 384>}, {pipeline_mode = #tpu.pipeline_mode<synchronous>, transform_indices = @transform_4, window_bounds = array<i64: 128, 384>}, {pipeline_mode = #tpu.pipeline_mode<synchronous>, transform_indices = @transform_5, window_bounds = array<i64: 1, 384>}, {pipeline_mode = #tpu.pipeline_mode<synchronous>, transform_indices = @transform_6, window_bounds = array<i64: 1, 128>}, {pipeline_mode = #tpu.pipeline_mode<synchronous>, transform_indices = @transform_7, window_bounds = array<i64: 128, 128>}, {pipeline_mode = #tpu.pipeline_mode<synchronous>, transform_indices = @transform_8, window_bounds = array<i64: 1, 128>}, {transform_indices = @transform_9, window_bounds = array<i64: 8, 128>}]} {
    %c0_i32 = arith.constant 0 : i32
    %0 = arith.cmpi eq, %arg1, %c0_i32 : i32
    %1 = arith.extui %0 : i1 to i32
    %c0_i32_0 = arith.constant 0 : i32
    %2 = arith.cmpi ne, %1, %c0_i32_0 : i32
    scf.if %2 {
      %cst_102 = arith.constant 0.000000e+00 : f32
      %422 = vector.broadcast %cst_102 : f32 to vector<8x128xf32>
      %c0_103 = arith.constant 0 : index
      %c0_104 = arith.constant 0 : index
      %423 = vector.load %arg12[%c0_103, %c0_104] : memref<8x128xf32, #tpu.memory_space<vmem>>, vector<8x128xf32>
      tpu.vector_store %arg12[%c0_103, %c0_104], %422 {strides = array<i32>} : memref<8x128xf32, #tpu.memory_space<vmem>>, vector<8x128xf32>,
      %cst_105 = arith.constant 0.000000e+00 : f32
      %424 = vector.broadcast %cst_105 : f32 to vector<8x128xf32>
      %c0_106 = arith.constant 0 : index
      %c0_107 = arith.constant 0 : index
      %425 = vector.load %arg13[%c0_106, %c0_107] : memref<8x128xf32, #tpu.memory_space<vmem>>, vector<8x128xf32>
      tpu.vector_store %arg13[%c0_106, %c0_107], %424 {strides = array<i32>} : memref<8x128xf32, #tpu.memory_space<vmem>>, vector<8x128xf32>,
    } else {
    }
    %c0 = arith.constant 0 : index
    %c0_1 = arith.constant 0 : index
    %3 = vector.load %arg3[%c0, %c0_1] : memref<128x384xf32, #tpu.memory_space<vmem>>, vector<128x384xf32>
    %c0_2 = arith.constant 0 : index
    %c0_3 = arith.constant 0 : index
    %4 = vector.load %arg5[%c0_2, %c0_3] : memref<128x384xf32, #tpu.memory_space<vmem>>, vector<128x384xf32>
    %c0_4 = arith.constant 0 : index
    %c0_5 = arith.constant 0 : index
    %5 = vector.load %arg6[%c0_4, %c0_5] : memref<128x384xf32, #tpu.memory_space<vmem>>, vector<128x384xf32>
    %c0_6 = arith.constant 0 : index
    %c0_7 = arith.constant 0 : index
    %6 = vector.load %arg7[%c0_6, %c0_7] : memref<1x384xf32, #tpu.memory_space<vmem>>, vector<1x384xf32>
    %7 = vector.shape_cast %6 : vector<1x384xf32> to vector<1x384xf32>
    %8 = vector.broadcast %7 : vector<1x384xf32> to vector<8x384xf32>
    %c0_8 = arith.constant 0 : index
    %c0_9 = arith.constant 0 : index
    %9 = vector.load %arg4[%c0_8, %c0_9] : memref<1x128xf32, #tpu.memory_space<vmem>>, vector<1x128xf32>
    %10 = vector.shape_cast %9 : vector<1x128xf32> to vector<1x128xf32>
    %11 = vector.broadcast %10 : vector<1x128xf32> to vector<8x128xf32>
    %c0_10 = arith.constant 0 : index
    %c0_11 = arith.constant 0 : index
    %12 = vector.load %arg8[%c0_10, %c0_11] : memref<1x128xf32, #tpu.memory_space<vmem>>, vector<1x128xf32>
    %13 = vector.shape_cast %12 : vector<1x128xf32> to vector<1x128xf32>
    %14 = vector.broadcast %13 : vector<1x128xf32> to vector<8x128xf32>
    %c0_12 = arith.constant 0 : index
    %c0_13 = arith.constant 0 : index
    %15 = vector.load %arg12[%c0_12, %c0_13] : memref<8x128xf32, #tpu.memory_space<vmem>>, vector<8x128xf32>
    %c0_14 = arith.constant 0 : index
    %c0_15 = arith.constant 0 : index
    %16 = vector.load %arg13[%c0_14, %c0_15] : memref<8x128xf32, #tpu.memory_space<vmem>>, vector<8x128xf32>
    %c0_i32_16 = arith.constant 0 : i32
    %c7_i32 = arith.constant 7 : i32
    %17 = arith.subi %c7_i32, %c0_i32_16 : i32
    %18 = arith.index_cast %17 : i32 to index
    %c0_17 = arith.constant 0 : index
    %c0_18 = arith.constant 0 : index
    %19 = vector.load %arg2[%18, %c0_17, %c0_18] : memref<8x8x384xf32, #tpu.memory_space<vmem>>, vector<1x8x384xf32>
    %20 = vector.shape_cast %19 : vector<1x8x384xf32> to vector<8x384xf32>
    %cst = arith.constant dense<0.000000e+00> : vector<8x384xf32>
    %21 = tpu.matmul %15, %3, %cst {dimension_numbers = #tpu.dot_dimension_numbers<[1], [0], [0], [1], [0, 0, 1, 1], [], []>} : vector<8x128xf32>, vector<128x384xf32>, vector<8x384xf32> -> vector<8x384xf32>
    %22 = vector.extract_strided_slice %20 {offsets = [0, 0], sizes = [8, 256], strides = [1, 1]} : vector<8x384xf32> to vector<8x256xf32>
    %23 = vector.extract_strided_slice %21 {offsets = [0, 0], sizes = [8, 256], strides = [1, 1]} : vector<8x384xf32> to vector<8x256xf32>
    %24 = arith.addf %22, %23 : vector<8x256xf32>
    %25 = arith.negf %24 : vector<8x256xf32>
    %26 = math.exp %25 : vector<8x256xf32>
    %cst_19 = arith.constant 1.000000e+00 : f32
    %27 = vector.broadcast %cst_19 : f32 to vector<8x256xf32>
    %28 = arith.addf %27, %26 : vector<8x256xf32>
    %29 = arith.divf %27, %28 : vector<8x256xf32>
    %30 = vector.extract_strided_slice %29 {offsets = [0, 0], sizes = [8, 128], strides = [1, 1]} : vector<8x256xf32> to vector<8x128xf32>
    %31 = vector.extract_strided_slice %29 {offsets = [0, 128], sizes = [8, 128], strides = [1, 1]} : vector<8x256xf32> to vector<8x128xf32>
    %32 = vector.extract_strided_slice %20 {offsets = [0, 256], sizes = [8, 128], strides = [1, 1]} : vector<8x384xf32> to vector<8x128xf32>
    %33 = vector.extract_strided_slice %21 {offsets = [0, 256], sizes = [8, 128], strides = [1, 1]} : vector<8x384xf32> to vector<8x128xf32>
    %34 = arith.addf %33, %11 : vector<8x128xf32>
    %35 = arith.mulf %30, %34 : vector<8x128xf32>
    %36 = arith.addf %32, %35 : vector<8x128xf32>
    %37 = math.tanh %36 : vector<8x128xf32>
    %cst_20 = arith.constant 1.000000e+00 : f32
    %38 = vector.broadcast %cst_20 : f32 to vector<8x128xf32>
    %39 = arith.subf %38, %31 : vector<8x128xf32>
    %40 = arith.mulf %39, %37 : vector<8x128xf32>
    %41 = arith.mulf %31, %15 : vector<8x128xf32>
    %42 = arith.addf %40, %41 : vector<8x128xf32>
    %cst_21 = arith.constant dense<0.000000e+00> : vector<8x384xf32>
    %43 = tpu.matmul %42, %4, %cst_21 {dimension_numbers = #tpu.dot_dimension_numbers<[1], [0], [0], [1], [0, 0, 1, 1], [], []>} : vector<8x128xf32>, vector<128x384xf32>, vector<8x384xf32> -> vector<8x384xf32>
    %44 = arith.addf %43, %8 : vector<8x384xf32>
    %cst_22 = arith.constant dense<0.000000e+00> : vector<8x384xf32>
    %45 = tpu.matmul %16, %5, %cst_22 {dimension_numbers = #tpu.dot_dimension_numbers<[1], [0], [0], [1], [0, 0, 1, 1], [], []>} : vector<8x128xf32>, vector<128x384xf32>, vector<8x384xf32> -> vector<8x384xf32>
    %46 = vector.extract_strided_slice %44 {offsets = [0, 0], sizes = [8, 256], strides = [1, 1]} : vector<8x384xf32> to vector<8x256xf32>
    %47 = vector.extract_strided_slice %45 {offsets = [0, 0], sizes = [8, 256], strides = [1, 1]} : vector<8x384xf32> to vector<8x256xf32>
    %48 = arith.addf %46, %47 : vector<8x256xf32>
    %49 = arith.negf %48 : vector<8x256xf32>
    %50 = math.exp %49 : vector<8x256xf32>
    %cst_23 = arith.constant 1.000000e+00 : f32
    %51 = vector.broadcast %cst_23 : f32 to vector<8x256xf32>
    %52 = arith.addf %51, %50 : vector<8x256xf32>
    %53 = arith.divf %51, %52 : vector<8x256xf32>
    %54 = vector.extract_strided_slice %53 {offsets = [0, 0], sizes = [8, 128], strides = [1, 1]} : vector<8x256xf32> to vector<8x128xf32>
    %55 = vector.extract_strided_slice %53 {offsets = [0, 128], sizes = [8, 128], strides = [1, 1]} : vector<8x256xf32> to vector<8x128xf32>
    %56 = vector.extract_strided_slice %44 {offsets = [0, 256], sizes = [8, 128], strides = [1, 1]} : vector<8x384xf32> to vector<8x128xf32>
    %57 = vector.extract_strided_slice %45 {offsets = [0, 256], sizes = [8, 128], strides = [1, 1]} : vector<8x384xf32> to vector<8x128xf32>
    %58 = arith.addf %57, %14 : vector<8x128xf32>
    %59 = arith.mulf %54, %58 : vector<8x128xf32>
    %60 = arith.addf %56, %59 : vector<8x128xf32>
    %61 = math.tanh %60 : vector<8x128xf32>
    %cst_24 = arith.constant 1.000000e+00 : f32
    %62 = vector.broadcast %cst_24 : f32 to vector<8x128xf32>
    %63 = arith.subf %62, %55 : vector<8x128xf32>
    %64 = arith.mulf %63, %61 : vector<8x128xf32>
    %65 = arith.mulf %55, %16 : vector<8x128xf32>
    %66 = arith.addf %64, %65 : vector<8x128xf32>
    %c1_i32 = arith.constant 1 : i32
    %c7_i32_25 = arith.constant 7 : i32
    %67 = arith.subi %c7_i32_25, %c1_i32 : i32
    %68 = arith.index_cast %67 : i32 to index
    %c0_26 = arith.constant 0 : index
    %c0_27 = arith.constant 0 : index
    %69 = vector.load %arg2[%68, %c0_26, %c0_27] : memref<8x8x384xf32, #tpu.memory_space<vmem>>, vector<1x8x384xf32>
    %70 = vector.shape_cast %69 : vector<1x8x384xf32> to vector<8x384xf32>
    %cst_28 = arith.constant dense<0.000000e+00> : vector<8x384xf32>
    %71 = tpu.matmul %42, %3, %cst_28 {dimension_numbers = #tpu.dot_dimension_numbers<[1], [0], [0], [1], [0, 0, 1, 1], [], []>} : vector<8x128xf32>, vector<128x384xf32>, vector<8x384xf32> -> vector<8x384xf32>
    %72 = vector.extract_strided_slice %70 {offsets = [0, 0], sizes = [8, 256], strides = [1, 1]} : vector<8x384xf32> to vector<8x256xf32>
    %73 = vector.extract_strided_slice %71 {offsets = [0, 0], sizes = [8, 256], strides = [1, 1]} : vector<8x384xf32> to vector<8x256xf32>
    %74 = arith.addf %72, %73 : vector<8x256xf32>
    %75 = arith.negf %74 : vector<8x256xf32>
    %76 = math.exp %75 : vector<8x256xf32>
    %cst_29 = arith.constant 1.000000e+00 : f32
    %77 = vector.broadcast %cst_29 : f32 to vector<8x256xf32>
    %78 = arith.addf %77, %76 : vector<8x256xf32>
    %79 = arith.divf %77, %78 : vector<8x256xf32>
    %80 = vector.extract_strided_slice %79 {offsets = [0, 0], sizes = [8, 128], strides = [1, 1]} : vector<8x256xf32> to vector<8x128xf32>
    %81 = vector.extract_strided_slice %79 {offsets = [0, 128], sizes = [8, 128], strides = [1, 1]} : vector<8x256xf32> to vector<8x128xf32>
    %82 = vector.extract_strided_slice %70 {offsets = [0, 256], sizes = [8, 128], strides = [1, 1]} : vector<8x384xf32> to vector<8x128xf32>
    %83 = vector.extract_strided_slice %71 {offsets = [0, 256], sizes = [8, 128], strides = [1, 1]} : vector<8x384xf32> to vector<8x128xf32>
    %84 = arith.addf %83, %11 : vector<8x128xf32>
    %85 = arith.mulf %80, %84 : vector<8x128xf32>
    %86 = arith.addf %82, %85 : vector<8x128xf32>
    %87 = math.tanh %86 : vector<8x128xf32>
    %cst_30 = arith.constant 1.000000e+00 : f32
    %88 = vector.broadcast %cst_30 : f32 to vector<8x128xf32>
    %89 = arith.subf %88, %81 : vector<8x128xf32>
    %90 = arith.mulf %89, %87 : vector<8x128xf32>
    %91 = arith.mulf %81, %42 : vector<8x128xf32>
    %92 = arith.addf %90, %91 : vector<8x128xf32>
    %cst_31 = arith.constant dense<0.000000e+00> : vector<8x384xf32>
    %93 = tpu.matmul %92, %4, %cst_31 {dimension_numbers = #tpu.dot_dimension_numbers<[1], [0], [0], [1], [0, 0, 1, 1], [], []>} : vector<8x128xf32>, vector<128x384xf32>, vector<8x384xf32> -> vector<8x384xf32>
    %94 = arith.addf %93, %8 : vector<8x384xf32>
    %cst_32 = arith.constant dense<0.000000e+00> : vector<8x384xf32>
    %95 = tpu.matmul %66, %5, %cst_32 {dimension_numbers = #tpu.dot_dimension_numbers<[1], [0], [0], [1], [0, 0, 1, 1], [], []>} : vector<8x128xf32>, vector<128x384xf32>, vector<8x384xf32> -> vector<8x384xf32>
    %96 = vector.extract_strided_slice %94 {offsets = [0, 0], sizes = [8, 256], strides = [1, 1]} : vector<8x384xf32> to vector<8x256xf32>
    %97 = vector.extract_strided_slice %95 {offsets = [0, 0], sizes = [8, 256], strides = [1, 1]} : vector<8x384xf32> to vector<8x256xf32>
    %98 = arith.addf %96, %97 : vector<8x256xf32>
    %99 = arith.negf %98 : vector<8x256xf32>
    %100 = math.exp %99 : vector<8x256xf32>
    %cst_33 = arith.constant 1.000000e+00 : f32
    %101 = vector.broadcast %cst_33 : f32 to vector<8x256xf32>
    %102 = arith.addf %101, %100 : vector<8x256xf32>
    %103 = arith.divf %101, %102 : vector<8x256xf32>
    %104 = vector.extract_strided_slice %103 {offsets = [0, 0], sizes = [8, 128], strides = [1, 1]} : vector<8x256xf32> to vector<8x128xf32>
    %105 = vector.extract_strided_slice %103 {offsets = [0, 128], sizes = [8, 128], strides = [1, 1]} : vector<8x256xf32> to vector<8x128xf32>
    %106 = vector.extract_strided_slice %94 {offsets = [0, 256], sizes = [8, 128], strides = [1, 1]} : vector<8x384xf32> to vector<8x128xf32>
    %107 = vector.extract_strided_slice %95 {offsets = [0, 256], sizes = [8, 128], strides = [1, 1]} : vector<8x384xf32> to vector<8x128xf32>
    %108 = arith.addf %107, %14 : vector<8x128xf32>
    %109 = arith.mulf %104, %108 : vector<8x128xf32>
    %110 = arith.addf %106, %109 : vector<8x128xf32>
    %111 = math.tanh %110 : vector<8x128xf32>
    %cst_34 = arith.constant 1.000000e+00 : f32
    %112 = vector.broadcast %cst_34 : f32 to vector<8x128xf32>
    %113 = arith.subf %112, %105 : vector<8x128xf32>
    %114 = arith.mulf %113, %111 : vector<8x128xf32>
    %115 = arith.mulf %105, %66 : vector<8x128xf32>
    %116 = arith.addf %114, %115 : vector<8x128xf32>
    %c2_i32 = arith.constant 2 : i32
    %c7_i32_35 = arith.constant 7 : i32
    %117 = arith.subi %c7_i32_35, %c2_i32 : i32
    %118 = arith.index_cast %117 : i32 to index
    %c0_36 = arith.constant 0 : index
    %c0_37 = arith.constant 0 : index
    %119 = vector.load %arg2[%118, %c0_36, %c0_37] : memref<8x8x384xf32, #tpu.memory_space<vmem>>, vector<1x8x384xf32>
    %120 = vector.shape_cast %119 : vector<1x8x384xf32> to vector<8x384xf32>
    %cst_38 = arith.constant dense<0.000000e+00> : vector<8x384xf32>
    %121 = tpu.matmul %92, %3, %cst_38 {dimension_numbers = #tpu.dot_dimension_numbers<[1], [0], [0], [1], [0, 0, 1, 1], [], []>} : vector<8x128xf32>, vector<128x384xf32>, vector<8x384xf32> -> vector<8x384xf32>
    %122 = vector.extract_strided_slice %120 {offsets = [0, 0], sizes = [8, 256], strides = [1, 1]} : vector<8x384xf32> to vector<8x256xf32>
    %123 = vector.extract_strided_slice %121 {offsets = [0, 0], sizes = [8, 256], strides = [1, 1]} : vector<8x384xf32> to vector<8x256xf32>
    %124 = arith.addf %122, %123 : vector<8x256xf32>
    %125 = arith.negf %124 : vector<8x256xf32>
    %126 = math.exp %125 : vector<8x256xf32>
    %cst_39 = arith.constant 1.000000e+00 : f32
    %127 = vector.broadcast %cst_39 : f32 to vector<8x256xf32>
    %128 = arith.addf %127, %126 : vector<8x256xf32>
    %129 = arith.divf %127, %128 : vector<8x256xf32>
    %130 = vector.extract_strided_slice %129 {offsets = [0, 0], sizes = [8, 128], strides = [1, 1]} : vector<8x256xf32> to vector<8x128xf32>
    %131 = vector.extract_strided_slice %129 {offsets = [0, 128], sizes = [8, 128], strides = [1, 1]} : vector<8x256xf32> to vector<8x128xf32>
    %132 = vector.extract_strided_slice %120 {offsets = [0, 256], sizes = [8, 128], strides = [1, 1]} : vector<8x384xf32> to vector<8x128xf32>
    %133 = vector.extract_strided_slice %121 {offsets = [0, 256], sizes = [8, 128], strides = [1, 1]} : vector<8x384xf32> to vector<8x128xf32>
    %134 = arith.addf %133, %11 : vector<8x128xf32>
    %135 = arith.mulf %130, %134 : vector<8x128xf32>
    %136 = arith.addf %132, %135 : vector<8x128xf32>
    %137 = math.tanh %136 : vector<8x128xf32>
    %cst_40 = arith.constant 1.000000e+00 : f32
    %138 = vector.broadcast %cst_40 : f32 to vector<8x128xf32>
    %139 = arith.subf %138, %131 : vector<8x128xf32>
    %140 = arith.mulf %139, %137 : vector<8x128xf32>
    %141 = arith.mulf %131, %92 : vector<8x128xf32>
    %142 = arith.addf %140, %141 : vector<8x128xf32>
    %cst_41 = arith.constant dense<0.000000e+00> : vector<8x384xf32>
    %143 = tpu.matmul %142, %4, %cst_41 {dimension_numbers = #tpu.dot_dimension_numbers<[1], [0], [0], [1], [0, 0, 1, 1], [], []>} : vector<8x128xf32>, vector<128x384xf32>, vector<8x384xf32> -> vector<8x384xf32>
    %144 = arith.addf %143, %8 : vector<8x384xf32>
    %cst_42 = arith.constant dense<0.000000e+00> : vector<8x384xf32>
    %145 = tpu.matmul %116, %5, %cst_42 {dimension_numbers = #tpu.dot_dimension_numbers<[1], [0], [0], [1], [0, 0, 1, 1], [], []>} : vector<8x128xf32>, vector<128x384xf32>, vector<8x384xf32> -> vector<8x384xf32>
    %146 = vector.extract_strided_slice %144 {offsets = [0, 0], sizes = [8, 256], strides = [1, 1]} : vector<8x384xf32> to vector<8x256xf32>
    %147 = vector.extract_strided_slice %145 {offsets = [0, 0], sizes = [8, 256], strides = [1, 1]} : vector<8x384xf32> to vector<8x256xf32>
    %148 = arith.addf %146, %147 : vector<8x256xf32>
    %149 = arith.negf %148 : vector<8x256xf32>
    %150 = math.exp %149 : vector<8x256xf32>
    %cst_43 = arith.constant 1.000000e+00 : f32
    %151 = vector.broadcast %cst_43 : f32 to vector<8x256xf32>
    %152 = arith.addf %151, %150 : vector<8x256xf32>
    %153 = arith.divf %151, %152 : vector<8x256xf32>
    %154 = vector.extract_strided_slice %153 {offsets = [0, 0], sizes = [8, 128], strides = [1, 1]} : vector<8x256xf32> to vector<8x128xf32>
    %155 = vector.extract_strided_slice %153 {offsets = [0, 128], sizes = [8, 128], strides = [1, 1]} : vector<8x256xf32> to vector<8x128xf32>
    %156 = vector.extract_strided_slice %144 {offsets = [0, 256], sizes = [8, 128], strides = [1, 1]} : vector<8x384xf32> to vector<8x128xf32>
    %157 = vector.extract_strided_slice %145 {offsets = [0, 256], sizes = [8, 128], strides = [1, 1]} : vector<8x384xf32> to vector<8x128xf32>
    %158 = arith.addf %157, %14 : vector<8x128xf32>
    %159 = arith.mulf %154, %158 : vector<8x128xf32>
    %160 = arith.addf %156, %159 : vector<8x128xf32>
    %161 = math.tanh %160 : vector<8x128xf32>
    %cst_44 = arith.constant 1.000000e+00 : f32
    %162 = vector.broadcast %cst_44 : f32 to vector<8x128xf32>
    %163 = arith.subf %162, %155 : vector<8x128xf32>
    %164 = arith.mulf %163, %161 : vector<8x128xf32>
    %165 = arith.mulf %155, %116 : vector<8x128xf32>
    %166 = arith.addf %164, %165 : vector<8x128xf32>
    %c3_i32 = arith.constant 3 : i32
    %c7_i32_45 = arith.constant 7 : i32
    %167 = arith.subi %c7_i32_45, %c3_i32 : i32
    %168 = arith.index_cast %167 : i32 to index
    %c0_46 = arith.constant 0 : index
    %c0_47 = arith.constant 0 : index
    %169 = vector.load %arg2[%168, %c0_46, %c0_47] : memref<8x8x384xf32, #tpu.memory_space<vmem>>, vector<1x8x384xf32>
    %170 = vector.shape_cast %169 : vector<1x8x384xf32> to vector<8x384xf32>
    %cst_48 = arith.constant dense<0.000000e+00> : vector<8x384xf32>
    %171 = tpu.matmul %142, %3, %cst_48 {dimension_numbers = #tpu.dot_dimension_numbers<[1], [0], [0], [1], [0, 0, 1, 1], [], []>} : vector<8x128xf32>, vector<128x384xf32>, vector<8x384xf32> -> vector<8x384xf32>
    %172 = vector.extract_strided_slice %170 {offsets = [0, 0], sizes = [8, 256], strides = [1, 1]} : vector<8x384xf32> to vector<8x256xf32>
    %173 = vector.extract_strided_slice %171 {offsets = [0, 0], sizes = [8, 256], strides = [1, 1]} : vector<8x384xf32> to vector<8x256xf32>
    %174 = arith.addf %172, %173 : vector<8x256xf32>
    %175 = arith.negf %174 : vector<8x256xf32>
    %176 = math.exp %175 : vector<8x256xf32>
    %cst_49 = arith.constant 1.000000e+00 : f32
    %177 = vector.broadcast %cst_49 : f32 to vector<8x256xf32>
    %178 = arith.addf %177, %176 : vector<8x256xf32>
    %179 = arith.divf %177, %178 : vector<8x256xf32>
    %180 = vector.extract_strided_slice %179 {offsets = [0, 0], sizes = [8, 128], strides = [1, 1]} : vector<8x256xf32> to vector<8x128xf32>
    %181 = vector.extract_strided_slice %179 {offsets = [0, 128], sizes = [8, 128], strides = [1, 1]} : vector<8x256xf32> to vector<8x128xf32>
    %182 = vector.extract_strided_slice %170 {offsets = [0, 256], sizes = [8, 128], strides = [1, 1]} : vector<8x384xf32> to vector<8x128xf32>
    %183 = vector.extract_strided_slice %171 {offsets = [0, 256], sizes = [8, 128], strides = [1, 1]} : vector<8x384xf32> to vector<8x128xf32>
    %184 = arith.addf %183, %11 : vector<8x128xf32>
    %185 = arith.mulf %180, %184 : vector<8x128xf32>
    %186 = arith.addf %182, %185 : vector<8x128xf32>
    %187 = math.tanh %186 : vector<8x128xf32>
    %cst_50 = arith.constant 1.000000e+00 : f32
    %188 = vector.broadcast %cst_50 : f32 to vector<8x128xf32>
    %189 = arith.subf %188, %181 : vector<8x128xf32>
    %190 = arith.mulf %189, %187 : vector<8x128xf32>
    %191 = arith.mulf %181, %142 : vector<8x128xf32>
    %192 = arith.addf %190, %191 : vector<8x128xf32>
    %cst_51 = arith.constant dense<0.000000e+00> : vector<8x384xf32>
    %193 = tpu.matmul %192, %4, %cst_51 {dimension_numbers = #tpu.dot_dimension_numbers<[1], [0], [0], [1], [0, 0, 1, 1], [], []>} : vector<8x128xf32>, vector<128x384xf32>, vector<8x384xf32> -> vector<8x384xf32>
    %194 = arith.addf %193, %8 : vector<8x384xf32>
    %cst_52 = arith.constant dense<0.000000e+00> : vector<8x384xf32>
    %195 = tpu.matmul %166, %5, %cst_52 {dimension_numbers = #tpu.dot_dimension_numbers<[1], [0], [0], [1], [0, 0, 1, 1], [], []>} : vector<8x128xf32>, vector<128x384xf32>, vector<8x384xf32> -> vector<8x384xf32>
    %196 = vector.extract_strided_slice %194 {offsets = [0, 0], sizes = [8, 256], strides = [1, 1]} : vector<8x384xf32> to vector<8x256xf32>
    %197 = vector.extract_strided_slice %195 {offsets = [0, 0], sizes = [8, 256], strides = [1, 1]} : vector<8x384xf32> to vector<8x256xf32>
    %198 = arith.addf %196, %197 : vector<8x256xf32>
    %199 = arith.negf %198 : vector<8x256xf32>
    %200 = math.exp %199 : vector<8x256xf32>
    %cst_53 = arith.constant 1.000000e+00 : f32
    %201 = vector.broadcast %cst_53 : f32 to vector<8x256xf32>
    %202 = arith.addf %201, %200 : vector<8x256xf32>
    %203 = arith.divf %201, %202 : vector<8x256xf32>
    %204 = vector.extract_strided_slice %203 {offsets = [0, 0], sizes = [8, 128], strides = [1, 1]} : vector<8x256xf32> to vector<8x128xf32>
    %205 = vector.extract_strided_slice %203 {offsets = [0, 128], sizes = [8, 128], strides = [1, 1]} : vector<8x256xf32> to vector<8x128xf32>
    %206 = vector.extract_strided_slice %194 {offsets = [0, 256], sizes = [8, 128], strides = [1, 1]} : vector<8x384xf32> to vector<8x128xf32>
    %207 = vector.extract_strided_slice %195 {offsets = [0, 256], sizes = [8, 128], strides = [1, 1]} : vector<8x384xf32> to vector<8x128xf32>
    %208 = arith.addf %207, %14 : vector<8x128xf32>
    %209 = arith.mulf %204, %208 : vector<8x128xf32>
    %210 = arith.addf %206, %209 : vector<8x128xf32>
    %211 = math.tanh %210 : vector<8x128xf32>
    %cst_54 = arith.constant 1.000000e+00 : f32
    %212 = vector.broadcast %cst_54 : f32 to vector<8x128xf32>
    %213 = arith.subf %212, %205 : vector<8x128xf32>
    %214 = arith.mulf %213, %211 : vector<8x128xf32>
    %215 = arith.mulf %205, %166 : vector<8x128xf32>
    %216 = arith.addf %214, %215 : vector<8x128xf32>
    %c4_i32 = arith.constant 4 : i32
    %c7_i32_55 = arith.constant 7 : i32
    %217 = arith.subi %c7_i32_55, %c4_i32 : i32
    %218 = arith.index_cast %217 : i32 to index
    %c0_56 = arith.constant 0 : index
    %c0_57 = arith.constant 0 : index
    %219 = vector.load %arg2[%218, %c0_56, %c0_57] : memref<8x8x384xf32, #tpu.memory_space<vmem>>, vector<1x8x384xf32>
    %220 = vector.shape_cast %219 : vector<1x8x384xf32> to vector<8x384xf32>
    %cst_58 = arith.constant dense<0.000000e+00> : vector<8x384xf32>
    %221 = tpu.matmul %192, %3, %cst_58 {dimension_numbers = #tpu.dot_dimension_numbers<[1], [0], [0], [1], [0, 0, 1, 1], [], []>} : vector<8x128xf32>, vector<128x384xf32>, vector<8x384xf32> -> vector<8x384xf32>
    %222 = vector.extract_strided_slice %220 {offsets = [0, 0], sizes = [8, 256], strides = [1, 1]} : vector<8x384xf32> to vector<8x256xf32>
    %223 = vector.extract_strided_slice %221 {offsets = [0, 0], sizes = [8, 256], strides = [1, 1]} : vector<8x384xf32> to vector<8x256xf32>
    %224 = arith.addf %222, %223 : vector<8x256xf32>
    %225 = arith.negf %224 : vector<8x256xf32>
    %226 = math.exp %225 : vector<8x256xf32>
    %cst_59 = arith.constant 1.000000e+00 : f32
    %227 = vector.broadcast %cst_59 : f32 to vector<8x256xf32>
    %228 = arith.addf %227, %226 : vector<8x256xf32>
    %229 = arith.divf %227, %228 : vector<8x256xf32>
    %230 = vector.extract_strided_slice %229 {offsets = [0, 0], sizes = [8, 128], strides = [1, 1]} : vector<8x256xf32> to vector<8x128xf32>
    %231 = vector.extract_strided_slice %229 {offsets = [0, 128], sizes = [8, 128], strides = [1, 1]} : vector<8x256xf32> to vector<8x128xf32>
    %232 = vector.extract_strided_slice %220 {offsets = [0, 256], sizes = [8, 128], strides = [1, 1]} : vector<8x384xf32> to vector<8x128xf32>
    %233 = vector.extract_strided_slice %221 {offsets = [0, 256], sizes = [8, 128], strides = [1, 1]} : vector<8x384xf32> to vector<8x128xf32>
    %234 = arith.addf %233, %11 : vector<8x128xf32>
    %235 = arith.mulf %230, %234 : vector<8x128xf32>
    %236 = arith.addf %232, %235 : vector<8x128xf32>
    %237 = math.tanh %236 : vector<8x128xf32>
    %cst_60 = arith.constant 1.000000e+00 : f32
    %238 = vector.broadcast %cst_60 : f32 to vector<8x128xf32>
    %239 = arith.subf %238, %231 : vector<8x128xf32>
    %240 = arith.mulf %239, %237 : vector<8x128xf32>
    %241 = arith.mulf %231, %192 : vector<8x128xf32>
    %242 = arith.addf %240, %241 : vector<8x128xf32>
    %cst_61 = arith.constant dense<0.000000e+00> : vector<8x384xf32>
    %243 = tpu.matmul %242, %4, %cst_61 {dimension_numbers = #tpu.dot_dimension_numbers<[1], [0], [0], [1], [0, 0, 1, 1], [], []>} : vector<8x128xf32>, vector<128x384xf32>, vector<8x384xf32> -> vector<8x384xf32>
    %244 = arith.addf %243, %8 : vector<8x384xf32>
    %cst_62 = arith.constant dense<0.000000e+00> : vector<8x384xf32>
    %245 = tpu.matmul %216, %5, %cst_62 {dimension_numbers = #tpu.dot_dimension_numbers<[1], [0], [0], [1], [0, 0, 1, 1], [], []>} : vector<8x128xf32>, vector<128x384xf32>, vector<8x384xf32> -> vector<8x384xf32>
    %246 = vector.extract_strided_slice %244 {offsets = [0, 0], sizes = [8, 256], strides = [1, 1]} : vector<8x384xf32> to vector<8x256xf32>
    %247 = vector.extract_strided_slice %245 {offsets = [0, 0], sizes = [8, 256], strides = [1, 1]} : vector<8x384xf32> to vector<8x256xf32>
    %248 = arith.addf %246, %247 : vector<8x256xf32>
    %249 = arith.negf %248 : vector<8x256xf32>
    %250 = math.exp %249 : vector<8x256xf32>
    %cst_63 = arith.constant 1.000000e+00 : f32
    %251 = vector.broadcast %cst_63 : f32 to vector<8x256xf32>
    %252 = arith.addf %251, %250 : vector<8x256xf32>
    %253 = arith.divf %251, %252 : vector<8x256xf32>
    %254 = vector.extract_strided_slice %253 {offsets = [0, 0], sizes = [8, 128], strides = [1, 1]} : vector<8x256xf32> to vector<8x128xf32>
    %255 = vector.extract_strided_slice %253 {offsets = [0, 128], sizes = [8, 128], strides = [1, 1]} : vector<8x256xf32> to vector<8x128xf32>
    %256 = vector.extract_strided_slice %244 {offsets = [0, 256], sizes = [8, 128], strides = [1, 1]} : vector<8x384xf32> to vector<8x128xf32>
    %257 = vector.extract_strided_slice %245 {offsets = [0, 256], sizes = [8, 128], strides = [1, 1]} : vector<8x384xf32> to vector<8x128xf32>
    %258 = arith.addf %257, %14 : vector<8x128xf32>
    %259 = arith.mulf %254, %258 : vector<8x128xf32>
    %260 = arith.addf %256, %259 : vector<8x128xf32>
    %261 = math.tanh %260 : vector<8x128xf32>
    %cst_64 = arith.constant 1.000000e+00 : f32
    %262 = vector.broadcast %cst_64 : f32 to vector<8x128xf32>
    %263 = arith.subf %262, %255 : vector<8x128xf32>
    %264 = arith.mulf %263, %261 : vector<8x128xf32>
    %265 = arith.mulf %255, %216 : vector<8x128xf32>
    %266 = arith.addf %264, %265 : vector<8x128xf32>
    %c5_i32 = arith.constant 5 : i32
    %c7_i32_65 = arith.constant 7 : i32
    %267 = arith.subi %c7_i32_65, %c5_i32 : i32
    %268 = arith.index_cast %267 : i32 to index
    %c0_66 = arith.constant 0 : index
    %c0_67 = arith.constant 0 : index
    %269 = vector.load %arg2[%268, %c0_66, %c0_67] : memref<8x8x384xf32, #tpu.memory_space<vmem>>, vector<1x8x384xf32>
    %270 = vector.shape_cast %269 : vector<1x8x384xf32> to vector<8x384xf32>
    %cst_68 = arith.constant dense<0.000000e+00> : vector<8x384xf32>
    %271 = tpu.matmul %242, %3, %cst_68 {dimension_numbers = #tpu.dot_dimension_numbers<[1], [0], [0], [1], [0, 0, 1, 1], [], []>} : vector<8x128xf32>, vector<128x384xf32>, vector<8x384xf32> -> vector<8x384xf32>
    %272 = vector.extract_strided_slice %270 {offsets = [0, 0], sizes = [8, 256], strides = [1, 1]} : vector<8x384xf32> to vector<8x256xf32>
    %273 = vector.extract_strided_slice %271 {offsets = [0, 0], sizes = [8, 256], strides = [1, 1]} : vector<8x384xf32> to vector<8x256xf32>
    %274 = arith.addf %272, %273 : vector<8x256xf32>
    %275 = arith.negf %274 : vector<8x256xf32>
    %276 = math.exp %275 : vector<8x256xf32>
    %cst_69 = arith.constant 1.000000e+00 : f32
    %277 = vector.broadcast %cst_69 : f32 to vector<8x256xf32>
    %278 = arith.addf %277, %276 : vector<8x256xf32>
    %279 = arith.divf %277, %278 : vector<8x256xf32>
    %280 = vector.extract_strided_slice %279 {offsets = [0, 0], sizes = [8, 128], strides = [1, 1]} : vector<8x256xf32> to vector<8x128xf32>
    %281 = vector.extract_strided_slice %279 {offsets = [0, 128], sizes = [8, 128], strides = [1, 1]} : vector<8x256xf32> to vector<8x128xf32>
    %282 = vector.extract_strided_slice %270 {offsets = [0, 256], sizes = [8, 128], strides = [1, 1]} : vector<8x384xf32> to vector<8x128xf32>
    %283 = vector.extract_strided_slice %271 {offsets = [0, 256], sizes = [8, 128], strides = [1, 1]} : vector<8x384xf32> to vector<8x128xf32>
    %284 = arith.addf %283, %11 : vector<8x128xf32>
    %285 = arith.mulf %280, %284 : vector<8x128xf32>
    %286 = arith.addf %282, %285 : vector<8x128xf32>
    %287 = math.tanh %286 : vector<8x128xf32>
    %cst_70 = arith.constant 1.000000e+00 : f32
    %288 = vector.broadcast %cst_70 : f32 to vector<8x128xf32>
    %289 = arith.subf %288, %281 : vector<8x128xf32>
    %290 = arith.mulf %289, %287 : vector<8x128xf32>
    %291 = arith.mulf %281, %242 : vector<8x128xf32>
    %292 = arith.addf %290, %291 : vector<8x128xf32>
    %cst_71 = arith.constant dense<0.000000e+00> : vector<8x384xf32>
    %293 = tpu.matmul %292, %4, %cst_71 {dimension_numbers = #tpu.dot_dimension_numbers<[1], [0], [0], [1], [0, 0, 1, 1], [], []>} : vector<8x128xf32>, vector<128x384xf32>, vector<8x384xf32> -> vector<8x384xf32>
    %294 = arith.addf %293, %8 : vector<8x384xf32>
    %cst_72 = arith.constant dense<0.000000e+00> : vector<8x384xf32>
    %295 = tpu.matmul %266, %5, %cst_72 {dimension_numbers = #tpu.dot_dimension_numbers<[1], [0], [0], [1], [0, 0, 1, 1], [], []>} : vector<8x128xf32>, vector<128x384xf32>, vector<8x384xf32> -> vector<8x384xf32>
    %296 = vector.extract_strided_slice %294 {offsets = [0, 0], sizes = [8, 256], strides = [1, 1]} : vector<8x384xf32> to vector<8x256xf32>
    %297 = vector.extract_strided_slice %295 {offsets = [0, 0], sizes = [8, 256], strides = [1, 1]} : vector<8x384xf32> to vector<8x256xf32>
    %298 = arith.addf %296, %297 : vector<8x256xf32>
    %299 = arith.negf %298 : vector<8x256xf32>
    %300 = math.exp %299 : vector<8x256xf32>
    %cst_73 = arith.constant 1.000000e+00 : f32
    %301 = vector.broadcast %cst_73 : f32 to vector<8x256xf32>
    %302 = arith.addf %301, %300 : vector<8x256xf32>
    %303 = arith.divf %301, %302 : vector<8x256xf32>
    %304 = vector.extract_strided_slice %303 {offsets = [0, 0], sizes = [8, 128], strides = [1, 1]} : vector<8x256xf32> to vector<8x128xf32>
    %305 = vector.extract_strided_slice %303 {offsets = [0, 128], sizes = [8, 128], strides = [1, 1]} : vector<8x256xf32> to vector<8x128xf32>
    %306 = vector.extract_strided_slice %294 {offsets = [0, 256], sizes = [8, 128], strides = [1, 1]} : vector<8x384xf32> to vector<8x128xf32>
    %307 = vector.extract_strided_slice %295 {offsets = [0, 256], sizes = [8, 128], strides = [1, 1]} : vector<8x384xf32> to vector<8x128xf32>
    %308 = arith.addf %307, %14 : vector<8x128xf32>
    %309 = arith.mulf %304, %308 : vector<8x128xf32>
    %310 = arith.addf %306, %309 : vector<8x128xf32>
    %311 = math.tanh %310 : vector<8x128xf32>
    %cst_74 = arith.constant 1.000000e+00 : f32
    %312 = vector.broadcast %cst_74 : f32 to vector<8x128xf32>
    %313 = arith.subf %312, %305 : vector<8x128xf32>
    %314 = arith.mulf %313, %311 : vector<8x128xf32>
    %315 = arith.mulf %305, %266 : vector<8x128xf32>
    %316 = arith.addf %314, %315 : vector<8x128xf32>
    %c6_i32 = arith.constant 6 : i32
    %c7_i32_75 = arith.constant 7 : i32
    %317 = arith.subi %c7_i32_75, %c6_i32 : i32
    %318 = arith.index_cast %317 : i32 to index
    %c0_76 = arith.constant 0 : index
    %c0_77 = arith.constant 0 : index
    %319 = vector.load %arg2[%318, %c0_76, %c0_77] : memref<8x8x384xf32, #tpu.memory_space<vmem>>, vector<1x8x384xf32>
    %320 = vector.shape_cast %319 : vector<1x8x384xf32> to vector<8x384xf32>
    %cst_78 = arith.constant dense<0.000000e+00> : vector<8x384xf32>
    %321 = tpu.matmul %292, %3, %cst_78 {dimension_numbers = #tpu.dot_dimension_numbers<[1], [0], [0], [1], [0, 0, 1, 1], [], []>} : vector<8x128xf32>, vector<128x384xf32>, vector<8x384xf32> -> vector<8x384xf32>
    %322 = vector.extract_strided_slice %320 {offsets = [0, 0], sizes = [8, 256], strides = [1, 1]} : vector<8x384xf32> to vector<8x256xf32>
    %323 = vector.extract_strided_slice %321 {offsets = [0, 0], sizes = [8, 256], strides = [1, 1]} : vector<8x384xf32> to vector<8x256xf32>
    %324 = arith.addf %322, %323 : vector<8x256xf32>
    %325 = arith.negf %324 : vector<8x256xf32>
    %326 = math.exp %325 : vector<8x256xf32>
    %cst_79 = arith.constant 1.000000e+00 : f32
    %327 = vector.broadcast %cst_79 : f32 to vector<8x256xf32>
    %328 = arith.addf %327, %326 : vector<8x256xf32>
    %329 = arith.divf %327, %328 : vector<8x256xf32>
    %330 = vector.extract_strided_slice %329 {offsets = [0, 0], sizes = [8, 128], strides = [1, 1]} : vector<8x256xf32> to vector<8x128xf32>
    %331 = vector.extract_strided_slice %329 {offsets = [0, 128], sizes = [8, 128], strides = [1, 1]} : vector<8x256xf32> to vector<8x128xf32>
    %332 = vector.extract_strided_slice %320 {offsets = [0, 256], sizes = [8, 128], strides = [1, 1]} : vector<8x384xf32> to vector<8x128xf32>
    %333 = vector.extract_strided_slice %321 {offsets = [0, 256], sizes = [8, 128], strides = [1, 1]} : vector<8x384xf32> to vector<8x128xf32>
    %334 = arith.addf %333, %11 : vector<8x128xf32>
    %335 = arith.mulf %330, %334 : vector<8x128xf32>
    %336 = arith.addf %332, %335 : vector<8x128xf32>
    %337 = math.tanh %336 : vector<8x128xf32>
    %cst_80 = arith.constant 1.000000e+00 : f32
    %338 = vector.broadcast %cst_80 : f32 to vector<8x128xf32>
    %339 = arith.subf %338, %331 : vector<8x128xf32>
    %340 = arith.mulf %339, %337 : vector<8x128xf32>
    %341 = arith.mulf %331, %292 : vector<8x128xf32>
    %342 = arith.addf %340, %341 : vector<8x128xf32>
    %cst_81 = arith.constant dense<0.000000e+00> : vector<8x384xf32>
    %343 = tpu.matmul %342, %4, %cst_81 {dimension_numbers = #tpu.dot_dimension_numbers<[1], [0], [0], [1], [0, 0, 1, 1], [], []>} : vector<8x128xf32>, vector<128x384xf32>, vector<8x384xf32> -> vector<8x384xf32>
    %344 = arith.addf %343, %8 : vector<8x384xf32>
    %cst_82 = arith.constant dense<0.000000e+00> : vector<8x384xf32>
    %345 = tpu.matmul %316, %5, %cst_82 {dimension_numbers = #tpu.dot_dimension_numbers<[1], [0], [0], [1], [0, 0, 1, 1], [], []>} : vector<8x128xf32>, vector<128x384xf32>, vector<8x384xf32> -> vector<8x384xf32>
    %346 = vector.extract_strided_slice %344 {offsets = [0, 0], sizes = [8, 256], strides = [1, 1]} : vector<8x384xf32> to vector<8x256xf32>
    %347 = vector.extract_strided_slice %345 {offsets = [0, 0], sizes = [8, 256], strides = [1, 1]} : vector<8x384xf32> to vector<8x256xf32>
    %348 = arith.addf %346, %347 : vector<8x256xf32>
    %349 = arith.negf %348 : vector<8x256xf32>
    %350 = math.exp %349 : vector<8x256xf32>
    %cst_83 = arith.constant 1.000000e+00 : f32
    %351 = vector.broadcast %cst_83 : f32 to vector<8x256xf32>
    %352 = arith.addf %351, %350 : vector<8x256xf32>
    %353 = arith.divf %351, %352 : vector<8x256xf32>
    %354 = vector.extract_strided_slice %353 {offsets = [0, 0], sizes = [8, 128], strides = [1, 1]} : vector<8x256xf32> to vector<8x128xf32>
    %355 = vector.extract_strided_slice %353 {offsets = [0, 128], sizes = [8, 128], strides = [1, 1]} : vector<8x256xf32> to vector<8x128xf32>
    %356 = vector.extract_strided_slice %344 {offsets = [0, 256], sizes = [8, 128], strides = [1, 1]} : vector<8x384xf32> to vector<8x128xf32>
    %357 = vector.extract_strided_slice %345 {offsets = [0, 256], sizes = [8, 128], strides = [1, 1]} : vector<8x384xf32> to vector<8x128xf32>
    %358 = arith.addf %357, %14 : vector<8x128xf32>
    %359 = arith.mulf %354, %358 : vector<8x128xf32>
    %360 = arith.addf %356, %359 : vector<8x128xf32>
    %361 = math.tanh %360 : vector<8x128xf32>
    %cst_84 = arith.constant 1.000000e+00 : f32
    %362 = vector.broadcast %cst_84 : f32 to vector<8x128xf32>
    %363 = arith.subf %362, %355 : vector<8x128xf32>
    %364 = arith.mulf %363, %361 : vector<8x128xf32>
    %365 = arith.mulf %355, %316 : vector<8x128xf32>
    %366 = arith.addf %364, %365 : vector<8x128xf32>
    %c7_i32_85 = arith.constant 7 : i32
    %c7_i32_86 = arith.constant 7 : i32
    %367 = arith.subi %c7_i32_86, %c7_i32_85 : i32
    %368 = arith.index_cast %367 : i32 to index
    %c0_87 = arith.constant 0 : index
    %c0_88 = arith.constant 0 : index
    %369 = vector.load %arg2[%368, %c0_87, %c0_88] : memref<8x8x384xf32, #tpu.memory_space<vmem>>, vector<1x8x384xf32>
    %370 = vector.shape_cast %369 : vector<1x8x384xf32> to vector<8x384xf32>
    %cst_89 = arith.constant dense<0.000000e+00> : vector<8x384xf32>
    %371 = tpu.matmul %342, %3, %cst_89 {dimension_numbers = #tpu.dot_dimension_numbers<[1], [0], [0], [1], [0, 0, 1, 1], [], []>} : vector<8x128xf32>, vector<128x384xf32>, vector<8x384xf32> -> vector<8x384xf32>
    %372 = vector.extract_strided_slice %370 {offsets = [0, 0], sizes = [8, 256], strides = [1, 1]} : vector<8x384xf32> to vector<8x256xf32>
    %373 = vector.extract_strided_slice %371 {offsets = [0, 0], sizes = [8, 256], strides = [1, 1]} : vector<8x384xf32> to vector<8x256xf32>
    %374 = arith.addf %372, %373 : vector<8x256xf32>
    %375 = arith.negf %374 : vector<8x256xf32>
    %376 = math.exp %375 : vector<8x256xf32>
    %cst_90 = arith.constant 1.000000e+00 : f32
    %377 = vector.broadcast %cst_90 : f32 to vector<8x256xf32>
    %378 = arith.addf %377, %376 : vector<8x256xf32>
    %379 = arith.divf %377, %378 : vector<8x256xf32>
    %380 = vector.extract_strided_slice %379 {offsets = [0, 0], sizes = [8, 128], strides = [1, 1]} : vector<8x256xf32> to vector<8x128xf32>
    %381 = vector.extract_strided_slice %379 {offsets = [0, 128], sizes = [8, 128], strides = [1, 1]} : vector<8x256xf32> to vector<8x128xf32>
    %382 = vector.extract_strided_slice %370 {offsets = [0, 256], sizes = [8, 128], strides = [1, 1]} : vector<8x384xf32> to vector<8x128xf32>
    %383 = vector.extract_strided_slice %371 {offsets = [0, 256], sizes = [8, 128], strides = [1, 1]} : vector<8x384xf32> to vector<8x128xf32>
    %384 = arith.addf %383, %11 : vector<8x128xf32>
    %385 = arith.mulf %380, %384 : vector<8x128xf32>
    %386 = arith.addf %382, %385 : vector<8x128xf32>
    %387 = math.tanh %386 : vector<8x128xf32>
    %cst_91 = arith.constant 1.000000e+00 : f32
    %388 = vector.broadcast %cst_91 : f32 to vector<8x128xf32>
    %389 = arith.subf %388, %381 : vector<8x128xf32>
    %390 = arith.mulf %389, %387 : vector<8x128xf32>
    %391 = arith.mulf %381, %342 : vector<8x128xf32>
    %392 = arith.addf %390, %391 : vector<8x128xf32>
    %cst_92 = arith.constant dense<0.000000e+00> : vector<8x384xf32>
    %393 = tpu.matmul %392, %4, %cst_92 {dimension_numbers = #tpu.dot_dimension_numbers<[1], [0], [0], [1], [0, 0, 1, 1], [], []>} : vector<8x128xf32>, vector<128x384xf32>, vector<8x384xf32> -> vector<8x384xf32>
    %394 = arith.addf %393, %8 : vector<8x384xf32>
    %cst_93 = arith.constant dense<0.000000e+00> : vector<8x384xf32>
    %395 = tpu.matmul %366, %5, %cst_93 {dimension_numbers = #tpu.dot_dimension_numbers<[1], [0], [0], [1], [0, 0, 1, 1], [], []>} : vector<8x128xf32>, vector<128x384xf32>, vector<8x384xf32> -> vector<8x384xf32>
    %396 = vector.extract_strided_slice %394 {offsets = [0, 0], sizes = [8, 256], strides = [1, 1]} : vector<8x384xf32> to vector<8x256xf32>
    %397 = vector.extract_strided_slice %395 {offsets = [0, 0], sizes = [8, 256], strides = [1, 1]} : vector<8x384xf32> to vector<8x256xf32>
    %398 = arith.addf %396, %397 : vector<8x256xf32>
    %399 = arith.negf %398 : vector<8x256xf32>
    %400 = math.exp %399 : vector<8x256xf32>
    %cst_94 = arith.constant 1.000000e+00 : f32
    %401 = vector.broadcast %cst_94 : f32 to vector<8x256xf32>
    %402 = arith.addf %401, %400 : vector<8x256xf32>
    %403 = arith.divf %401, %402 : vector<8x256xf32>
    %404 = vector.extract_strided_slice %403 {offsets = [0, 0], sizes = [8, 128], strides = [1, 1]} : vector<8x256xf32> to vector<8x128xf32>
    %405 = vector.extract_strided_slice %403 {offsets = [0, 128], sizes = [8, 128], strides = [1, 1]} : vector<8x256xf32> to vector<8x128xf32>
    %406 = vector.extract_strided_slice %394 {offsets = [0, 256], sizes = [8, 128], strides = [1, 1]} : vector<8x384xf32> to vector<8x128xf32>
    %407 = vector.extract_strided_slice %395 {offsets = [0, 256], sizes = [8, 128], strides = [1, 1]} : vector<8x384xf32> to vector<8x128xf32>
    %408 = arith.addf %407, %14 : vector<8x128xf32>
    %409 = arith.mulf %404, %408 : vector<8x128xf32>
    %410 = arith.addf %406, %409 : vector<8x128xf32>
    %411 = math.tanh %410 : vector<8x128xf32>
    %cst_95 = arith.constant 1.000000e+00 : f32
    %412 = vector.broadcast %cst_95 : f32 to vector<8x128xf32>
    %413 = arith.subf %412, %405 : vector<8x128xf32>
    %414 = arith.mulf %413, %411 : vector<8x128xf32>
    %415 = arith.mulf %405, %366 : vector<8x128xf32>
    %416 = arith.addf %414, %415 : vector<8x128xf32>
    %c8_i32 = arith.constant 8 : i32
    %c0_96 = arith.constant 0 : index
    %c0_97 = arith.constant 0 : index
    %417 = vector.load %arg12[%c0_96, %c0_97] : memref<8x128xf32, #tpu.memory_space<vmem>>, vector<8x128xf32>
    tpu.vector_store %arg12[%c0_96, %c0_97], %392 {strides = array<i32>} : memref<8x128xf32, #tpu.memory_space<vmem>>, vector<8x128xf32>,
    %c0_98 = arith.constant 0 : index
    %c0_99 = arith.constant 0 : index
    %418 = vector.load %arg13[%c0_98, %c0_99] : memref<8x128xf32, #tpu.memory_space<vmem>>, vector<8x128xf32>
    tpu.vector_store %arg13[%c0_98, %c0_99], %416 {strides = array<i32>} : memref<8x128xf32, #tpu.memory_space<vmem>>, vector<8x128xf32>,
    %c0_i32_100 = arith.constant 0 : i32
    %419 = arith.cmpi eq, %arg1, %c0_i32_100 : i32
    %420 = arith.extui %419 : i1 to i32
    %c0_i32_101 = arith.constant 0 : i32
    %421 = arith.cmpi ne, %420, %c0_i32_101 : i32
    scf.if %421 {
      %c0_102 = arith.constant 0 : index
      %c0_103 = arith.constant 0 : index
      %422 = vector.load %arg9[%c0_102, %c0_103] : memref<128x128xf32, #tpu.memory_space<vmem>>, vector<128x128xf32>
      %cst_104 = arith.constant dense<0.000000e+00> : vector<8x128xf32>
      %423 = tpu.matmul %416, %422, %cst_104 {dimension_numbers = #tpu.dot_dimension_numbers<[1], [0], [0], [1], [0, 0, 1, 1], [], []>} : vector<8x128xf32>, vector<128x128xf32>, vector<8x128xf32> -> vector<8x128xf32>
      %c0_105 = arith.constant 0 : index
      %c0_106 = arith.constant 0 : index
      %424 = vector.load %arg10[%c0_105, %c0_106] : memref<1x128xf32, #tpu.memory_space<vmem>>, vector<1x128xf32>
      %425 = vector.shape_cast %424 : vector<1x128xf32> to vector<1x128xf32>
      %426 = vector.broadcast %425 : vector<1x128xf32> to vector<8x128xf32>
      %427 = arith.addf %423, %426 : vector<8x128xf32>
      %c0_107 = arith.constant 0 : index
      %c0_108 = arith.constant 0 : index
      %428 = vector.load %arg11[%c0_107, %c0_108] : memref<8x128xf32, #tpu.memory_space<vmem>>, vector<8x128xf32>
      tpu.vector_store %arg11[%c0_107, %c0_108], %427 {strides = array<i32>} : memref<8x128xf32, #tpu.memory_space<vmem>>, vector<8x128xf32>,
    } else {
    }
    return
  }
  func.func @transform_0(%arg0: i32, %arg1: i32) -> (i32, i32, i32) {
    %c0_i32 = arith.constant 0 : i32
    %0 = arith.subi %c0_i32, %arg1 : i32
    %c0_i32_0 = arith.constant 0 : i32
    %c0_i32_1 = arith.constant 0 : i32
    return %0, %arg0, %c0_i32_0 : i32, i32, i32
  }
  func.func @transform_1(%arg0: i32, %arg1: i32) -> (i32, i32) {
    %c0_i32 = arith.constant 0 : i32
    %c0_i32_0 = arith.constant 0 : i32
    %c0_i32_1 = arith.constant 0 : i32
    return %c0_i32, %c0_i32_0 : i32, i32
  }
  func.func @transform_2(%arg0: i32, %arg1: i32) -> (i32, i32) {
    %c0_i32 = arith.constant 0 : i32
    %c0_i32_0 = arith.constant 0 : i32
    %c0_i32_1 = arith.constant 0 : i32
    return %c0_i32, %c0_i32_0 : i32, i32
  }
  func.func @transform_3(%arg0: i32, %arg1: i32) -> (i32, i32) {
    %c0_i32 = arith.constant 0 : i32
    %c0_i32_0 = arith.constant 0 : i32
    %c0_i32_1 = arith.constant 0 : i32
    return %c0_i32, %c0_i32_0 : i32, i32
  }
  func.func @transform_4(%arg0: i32, %arg1: i32) -> (i32, i32) {
    %c0_i32 = arith.constant 0 : i32
    %c0_i32_0 = arith.constant 0 : i32
    %c0_i32_1 = arith.constant 0 : i32
    return %c0_i32, %c0_i32_0 : i32, i32
  }
  func.func @transform_5(%arg0: i32, %arg1: i32) -> (i32, i32) {
    %c0_i32 = arith.constant 0 : i32
    %c0_i32_0 = arith.constant 0 : i32
    %c0_i32_1 = arith.constant 0 : i32
    return %c0_i32, %c0_i32_0 : i32, i32
  }
  func.func @transform_6(%arg0: i32, %arg1: i32) -> (i32, i32) {
    %c0_i32 = arith.constant 0 : i32
    %c0_i32_0 = arith.constant 0 : i32
    %c0_i32_1 = arith.constant 0 : i32
    return %c0_i32, %c0_i32_0 : i32, i32
  }
  func.func @transform_7(%arg0: i32, %arg1: i32) -> (i32, i32) {
    %c0_i32 = arith.constant 0 : i32
    %c0_i32_0 = arith.constant 0 : i32
    %c0_i32_1 = arith.constant 0 : i32
    return %c0_i32, %c0_i32_0 : i32, i32
  }
  func.func @transform_8(%arg0: i32, %arg1: i32) -> (i32, i32) {
    %c0_i32 = arith.constant 0 : i32
    %c0_i32_0 = arith.constant 0 : i32
    %c0_i32_1 = arith.constant 0 : i32
    return %c0_i32, %c0_i32_0 : i32, i32
  }
  func.func @transform_9(%arg0: i32, %arg1: i32) -> (i32, i32) {
    %c0_i32 = arith.constant 0 : i32
    %c0_i32_0 = arith.constant 0 : i32
    return %arg0, %c0_i32 : i32, i32
  }
}

</mosaic_0001>

<bundles_post_ra>
// kernel: reverse_gru_encoder.2
= control target key start
LH: loop header
LB: loop body
LE: loop exit
PB: predicated region body
PF: predicated region fallthrough
CT: control target
= control target key end

     0   :  { %vm69_vm0 = vcmask 1043456   ;;  %v368_v1 = vmov 0.0   ;;  %vm44_vm1 = vcmask 31744   ;;  %v26_v12 = vlaneseq  ;;  %s536_s1 = inlined_call_operand.vmem [shape: f32[4,384], index: 1, kind: input, shape index: {}]   ;;  %s537_s0 = inlined_call_operand.vmem [shape: f32[64,4], index: 0, kind: input, shape index: {}]   ;;  %s538_s2 = inlined_call_operand.vmem [shape: f32[1,384], index: 2, kind: input, shape index: {}]   ;;  %s539_s3 = inlined_call_operand.vmem [shape: f32[64,384], index: 3, kind: output, shape index: {}]  }
   0x1   :  { %v22_v0 = vld [vmem:[%s536_s1] sm:$0xff]  ;;  %140 = vmatprep.mubr.f32.mxu0 %v368_v1  ;;  %176 = vmatprep.mubr.f32.mxu1 %v368_v1  ;;  %v20_v4 = vld [vmem:[%s537_s0 + $0x30] sm:$0xff]  ;;  %v23_v5 = vld [vmem:[%s536_s1 + $0x8] sm:$0xf] }
   0x2   :  { %v43_v2 = vcombine.high %v22_v0, %v22_v0  ;;  %v14_v3 = vld [vmem:[%s537_s0] sm:$0xff]  ;;  %v15_v6 = vld [vmem:[%s537_s0 + $0x8] sm:$0xff]  ;;  %v21_v7 = vld [vmem:[%s537_s0 + $0x38] sm:$0xff]  ;;  %v27_v13 = vshrl.u32 %v26_v12, 7 }
   0x3   :  { %v16_v8 = vld [vmem:[%s537_s0 + $0x10] sm:$0xff]  ;;  %v17_v9 = vld [vmem:[%s537_s0 + $0x18] sm:$0xff]  ;;  %v18_v10 = vld [vmem:[%s537_s0 + $0x20] sm:$0xff] }
   0x4   :  { %322 = vmatprep.subr.msk.mxu0 %vm69_vm0, %v43_v2  ;;  %364 = vmatprep.subr.msk.mxu1 %vm69_vm0, %v43_v2  ;;  %v19_v11 = vld [vmem:[%s537_s0 + $0x28] sm:$0xff]  ;;  %v28_v14 = vsub.s32 0, %v27_v13  ;;  %v24_v15 = vld [vmem:[%s538_s2] sm:$0x7]  ;;  %v32_v16 = vsub.s32 1, %v27_v13  ;;  %v36_v23 = vsub.s32 2, %v27_v13 }
   0x5   :  { %323 = vmatpush1.msk.msra.mxu0 %vm69_vm0, %v22_v0  ;;  %365 = vmatpush1.msk.msra.mxu1 %vm69_vm0, %v22_v0 }
   0x6   :  { %324 = vmatmul.mubr.msk.f32.vlgmr.msra.gmra.mxu0 %vm44_vm1, %v14_v3  ;;  %330 = vmatmul.mubr.msk.f32.vlgmr.msra.gmra.mxu1 %vm44_vm1, %v20_v4  ;;  %v444_v17 = vrot.slane %v24_v15, %v28_v14  ;;  %v446_v18 = vrot.slane %v24_v15, %v32_v16  ;;  %v37_v32 = vrot.slane %v24_v15, %v36_v23 }
   0x7   :  { %350 = vmatprep.subr.msk.mxu1 %vm69_vm0, %v23_v5  ;;  %146 = vmatprep.mubr.f32.mxu0 %v368_v1 }
   0x8   :  { %351 = vmatpush3.msk.msra.mxu1 %vm69_vm0, %v23_v5  ;;  %182 = vmatprep.mubr.f32.mxu1 %v368_v1 }
   0xa   :  { %325 = vmatmul.mubr.msk.f32.gmra.mxu0 %vm44_vm1, %v15_v6  ;;  %331 = vmatmul.mubr.msk.f32.gmra.mxu1 %vm44_vm1, %v21_v7 }
   0xb   :  { %152 = vmatprep.mubr.f32.mxu0 %v368_v1  ;;  %352 = vmatprep.mubr.msk.f32.mxu1 %vm44_vm1, %v14_v3 }
   0xe   :  { %326 = vmatmul.mubr.msk.f32.gmra.mxu0 %vm44_vm1, %v16_v8  ;;  %353 = vmatmul.mubr.msk.f32.vlgmr.msra.gmra.mxu1 %vm44_vm1, %v15_v6 }
   0xf   :  { %158 = vmatprep.mubr.f32.mxu0 %v368_v1  ;;  %355 = vmatprep.mubr.msk.f32.mxu1 %vm44_vm1, %v16_v8 }
  0x12   :  { %327 = vmatmul.mubr.msk.f32.gmra.mxu0 %vm44_vm1, %v17_v9  ;;  %356 = vmatmul.mubr.msk.f32.gmra.mxu1 %vm44_vm1, %v17_v9 }
  0x13   :  { %164 = vmatprep.mubr.f32.mxu0 %v368_v1  ;;  %358 = vmatprep.mubr.msk.f32.mxu1 %vm44_vm1, %v18_v10 }
  0x16   :  { %328 = vmatmul.mubr.msk.f32.gmra.mxu0 %vm44_vm1, %v18_v10  ;;  %359 = vmatmul.mubr.msk.f32.gmra.mxu1 %vm44_vm1, %v19_v11 }
  0x17   :  { %170 = vmatprep.mubr.f32.mxu0 %v368_v1  ;;  %361 = vmatprep.mubr.msk.f32.mxu1 %vm44_vm1, %v20_v4 }
  0x1a   :  { %329 = vmatmul.mubr.msk.f32.gmra.mxu0 %vm44_vm1, %v19_v11  ;;  %362 = vmatmul.mubr.msk.f32.gmra.mxu1 %vm44_vm1, %v21_v7 }
  0xc6   :  { %v142_v19 = vpop.f32.mrf.mxu0  ;;  %v178_v20 = vpop.f32.mrf.mxu1 }
  0xc7   :  { %v143_v21 = vadd.f32 %v142_v19, %v444_v17  ;;  %v179_v22 = vadd.f32 %v178_v20, %v444_v17 }
  0xc8   :  { %v144_v24 = vpop.f32.mrf.mxu0  ;;  %v180_v25 = vpop.f32.mrf.mxu1 }
  0xc9   :  { %294 = vst [vmem:[%s539_s3] sm:$0xff] %v143_v21  ;;  %312 = vst [vmem:[%s539_s3 + $0x90] sm:$0xff] %v179_v22  ;;  %v145_v26 = vadd.f32 %v144_v24, %v446_v18  ;;  %v181_v27 = vadd.f32 %v180_v25, %v446_v18 }
  0xca   :  { %v148_v28 = vpop.f32.mrf.mxu0  ;;  %v184_v29 = vpop.f32.mrf.mxu1 }
  0xcb   :  { %295 = vst [vmem:[%s539_s3 + $0x8] sm:$0xff] %v145_v26  ;;  %313 = vst [vmem:[%s539_s3 + $0x98] sm:$0xff] %v181_v27  ;;  %v149_v30 = vadd.f32 %v148_v28, %v444_v17  ;;  %v185_v31 = vadd.f32 %v184_v29, %v444_v17 }
  0xcc   :  { %v150_v33 = vpop.f32.mrf.mxu0  ;;  %v186_v34 = vpop.f32.mrf.mxu1 }
  0xcd   :  { %297 = vst [vmem:[%s539_s3 + $0x18] sm:$0xff] %v149_v30  ;;  %315 = vst [vmem:[%s539_s3 + $0xa8] sm:$0xff] %v185_v31  ;;  %v151_v35 = vadd.f32 %v150_v33, %v446_v18  ;;  %v187_v36 = vadd.f32 %v186_v34, %v446_v18 }
  0xce   :  { %v154_v37 = vpop.f32.mrf.mxu0  ;;  %v354_v38 = vpop.f32.mrf.mxu1 }
  0xcf   :  { %298 = vst [vmem:[%s539_s3 + $0x20] sm:$0xff] %v151_v35  ;;  %316 = vst [vmem:[%s539_s3 + $0xb0] sm:$0xff] %v187_v36  ;;  %v155_v39 = vadd.f32 %v154_v37, %v444_v17  ;;  %v261_v40 = vadd.f32 %v354_v38, %v37_v32 }
  0xd0   :  { %v156_v41 = vpop.f32.mrf.mxu0  ;;  %v255_v42 = vpop.f32.mrf.mxu1 }
  0xd1   :  { %300 = vst [vmem:[%s539_s3 + $0x30] sm:$0xff] %v155_v39  ;;  %299 = vst [vmem:[%s539_s3 + $0x28] sm:$0xff] %v261_v40  ;;  %v157_v43 = vadd.f32 %v156_v41, %v446_v18  ;;  %v256_v44 = vadd.f32 %v255_v42, %v37_v32 }
  0xd2   :  { %v160_v45 = vpop.f32.mrf.mxu0  ;;  %v357_v46 = vpop.f32.mrf.mxu1 }
  0xd3   :  { %301 = vst [vmem:[%s539_s3 + $0x38] sm:$0xff] %v157_v43  ;;  %296 = vst [vmem:[%s539_s3 + $0x10] sm:$0xff] %v256_v44  ;;  %v161_v47 = vadd.f32 %v160_v45, %v444_v17  ;;  %v271_v48 = vadd.f32 %v357_v46, %v37_v32 }
  0xd4   :  { %v162_v49 = vpop.f32.mrf.mxu0  ;;  %v265_v50 = vpop.f32.mrf.mxu1 }
  0xd5   :  { %303 = vst [vmem:[%s539_s3 + $0x48] sm:$0xff] %v161_v47  ;;  %305 = vst [vmem:[%s539_s3 + $0x58] sm:$0xff] %v271_v48  ;;  %v163_v51 = vadd.f32 %v162_v49, %v446_v18  ;;  %v266_v52 = vadd.f32 %v265_v50, %v37_v32 }
  0xd6   :  { %v166_v53 = vpop.f32.mrf.mxu0  ;;  %v360_v54 = vpop.f32.mrf.mxu1 }
  0xd7   :  { %304 = vst [vmem:[%s539_s3 + $0x50] sm:$0xff] %v163_v51  ;;  %302 = vst [vmem:[%s539_s3 + $0x40] sm:$0xff] %v266_v52  ;;  %v167_v55 = vadd.f32 %v166_v53, %v444_v17  ;;  %v281_v56 = vadd.f32 %v360_v54, %v37_v32 }
  0xd8   :  { %v168_v57 = vpop.f32.mrf.mxu0  ;;  %v275_v58 = vpop.f32.mrf.mxu1 }
  0xd9   :  { %306 = vst [vmem:[%s539_s3 + $0x60] sm:$0xff] %v167_v55  ;;  %311 = vst [vmem:[%s539_s3 + $0x88] sm:$0xff] %v281_v56  ;;  %v169_v59 = vadd.f32 %v168_v57, %v446_v18  ;;  %v276_v60 = vadd.f32 %v275_v58, %v37_v32 }
  0xda   :  { %v172_v61 = vpop.f32.mrf.mxu0  ;;  %v363_v62 = vpop.f32.mrf.mxu1 }
  0xdb   :  { %307 = vst [vmem:[%s539_s3 + $0x68] sm:$0xff] %v169_v59  ;;  %308 = vst [vmem:[%s539_s3 + $0x70] sm:$0xff] %v276_v60  ;;  %v173_v63 = vadd.f32 %v172_v61, %v444_v17  ;;  %v291_v0 = vadd.f32 %v363_v62, %v37_v32 }
  0xdc   :  { %v174_v1 = vpop.f32.mrf.mxu0  ;;  %v285_v2 = vpop.f32.mrf.mxu1 }
  0xdd   :  { %309 = vst [vmem:[%s539_s3 + $0x78] sm:$0xff] %v173_v63  ;;  %317 = vst [vmem:[%s539_s3 + $0xb8] sm:$0xff] %v291_v0  ;;  %v175_v3 = vadd.f32 %v174_v1, %v446_v18  ;;  %v286_v4 = vadd.f32 %v285_v2, %v37_v32 }
  0xdf   :  { %310 = vst [vmem:[%s539_s3 + $0x80] sm:$0xff] %v175_v3  ;;  %314 = vst [vmem:[%s539_s3 + $0xa0] sm:$0xff] %v286_v4 }

// kernel: reverse_gru_encoder.3
= control target key start
LH: loop header
LB: loop body
LE: loop exit
PB: predicated region body
PF: predicated region fallthrough
CT: control target
= control target key end

     0   :  { %v10962_v3 = vmov 0.0   ;;  %vm6073_vm0 = vmmov 0   ;;  %s10942_s1 = inlined_call_operand.vmem [shape: f32[128,384], index: 1, kind: input, shape index: {}]   ;;  %s10943_s3 = inlined_call_operand.vmem [shape: f32[128,384], index: 3, kind: input, shape index: {}]   ;;  %s10944_s4 = inlined_call_operand.vmem [shape: f32[128,384], index: 4, kind: input, shape index: {}]   ;;  %s10945_s0 = inlined_call_operand.vmem [shape: f32[8,8,384], index: 0, kind: input, shape index: {}]   ;;  %s10946_s2 = inlined_call_operand.vmem [shape: f32[1,128], index: 2, kind: input, shape index: {}]   ;;  %s10947_s5 = inlined_call_operand.vmem [shape: f32[1,384], index: 5, kind: input, shape index: {}]   ;;  %s10948_s6 = inlined_call_operand.vmem [shape: f32[1,128], index: 6, kind: input, shape index: {}]   ;;  %s10949_s7 = inlined_call_operand.vmem [shape: f32[128,128], index: 7, kind: input, shape index: {}]   ;;  %s10950_s8 = inlined_call_operand.vmem [shape: f32[1,128], index: 8, kind: input, shape index: {}]   ;;  %s10951_s9 = inlined_call_operand.vmem [shape: f32[8,128], index: 9, kind: output, shape index: {}]  }
   0x1   :  { %v6127_v0 = vld [vmem:[%s10942_s1 + $0x170] sm:$0xff]  ;;  %v6132_v1 = vld [vmem:[%s10942_s1 + $0x168] sm:$0xff]  ;;  %v6137_v2 = vld [vmem:[%s10942_s1 + $0x158] sm:$0xff]  ;;  %4597 = vmatprep.subr.mxu1 %v10962_v3  ;;  %308 = vmatprep.mubr.f32.mxu0 %v10962_v3 }
   0x2   :  { %244 = vmatprep.subr.mxu0 %v6127_v0  ;;  %v6145_v4 = vld [vmem:[%s10942_s1 + $0x150] sm:$0xff]  ;;  %4629 = vmatprep.mubr.msk.f32.mxu1 %vm6073_vm0, %v10962_v3  ;;  %v6153_v5 = vld [vmem:[%s10942_s1 + $0x140] sm:$0xff]  ;;  %v6159_v6 = vld [vmem:[%s10942_s1 + $0x138] sm:$0xff] }
   0x3   :  { %245 = vmatpush1.msra.mxu0 %v6132_v1  ;;  %v6165_v7 = vld [vmem:[%s10942_s1 + $0x128] sm:$0xff]  ;;  %v6171_v8 = vld [vmem:[%s10942_s1 + $0x120] sm:$0xff]  ;;  %v6177_v9 = vld [vmem:[%s10942_s1 + $0x110] sm:$0xff] }
   0x4   :  { %246 = vmatprep.subr.mxu0 %v6137_v2  ;;  %v6183_v10 = vld [vmem:[%s10942_s1 + $0x108] sm:$0xff]  ;;  %v6189_v11 = vld [vmem:[%s10942_s1 + $0xf8] sm:$0xff]  ;;  %v6195_v12 = vld [vmem:[%s10942_s1 + $0xf0] sm:$0xff] }
   0x5   :  { %247 = vmatpush1.msra.mxu0 %v6145_v4  ;;  %v6201_v13 = vld [vmem:[%s10942_s1 + $0xe0] sm:$0xff]  ;;  %v6206_v14 = vld [vmem:[%s10942_s1 + $0x178] sm:$0xff]  ;;  %v6224_v17 = vld [vmem:[%s10942_s1 + $0xc8] sm:$0xff] }
   0x6   :  { %248 = vmatprep.subr.mxu0 %v6153_v5  ;;  %v6212_v15 = vld [vmem:[%s10942_s1 + $0xd8] sm:$0xff]  ;;  %4598 = vmatpush3.msra.mxu1 %v6206_v14  ;;  %v6218_v16 = vld [vmem:[%s10942_s1 + $0x160] sm:$0xff]  ;;  %v6230_v18 = vld [vmem:[%s10942_s1 + $0x148] sm:$0xff] }
   0x7   :  { %249 = vmatpush1.msra.mxu0 %v6159_v6  ;;  %4599 = vmatprep.subr.mxu1 %v10962_v3  ;;  %v6236_v19 = vld [vmem:[%s10942_s1 + $0xc0] sm:$0xff]  ;;  %v6243_v20 = vld [vmem:[%s10942_s1 + $0xb0] sm:$0xff]  ;;  %v6255_v22 = vld [vmem:[%s10942_s1 + $0xa8] sm:$0xff] }
   0x8   :  { %250 = vmatprep.subr.mxu0 %v6165_v7  ;;  %4600 = vmatpush3.msra.mxu1 %v6218_v16  ;;  %v6249_v21 = vld [vmem:[%s10942_s1 + $0x130] sm:$0xff]  ;;  %v6262_v23 = vld [vmem:[%s10942_s1 + $0x98] sm:$0xff]  ;;  %v6281_v26 = vld [vmem:[%s10942_s1 + $0x80] sm:$0xff] }
   0x9   :  { %251 = vmatpush1.msra.mxu0 %v6171_v8  ;;  %4601 = vmatprep.subr.mxu1 %v10962_v3  ;;  %v6268_v24 = vld [vmem:[%s10942_s1 + $0x118] sm:$0xff]  ;;  %v6274_v25 = vld [vmem:[%s10942_s1 + $0x90] sm:$0xff]  ;;  %v6287_v27 = vld [vmem:[%s10942_s1 + $0x100] sm:$0xff] }
   0xa   :  { %252 = vmatprep.subr.mxu0 %v6177_v9  ;;  %4602 = vmatpush3.msra.mxu1 %v6230_v18  ;;  %v6293_v28 = vld [vmem:[%s10942_s1 + $0x78] sm:$0xff]  ;;  %v6300_v29 = vld [vmem:[%s10942_s1 + $0x68] sm:$0xff]  ;;  %v6312_v31 = vld [vmem:[%s10942_s1 + $0x60] sm:$0xff] }
   0xb   :  { %253 = vmatpush1.msra.mxu0 %v6183_v10  ;;  %4603 = vmatprep.subr.mxu1 %v10962_v3  ;;  %v6306_v30 = vld [vmem:[%s10942_s1 + $0xe8] sm:$0xff]  ;;  %v6319_v32 = vld [vmem:[%s10942_s1 + $0x50] sm:$0xff]  ;;  %v6338_v35 = vld [vmem:[%s10942_s1 + $0x38] sm:$0xff] }
   0xc   :  { %254 = vmatprep.subr.mxu0 %v6189_v11  ;;  %4604 = vmatpush3.msra.mxu1 %v6249_v21  ;;  %v6325_v33 = vld [vmem:[%s10942_s1 + $0xd0] sm:$0xff]  ;;  %v6331_v34 = vld [vmem:[%s10942_s1 + $0x48] sm:$0xff]  ;;  %v6344_v36 = vld [vmem:[%s10942_s1 + $0xb8] sm:$0xff] }
   0xd   :  { %255 = vmatpush1.msra.mxu0 %v6195_v12  ;;  %4605 = vmatprep.subr.mxu1 %v10962_v3  ;;  %v6350_v37 = vld [vmem:[%s10942_s1 + $0x30] sm:$0xff]  ;;  %v6357_v38 = vld [vmem:[%s10942_s1 + $0x20] sm:$0xff]  ;;  %v6369_v40 = vld [vmem:[%s10942_s1 + $0x18] sm:$0xff] }
   0xe   :  { %256 = vmatprep.subr.mxu0 %v6201_v13  ;;  %4606 = vmatpush3.msra.mxu1 %v6268_v24  ;;  %v6363_v39 = vld [vmem:[%s10942_s1 + $0xa0] sm:$0xff]  ;;  %v6376_v41 = vld [vmem:[%s10942_s1 + $0x8] sm:$0xff]  ;;  %v6396_v44 = vld [vmem:[%s10942_s1 + $0x70] sm:$0xff] }
   0xf   :  { %257 = vmatpush1.msra.mxu0 %v6212_v15  ;;  %4607 = vmatprep.subr.mxu1 %v10962_v3  ;;  %v6382_v42 = vld [vmem:[%s10942_s1 + $0x88] sm:$0xff]  ;;  %v6388_v43 = vld [vmem:[%s10942_s1] sm:$0xff]  ;;  %v6405_v45 = vld [vmem:[%s10942_s1 + $0x58] sm:$0xff] }
  0x10   :  { %258 = vmatprep.subr.mxu0 %v6224_v17  ;;  %4608 = vmatpush3.msra.mxu1 %v6287_v27  ;;  %v6413_v46 = vld [vmem:[%s10942_s1 + $0x40] sm:$0xff]  ;;  %v6421_v47 = vld [vmem:[%s10942_s1 + $0x28] sm:$0xff]  ;;  %v6428_v48 = vld [vmem:[%s10942_s1 + $0x10] sm:$0xff] }
  0x11   :  { %259 = vmatpush1.msra.mxu0 %v6236_v19  ;;  %4609 = vmatprep.subr.mxu1 %v10962_v3  ;;  %v6440_v49 = vld [vmem:[%s10943_s3 + $0x170] sm:$0xff]  ;;  %v6445_v50 = vld [vmem:[%s10943_s3 + $0x168] sm:$0xff]  ;;  %v6450_v51 = vld [vmem:[%s10943_s3 + $0x178] sm:$0xff] }
  0x12   :  { %260 = vmatprep.subr.mxu0 %v6243_v20  ;;  %4610 = vmatpush3.msra.mxu1 %v6306_v30  ;;  %11308 = vst [vmem:[#allocation4_spill] sm:$0xff] %v6440_v49  ;;  %11309 = vst [vmem:[#allocation5_spill] sm:$0xff] %v6445_v50  ;;  %v6457_v52 = vld [vmem:[%s10943_s3 + $0x158] sm:$0xff]  ;;  %v6462_v53 = vld [vmem:[%s10943_s3 + $0x150] sm:$0xff] }
  0x13   :  { %261 = vmatpush1.msra.mxu0 %v6255_v22  ;;  %4611 = vmatprep.subr.mxu1 %v10962_v3  ;;  %11310 = vst [vmem:[#allocation6_spill] sm:$0xff] %v6450_v51  ;;  %11311 = vst [vmem:[#allocation7_spill] sm:$0xff] %v6457_v52  ;;  %v6467_v54 = vld [vmem:[%s10943_s3 + $0x160] sm:$0xff]  ;;  %v6479_v56 = vld [vmem:[%s10943_s3 + $0x148] sm:$0xff] }
  0x14   :  { %262 = vmatprep.subr.mxu0 %v6262_v23  ;;  %4612 = vmatpush3.msra.mxu1 %v6325_v33  ;;  %11312 = vst [vmem:[#allocation8_spill] sm:$0xff] %v6462_v53  ;;  %11313 = vst [vmem:[#allocation9_spill] sm:$0xff] %v6467_v54  ;;  %v6474_v55 = vld [vmem:[%s10943_s3 + $0x140] sm:$0xff]  ;;  %v6486_v57 = vld [vmem:[%s10943_s3 + $0x138] sm:$0xff] }
  0x15   :  { %263 = vmatpush1.msra.mxu0 %v6274_v25  ;;  %4613 = vmatprep.subr.mxu1 %v10962_v3  ;;  %11314 = vst [vmem:[#allocation10_spill] sm:$0xff] %v6474_v55  ;;  %11315 = vst [vmem:[#allocation11_spill] sm:$0xff] %v6479_v56  ;;  %v6496_v58 = vld [vmem:[%s10943_s3 + $0x128] sm:$0xff]  ;;  %v6503_v59 = vld [vmem:[%s10943_s3 + $0x120] sm:$0xff] }
  0x16   :  { %264 = vmatprep.subr.mxu0 %v6281_v26  ;;  %4614 = vmatpush3.msra.mxu1 %v6344_v36  ;;  %11316 = vst [vmem:[#allocation12_spill] sm:$0xff] %v6486_v57  ;;  %11317 = vst [vmem:[#allocation13_spill] sm:$0xff] %v6496_v58  ;;  %v6508_v60 = vld [vmem:[%s10943_s3 + $0x130] sm:$0xff]  ;;  %v6522_v62 = vld [vmem:[%s10943_s3 + $0x108] sm:$0xff] }
  0x17   :  { %265 = vmatpush1.msra.mxu0 %v6293_v28  ;;  %4615 = vmatprep.subr.mxu1 %v10962_v3  ;;  %11318 = vst [vmem:[#allocation14_spill] sm:$0xff] %v6503_v59  ;;  %11319 = vst [vmem:[#allocation15_spill] sm:$0xff] %v6508_v60  ;;  %v6515_v61 = vld [vmem:[%s10943_s3 + $0x110] sm:$0xff]  ;;  %v6527_v63 = vld [vmem:[%s10943_s3 + $0x118] sm:$0xff] }
  0x18   :  { %266 = vmatprep.subr.mxu0 %v6300_v29  ;;  %4616 = vmatpush3.msra.mxu1 %v6363_v39  ;;  %11320 = vst [vmem:[#allocation16_spill] sm:$0xff] %v6515_v61  ;;  %11321 = vst [vmem:[#allocation17_spill] sm:$0xff] %v6522_v62 }
  0x19   :  { %267 = vmatpush1.msra.mxu0 %v6312_v31  ;;  %4617 = vmatprep.subr.mxu1 %v10962_v3  ;;  %11322 = vst [vmem:[#allocation18_spill] sm:$0xff] %v6527_v63 }
  0x1a   :  { %268 = vmatprep.subr.mxu0 %v6319_v32  ;;  %4618 = vmatpush3.msra.mxu1 %v6382_v42 }
  0x1b   :  { %269 = vmatpush1.msra.mxu0 %v6331_v34  ;;  %4619 = vmatprep.subr.mxu1 %v10962_v3 }
  0x1c   :  { %270 = vmatprep.subr.mxu0 %v6338_v35  ;;  %4620 = vmatpush3.msra.mxu1 %v6396_v44 }
  0x1d   :  { %271 = vmatpush1.msra.mxu0 %v6350_v37  ;;  %4621 = vmatprep.subr.mxu1 %v10962_v3 }
  0x1e   :  { %272 = vmatprep.subr.mxu0 %v6357_v38  ;;  %4622 = vmatpush3.msra.mxu1 %v6405_v45 }
  0x1f   :  { %273 = vmatpush1.msra.mxu0 %v6369_v40  ;;  %4623 = vmatprep.subr.mxu1 %v10962_v3 }
  0x20   :  { %274 = vmatprep.subr.mxu0 %v6376_v41  ;;  %4624 = vmatpush3.msra.mxu1 %v6413_v46 }
  0x21   :  { %275 = vmatpush1.msra.mxu0 %v6388_v43  ;;  %4625 = vmatprep.subr.mxu1 %v10962_v3 }
  0x22   :  { %309 = vmatmul.mubr.f32.vlgmr.msra.gmra.mxu0 %v10962_v3  ;;  %4626 = vmatpush3.msra.mxu1 %v6421_v47 }
  0x23   :  { %471 = vmatprep.mubr.f32.mxu0 %v10962_v3  ;;  %4627 = vmatprep.subr.mxu1 %v10962_v3 }
  0x24   :  { %4628 = vmatpush3.msra.mxu1 %v6428_v48  ;;  %407 = vmatprep.subr.mxu0 %v6440_v49 }
  0x25   :  { %4630 = vmatmul.mubr.f32.vlgmr.msra.gmra.mxu1 %v10962_v3  ;;  %4632 = vmatprep.subr.mxu1 %v10962_v3 }
  0x26   :  { %4664 = vmatprep.mubr.msk.f32.mxu1 %vm6073_vm0, %v10962_v3  ;;  %4633 = vmatpush3.msra.mxu1 %v6450_v51 }
  0x27   :  { %408 = vmatpush1.msra.mxu0 %v6445_v50  ;;  %4634 = vmatprep.subr.mxu1 %v10962_v3 }
  0x28   :  { %409 = vmatprep.subr.mxu0 %v6457_v52  ;;  %4635 = vmatpush3.msra.mxu1 %v6467_v54 }
  0x29   :  { %410 = vmatpush1.msra.mxu0 %v6462_v53  ;;  %4636 = vmatprep.subr.mxu1 %v10962_v3 }
  0x2a   :  { %411 = vmatprep.subr.mxu0 %v6474_v55  ;;  %4637 = vmatpush3.msra.mxu1 %v6479_v56  ;;  %v6632_v56 = vld [vmem:[%s10943_s3 + $0x78] sm:$0xff] }
  0x2b   :  { %412 = vmatpush1.msra.mxu0 %v6486_v57  ;;  %4638 = vmatprep.subr.mxu1 %v10962_v3  ;;  %11340 = vst [vmem:[#allocation35_spill] sm:$0xff] %v6632_v56 }
  0x2c   :  { %413 = vmatprep.subr.mxu0 %v6496_v58  ;;  %4639 = vmatpush3.msra.mxu1 %v6508_v60  ;;  %v6541_v60 = vld [vmem:[%s10943_s3 + $0xf0] sm:$0xff]  ;;  %v6618_v58 = vld [vmem:[%s10943_s3 + $0xa0] sm:$0xff] }
  0x2d   :  { %414 = vmatpush1.msra.mxu0 %v6503_v59  ;;  %4640 = vmatprep.subr.mxu1 %v10962_v3  ;;  %11324 = vst [vmem:[#allocation20_spill] sm:$0xff] %v6541_v60  ;;  %v6613_v59 = vld [vmem:[%s10943_s3 + $0x90] sm:$0xff]  ;;  %11338 = vst [vmem:[#allocation33_spill] sm:$0xff] %v6618_v58 }
  0x2e   :  { %415 = vmatprep.subr.mxu0 %v6515_v61  ;;  %4641 = vmatpush3.msra.mxu1 %v6527_v63  ;;  %v6534_v61 = vld [vmem:[%s10943_s3 + $0xf8] sm:$0xff]  ;;  %11337 = vst [vmem:[#allocation32_spill] sm:$0xff] %v6613_v59 }
  0x2f   :  { %416 = vmatpush1.msra.mxu0 %v6522_v62  ;;  %11323 = vst [vmem:[#allocation19_spill] sm:$0xff] %v6534_v61  ;;  %4642 = vmatprep.subr.mxu1 %v10962_v3  ;;  %v6546_v62 = vld [vmem:[%s10943_s3 + $0x100] sm:$0xff]  ;;  %v6560_v63 = vld [vmem:[%s10943_s3 + $0xd8] sm:$0xff] }
  0x30   :  { %417 = vmatprep.subr.mxu0 %v6534_v61  ;;  %11325 = vst [vmem:[#allocation21_spill] sm:$0xff] %v6546_v62  ;;  %4643 = vmatpush3.msra.mxu1 %v6546_v62  ;;  %v6553_v61 = vld [vmem:[%s10943_s3 + $0xe0] sm:$0xff]  ;;  %11327 = vst [vmem:[#allocation23_spill] sm:$0xff] %v6560_v63 }
  0x31   :  { %418 = vmatpush1.msra.mxu0 %v6541_v60  ;;  %11326 = vst [vmem:[#allocation22_spill] sm:$0xff] %v6553_v61  ;;  %4644 = vmatprep.subr.mxu1 %v10962_v3  ;;  %v6565_v60 = vld [vmem:[%s10943_s3 + $0xe8] sm:$0xff]  ;;  %v6579_v62 = vld [vmem:[%s10943_s3 + $0xc0] sm:$0xff] }
  0x32   :  { %419 = vmatprep.subr.mxu0 %v6553_v61  ;;  %11328 = vst [vmem:[#allocation24_spill] sm:$0xff] %v6565_v60  ;;  %4645 = vmatpush3.msra.mxu1 %v6565_v60  ;;  %v6572_v61 = vld [vmem:[%s10943_s3 + $0xc8] sm:$0xff]  ;;  %11330 = vst [vmem:[#allocation26_spill] sm:$0xff] %v6579_v62  ;;  %v6601_v60 = vld [vmem:[%s10943_s3 + $0xb8] sm:$0xff] }
  0x33   :  { %420 = vmatpush1.msra.mxu0 %v6560_v63  ;;  %11329 = vst [vmem:[#allocation25_spill] sm:$0xff] %v6572_v61  ;;  %4646 = vmatprep.subr.mxu1 %v10962_v3  ;;  %v6584_v63 = vld [vmem:[%s10943_s3 + $0xd0] sm:$0xff]  ;;  %v6596_v3 = vld [vmem:[%s10943_s3 + $0xa8] sm:$0xff]  ;;  %11334 = vst [vmem:[#allocation30_spill] sm:$0xff] %v6601_v60 }
  0x34   :  { %421 = vmatprep.subr.mxu0 %v6572_v61  ;;  %11331 = vst [vmem:[#allocation27_spill] sm:$0xff] %v6584_v63  ;;  %4647 = vmatpush3.msra.mxu1 %v6584_v63  ;;  %v6591_v61 = vld [vmem:[%s10943_s3 + $0xb0] sm:$0xff]  ;;  %11333 = vst [vmem:[#allocation29_spill] sm:$0xff] %v6596_v3  ;;  %v6608_v63 = vld [vmem:[%s10943_s3 + $0x98] sm:$0xff] }
  0x35   :  { %422 = vmatpush1.msra.mxu0 %v6579_v62  ;;  %11332 = vst [vmem:[#allocation28_spill] sm:$0xff] %v6591_v61  ;;  %v11335_v62 = vmov 0.0   ;;  %11336 = vst [vmem:[#allocation31_spill] sm:$0xff] %v6608_v63 }
  0x36   :  { %423 = vmatprep.subr.mxu0 %v6591_v61  ;;  %4648 = vmatprep.subr.mxu1 %v11335_v62  ;;  %v6625_v61 = vld [vmem:[%s10943_s3 + $0x80] sm:$0xff] }
  0x37   :  { %424 = vmatpush1.msra.mxu0 %v6596_v3  ;;  %4649 = vmatpush3.msra.mxu1 %v6601_v60  ;;  %11339 = vst [vmem:[#allocation34_spill] sm:$0xff] %v6625_v61  ;;  %v6637_v3 = vld [vmem:[%s10943_s3 + $0x88] sm:$0xff]  ;;  %v6651_v60 = vld [vmem:[%s10943_s3 + $0x60] sm:$0xff] }
  0x38   :  { %425 = vmatprep.subr.mxu0 %v6608_v63  ;;  %4650 = vmatprep.subr.mxu1 %v11335_v62  ;;  %11341 = vst [vmem:[#allocation36_spill] sm:$0xff] %v6637_v3  ;;  %v6644_v63 = vld [vmem:[%s10943_s3 + $0x68] sm:$0xff]  ;;  %11343 = vst [vmem:[#allocation38_spill] sm:$0xff] %v6651_v60 }
  0x39   :  { %426 = vmatpush1.msra.mxu0 %v6613_v59  ;;  %4651 = vmatpush3.msra.mxu1 %v6618_v58  ;;  %11342 = vst [vmem:[#allocation37_spill] sm:$0xff] %v6644_v63  ;;  %v6656_v59 = vld [vmem:[%s10943_s3 + $0x70] sm:$0xff]  ;;  %v6670_v58 = vld [vmem:[%s10943_s3 + $0x48] sm:$0xff] }
  0x3a   :  { %427 = vmatprep.subr.mxu0 %v6625_v61  ;;  %4652 = vmatprep.subr.mxu1 %v11335_v62  ;;  %11344 = vst [vmem:[#allocation39_spill] sm:$0xff] %v6656_v59  ;;  %v6663_v61 = vld [vmem:[%s10943_s3 + $0x50] sm:$0xff]  ;;  %11346 = vst [vmem:[#allocation41_spill] sm:$0xff] %v6670_v58 }
  0x3b   :  { %428 = vmatpush1.msra.mxu0 %v6632_v56  ;;  %4653 = vmatpush3.msra.mxu1 %v6637_v3  ;;  %11345 = vst [vmem:[#allocation40_spill] sm:$0xff] %v6663_v61  ;;  %v6675_v56 = vld [vmem:[%s10943_s3 + $0x58] sm:$0xff]  ;;  %v6689_v3 = vld [vmem:[%s10943_s3 + $0x30] sm:$0xff] }
  0x3c   :  { %429 = vmatprep.subr.mxu0 %v6644_v63  ;;  %4654 = vmatprep.subr.mxu1 %v11335_v62  ;;  %11347 = vst [vmem:[#allocation42_spill] sm:$0xff] %v6675_v56  ;;  %v6682_v63 = vld [vmem:[%s10943_s3 + $0x38] sm:$0xff]  ;;  %11349 = vst [vmem:[#allocation44_spill] sm:$0xff] %v6689_v3 }
  0x3d   :  { %430 = vmatpush1.msra.mxu0 %v6651_v60  ;;  %4655 = vmatpush3.msra.mxu1 %v6656_v59  ;;  %11348 = vst [vmem:[#allocation43_spill] sm:$0xff] %v6682_v63  ;;  %v6694_v60 = vld [vmem:[%s10943_s3 + $0x40] sm:$0xff]  ;;  %v6708_v59 = vld [vmem:[%s10943_s3 + $0x18] sm:$0xff] }
  0x3e   :  { %431 = vmatprep.subr.mxu0 %v6663_v61  ;;  %4656 = vmatprep.subr.mxu1 %v11335_v62  ;;  %11350 = vst [vmem:[#allocation45_spill] sm:$0xff] %v6694_v60  ;;  %v6701_v61 = vld [vmem:[%s10943_s3 + $0x20] sm:$0xff]  ;;  %11352 = vst [vmem:[#allocation47_spill] sm:$0xff] %v6708_v59 }
  0x3f   :  { %432 = vmatpush1.msra.mxu0 %v6670_v58  ;;  %4657 = vmatpush3.msra.mxu1 %v6675_v56  ;;  %11351 = vst [vmem:[#allocation46_spill] sm:$0xff] %v6701_v61  ;;  %v6713_v58 = vld [vmem:[%s10943_s3 + $0x28] sm:$0xff]  ;;  %v6727_v56 = vld [vmem:[%s10943_s3] sm:$0xff] }
  0x40   :  { %433 = vmatprep.subr.mxu0 %v6682_v63  ;;  %4658 = vmatprep.subr.mxu1 %v11335_v62  ;;  %11353 = vst [vmem:[#allocation48_spill] sm:$0xff] %v6713_v58  ;;  %v6720_v63 = vld [vmem:[%s10943_s3 + $0x8] sm:$0xff]  ;;  %11355 = vst [vmem:[#allocation50_spill] sm:$0xff] %v6727_v56 }
  0x41   :  { %434 = vmatpush1.msra.mxu0 %v6689_v3  ;;  %4659 = vmatpush3.msra.mxu1 %v6694_v60  ;;  %11354 = vst [vmem:[#allocation49_spill] sm:$0xff] %v6720_v63  ;;  %v6732_v3 = vld [vmem:[%s10943_s3 + $0x10] sm:$0xff] }
  0x42   :  { %435 = vmatprep.subr.mxu0 %v6701_v61  ;;  %4660 = vmatprep.subr.mxu1 %v11335_v62  ;;  %11356 = vst [vmem:[#allocation51_spill] sm:$0xff] %v6732_v3  ;;  %v6739_v61 = vld [vmem:[%s10944_s4 + $0x170] sm:$0xff] }
  0x43   :  { %436 = vmatpush1.msra.mxu0 %v6708_v59  ;;  %4661 = vmatpush3.msra.mxu1 %v6713_v58  ;;  %11357 = vst [vmem:[#allocation52_spill] sm:$0xff] %v6739_v61  ;;  %v4118_v58 = vld [vmem:[%s10945_s0 + $0xa8] sm:$0xff] }
  0x44   :  { %437 = vmatprep.subr.mxu0 %v6720_v63  ;;  %4662 = vmatprep.subr.mxu1 %v11335_v62  ;;  %v4119_v63 = vld [vmem:[%s10945_s0 + $0xb0] sm:$0xff] }
  0x45   :  { %438 = vmatpush1.msra.mxu0 %v6727_v56  ;;  %4663 = vmatpush3.msra.mxu1 %v6732_v3 }
  0x46   :  { %548 = vmatprep.subr.mxu0 %v6739_v61  ;;  %4667 = vmatprep.subr.mxu1 %v11335_v62 }
  0xe2   :  { %v310_v59 = vpop.f32.mrf.mxu0 }
  0xe3   :  { %v385_v60 = vadd.f32 %v4118_v58, %v310_v59  ;;  %v6756_v58 = vld [vmem:[%s10946_s2] ss:$0 sm:$0xff] }
  0xe4   :  { %v312_v55 = vpop.f32.mrf.mxu0 }
  0xe5   :  { %v4121_v57 = vmul.f32 -1.442695, %v385_v60  ;;  %v386_v56 = vadd.f32 %v4119_v63, %v312_v55  ;;  %v381_v54 = vpop.f32.mrf.mxu1  ;;  %v4120_v55 = vld [vmem:[%s10945_s0 + $0xb8] sm:$0xff] }
  0xe6   :  { %v399_v60 = vadd.f32 %v6756_v58, %v381_v54  ;;  %v6772_v54 = vld [vmem:[%s10944_s4 + $0x178] sm:$0xff] }
  0xe7   :  { %5474 = vpow2.f32 %v4121_v57  ;;  %v4122_v3 = vmul.f32 -1.442695, %v386_v56  ;;  %v4631_v53 = vpop.f32.mrf.mxu1 }
  0xe9   :  { %5476 = vpow2.f32 %v4122_v3 }
  0xf4   :  { %v5475_v61 = vpop.eup %5474 }
  0xf5   :  { %v393_v52 = vadd.f32 1.0, %v5475_v61 }
  0xf6   :  { %v5477_v51 = vpop.eup %5476 }
  0xf7   :  { %5478 = vrcp.f32 %v393_v52  ;;  %v394_v59 = vadd.f32 1.0, %v5477_v51  ;;  %v6767_v51 = vld [vmem:[%s10944_s4 + $0x168] sm:$0xff] }
  0xf9   :  { %5480 = vrcp.f32 %v394_v59  ;;  %v6784_v59 = vld [vmem:[%s10944_s4 + $0x150] sm:$0xff] }
 0x104   :  { %v5479_v50 = vpop.eup %5478 }
 0x105   :  { %v400_v53 = vmul.f32 %v5479_v50, %v399_v60  ;;  %v6777_v50 = vld [vmem:[%s10944_s4 + $0x158] sm:$0xff]  ;;  %v6789_v60 = vld [vmem:[%s10944_s4 + $0x160] sm:$0xff] }
 0x106   :  { %v5481_v56 = vpop.eup %5480 }
 0x107   :  { %v401_v3 = vadd.f32 %v4120_v55, %v400_v53  ;;  %v403_v52 = vsub.f32 1.0, %v5481_v56  ;;  %v405_v63 = vmul.f32 0.0, %v5481_v56  ;;  %v6796_v55 = vld [vmem:[%s10944_s4 + $0x140] sm:$0xff]  ;;  %v6803_v53 = vld [vmem:[%s10944_s4 + $0x138] sm:$0xff]  ;;  %v6815_v56 = vld [vmem:[%s10944_s4 + $0x128] sm:$0xff] }
 0x108   :  { %11358 = vst [vmem:[#allocation53_spill] sm:$0xff] %v6803_v53  ;;  %11360 = vst [vmem:[#allocation55_spill] sm:$0xff] %v6815_v56 }
 0x109   :  { %5482 = vtanh.f32 %v401_v3  ;;  %v6808_v3 = vld [vmem:[%s10944_s4 + $0x148] sm:$0xff] }
 0x10a   :  { %11359 = vst [vmem:[#allocation54_spill] sm:$0xff] %v6808_v3 }
 0x116   :  { %v5483_v57 = vpop.eup %5482 }
 0x117   :  { %v404_v61 = vmul.f32 %v5483_v57, %v403_v52  ;;  %v6822_v52 = vld [vmem:[%s10944_s4 + $0x120] sm:$0xff]  ;;  %v6827_v57 = vld [vmem:[%s10944_s4 + $0x130] sm:$0xff] }
 0x118   :  { %11361 = vst [vmem:[#allocation56_spill] sm:$0xff] %v6822_v52  ;;  %11362 = vst [vmem:[#allocation57_spill] sm:$0xff] %v6827_v57 }
 0x119   :  { %v6762_v49 = vadd.f32 %v405_v63, %v404_v61  ;;  %v6834_v61 = vld [vmem:[%s10944_s4 + $0x110] sm:$0xff]  ;;  %v6841_v63 = vld [vmem:[%s10944_s4 + $0x108] sm:$0xff] }
 0x11a   :  { %11363 = vst [vmem:[#allocation58_spill] sm:$0xff] %v6834_v61  ;;  %11364 = vst [vmem:[#allocation59_spill] sm:$0xff] %v6841_v63 }
 0x11b   :  { %472 = vmatmul.mubr.f32.vlgmr.msra.gmra.mxu0 %v6762_v49  ;;  %4665 = vmatmul.mubr.f32.vlgmr.msra.gmra.mxu1 %v6762_v49 }
 0x11c   :  { %549 = vmatpush1.msra.mxu0 %v6767_v51  ;;  %4668 = vmatpush3.msra.mxu1 %v6772_v54 }
 0x11d   :  { %550 = vmatprep.subr.mxu0 %v6777_v50  ;;  %4669 = vmatprep.subr.mxu1 %v11335_v62 }
 0x11e   :  { %551 = vmatpush1.msra.mxu0 %v6784_v59  ;;  %4670 = vmatpush3.msra.mxu1 %v6789_v60 }
 0x11f   :  { %552 = vmatprep.subr.mxu0 %v6796_v55  ;;  %4671 = vmatprep.subr.mxu1 %v11335_v62 }
 0x120   :  { %553 = vmatpush1.msra.mxu0 %v6803_v53  ;;  %4672 = vmatpush3.msra.mxu1 %v6808_v3  ;;  %v6846_v53 = vld [vmem:[%s10944_s4 + $0x118] sm:$0xff]  ;;  %v6860_v3 = vld [vmem:[%s10944_s4 + $0xf0] sm:$0xff] }
 0x121   :  { %554 = vmatprep.subr.mxu0 %v6815_v56  ;;  %4673 = vmatprep.subr.mxu1 %v11335_v62  ;;  %11365 = vst [vmem:[#allocation60_spill] sm:$0xff] %v6846_v53  ;;  %v6853_v56 = vld [vmem:[%s10944_s4 + $0xf8] sm:$0xff]  ;;  %11367 = vst [vmem:[#allocation62_spill] sm:$0xff] %v6860_v3 }
 0x122   :  { %555 = vmatpush1.msra.mxu0 %v6822_v52  ;;  %4674 = vmatpush3.msra.mxu1 %v6827_v57  ;;  %11366 = vst [vmem:[#allocation61_spill] sm:$0xff] %v6853_v56  ;;  %v6865_v52 = vld [vmem:[%s10944_s4 + $0x100] sm:$0xff]  ;;  %v6879_v57 = vld [vmem:[%s10944_s4 + $0xd8] sm:$0xff] }
 0x123   :  { %556 = vmatprep.subr.mxu0 %v6834_v61  ;;  %4675 = vmatprep.subr.mxu1 %v11335_v62  ;;  %11368 = vst [vmem:[#allocation63_spill] sm:$0xff] %v6865_v52  ;;  %v6872_v61 = vld [vmem:[%s10944_s4 + $0xe0] sm:$0xff]  ;;  %11370 = vst [vmem:[#allocation65_spill] sm:$0xff] %v6879_v57 }
 0x124   :  { %557 = vmatpush1.msra.mxu0 %v6841_v63  ;;  %4676 = vmatpush3.msra.mxu1 %v6846_v53  ;;  %11369 = vst [vmem:[#allocation64_spill] sm:$0xff] %v6872_v61  ;;  %v6884_v63 = vld [vmem:[%s10944_s4 + $0xe8] sm:$0xff]  ;;  %v6898_v53 = vld [vmem:[%s10944_s4 + $0xc0] sm:$0xff] }
 0x125   :  { %558 = vmatprep.subr.mxu0 %v6853_v56  ;;  %4677 = vmatprep.subr.mxu1 %v11335_v62  ;;  %11371 = vst [vmem:[#allocation66_spill] sm:$0xff] %v6884_v63  ;;  %v6891_v56 = vld [vmem:[%s10944_s4 + $0xc8] sm:$0xff]  ;;  %11373 = vst [vmem:[#allocation68_spill] sm:$0xff] %v6898_v53 }
 0x126   :  { %559 = vmatpush1.msra.mxu0 %v6860_v3  ;;  %4678 = vmatpush3.msra.mxu1 %v6865_v52  ;;  %11372 = vst [vmem:[#allocation67_spill] sm:$0xff] %v6891_v56  ;;  %v6903_v3 = vld [vmem:[%s10944_s4 + $0xd0] sm:$0xff]  ;;  %v6917_v52 = vld [vmem:[%s10944_s4 + $0xa8] sm:$0xff] }
 0x127   :  { %560 = vmatprep.subr.mxu0 %v6872_v61  ;;  %4679 = vmatprep.subr.mxu1 %v11335_v62  ;;  %11374 = vst [vmem:[#allocation69_spill] sm:$0xff] %v6903_v3  ;;  %v6910_v61 = vld [vmem:[%s10944_s4 + $0xb0] sm:$0xff]  ;;  %11376 = vst [vmem:[#allocation71_spill] sm:$0xff] %v6917_v52 }
 0x128   :  { %561 = vmatpush1.msra.mxu0 %v6879_v57  ;;  %4680 = vmatpush3.msra.mxu1 %v6884_v63  ;;  %11375 = vst [vmem:[#allocation70_spill] sm:$0xff] %v6910_v61  ;;  %v6922_v57 = vld [vmem:[%s10944_s4 + $0xb8] sm:$0xff]  ;;  %v6936_v63 = vld [vmem:[%s10944_s4 + $0x90] sm:$0xff] }
 0x129   :  { %562 = vmatprep.subr.mxu0 %v6891_v56  ;;  %4681 = vmatprep.subr.mxu1 %v11335_v62  ;;  %11377 = vst [vmem:[#allocation72_spill] sm:$0xff] %v6922_v57  ;;  %v6929_v56 = vld [vmem:[%s10944_s4 + $0x98] sm:$0xff]  ;;  %11379 = vst [vmem:[#allocation74_spill] sm:$0xff] %v6936_v63 }
 0x12a   :  { %563 = vmatpush1.msra.mxu0 %v6898_v53  ;;  %4682 = vmatpush3.msra.mxu1 %v6903_v3  ;;  %11378 = vst [vmem:[#allocation73_spill] sm:$0xff] %v6929_v56  ;;  %v6941_v53 = vld [vmem:[%s10944_s4 + $0xa0] sm:$0xff]  ;;  %v6955_v3 = vld [vmem:[%s10944_s4 + $0x78] sm:$0xff] }
 0x12b   :  { %564 = vmatprep.subr.mxu0 %v6910_v61  ;;  %4683 = vmatprep.subr.mxu1 %v11335_v62  ;;  %11380 = vst [vmem:[#allocation75_spill] sm:$0xff] %v6941_v53  ;;  %v6948_v61 = vld [vmem:[%s10944_s4 + $0x80] sm:$0xff]  ;;  %11382 = vst [vmem:[#allocation77_spill] sm:$0xff] %v6955_v3 }
 0x12c   :  { %565 = vmatpush1.msra.mxu0 %v6917_v52  ;;  %4684 = vmatpush3.msra.mxu1 %v6922_v57  ;;  %11381 = vst [vmem:[#allocation76_spill] sm:$0xff] %v6948_v61  ;;  %v6960_v52 = vld [vmem:[%s10944_s4 + $0x88] sm:$0xff]  ;;  %v6974_v57 = vld [vmem:[%s10944_s4 + $0x60] sm:$0xff] }
 0x12d   :  { %566 = vmatprep.subr.mxu0 %v6929_v56  ;;  %4685 = vmatprep.subr.mxu1 %v11335_v62  ;;  %11383 = vst [vmem:[#allocation78_spill] sm:$0xff] %v6960_v52  ;;  %v6967_v56 = vld [vmem:[%s10944_s4 + $0x68] sm:$0xff]  ;;  %11385 = vst [vmem:[#allocation80_spill] sm:$0xff] %v6974_v57 }
 0x12e   :  { %567 = vmatpush1.msra.mxu0 %v6936_v63  ;;  %4686 = vmatpush3.msra.mxu1 %v6941_v53  ;;  %11384 = vst [vmem:[#allocation79_spill] sm:$0xff] %v6967_v56  ;;  %v6979_v63 = vld [vmem:[%s10944_s4 + $0x70] sm:$0xff]  ;;  %v6993_v53 = vld [vmem:[%s10944_s4 + $0x48] sm:$0xff] }
 0x12f   :  { %568 = vmatprep.subr.mxu0 %v6948_v61  ;;  %4687 = vmatprep.subr.mxu1 %v11335_v62  ;;  %11386 = vst [vmem:[#allocation81_spill] sm:$0xff] %v6979_v63  ;;  %v6986_v61 = vld [vmem:[%s10944_s4 + $0x50] sm:$0xff]  ;;  %11388 = vst [vmem:[#allocation83_spill] sm:$0xff] %v6993_v53 }
 0x130   :  { %569 = vmatpush1.msra.mxu0 %v6955_v3  ;;  %4688 = vmatpush3.msra.mxu1 %v6960_v52  ;;  %11387 = vst [vmem:[#allocation82_spill] sm:$0xff] %v6986_v61  ;;  %v6998_v3 = vld [vmem:[%s10944_s4 + $0x58] sm:$0xff]  ;;  %v7012_v52 = vld [vmem:[%s10944_s4 + $0x30] sm:$0xff] }
 0x131   :  { %570 = vmatprep.subr.mxu0 %v6967_v56  ;;  %4689 = vmatprep.subr.mxu1 %v11335_v62  ;;  %11389 = vst [vmem:[#allocation84_spill] sm:$0xff] %v6998_v3  ;;  %v7005_v56 = vld [vmem:[%s10944_s4 + $0x38] sm:$0xff] }
 0x132   :  { %571 = vmatpush1.msra.mxu0 %v6974_v57  ;;  %4690 = vmatpush3.msra.mxu1 %v6979_v63  ;;  %11390 = vst [vmem:[#allocation85_spill] sm:$0xff] %v7005_v56  ;;  %v7017_v57 = vld [vmem:[%s10944_s4 + $0x40] sm:$0xff]  ;;  %v7031_v63 = vld [vmem:[%s10944_s4 + $0x18] sm:$0xff] }
 0x133   :  { %572 = vmatprep.subr.mxu0 %v6986_v61  ;;  %4691 = vmatprep.subr.mxu1 %v11335_v62  ;;  %11391 = vst [vmem:[#allocation86_spill] sm:$0xff] %v7017_v57  ;;  %v7024_v61 = vld [vmem:[%s10944_s4 + $0x20] sm:$0xff] }
 0x134   :  { %573 = vmatpush1.msra.mxu0 %v6993_v53  ;;  %4692 = vmatpush3.msra.mxu1 %v6998_v3  ;;  %v7036_v53 = vld [vmem:[%s10944_s4 + $0x28] sm:$0xff]  ;;  %v7050_v3 = vld [vmem:[%s10944_s4] sm:$0xff] }
 0x135   :  { %574 = vmatprep.subr.mxu0 %v7005_v56  ;;  %4693 = vmatprep.subr.mxu1 %v11335_v62  ;;  %v7043_v56 = vld [vmem:[%s10944_s4 + $0x8] sm:$0xff] }
 0x136   :  { %575 = vmatpush1.msra.mxu0 %v7012_v52  ;;  %4694 = vmatpush3.msra.mxu1 %v7017_v57  ;;  %v7057_v57 = vld [vmem:[%s10944_s4 + $0x10] sm:$0xff] }
 0x137   :  { %576 = vmatprep.subr.mxu0 %v7024_v61  ;;  %4695 = vmatprep.subr.mxu1 %v11335_v62 }
 0x138   :  { %577 = vmatpush1.msra.mxu0 %v7031_v63  ;;  %4696 = vmatpush3.msra.mxu1 %v7036_v53 }
 0x139   :  { %578 = vmatprep.subr.mxu0 %v7043_v56  ;;  %4697 = vmatprep.subr.mxu1 %v11335_v62 }
 0x13a   :  { %579 = vmatpush1.msra.mxu0 %v7050_v3  ;;  %612 = vmatprep.mubr.f32.mxu0 %v11335_v62 }
 0x13b   :  { %4698 = vmatpush3.msra.mxu1 %v7057_v57  ;;  %613 = vmatmul.mubr.f32.vlgmr.msra.gmra.mxu0 %v11335_v62 }
 0x13c   :  { %4699 = vmatprep.mubr.msk.f32.mxu1 %vm6073_vm0, %v11335_v62  ;;  %715 = vmatprep.subr.mxu0 %v6127_v0  ;;  %v11392_v0 = vld [vmem:[#allocation4_spill] sm:$0xff] }
 0x13d   :  { %4702 = vmatprep.subr.mxu1 %v11335_v62  ;;  %4700 = vmatmul.mubr.f32.vlgmr.msra.gmra.mxu1 %v11335_v62 }
 0x13e   :  { %716 = vmatpush1.msra.mxu0 %v6132_v1  ;;  %4703 = vmatpush3.msra.mxu1 %v6206_v14  ;;  %v11393_v1 = vld [vmem:[#allocation5_spill] sm:$0xff] }
 0x13f   :  { %717 = vmatprep.subr.mxu0 %v6137_v2  ;;  %4704 = vmatprep.subr.mxu1 %v11335_v62  ;;  %v11394_v2 = vld [vmem:[#allocation6_spill] sm:$0xff]  ;;  %v11405_v14 = vld [vmem:[#allocation17_spill] sm:$0xff] }
 0x140   :  { %718 = vmatpush1.msra.mxu0 %v6145_v4  ;;  %4705 = vmatpush3.msra.mxu1 %v6218_v16  ;;  %v11395_v4 = vld [vmem:[#allocation7_spill] sm:$0xff] }
 0x141   :  { %719 = vmatprep.subr.mxu0 %v6153_v5  ;;  %4706 = vmatprep.subr.mxu1 %v11335_v62  ;;  %v11396_v5 = vld [vmem:[#allocation8_spill] sm:$0xff]  ;;  %v11407_v16 = vld [vmem:[#allocation19_spill] sm:$0xff] }
 0x142   :  { %720 = vmatpush1.msra.mxu0 %v6159_v6  ;;  %4707 = vmatpush3.msra.mxu1 %v6230_v18  ;;  %v11397_v6 = vld [vmem:[#allocation9_spill] sm:$0xff] }
 0x143   :  { %721 = vmatprep.subr.mxu0 %v6165_v7  ;;  %4708 = vmatprep.subr.mxu1 %v11335_v62  ;;  %v11398_v7 = vld [vmem:[#allocation10_spill] sm:$0xff]  ;;  %v11409_v18 = vld [vmem:[#allocation21_spill] sm:$0xff] }
 0x144   :  { %722 = vmatpush1.msra.mxu0 %v6171_v8  ;;  %4709 = vmatpush3.msra.mxu1 %v6249_v21  ;;  %v11399_v8 = vld [vmem:[#allocation12_spill] sm:$0xff] }
 0x145   :  { %723 = vmatprep.subr.mxu0 %v6177_v9  ;;  %4710 = vmatprep.subr.mxu1 %v11335_v62  ;;  %v11400_v9 = vld [vmem:[#allocation11_spill] sm:$0xff]  ;;  %v11412_v21 = vld [vmem:[#allocation24_spill] sm:$0xff] }
 0x146   :  { %724 = vmatpush1.msra.mxu0 %v6183_v10  ;;  %4711 = vmatpush3.msra.mxu1 %v6268_v24  ;;  %v11401_v10 = vld [vmem:[#allocation13_spill] sm:$0xff]  ;;  %v11415_v24 = vld [vmem:[#allocation27_spill] sm:$0xff] }
 0x147   :  { %725 = vmatprep.subr.mxu0 %v6189_v11  ;;  %4712 = vmatprep.subr.mxu1 %v11335_v62  ;;  %v11402_v11 = vld [vmem:[#allocation14_spill] sm:$0xff] }
 0x148   :  { %726 = vmatpush1.msra.mxu0 %v6195_v12  ;;  %4713 = vmatpush3.msra.mxu1 %v6287_v27  ;;  %v11403_v12 = vld [vmem:[#allocation15_spill] sm:$0xff]  ;;  %v11418_v27 = vld [vmem:[#allocation30_spill] sm:$0xff] }
 0x149   :  { %727 = vmatprep.subr.mxu0 %v6201_v13  ;;  %4714 = vmatprep.subr.mxu1 %v11335_v62  ;;  %v11404_v13 = vld [vmem:[#allocation16_spill] sm:$0xff] }
 0x14a   :  { %728 = vmatpush1.msra.mxu0 %v6212_v15  ;;  %4715 = vmatpush3.msra.mxu1 %v6306_v30  ;;  %v11406_v15 = vld [vmem:[#allocation18_spill] sm:$0xff]  ;;  %v11421_v30 = vld [vmem:[#allocation33_spill] sm:$0xff] }
 0x14b   :  { %729 = vmatprep.subr.mxu0 %v6224_v17  ;;  %4716 = vmatprep.subr.mxu1 %v11335_v62  ;;  %v11408_v17 = vld [vmem:[#allocation20_spill] sm:$0xff] }
 0x14c   :  { %730 = vmatpush1.msra.mxu0 %v6236_v19  ;;  %4717 = vmatpush3.msra.mxu1 %v6325_v33  ;;  %v11410_v19 = vld [vmem:[#allocation22_spill] sm:$0xff]  ;;  %v11424_v33 = vld [vmem:[#allocation36_spill] sm:$0xff] }
 0x14d   :  { %731 = vmatprep.subr.mxu0 %v6243_v20  ;;  %4718 = vmatprep.subr.mxu1 %v11335_v62  ;;  %v11411_v20 = vld [vmem:[#allocation23_spill] sm:$0xff] }
 0x14e   :  { %732 = vmatpush1.msra.mxu0 %v6255_v22  ;;  %4719 = vmatpush3.msra.mxu1 %v6344_v36  ;;  %v11413_v22 = vld [vmem:[#allocation25_spill] sm:$0xff]  ;;  %v11427_v36 = vld [vmem:[#allocation39_spill] sm:$0xff] }
 0x14f   :  { %733 = vmatprep.subr.mxu0 %v6262_v23  ;;  %4720 = vmatprep.subr.mxu1 %v11335_v62  ;;  %v11414_v23 = vld [vmem:[#allocation26_spill] sm:$0xff] }
 0x150   :  { %734 = vmatpush1.msra.mxu0 %v6274_v25  ;;  %4721 = vmatpush3.msra.mxu1 %v6363_v39  ;;  %v11416_v25 = vld [vmem:[#allocation28_spill] sm:$0xff]  ;;  %v11430_v39 = vld [vmem:[#allocation42_spill] sm:$0xff] }
 0x151   :  { %735 = vmatprep.subr.mxu0 %v6281_v26  ;;  %4722 = vmatprep.subr.mxu1 %v11335_v62  ;;  %v11417_v26 = vld [vmem:[#allocation29_spill] sm:$0xff] }
 0x152   :  { %736 = vmatpush1.msra.mxu0 %v6293_v28  ;;  %4723 = vmatpush3.msra.mxu1 %v6382_v42  ;;  %v11419_v28 = vld [vmem:[#allocation31_spill] sm:$0xff]  ;;  %v11433_v42 = vld [vmem:[#allocation45_spill] sm:$0xff] }
 0x153   :  { %737 = vmatprep.subr.mxu0 %v6300_v29  ;;  %4724 = vmatprep.subr.mxu1 %v11335_v62  ;;  %v11420_v29 = vld [vmem:[#allocation32_spill] sm:$0xff] }
 0x154   :  { %738 = vmatpush1.msra.mxu0 %v6312_v31  ;;  %4725 = vmatpush3.msra.mxu1 %v6396_v44  ;;  %v11422_v31 = vld [vmem:[#allocation34_spill] sm:$0xff]  ;;  %v11435_v44 = vld [vmem:[#allocation47_spill] sm:$0xff] }
 0x155   :  { %739 = vmatprep.subr.mxu0 %v6319_v32  ;;  %4726 = vmatprep.subr.mxu1 %v11335_v62  ;;  %v11423_v32 = vld [vmem:[#allocation35_spill] sm:$0xff] }
 0x156   :  { %740 = vmatpush1.msra.mxu0 %v6331_v34  ;;  %4727 = vmatpush3.msra.mxu1 %v6405_v45  ;;  %v11425_v34 = vld [vmem:[#allocation37_spill] sm:$0xff]  ;;  %v11436_v45 = vld [vmem:[#allocation48_spill] sm:$0xff] }
 0x157   :  { %741 = vmatprep.subr.mxu0 %v6338_v35  ;;  %4728 = vmatprep.subr.mxu1 %v11335_v62  ;;  %v11426_v35 = vld [vmem:[#allocation38_spill] sm:$0xff] }
 0x158   :  { %742 = vmatpush1.msra.mxu0 %v6350_v37  ;;  %4729 = vmatpush3.msra.mxu1 %v6413_v46  ;;  %v11428_v37 = vld [vmem:[#allocation40_spill] sm:$0xff]  ;;  %v11437_v46 = vld [vmem:[#allocation49_spill] sm:$0xff] }
 0x159   :  { %743 = vmatprep.subr.mxu0 %v6357_v38  ;;  %4730 = vmatprep.subr.mxu1 %v11335_v62  ;;  %v11429_v38 = vld [vmem:[#allocation41_spill] sm:$0xff] }
 0x15a   :  { %744 = vmatpush1.msra.mxu0 %v6369_v40  ;;  %4731 = vmatpush3.msra.mxu1 %v6421_v47  ;;  %v11431_v40 = vld [vmem:[#allocation43_spill] sm:$0xff]  ;;  %v11438_v47 = vld [vmem:[#allocation50_spill] sm:$0xff] }
 0x15b   :  { %745 = vmatprep.subr.mxu0 %v6376_v41  ;;  %4732 = vmatprep.subr.mxu1 %v11335_v62  ;;  %v11432_v41 = vld [vmem:[#allocation44_spill] sm:$0xff] }
 0x15c   :  { %746 = vmatpush1.msra.mxu0 %v6388_v43  ;;  %779 = vmatprep.mubr.f32.mxu0 %v11335_v62  ;;  %v11434_v43 = vld [vmem:[#allocation46_spill] sm:$0xff] }
 0x15d   :  { %4733 = vmatpush3.msra.mxu1 %v6428_v48  ;;  %4734 = vmatprep.mubr.msk.f32.mxu1 %vm6073_vm0, %v11335_v62  ;;  %v11439_v48 = vld [vmem:[#allocation51_spill] sm:$0xff] }
 0x15e   :  { %780 = vmatmul.mubr.f32.vlgmr.msra.gmra.mxu0 %v6762_v49  ;;  %4735 = vmatmul.mubr.f32.vlgmr.msra.gmra.mxu1 %v6762_v49 }
 0x15f   :  { %878 = vmatprep.subr.mxu0 %v11392_v0  ;;  %4737 = vmatprep.subr.mxu1 %v11335_v62  ;;  %v11440_v0 = vld [vmem:[#allocation52_spill] sm:$0xff] }
 0x160   :  { %879 = vmatpush1.msra.mxu0 %v11393_v1  ;;  %4738 = vmatpush3.msra.mxu1 %v11394_v2 }
 0x161   :  { %880 = vmatprep.subr.mxu0 %v11395_v4  ;;  %4739 = vmatprep.subr.mxu1 %v11335_v62  ;;  %v209_v4 = vlaneseq }
 0x162   :  { %881 = vmatpush1.msra.mxu0 %v11396_v5  ;;  %4740 = vmatpush3.msra.mxu1 %v11397_v6 }
 0x163   :  { %882 = vmatprep.subr.mxu0 %v11398_v7  ;;  %4741 = vmatprep.subr.mxu1 %v11335_v62  ;;  %v210_v5 = vshrl.u32 %v209_v4, 7  ;;  %v207_v7 = vld [vmem:[%s10947_s5] sm:$0x7] }
 0x164   :  { %883 = vmatpush1.msra.mxu0 %v11399_v8  ;;  %4742 = vmatpush3.msra.mxu1 %v11400_v9 }
 0x165   :  { %884 = vmatprep.subr.mxu0 %v11401_v10  ;;  %4743 = vmatprep.subr.mxu1 %v11335_v62  ;;  %v211_v6 = vsub.s32 0, %v210_v5 }
 0x166   :  { %885 = vmatpush1.msra.mxu0 %v11402_v11  ;;  %4744 = vmatpush3.msra.mxu1 %v11403_v12 }
 0x167   :  { %886 = vmatprep.subr.mxu0 %v11404_v13  ;;  %4745 = vmatprep.subr.mxu1 %v11335_v62  ;;  %v7209_v9 = vrot.slane %v207_v7, %v211_v6 }
 0x168   :  { %887 = vmatpush1.msra.mxu0 %v11405_v14  ;;  %4746 = vmatpush3.msra.mxu1 %v11406_v15 }
 0x169   :  { %888 = vmatprep.subr.mxu0 %v11407_v16  ;;  %4747 = vmatprep.subr.mxu1 %v11335_v62  ;;  %11441 = vst [vmem:[#allocation4_spill] sm:$0xff] %v7209_v9 }
 0x16a   :  { %889 = vmatpush1.msra.mxu0 %v11408_v17  ;;  %4748 = vmatpush3.msra.mxu1 %v11409_v18 }
 0x16b   :  { %890 = vmatprep.subr.mxu0 %v11410_v19  ;;  %4749 = vmatprep.subr.mxu1 %v11335_v62  ;;  %v219_v19 = vsub.s32 2, %v210_v5 }
 0x16c   :  { %891 = vmatpush1.msra.mxu0 %v11411_v20  ;;  %4750 = vmatpush3.msra.mxu1 %v11412_v21  ;;  %v7215_v20 = vld [vmem:[%s10948_s6] ss:$0 sm:$0xff] }
 0x16d   :  { %892 = vmatprep.subr.mxu0 %v11413_v22  ;;  %4751 = vmatprep.subr.mxu1 %v11335_v62  ;;  %v7217_v21 = vrot.slane %v207_v7, %v219_v19  ;;  %v11456_v19 = vld [vmem:[#allocation67_spill] sm:$0xff] }
 0x16e   :  { %893 = vmatpush1.msra.mxu0 %v11414_v23  ;;  %4752 = vmatpush3.msra.mxu1 %v11415_v24  ;;  %v4125_v24 = vld [vmem:[%s10945_s0 + $0x90] sm:$0xff] }
 0x16f   :  { %894 = vmatprep.subr.mxu0 %v11416_v25  ;;  %4753 = vmatprep.subr.mxu1 %v11335_v62 }
 0x170   :  { %895 = vmatpush1.msra.mxu0 %v11417_v26  ;;  %4754 = vmatpush3.msra.mxu1 %v11418_v27 }
 0x171   :  { %896 = vmatprep.subr.mxu0 %v11419_v28  ;;  %4755 = vmatprep.subr.mxu1 %v11335_v62 }
 0x172   :  { %897 = vmatpush1.msra.mxu0 %v11420_v29  ;;  %4756 = vmatpush3.msra.mxu1 %v11421_v30 }
 0x173   :  { %898 = vmatprep.subr.mxu0 %v11422_v31  ;;  %4757 = vmatprep.subr.mxu1 %v11335_v62 }
 0x174   :  { %899 = vmatpush1.msra.mxu0 %v11423_v32  ;;  %4758 = vmatpush3.msra.mxu1 %v11424_v33 }
 0x175   :  { %900 = vmatprep.subr.mxu0 %v11425_v34  ;;  %4759 = vmatprep.subr.mxu1 %v11335_v62  ;;  %v4126_v34 = vld [vmem:[%s10945_s0 + $0x98] sm:$0xff] }
 0x176   :  { %901 = vmatpush1.msra.mxu0 %v11426_v35  ;;  %4760 = vmatpush3.msra.mxu1 %v11427_v36 }
 0x177   :  { %902 = vmatprep.subr.mxu0 %v11428_v37  ;;  %4761 = vmatprep.subr.mxu1 %v11335_v62 }
 0x178   :  { %903 = vmatpush1.msra.mxu0 %v11429_v38  ;;  %4762 = vmatpush3.msra.mxu1 %v11430_v39 }
 0x179   :  { %904 = vmatprep.subr.mxu0 %v11431_v40  ;;  %4763 = vmatprep.subr.mxu1 %v11335_v62 }
 0x17a   :  { %905 = vmatpush1.msra.mxu0 %v11432_v41  ;;  %4764 = vmatpush3.msra.mxu1 %v11433_v42  ;;  %v215_v41 = vsub.s32 1, %v210_v5 }
 0x17b   :  { %906 = vmatprep.subr.mxu0 %v11434_v43  ;;  %4765 = vmatprep.subr.mxu1 %v11335_v62 }
 0x17c   :  { %907 = vmatpush1.msra.mxu0 %v11435_v44  ;;  %4766 = vmatpush3.msra.mxu1 %v11436_v45  ;;  %v7227_v43 = vrot.slane %v207_v7, %v215_v41 }
 0x17d   :  { %908 = vmatprep.subr.mxu0 %v11437_v46  ;;  %4767 = vmatprep.subr.mxu1 %v11335_v62  ;;  %v4127_v46 = vld [vmem:[%s10945_s0 + $0xa0] sm:$0xff] }
 0x17e   :  { %909 = vmatpush1.msra.mxu0 %v11438_v47  ;;  %4768 = vmatpush3.msra.mxu1 %v11439_v48 }
 0x17f   :  { %942 = vmatprep.mubr.f32.mxu0 %v11335_v62  ;;  %4769 = vmatprep.mubr.msk.f32.mxu1 %vm6073_vm0, %v11335_v62 }
 0x180   :  { %1019 = vmatprep.subr.mxu0 %v11440_v0  ;;  %4772 = vmatprep.subr.mxu1 %v11335_v62 }
 0x1db   :  { %v544_v1 = vpop.f32.mrf.mxu1  ;;  %v473_v8 = vpop.f32.mrf.mxu0 }
 0x1dc   :  { %v474_v11 = vadd.f32 %v473_v8, %v7209_v9  ;;  %v545_v26 = vadd.f32 %v544_v1, %v7217_v21 }
 0x1dd   :  { %v4666_v2 = vpop.f32.mrf.mxu1  ;;  %v475_v10 = vpop.f32.mrf.mxu0 }
 0x1de   :  { %v476_v48 = vadd.f32 %v475_v10, %v7227_v43 }
 0x1fb   :  { %v614_v12 = vpop.f32.mrf.mxu0 }
 0x1fc   :  { %v689_v13 = vadd.f32 %v614_v12, %v474_v11  ;;  %v11442_v11 = vld [vmem:[#allocation53_spill] sm:$0xff]  ;;  %v11443_v12 = vld [vmem:[#allocation54_spill] sm:$0xff] }
 0x1fd   :  { %v685_v14 = vpop.f32.mrf.mxu1  ;;  %v616_v23 = vpop.f32.mrf.mxu0 }
 0x1fe   :  { %v4123_v15 = vmul.f32 -1.442695, %v689_v13  ;;  %v703_v22 = vadd.f32 %v7215_v20, %v685_v14  ;;  %v690_v1 = vadd.f32 %v616_v23, %v476_v48  ;;  %v11450_v13 = vld [vmem:[#allocation61_spill] sm:$0xff]  ;;  %v11451_v14 = vld [vmem:[#allocation62_spill] sm:$0xff]  ;;  %v7356_v48 = vld [vmem:[%s10942_s1 + $0x138] sm:$0xff] }
 0x1ff   :  { %v4701_v16 = vpop.f32.mrf.mxu1  ;;  %v11458_v23 = vld [vmem:[#allocation69_spill] sm:$0xff] }
 0x200   :  { %5484 = vpow2.f32 %v4123_v15  ;;  %v4124_v2 = vmul.f32 -1.442695, %v690_v1  ;;  %v11452_v15 = vld [vmem:[#allocation63_spill] sm:$0xff]  ;;  %v11453_v16 = vld [vmem:[#allocation64_spill] sm:$0xff]  ;;  %v7368_v1 = vld [vmem:[%s10942_s1 + $0x128] sm:$0xff] }
 0x20d   :  { %v5485_v17 = vpop.eup %5484 }
 0x20e   :  { %v697_v18 = vadd.f32 1.0, %v5485_v17  ;;  %v11454_v17 = vld [vmem:[#allocation65_spill] sm:$0xff] }
 0x210   :  { %5486 = vrcp.f32 %v697_v18  ;;  %v11455_v18 = vld [vmem:[#allocation66_spill] sm:$0xff] }
 0x21d   :  { %v5487_v25 = vpop.eup %5486 }
 0x21e   :  { %v704_v27 = vmul.f32 %v5487_v25, %v703_v22  ;;  %v781_v28 = vpop.f32.mrf.mxu0  ;;  %v852_v29 = vpop.f32.mrf.mxu1  ;;  %v11457_v22 = vld [vmem:[#allocation68_spill] sm:$0xff]  ;;  %v11460_v25 = vld [vmem:[#allocation71_spill] sm:$0xff] }
 0x21f   :  { %v856_v30 = vadd.f32 %v4125_v24, %v781_v28  ;;  %v870_v44 = vadd.f32 %v6756_v58, %v852_v29  ;;  %v11459_v24 = vld [vmem:[#allocation70_spill] sm:$0xff]  ;;  %v11464_v29 = vld [vmem:[#allocation75_spill] sm:$0xff] }
 0x220   :  { %v705_v31 = vadd.f32 %v704_v27, %v545_v26  ;;  %v4736_v32 = vpop.f32.mrf.mxu1  ;;  %v783_v35 = vpop.f32.mrf.mxu0  ;;  %v11461_v26 = vld [vmem:[#allocation72_spill] sm:$0xff]  ;;  %v11462_v27 = vld [vmem:[#allocation73_spill] sm:$0xff]  ;;  %v11463_v28 = vld [vmem:[#allocation74_spill] sm:$0xff] }
 0x221   :  { %v4128_v33 = vmul.f32 -1.442695, %v856_v30  ;;  %v857_v36 = vadd.f32 %v4126_v34, %v783_v35  ;;  %v11465_v30 = vld [vmem:[#allocation76_spill] sm:$0xff]  ;;  %v11467_v32 = vld [vmem:[#allocation78_spill] sm:$0xff]  ;;  %v11468_v34 = vld [vmem:[#allocation79_spill] sm:$0xff] }
 0x222   :  { %v11469_v35 = vld [vmem:[#allocation80_spill] sm:$0xff] }
 0x223   :  { %5488 = vpow2.f32 %v4128_v33  ;;  %v4129_v37 = vmul.f32 -1.442695, %v857_v36  ;;  %v11470_v36 = vld [vmem:[#allocation81_spill] sm:$0xff] }
 0x225   :  { %5490 = vpow2.f32 %v4129_v37 }
 0x230   :  { %v5489_v38 = vpop.eup %5488 }
 0x231   :  { %v864_v39 = vadd.f32 1.0, %v5489_v38  ;;  %v11471_v38 = vld [vmem:[#allocation82_spill] sm:$0xff] }
 0x232   :  { %v5491_v40 = vpop.eup %5490 }
 0x233   :  { %5492 = vrcp.f32 %v864_v39  ;;  %v865_v42 = vadd.f32 1.0, %v5491_v40  ;;  %v11472_v39 = vld [vmem:[#allocation83_spill] sm:$0xff]  ;;  %v11473_v40 = vld [vmem:[#allocation84_spill] sm:$0xff] }
 0x235   :  { %5494 = vrcp.f32 %v865_v42  ;;  %v11474_v42 = vld [vmem:[#allocation85_spill] sm:$0xff] }
 0x240   :  { %v5493_v45 = vpop.eup %5492 }
 0x241   :  { %v871_v47 = vmul.f32 %v5493_v45, %v870_v44  ;;  %v11475_v44 = vld [vmem:[#allocation86_spill] sm:$0xff] }
 0x242   :  { %v5495_v4 = vpop.eup %5494 }
 0x243   :  { %v872_v0 = vadd.f32 %v4127_v46, %v871_v47  ;;  %v874_v5 = vsub.f32 1.0, %v5495_v4  ;;  %v876_v58 = vmul.f32 %v5495_v4, %v6762_v49  ;;  %v7349_v47 = vld [vmem:[%s10942_s1 + $0x140] sm:$0xff]  ;;  %v7381_v4 = vld [vmem:[%s10942_s1 + $0x130] sm:$0xff] }
 0x245   :  { %5496 = vtanh.f32 %v872_v0  ;;  %v7362_v0 = vld [vmem:[%s10942_s1 + $0x148] sm:$0xff] }
 0x246   :  { %5498 = vpow2.f32 %v4124_v2  ;;  %v7375_v2 = vld [vmem:[%s10942_s1 + $0x120] sm:$0xff] }
 0x252   :  { %v5497_v6 = vpop.eup %5496 }
 0x253   :  { %v875_v7 = vmul.f32 %v5497_v6, %v874_v5  ;;  %v5499_v10 = vpop.eup %5498  ;;  %v7387_v5 = vld [vmem:[%s10942_s1 + $0x110] sm:$0xff]  ;;  %v7394_v6 = vld [vmem:[%s10942_s1 + $0x108] sm:$0xff] }
 0x254   :  { %v698_v49 = vadd.f32 1.0, %v5499_v10  ;;  %v7413_v10 = vld [vmem:[%s10942_s1 + $0xf0] sm:$0xff] }
 0x255   :  { %v7235_v8 = vadd.f32 %v876_v58, %v875_v7  ;;  %v7400_v7 = vld [vmem:[%s10942_s1 + $0x118] sm:$0xff] }
 0x256   :  { %5500 = vrcp.f32 %v698_v49  ;;  %v7406_v58 = vld [vmem:[%s10942_s1 + $0xf8] sm:$0xff]  ;;  %v7419_v49 = vld [vmem:[%s10942_s1 + $0x100] sm:$0xff] }
 0x257   :  { %943 = vmatmul.mubr.f32.vlgmr.msra.gmra.mxu0 %v7235_v8  ;;  %4770 = vmatmul.mubr.f32.vlgmr.msra.gmra.mxu1 %v7235_v8  ;;  %5502 = vtanh.f32 %v705_v31  ;;  %v11466_v31 = vld [vmem:[#allocation77_spill] sm:$0xff] }
 0x258   :  { %1020 = vmatpush1.msra.mxu0 %v6767_v51  ;;  %4773 = vmatpush3.msra.mxu1 %v6772_v54  ;;  %v11444_v51 = vld [vmem:[#allocation55_spill] sm:$0xff]  ;;  %v11445_v54 = vld [vmem:[#allocation56_spill] sm:$0xff] }
 0x259   :  { %1021 = vmatprep.subr.mxu0 %v6777_v50  ;;  %4774 = vmatprep.subr.mxu1 %v11335_v62  ;;  %v11446_v50 = vld [vmem:[#allocation57_spill] sm:$0xff] }
 0x25a   :  { %1022 = vmatpush1.msra.mxu0 %v6784_v59  ;;  %4775 = vmatpush3.msra.mxu1 %v6789_v60  ;;  %v11447_v59 = vld [vmem:[#allocation58_spill] sm:$0xff]  ;;  %v11448_v60 = vld [vmem:[#allocation59_spill] sm:$0xff] }
 0x25b   :  { %1023 = vmatprep.subr.mxu0 %v6796_v55  ;;  %4776 = vmatprep.subr.mxu1 %v11335_v62  ;;  %v11449_v55 = vld [vmem:[#allocation60_spill] sm:$0xff] }
 0x25c   :  { %1024 = vmatpush1.msra.mxu0 %v11442_v11  ;;  %4777 = vmatpush3.msra.mxu1 %v11443_v12  ;;  %v7425_v11 = vld [vmem:[%s10942_s1 + $0xe0] sm:$0xff]  ;;  %v7432_v12 = vld [vmem:[%s10942_s1 + $0xd8] sm:$0xff] }
 0x25d   :  { %1025 = vmatprep.subr.mxu0 %v11444_v51  ;;  %4778 = vmatprep.subr.mxu1 %v11335_v62  ;;  %v7438_v51 = vld [vmem:[%s10942_s1 + $0xe8] sm:$0xff] }
 0x25e   :  { %1026 = vmatpush1.msra.mxu0 %v11445_v54  ;;  %4779 = vmatpush3.msra.mxu1 %v11446_v50  ;;  %v7444_v54 = vld [vmem:[%s10942_s1 + $0xc8] sm:$0xff]  ;;  %v7451_v50 = vld [vmem:[%s10942_s1 + $0xc0] sm:$0xff] }
 0x25f   :  { %1027 = vmatprep.subr.mxu0 %v11447_v59  ;;  %4780 = vmatprep.subr.mxu1 %v11335_v62  ;;  %v7457_v59 = vld [vmem:[%s10942_s1 + $0xd0] sm:$0xff] }
 0x260   :  { %1028 = vmatpush1.msra.mxu0 %v11448_v60  ;;  %4781 = vmatpush3.msra.mxu1 %v11449_v55  ;;  %v7463_v60 = vld [vmem:[%s10942_s1 + $0xb0] sm:$0xff]  ;;  %v7470_v55 = vld [vmem:[%s10942_s1 + $0xa8] sm:$0xff] }
 0x261   :  { %1029 = vmatprep.subr.mxu0 %v11450_v13  ;;  %4782 = vmatprep.subr.mxu1 %v11335_v62  ;;  %v7476_v13 = vld [vmem:[%s10942_s1 + $0xb8] sm:$0xff] }
 0x262   :  { %1030 = vmatpush1.msra.mxu0 %v11451_v14  ;;  %4783 = vmatpush3.msra.mxu1 %v11452_v15  ;;  %v7482_v14 = vld [vmem:[%s10942_s1 + $0x98] sm:$0xff]  ;;  %v7489_v15 = vld [vmem:[%s10942_s1 + $0x90] sm:$0xff] }
 0x263   :  { %1031 = vmatprep.subr.mxu0 %v11453_v16  ;;  %4784 = vmatprep.subr.mxu1 %v11335_v62  ;;  %v5501_v33 = vpop.eup %5500  ;;  %v7495_v16 = vld [vmem:[%s10942_s1 + $0xa0] sm:$0xff] }
 0x264   :  { %1032 = vmatpush1.msra.mxu0 %v11454_v17  ;;  %4785 = vmatpush3.msra.mxu1 %v11455_v18  ;;  %v5503_v37 = vpop.eup %5502  ;;  %v707_v41 = vsub.f32 1.0, %v5501_v33  ;;  %v709_v46 = vmul.f32 0.0, %v5501_v33  ;;  %v7501_v17 = vld [vmem:[%s10942_s1 + $0x80] sm:$0xff]  ;;  %v7508_v18 = vld [vmem:[%s10942_s1 + $0x78] sm:$0xff]  ;;  %v7590_v33 = vld [vmem:[%s10942_s1 + $0x28] sm:$0xff] }
 0x265   :  { %1033 = vmatprep.subr.mxu0 %v11456_v19  ;;  %4786 = vmatprep.subr.mxu1 %v11335_v62  ;;  %v7514_v19 = vld [vmem:[%s10942_s1 + $0x88] sm:$0xff]  ;;  %11482 = vst [vmem:[#allocation12_spill] sm:$0xff] %v7590_v33 }
 0x266   :  { %1034 = vmatpush1.msra.mxu0 %v11457_v22  ;;  %4787 = vmatpush3.msra.mxu1 %v11458_v23  ;;  %v708_v45 = vmul.f32 %v5503_v37, %v707_v41  ;;  %v7520_v22 = vld [vmem:[%s10942_s1 + $0x68] sm:$0xff]  ;;  %v7527_v23 = vld [vmem:[%s10942_s1 + $0x60] sm:$0xff]  ;;  %v7620_v37 = vld [vmem:[%s10943_s3 + $0x170] sm:$0xff] }
 0x267   :  { %1035 = vmatprep.subr.mxu0 %v11459_v24  ;;  %4788 = vmatprep.subr.mxu1 %v11335_v62  ;;  %v7533_v24 = vld [vmem:[%s10942_s1 + $0x70] sm:$0xff]  ;;  %11486 = vst [vmem:[#allocation15_spill] sm:$0xff] %v7620_v37 }
 0x268   :  { %1036 = vmatpush1.msra.mxu0 %v11460_v25  ;;  %4789 = vmatpush3.msra.mxu1 %v11461_v26  ;;  %v7539_v25 = vld [vmem:[%s10942_s1 + $0x50] sm:$0xff]  ;;  %v7546_v26 = vld [vmem:[%s10942_s1 + $0x48] sm:$0xff] }
 0x269   :  { %1037 = vmatprep.subr.mxu0 %v11462_v27  ;;  %4790 = vmatprep.subr.mxu1 %v11335_v62  ;;  %v7552_v27 = vld [vmem:[%s10942_s1 + $0x58] sm:$0xff]  ;;  %v7646_v41 = vld [vmem:[%s10943_s3 + $0x150] sm:$0xff] }
 0x26a   :  { %1038 = vmatpush1.msra.mxu0 %v11463_v28  ;;  %4791 = vmatpush3.msra.mxu1 %v11464_v29  ;;  %11476 = vst [vmem:[#allocation5_spill] sm:$0xff] %v7552_v27  ;;  %v7558_v28 = vld [vmem:[%s10942_s1 + $0x38] sm:$0xff]  ;;  %v7565_v29 = vld [vmem:[%s10942_s1 + $0x30] sm:$0xff]  ;;  %11490 = vst [vmem:[#allocation19_spill] sm:$0xff] %v7646_v41 }
 0x26b   :  { %1039 = vmatprep.subr.mxu0 %v11465_v30  ;;  %4792 = vmatprep.subr.mxu1 %v11335_v62  ;;  %11477 = vst [vmem:[#allocation6_spill] sm:$0xff] %v7558_v28  ;;  %11478 = vst [vmem:[#allocation7_spill] sm:$0xff] %v7565_v29  ;;  %v7571_v30 = vld [vmem:[%s10942_s1 + $0x40] sm:$0xff] }
 0x26c   :  { %1040 = vmatpush1.msra.mxu0 %v11466_v31  ;;  %4793 = vmatpush3.msra.mxu1 %v11467_v32  ;;  %11479 = vst [vmem:[#allocation8_spill] sm:$0xff] %v7571_v30  ;;  %v7577_v31 = vld [vmem:[%s10942_s1 + $0x20] sm:$0xff]  ;;  %v7584_v32 = vld [vmem:[%s10942_s1 + $0x18] sm:$0xff] }
 0x26d   :  { %1041 = vmatprep.subr.mxu0 %v11468_v34  ;;  %4794 = vmatprep.subr.mxu1 %v11335_v62  ;;  %11480 = vst [vmem:[#allocation9_spill] sm:$0xff] %v7577_v31  ;;  %11481 = vst [vmem:[#allocation10_spill] sm:$0xff] %v7584_v32  ;;  %v7596_v34 = vld [vmem:[%s10942_s1 + $0x8] sm:$0xff] }
 0x26e   :  { %1042 = vmatpush1.msra.mxu0 %v11469_v35  ;;  %4795 = vmatpush3.msra.mxu1 %v11470_v36  ;;  %11483 = vst [vmem:[#allocation11_spill] sm:$0xff] %v7596_v34  ;;  %v7603_v35 = vld [vmem:[%s10942_s1] sm:$0xff]  ;;  %v7610_v36 = vld [vmem:[%s10942_s1 + $0x10] sm:$0xff] }
 0x26f   :  { %1043 = vmatprep.subr.mxu0 %v11471_v38  ;;  %4796 = vmatprep.subr.mxu1 %v11335_v62  ;;  %11484 = vst [vmem:[#allocation13_spill] sm:$0xff] %v7603_v35  ;;  %11485 = vst [vmem:[#allocation14_spill] sm:$0xff] %v7610_v36  ;;  %v7627_v38 = vld [vmem:[%s10943_s3 + $0x168] sm:$0xff] }
 0x270   :  { %1044 = vmatpush1.msra.mxu0 %v11472_v39  ;;  %4797 = vmatpush3.msra.mxu1 %v11473_v40  ;;  %11487 = vst [vmem:[#allocation16_spill] sm:$0xff] %v7627_v38  ;;  %v7633_v39 = vld [vmem:[%s10943_s3 + $0x178] sm:$0xff] }
 0x271   :  { %1045 = vmatprep.subr.mxu0 %v11474_v42  ;;  %4798 = vmatprep.subr.mxu1 %v11335_v62  ;;  %11488 = vst [vmem:[#allocation17_spill] sm:$0xff] %v7633_v39  ;;  %v7639_v40 = vld [vmem:[%s10943_s3 + $0x158] sm:$0xff]  ;;  %v7652_v42 = vld [vmem:[%s10943_s3 + $0x160] sm:$0xff] }
 0x272   :  { %1046 = vmatpush1.msra.mxu0 %v7012_v52  ;;  %4799 = vmatpush3.msra.mxu1 %v11475_v44  ;;  %v7301_v52 = vadd.f32 %v709_v46, %v708_v45  ;;  %11489 = vst [vmem:[#allocation18_spill] sm:$0xff] %v7639_v40  ;;  %11491 = vst [vmem:[#allocation20_spill] sm:$0xff] %v7652_v42  ;;  %v7658_v44 = vld [vmem:[%s10943_s3 + $0x140] sm:$0xff]  ;;  %v7665_v45 = vld [vmem:[%s10943_s3 + $0x138] sm:$0xff] }
 0x273   :  { %1047 = vmatprep.subr.mxu0 %v7024_v61  ;;  %4800 = vmatprep.subr.mxu1 %v11335_v62  ;;  %v7337_v61 = vld [vmem:[%s10942_s1 + $0x150] sm:$0xff]  ;;  %11492 = vst [vmem:[#allocation21_spill] sm:$0xff] %v7658_v44  ;;  %11493 = vst [vmem:[#allocation22_spill] sm:$0xff] %v7665_v45  ;;  %v7671_v46 = vld [vmem:[%s10943_s3 + $0x148] sm:$0xff] }
 0x274   :  { %1048 = vmatpush1.msra.mxu0 %v7031_v63  ;;  %4801 = vmatpush3.msra.mxu1 %v7036_v53  ;;  %v7311_v53 = vld [vmem:[%s10942_s1 + $0x170] sm:$0xff]  ;;  %v7343_v63 = vld [vmem:[%s10942_s1 + $0x160] sm:$0xff]  ;;  %11494 = vst [vmem:[#allocation23_spill] sm:$0xff] %v7671_v46 }
 0x275   :  { %1049 = vmatprep.subr.mxu0 %v7043_v56  ;;  %4802 = vmatprep.subr.mxu1 %v11335_v62  ;;  %v7324_v56 = vld [vmem:[%s10942_s1 + $0x178] sm:$0xff] }
 0x276   :  { %1050 = vmatpush1.msra.mxu0 %v7050_v3  ;;  %1083 = vmatprep.mubr.f32.mxu0 %v11335_v62  ;;  %v7318_v3 = vld [vmem:[%s10942_s1 + $0x168] sm:$0xff] }
 0x277   :  { %4803 = vmatpush3.msra.mxu1 %v7057_v57  ;;  %4804 = vmatprep.mubr.msk.f32.mxu1 %vm6073_vm0, %v11335_v62  ;;  %v7330_v57 = vld [vmem:[%s10942_s1 + $0x158] sm:$0xff] }
 0x278   :  { %1084 = vmatmul.mubr.f32.vlgmr.msra.gmra.mxu0 %v7301_v52  ;;  %4805 = vmatmul.mubr.f32.vlgmr.msra.gmra.mxu1 %v7301_v52 }
 0x279   :  { %1186 = vmatprep.subr.mxu0 %v7311_v53  ;;  %4807 = vmatprep.subr.mxu1 %v11335_v62 }
 0x27a   :  { %1187 = vmatpush1.msra.mxu0 %v7318_v3  ;;  %4808 = vmatpush3.msra.mxu1 %v7324_v56 }
 0x27b   :  { %1188 = vmatprep.subr.mxu0 %v7330_v57  ;;  %4809 = vmatprep.subr.mxu1 %v11335_v62 }
 0x27c   :  { %1189 = vmatpush1.msra.mxu0 %v7337_v61  ;;  %4810 = vmatpush3.msra.mxu1 %v7343_v63 }
 0x27d   :  { %1190 = vmatprep.subr.mxu0 %v7349_v47  ;;  %4811 = vmatprep.subr.mxu1 %v11335_v62 }
 0x27e   :  { %1191 = vmatpush1.msra.mxu0 %v7356_v48  ;;  %4812 = vmatpush3.msra.mxu1 %v7362_v0 }
 0x27f   :  { %1192 = vmatprep.subr.mxu0 %v7368_v1  ;;  %4813 = vmatprep.subr.mxu1 %v11335_v62 }
 0x280   :  { %1193 = vmatpush1.msra.mxu0 %v7375_v2  ;;  %4814 = vmatpush3.msra.mxu1 %v7381_v4 }
 0x281   :  { %1194 = vmatprep.subr.mxu0 %v7387_v5  ;;  %4815 = vmatprep.subr.mxu1 %v11335_v62 }
 0x282   :  { %1195 = vmatpush1.msra.mxu0 %v7394_v6  ;;  %4816 = vmatpush3.msra.mxu1 %v7400_v7 }
 0x283   :  { %1196 = vmatprep.subr.mxu0 %v7406_v58  ;;  %4817 = vmatprep.subr.mxu1 %v11335_v62 }
 0x284   :  { %1197 = vmatpush1.msra.mxu0 %v7413_v10  ;;  %4818 = vmatpush3.msra.mxu1 %v7419_v49 }
 0x285   :  { %1198 = vmatprep.subr.mxu0 %v7425_v11  ;;  %4819 = vmatprep.subr.mxu1 %v11335_v62 }
 0x286   :  { %1199 = vmatpush1.msra.mxu0 %v7432_v12  ;;  %4820 = vmatpush3.msra.mxu1 %v7438_v51 }
 0x287   :  { %1200 = vmatprep.subr.mxu0 %v7444_v54  ;;  %4821 = vmatprep.subr.mxu1 %v11335_v62 }
 0x288   :  { %1201 = vmatpush1.msra.mxu0 %v7451_v50  ;;  %4822 = vmatpush3.msra.mxu1 %v7457_v59 }
 0x289   :  { %1202 = vmatprep.subr.mxu0 %v7463_v60  ;;  %4823 = vmatprep.subr.mxu1 %v11335_v62 }
 0x28a   :  { %1203 = vmatpush1.msra.mxu0 %v7470_v55  ;;  %4824 = vmatpush3.msra.mxu1 %v7476_v13 }
 0x28b   :  { %1204 = vmatprep.subr.mxu0 %v7482_v14  ;;  %4825 = vmatprep.subr.mxu1 %v11335_v62 }
 0x28c   :  { %1205 = vmatpush1.msra.mxu0 %v7489_v15  ;;  %4826 = vmatpush3.msra.mxu1 %v7495_v16 }
 0x28d   :  { %1206 = vmatprep.subr.mxu0 %v7501_v17  ;;  %4827 = vmatprep.subr.mxu1 %v11335_v62 }
 0x28e   :  { %1207 = vmatpush1.msra.mxu0 %v7508_v18  ;;  %4828 = vmatpush3.msra.mxu1 %v7514_v19 }
 0x28f   :  { %1208 = vmatprep.subr.mxu0 %v7520_v22  ;;  %4829 = vmatprep.subr.mxu1 %v11335_v62 }
 0x290   :  { %1209 = vmatpush1.msra.mxu0 %v7527_v23  ;;  %4830 = vmatpush3.msra.mxu1 %v7533_v24 }
 0x291   :  { %1210 = vmatprep.subr.mxu0 %v7539_v25  ;;  %4831 = vmatprep.subr.mxu1 %v11335_v62 }
 0x292   :  { %1211 = vmatpush1.msra.mxu0 %v7546_v26  ;;  %4832 = vmatpush3.msra.mxu1 %v7552_v27 }
 0x293   :  { %1212 = vmatprep.subr.mxu0 %v7558_v28  ;;  %4833 = vmatprep.subr.mxu1 %v11335_v62 }
 0x294   :  { %1213 = vmatpush1.msra.mxu0 %v7565_v29  ;;  %4834 = vmatpush3.msra.mxu1 %v7571_v30 }
 0x295   :  { %1214 = vmatprep.subr.mxu0 %v7577_v31  ;;  %4835 = vmatprep.subr.mxu1 %v11335_v62 }
 0x296   :  { %1215 = vmatpush1.msra.mxu0 %v7584_v32  ;;  %4836 = vmatpush3.msra.mxu1 %v7590_v33 }
 0x297   :  { %1216 = vmatprep.subr.mxu0 %v7596_v34  ;;  %4837 = vmatprep.subr.mxu1 %v11335_v62 }
 0x298   :  { %1217 = vmatpush1.msra.mxu0 %v7603_v35  ;;  %1250 = vmatprep.mubr.f32.mxu0 %v11335_v62 }
 0x299   :  { %4838 = vmatpush3.msra.mxu1 %v7610_v36  ;;  %4839 = vmatprep.mubr.msk.f32.mxu1 %vm6073_vm0, %v11335_v62 }
 0x29a   :  { %1251 = vmatmul.mubr.f32.vlgmr.msra.gmra.mxu0 %v7235_v8  ;;  %4840 = vmatmul.mubr.f32.vlgmr.msra.gmra.mxu1 %v7235_v8 }
 0x29b   :  { %1349 = vmatprep.subr.mxu0 %v7620_v37  ;;  %4842 = vmatprep.subr.mxu1 %v11335_v62 }
 0x29c   :  { %1350 = vmatpush1.msra.mxu0 %v7627_v38  ;;  %4843 = vmatpush3.msra.mxu1 %v7633_v39 }
 0x29d   :  { %1351 = vmatprep.subr.mxu0 %v7639_v40  ;;  %4844 = vmatprep.subr.mxu1 %v11335_v62 }
 0x29e   :  { %1352 = vmatpush1.msra.mxu0 %v7646_v41  ;;  %4845 = vmatpush3.msra.mxu1 %v7652_v42 }
 0x29f   :  { %1353 = vmatprep.subr.mxu0 %v7658_v44  ;;  %4846 = vmatprep.subr.mxu1 %v11335_v62  ;;  %v7677_v44 = vld [vmem:[%s10943_s3 + $0x128] sm:$0xff] }
 0x2a0   :  { %1354 = vmatpush1.msra.mxu0 %v7665_v45  ;;  %4847 = vmatpush3.msra.mxu1 %v7671_v46  ;;  %11495 = vst [vmem:[#allocation24_spill] sm:$0xff] %v7677_v44  ;;  %v7684_v45 = vld [vmem:[%s10943_s3 + $0x120] sm:$0xff]  ;;  %v7690_v46 = vld [vmem:[%s10943_s3 + $0x130] sm:$0xff] }
 0x2a1   :  { %1355 = vmatprep.subr.mxu0 %v7677_v44  ;;  %4848 = vmatprep.subr.mxu1 %v11335_v62  ;;  %11496 = vst [vmem:[#allocation25_spill] sm:$0xff] %v7684_v45  ;;  %11497 = vst [vmem:[#allocation26_spill] sm:$0xff] %v7690_v46  ;;  %v7696_v44 = vld [vmem:[%s10943_s3 + $0x110] sm:$0xff] }
 0x2a2   :  { %1356 = vmatpush1.msra.mxu0 %v7684_v45  ;;  %4849 = vmatpush3.msra.mxu1 %v7690_v46  ;;  %11498 = vst [vmem:[#allocation27_spill] sm:$0xff] %v7696_v44  ;;  %v7703_v45 = vld [vmem:[%s10943_s3 + $0x108] sm:$0xff]  ;;  %v7709_v46 = vld [vmem:[%s10943_s3 + $0x118] sm:$0xff] }
 0x2a3   :  { %1357 = vmatprep.subr.mxu0 %v7696_v44  ;;  %4850 = vmatprep.subr.mxu1 %v11335_v62  ;;  %11499 = vst [vmem:[#allocation28_spill] sm:$0xff] %v7703_v45  ;;  %11500 = vst [vmem:[#allocation29_spill] sm:$0xff] %v7709_v46  ;;  %v7715_v44 = vld [vmem:[%s10943_s3 + $0xf8] sm:$0xff] }
 0x2a4   :  { %1358 = vmatpush1.msra.mxu0 %v7703_v45  ;;  %4851 = vmatpush3.msra.mxu1 %v7709_v46  ;;  %11501 = vst [vmem:[#allocation30_spill] sm:$0xff] %v7715_v44  ;;  %v7722_v45 = vld [vmem:[%s10943_s3 + $0xf0] sm:$0xff]  ;;  %v7728_v46 = vld [vmem:[%s10943_s3 + $0x100] sm:$0xff] }
 0x2a5   :  { %1359 = vmatprep.subr.mxu0 %v7715_v44  ;;  %4852 = vmatprep.subr.mxu1 %v11335_v62  ;;  %11502 = vst [vmem:[#allocation31_spill] sm:$0xff] %v7722_v45  ;;  %11503 = vst [vmem:[#allocation32_spill] sm:$0xff] %v7728_v46  ;;  %v7734_v44 = vld [vmem:[%s10943_s3 + $0xe0] sm:$0xff] }
 0x2a6   :  { %1360 = vmatpush1.msra.mxu0 %v7722_v45  ;;  %4853 = vmatpush3.msra.mxu1 %v7728_v46  ;;  %11504 = vst [vmem:[#allocation33_spill] sm:$0xff] %v7734_v44  ;;  %v7741_v45 = vld [vmem:[%s10943_s3 + $0xd8] sm:$0xff]  ;;  %v7747_v46 = vld [vmem:[%s10943_s3 + $0xe8] sm:$0xff] }
 0x2a7   :  { %1361 = vmatprep.subr.mxu0 %v7734_v44  ;;  %4854 = vmatprep.subr.mxu1 %v11335_v62  ;;  %11505 = vst [vmem:[#allocation34_spill] sm:$0xff] %v7741_v45  ;;  %11506 = vst [vmem:[#allocation35_spill] sm:$0xff] %v7747_v46  ;;  %v7753_v44 = vld [vmem:[%s10943_s3 + $0xc8] sm:$0xff] }
 0x2a8   :  { %1362 = vmatpush1.msra.mxu0 %v7741_v45  ;;  %4855 = vmatpush3.msra.mxu1 %v7747_v46  ;;  %11507 = vst [vmem:[#allocation36_spill] sm:$0xff] %v7753_v44  ;;  %v7760_v45 = vld [vmem:[%s10943_s3 + $0xc0] sm:$0xff]  ;;  %v7766_v46 = vld [vmem:[%s10943_s3 + $0xd0] sm:$0xff] }
 0x2a9   :  { %1363 = vmatprep.subr.mxu0 %v7753_v44  ;;  %4856 = vmatprep.subr.mxu1 %v11335_v62  ;;  %11508 = vst [vmem:[#allocation37_spill] sm:$0xff] %v7760_v45  ;;  %11509 = vst [vmem:[#allocation38_spill] sm:$0xff] %v7766_v46  ;;  %v7772_v44 = vld [vmem:[%s10943_s3 + $0xb0] sm:$0xff] }
 0x2aa   :  { %1364 = vmatpush1.msra.mxu0 %v7760_v45  ;;  %4857 = vmatpush3.msra.mxu1 %v7766_v46  ;;  %11510 = vst [vmem:[#allocation39_spill] sm:$0xff] %v7772_v44  ;;  %v7779_v45 = vld [vmem:[%s10943_s3 + $0xa8] sm:$0xff]  ;;  %v7785_v46 = vld [vmem:[%s10943_s3 + $0xb8] sm:$0xff] }
 0x2ab   :  { %1365 = vmatprep.subr.mxu0 %v7772_v44  ;;  %4858 = vmatprep.subr.mxu1 %v11335_v62  ;;  %11511 = vst [vmem:[#allocation40_spill] sm:$0xff] %v7779_v45  ;;  %11512 = vst [vmem:[#allocation41_spill] sm:$0xff] %v7785_v46  ;;  %v7791_v44 = vld [vmem:[%s10943_s3 + $0x98] sm:$0xff] }
 0x2ac   :  { %1366 = vmatpush1.msra.mxu0 %v7779_v45  ;;  %4859 = vmatpush3.msra.mxu1 %v7785_v46  ;;  %11513 = vst [vmem:[#allocation42_spill] sm:$0xff] %v7791_v44  ;;  %v7798_v45 = vld [vmem:[%s10943_s3 + $0x90] sm:$0xff]  ;;  %v7804_v46 = vld [vmem:[%s10943_s3 + $0xa0] sm:$0xff] }
 0x2ad   :  { %1367 = vmatprep.subr.mxu0 %v7791_v44  ;;  %4860 = vmatprep.subr.mxu1 %v11335_v62  ;;  %11514 = vst [vmem:[#allocation43_spill] sm:$0xff] %v7798_v45  ;;  %11515 = vst [vmem:[#allocation44_spill] sm:$0xff] %v7804_v46  ;;  %v7810_v44 = vld [vmem:[%s10943_s3 + $0x80] sm:$0xff] }
 0x2ae   :  { %1368 = vmatpush1.msra.mxu0 %v7798_v45  ;;  %4861 = vmatpush3.msra.mxu1 %v7804_v46  ;;  %11516 = vst [vmem:[#allocation45_spill] sm:$0xff] %v7810_v44  ;;  %v7817_v45 = vld [vmem:[%s10943_s3 + $0x78] sm:$0xff]  ;;  %v7823_v46 = vld [vmem:[%s10943_s3 + $0x88] sm:$0xff] }
 0x2af   :  { %1369 = vmatprep.subr.mxu0 %v7810_v44  ;;  %4862 = vmatprep.subr.mxu1 %v11335_v62  ;;  %11517 = vst [vmem:[#allocation46_spill] sm:$0xff] %v7817_v45  ;;  %11518 = vst [vmem:[#allocation47_spill] sm:$0xff] %v7823_v46  ;;  %v7829_v44 = vld [vmem:[%s10943_s3 + $0x68] sm:$0xff] }
 0x2b0   :  { %1370 = vmatpush1.msra.mxu0 %v7817_v45  ;;  %4863 = vmatpush3.msra.mxu1 %v7823_v46  ;;  %11519 = vst [vmem:[#allocation48_spill] sm:$0xff] %v7829_v44  ;;  %v7836_v45 = vld [vmem:[%s10943_s3 + $0x60] sm:$0xff]  ;;  %v7842_v46 = vld [vmem:[%s10943_s3 + $0x70] sm:$0xff] }
 0x2b1   :  { %1371 = vmatprep.subr.mxu0 %v7829_v44  ;;  %4864 = vmatprep.subr.mxu1 %v11335_v62  ;;  %11520 = vst [vmem:[#allocation49_spill] sm:$0xff] %v7836_v45  ;;  %11521 = vst [vmem:[#allocation50_spill] sm:$0xff] %v7842_v46  ;;  %v7848_v44 = vld [vmem:[%s10943_s3 + $0x50] sm:$0xff] }
 0x2b2   :  { %1372 = vmatpush1.msra.mxu0 %v7836_v45  ;;  %4865 = vmatpush3.msra.mxu1 %v7842_v46  ;;  %11522 = vst [vmem:[#allocation51_spill] sm:$0xff] %v7848_v44  ;;  %v7855_v45 = vld [vmem:[%s10943_s3 + $0x48] sm:$0xff]  ;;  %v7861_v46 = vld [vmem:[%s10943_s3 + $0x58] sm:$0xff] }
 0x2b3   :  { %1373 = vmatprep.subr.mxu0 %v7848_v44  ;;  %4866 = vmatprep.subr.mxu1 %v11335_v62  ;;  %11523 = vst [vmem:[#allocation52_spill] sm:$0xff] %v7855_v45  ;;  %11524 = vst [vmem:[#allocation53_spill] sm:$0xff] %v7861_v46  ;;  %v7867_v44 = vld [vmem:[%s10943_s3 + $0x38] sm:$0xff] }
 0x2b4   :  { %1374 = vmatpush1.msra.mxu0 %v7855_v45  ;;  %4867 = vmatpush3.msra.mxu1 %v7861_v46  ;;  %11525 = vst [vmem:[#allocation54_spill] sm:$0xff] %v7867_v44  ;;  %v7874_v45 = vld [vmem:[%s10943_s3 + $0x30] sm:$0xff]  ;;  %v7880_v46 = vld [vmem:[%s10943_s3 + $0x40] sm:$0xff] }
 0x2b5   :  { %1375 = vmatprep.subr.mxu0 %v7867_v44  ;;  %4868 = vmatprep.subr.mxu1 %v11335_v62  ;;  %11526 = vst [vmem:[#allocation55_spill] sm:$0xff] %v7874_v45  ;;  %11527 = vst [vmem:[#allocation56_spill] sm:$0xff] %v7880_v46  ;;  %v7886_v44 = vld [vmem:[%s10943_s3 + $0x20] sm:$0xff] }
 0x2b6   :  { %1376 = vmatpush1.msra.mxu0 %v7874_v45  ;;  %4869 = vmatpush3.msra.mxu1 %v7880_v46  ;;  %11528 = vst [vmem:[#allocation57_spill] sm:$0xff] %v7886_v44  ;;  %v7893_v45 = vld [vmem:[%s10943_s3 + $0x18] sm:$0xff]  ;;  %v7899_v46 = vld [vmem:[%s10943_s3 + $0x28] sm:$0xff] }
 0x2b7   :  { %1377 = vmatprep.subr.mxu0 %v7886_v44  ;;  %4870 = vmatprep.subr.mxu1 %v11335_v62  ;;  %11529 = vst [vmem:[#allocation58_spill] sm:$0xff] %v7893_v45  ;;  %11530 = vst [vmem:[#allocation59_spill] sm:$0xff] %v7899_v46  ;;  %v7905_v44 = vld [vmem:[%s10943_s3 + $0x8] sm:$0xff] }
 0x2b8   :  { %1378 = vmatpush1.msra.mxu0 %v7893_v45  ;;  %4871 = vmatpush3.msra.mxu1 %v7899_v46  ;;  %11531 = vst [vmem:[#allocation60_spill] sm:$0xff] %v7905_v44  ;;  %v7912_v45 = vld [vmem:[%s10943_s3] sm:$0xff]  ;;  %v7918_v46 = vld [vmem:[%s10943_s3 + $0x10] sm:$0xff] }
 0x2b9   :  { %1379 = vmatprep.subr.mxu0 %v7905_v44  ;;  %4872 = vmatprep.subr.mxu1 %v11335_v62  ;;  %11532 = vst [vmem:[#allocation61_spill] sm:$0xff] %v7912_v45  ;;  %11533 = vst [vmem:[#allocation62_spill] sm:$0xff] %v7918_v46  ;;  %v7927_v44 = vld [vmem:[%s10944_s4 + $0x170] sm:$0xff] }
 0x2ba   :  { %1380 = vmatpush1.msra.mxu0 %v7912_v45  ;;  %4873 = vmatpush3.msra.mxu1 %v7918_v46  ;;  %11534 = vst [vmem:[#allocation63_spill] sm:$0xff] %v7927_v44 }
 0x2bb   :  { %1413 = vmatprep.mubr.f32.mxu0 %v11335_v62  ;;  %4874 = vmatprep.mubr.msk.f32.mxu1 %vm6073_vm0, %v11335_v62 }
 0x2bc   :  { %1490 = vmatprep.subr.mxu0 %v7927_v44  ;;  %4877 = vmatprep.subr.mxu1 %v11335_v62  ;;  %v4132_v44 = vld [vmem:[%s10945_s0 + $0x78] sm:$0xff] }
 0x317   :  { %v1015_v45 = vpop.f32.mrf.mxu1  ;;  %v944_v41 = vpop.f32.mrf.mxu0 }
 0x318   :  { %v945_v46 = vadd.f32 %v944_v41, %v7209_v9  ;;  %v1016_v41 = vadd.f32 %v1015_v45, %v7217_v21 }
 0x319   :  { %v4771_v42 = vpop.f32.mrf.mxu1  ;;  %v946_v40 = vpop.f32.mrf.mxu0 }
 0x338   :  { %v1085_v39 = vpop.f32.mrf.mxu0  ;;  %v1156_v38 = vpop.f32.mrf.mxu1 }
 0x339   :  { %v1160_v37 = vadd.f32 %v1085_v39, %v945_v46  ;;  %v1174_v42 = vadd.f32 %v7215_v20, %v1156_v38 }
 0x33a   :  { %v4806_v36 = vpop.f32.mrf.mxu1  ;;  %v1087_v32 = vpop.f32.mrf.mxu0 }
 0x33b   :  { %v4130_v35 = vmul.f32 -1.442695, %v1160_v37 }
 0x33d   :  { %5504 = vpow2.f32 %v4130_v35 }
 0x34a   :  { %v5505_v34 = vpop.eup %5504 }
 0x34b   :  { %v1168_v33 = vadd.f32 1.0, %v5505_v34 }
 0x34d   :  { %5506 = vrcp.f32 %v1168_v33  ;;  %v4133_v33 = vld [vmem:[%s10945_s0 + $0x80] sm:$0xff] }
 0x35a   :  { %v5507_v31 = vpop.eup %5506  ;;  %v1252_v30 = vpop.f32.mrf.mxu0 }
 0x35b   :  { %v1323_v29 = vpop.f32.mrf.mxu1  ;;  %v1175_v9 = vmul.f32 %v5507_v31, %v1174_v42  ;;  %v1327_v39 = vadd.f32 %v4132_v44, %v1252_v30  ;;  %v4134_v44 = vld [vmem:[%s10945_s0 + $0x88] sm:$0xff] }
 0x35c   :  { %v1254_v34 = vpop.f32.mrf.mxu0 }
 0x35d   :  { %v4841_v36 = vpop.f32.mrf.mxu1  ;;  %v7937_v37 = vadd.f32 %v1175_v9, %v1016_v41  ;;  %v4135_v35 = vmul.f32 -1.442695, %v1327_v39  ;;  %v1328_v46 = vadd.f32 %v4133_v33, %v1254_v34  ;;  %v7945_v9 = vld [vmem:[%s10946_s2] ss:$0 sm:$0xff] }
 0x35e   :  { %v1341_v30 = vadd.f32 %v7945_v9, %v1323_v29 }
 0x35f   :  { %5508 = vpow2.f32 %v4135_v35  ;;  %v4136_v28 = vmul.f32 -1.442695, %v1328_v46 }
 0x361   :  { %5510 = vpow2.f32 %v4136_v28  ;;  %v947_v28 = vadd.f32 %v946_v40, %v7227_v43  ;;  %v7960_v40 = vld [vmem:[%s10944_s4 + $0x168] sm:$0xff] }
 0x363   :  { %v1161_v39 = vadd.f32 %v1087_v32, %v947_v28  ;;  %v7966_v32 = vld [vmem:[%s10944_s4 + $0x178] sm:$0xff]  ;;  %v8010_v28 = vld [vmem:[%s10944_s4 + $0x128] sm:$0xff] }
 0x36c   :  { %v5509_v20 = vpop.eup %5508 }
 0x36d   :  { %v1335_v38 = vadd.f32 1.0, %v5509_v20  ;;  %v7972_v20 = vld [vmem:[%s10944_s4 + $0x158] sm:$0xff] }
 0x36e   :  { %v5511_v27 = vpop.eup %5510 }
 0x36f   :  { %5512 = vrcp.f32 %v1335_v38  ;;  %v1336_v45 = vadd.f32 1.0, %v5511_v27  ;;  %v4131_v27 = vmul.f32 -1.442695, %v1161_v39  ;;  %v7979_v38 = vld [vmem:[%s10944_s4 + $0x150] sm:$0xff] }
 0x370   :  { %v8023_v39 = vld [vmem:[%s10944_s4 + $0x130] sm:$0xff] }
 0x371   :  { %5514 = vrcp.f32 %v1336_v45  ;;  %v7985_v45 = vld [vmem:[%s10944_s4 + $0x160] sm:$0xff] }
 0x37c   :  { %v5513_v31 = vpop.eup %5512 }
 0x37d   :  { %v1342_v42 = vmul.f32 %v5513_v31, %v1341_v30  ;;  %v7991_v30 = vld [vmem:[%s10944_s4 + $0x140] sm:$0xff] }
 0x37e   :  { %v5515_v36 = vpop.eup %5514 }
 0x37f   :  { %v1343_v41 = vadd.f32 %v4134_v44, %v1342_v42  ;;  %v1345_v35 = vsub.f32 1.0, %v5515_v36  ;;  %v1347_v29 = vmul.f32 %v5515_v36, %v7235_v8  ;;  %v7998_v44 = vld [vmem:[%s10944_s4 + $0x138] sm:$0xff]  ;;  %v8004_v42 = vld [vmem:[%s10944_s4 + $0x148] sm:$0xff] }
 0x380   :  { %v8036_v36 = vld [vmem:[%s10944_s4 + $0x108] sm:$0xff] }
 0x381   :  { %5516 = vtanh.f32 %v1343_v41  ;;  %v8017_v41 = vld [vmem:[%s10944_s4 + $0x120] sm:$0xff] }
 0x382   :  { %5518 = vpow2.f32 %v4131_v27  ;;  %v8029_v27 = vld [vmem:[%s10944_s4 + $0x110] sm:$0xff] }
 0x38e   :  { %v5517_v33 = vpop.eup %5516 }
 0x38f   :  { %v1346_v34 = vmul.f32 %v5517_v33, %v1345_v35  ;;  %v5519_v8 = vpop.eup %5518  ;;  %v8042_v35 = vld [vmem:[%s10944_s4 + $0x118] sm:$0xff] }
 0x390   :  { %v1169_v31 = vadd.f32 1.0, %v5519_v8  ;;  %11535 = vst [vmem:[#allocation64_spill] sm:$0xff] %v8042_v35  ;;  %v8048_v33 = vld [vmem:[%s10944_s4 + $0xf8] sm:$0xff]  ;;  %v8068_v8 = vld [vmem:[%s10944_s4 + $0xe0] sm:$0xff] }
 0x391   :  { %v7953_v46 = vadd.f32 %v1347_v29, %v1346_v34  ;;  %11536 = vst [vmem:[#allocation65_spill] sm:$0xff] %v8048_v33  ;;  %v8056_v34 = vld [vmem:[%s10944_s4 + $0xf0] sm:$0xff]  ;;  %v8062_v29 = vld [vmem:[%s10944_s4 + $0x100] sm:$0xff]  ;;  %11539 = vst [vmem:[#allocation68_spill] sm:$0xff] %v8068_v8 }
 0x392   :  { %5520 = vrcp.f32 %v1169_v31  ;;  %11537 = vst [vmem:[#allocation66_spill] sm:$0xff] %v8056_v34  ;;  %11538 = vst [vmem:[#allocation67_spill] sm:$0xff] %v8062_v29  ;;  %v8081_v31 = vld [vmem:[%s10944_s4 + $0xe8] sm:$0xff] }
 0x393   :  { %1414 = vmatmul.mubr.f32.vlgmr.msra.gmra.mxu0 %v7953_v46  ;;  %4875 = vmatmul.mubr.f32.vlgmr.msra.gmra.mxu1 %v7953_v46  ;;  %5522 = vtanh.f32 %v7937_v37  ;;  %v8075_v37 = vld [vmem:[%s10944_s4 + $0xd8] sm:$0xff]  ;;  %11541 = vst [vmem:[#allocation70_spill] sm:$0xff] %v8081_v31 }
 0x394   :  { %1491 = vmatpush1.msra.mxu0 %v7960_v40  ;;  %4878 = vmatpush3.msra.mxu1 %v7966_v32  ;;  %11540 = vst [vmem:[#allocation69_spill] sm:$0xff] %v8075_v37 }
 0x395   :  { %1492 = vmatprep.subr.mxu0 %v7972_v20  ;;  %4879 = vmatprep.subr.mxu1 %v11335_v62 }
 0x396   :  { %1493 = vmatpush1.msra.mxu0 %v7979_v38  ;;  %4880 = vmatpush3.msra.mxu1 %v7985_v45 }
 0x397   :  { %1494 = vmatprep.subr.mxu0 %v7991_v30  ;;  %4881 = vmatprep.subr.mxu1 %v11335_v62 }
 0x398   :  { %1495 = vmatpush1.msra.mxu0 %v7998_v44  ;;  %4882 = vmatpush3.msra.mxu1 %v8004_v42 }
 0x399   :  { %1496 = vmatprep.subr.mxu0 %v8010_v28  ;;  %4883 = vmatprep.subr.mxu1 %v11335_v62 }
 0x39a   :  { %1497 = vmatpush1.msra.mxu0 %v8017_v41  ;;  %4884 = vmatpush3.msra.mxu1 %v8023_v39 }
 0x39b   :  { %1498 = vmatprep.subr.mxu0 %v8029_v27  ;;  %4885 = vmatprep.subr.mxu1 %v11335_v62 }
 0x39c   :  { %1499 = vmatpush1.msra.mxu0 %v8036_v36  ;;  %4886 = vmatpush3.msra.mxu1 %v8042_v35 }
 0x39d   :  { %1500 = vmatprep.subr.mxu0 %v8048_v33  ;;  %4887 = vmatprep.subr.mxu1 %v11335_v62 }
 0x39e   :  { %1501 = vmatpush1.msra.mxu0 %v8056_v34  ;;  %4888 = vmatpush3.msra.mxu1 %v8062_v29 }
 0x39f   :  { %1502 = vmatprep.subr.mxu0 %v8068_v8  ;;  %4889 = vmatprep.subr.mxu1 %v11335_v62  ;;  %v8087_v8 = vld [vmem:[%s10944_s4 + $0xc8] sm:$0xff]  ;;  %v5521_v29 = vpop.eup %5520 }
 0x3a0   :  { %1503 = vmatpush1.msra.mxu0 %v8075_v37  ;;  %4890 = vmatpush3.msra.mxu1 %v8081_v31  ;;  %11542 = vst [vmem:[#allocation71_spill] sm:$0xff] %v8087_v8  ;;  %v8094_v37 = vld [vmem:[%s10944_s4 + $0xc0] sm:$0xff]  ;;  %v8100_v31 = vld [vmem:[%s10944_s4 + $0xd0] sm:$0xff]  ;;  %v5523_v34 = vpop.eup %5522  ;;  %v1178_v33 = vsub.f32 1.0, %v5521_v29 }
 0x3a1   :  { %1504 = vmatprep.subr.mxu0 %v8087_v8  ;;  %4891 = vmatprep.subr.mxu1 %v11335_v62  ;;  %11543 = vst [vmem:[#allocation72_spill] sm:$0xff] %v8094_v37  ;;  %11544 = vst [vmem:[#allocation73_spill] sm:$0xff] %v8100_v31  ;;  %v8106_v8 = vld [vmem:[%s10944_s4 + $0xb0] sm:$0xff] }
 0x3a2   :  { %1505 = vmatpush1.msra.mxu0 %v8094_v37  ;;  %4892 = vmatpush3.msra.mxu1 %v8100_v31  ;;  %11545 = vst [vmem:[#allocation74_spill] sm:$0xff] %v8106_v8  ;;  %v8113_v37 = vld [vmem:[%s10944_s4 + $0xa8] sm:$0xff]  ;;  %v8119_v31 = vld [vmem:[%s10944_s4 + $0xb8] sm:$0xff]  ;;  %v1179_v35 = vmul.f32 %v5523_v34, %v1178_v33  ;;  %v1180_v34 = vmul.f32 %v5521_v29, %v7301_v52  ;;  %v8256_v52 = vld [vmem:[%s10944_s4 + $0x10] sm:$0xff] }
 0x3a3   :  { %1506 = vmatprep.subr.mxu0 %v8106_v8  ;;  %4893 = vmatprep.subr.mxu1 %v11335_v62  ;;  %11546 = vst [vmem:[#allocation75_spill] sm:$0xff] %v8113_v37  ;;  %11547 = vst [vmem:[#allocation76_spill] sm:$0xff] %v8119_v31  ;;  %v8125_v8 = vld [vmem:[%s10944_s4 + $0x98] sm:$0xff]  ;;  %v8233_v33 = vld [vmem:[%s10944_s4 + $0x28] sm:$0xff] }
 0x3a4   :  { %1507 = vmatpush1.msra.mxu0 %v8113_v37  ;;  %4894 = vmatpush3.msra.mxu1 %v8119_v31  ;;  %11548 = vst [vmem:[#allocation77_spill] sm:$0xff] %v8125_v8  ;;  %v8132_v37 = vld [vmem:[%s10944_s4 + $0x90] sm:$0xff]  ;;  %v8138_v31 = vld [vmem:[%s10944_s4 + $0xa0] sm:$0xff]  ;;  %11564 = vst [vmem:[#allocation93_spill] sm:$0xff] %v8233_v33 }
 0x3a5   :  { %1508 = vmatprep.subr.mxu0 %v8125_v8  ;;  %4895 = vmatprep.subr.mxu1 %v11335_v62  ;;  %11549 = vst [vmem:[#allocation78_spill] sm:$0xff] %v8132_v37  ;;  %11550 = vst [vmem:[#allocation79_spill] sm:$0xff] %v8138_v31  ;;  %v8144_v8 = vld [vmem:[%s10944_s4 + $0x80] sm:$0xff] }
 0x3a6   :  { %1509 = vmatpush1.msra.mxu0 %v8132_v37  ;;  %4896 = vmatpush3.msra.mxu1 %v8138_v31  ;;  %11551 = vst [vmem:[#allocation80_spill] sm:$0xff] %v8144_v8  ;;  %v8151_v37 = vld [vmem:[%s10944_s4 + $0x78] sm:$0xff]  ;;  %v8157_v31 = vld [vmem:[%s10944_s4 + $0x88] sm:$0xff]  ;;  %v11604_v29 = vld [vmem:[#allocation44_spill] sm:$0xff] }
 0x3a7   :  { %1510 = vmatprep.subr.mxu0 %v8144_v8  ;;  %4897 = vmatprep.subr.mxu1 %v11335_v62  ;;  %11552 = vst [vmem:[#allocation81_spill] sm:$0xff] %v8151_v37  ;;  %11553 = vst [vmem:[#allocation82_spill] sm:$0xff] %v8157_v31  ;;  %v8163_v8 = vld [vmem:[%s10944_s4 + $0x68] sm:$0xff] }
 0x3a8   :  { %1511 = vmatpush1.msra.mxu0 %v8151_v37  ;;  %4898 = vmatpush3.msra.mxu1 %v8157_v31  ;;  %11554 = vst [vmem:[#allocation83_spill] sm:$0xff] %v8163_v8  ;;  %v8170_v37 = vld [vmem:[%s10944_s4 + $0x60] sm:$0xff]  ;;  %v8176_v31 = vld [vmem:[%s10944_s4 + $0x70] sm:$0xff] }
 0x3a9   :  { %1512 = vmatprep.subr.mxu0 %v8163_v8  ;;  %4899 = vmatprep.subr.mxu1 %v11335_v62  ;;  %11555 = vst [vmem:[#allocation84_spill] sm:$0xff] %v8170_v37  ;;  %11556 = vst [vmem:[#allocation85_spill] sm:$0xff] %v8176_v31  ;;  %v8182_v8 = vld [vmem:[%s10944_s4 + $0x50] sm:$0xff] }
 0x3aa   :  { %1513 = vmatpush1.msra.mxu0 %v8170_v37  ;;  %4900 = vmatpush3.msra.mxu1 %v8176_v31  ;;  %11557 = vst [vmem:[#allocation86_spill] sm:$0xff] %v8182_v8  ;;  %v8189_v37 = vld [vmem:[%s10944_s4 + $0x48] sm:$0xff]  ;;  %v8195_v31 = vld [vmem:[%s10944_s4 + $0x58] sm:$0xff] }
 0x3ab   :  { %1514 = vmatprep.subr.mxu0 %v8182_v8  ;;  %4901 = vmatprep.subr.mxu1 %v11335_v62  ;;  %11558 = vst [vmem:[#allocation87_spill] sm:$0xff] %v8189_v37  ;;  %11559 = vst [vmem:[#allocation88_spill] sm:$0xff] %v8195_v31  ;;  %v8201_v8 = vld [vmem:[%s10944_s4 + $0x38] sm:$0xff] }
 0x3ac   :  { %1515 = vmatpush1.msra.mxu0 %v8189_v37  ;;  %4902 = vmatpush3.msra.mxu1 %v8195_v31  ;;  %11560 = vst [vmem:[#allocation89_spill] sm:$0xff] %v8201_v8  ;;  %v8208_v37 = vld [vmem:[%s10944_s4 + $0x30] sm:$0xff]  ;;  %v8214_v31 = vld [vmem:[%s10944_s4 + $0x40] sm:$0xff] }
 0x3ad   :  { %1516 = vmatprep.subr.mxu0 %v8201_v8  ;;  %4903 = vmatprep.subr.mxu1 %v11335_v62  ;;  %11561 = vst [vmem:[#allocation90_spill] sm:$0xff] %v8208_v37  ;;  %v8220_v8 = vld [vmem:[%s10944_s4 + $0x20] sm:$0xff] }
 0x3ae   :  { %1517 = vmatpush1.msra.mxu0 %v8208_v37  ;;  %4904 = vmatpush3.msra.mxu1 %v8214_v31  ;;  %11562 = vst [vmem:[#allocation91_spill] sm:$0xff] %v8220_v8  ;;  %v8227_v37 = vld [vmem:[%s10944_s4 + $0x18] sm:$0xff] }
 0x3af   :  { %1518 = vmatprep.subr.mxu0 %v8220_v8  ;;  %4905 = vmatprep.subr.mxu1 %v11335_v62  ;;  %11563 = vst [vmem:[#allocation92_spill] sm:$0xff] %v8227_v37  ;;  %v8240_v8 = vld [vmem:[%s10944_s4 + $0x8] sm:$0xff] }
 0x3b0   :  { %1519 = vmatpush1.msra.mxu0 %v8227_v37  ;;  %4906 = vmatpush3.msra.mxu1 %v8233_v33  ;;  %v8247_v37 = vld [vmem:[%s10944_s4] sm:$0xff]  ;;  %v8251_v33 = vadd.f32 %v1180_v34, %v1179_v35  ;;  %v11603_v35 = vld [vmem:[#allocation43_spill] sm:$0xff]  ;;  %v11605_v34 = vld [vmem:[#allocation45_spill] sm:$0xff] }
 0x3b1   :  { %1520 = vmatprep.subr.mxu0 %v8240_v8  ;;  %4907 = vmatprep.subr.mxu1 %v11335_v62 }
 0x3b2   :  { %1521 = vmatpush1.msra.mxu0 %v8247_v37  ;;  %1554 = vmatprep.mubr.f32.mxu0 %v11335_v62 }
 0x3b3   :  { %4908 = vmatpush3.msra.mxu1 %v8256_v52  ;;  %4909 = vmatprep.mubr.msk.f32.mxu1 %vm6073_vm0, %v11335_v62 }
 0x3b4   :  { %1555 = vmatmul.mubr.f32.vlgmr.msra.gmra.mxu0 %v8251_v33  ;;  %4910 = vmatmul.mubr.f32.vlgmr.msra.gmra.mxu1 %v8251_v33 }
 0x3b5   :  { %1657 = vmatprep.subr.mxu0 %v7311_v53  ;;  %4912 = vmatprep.subr.mxu1 %v11335_v62  ;;  %v11565_v53 = vld [vmem:[#allocation5_spill] sm:$0xff] }
 0x3b6   :  { %1658 = vmatpush1.msra.mxu0 %v7318_v3  ;;  %4913 = vmatpush3.msra.mxu1 %v7324_v56  ;;  %v11566_v3 = vld [vmem:[#allocation6_spill] sm:$0xff]  ;;  %v11567_v56 = vld [vmem:[#allocation7_spill] sm:$0xff] }
 0x3b7   :  { %1659 = vmatprep.subr.mxu0 %v7330_v57  ;;  %4914 = vmatprep.subr.mxu1 %v11335_v62  ;;  %v11568_v57 = vld [vmem:[#allocation8_spill] sm:$0xff] }
 0x3b8   :  { %1660 = vmatpush1.msra.mxu0 %v7337_v61  ;;  %4915 = vmatpush3.msra.mxu1 %v7343_v63  ;;  %v11569_v61 = vld [vmem:[#allocation9_spill] sm:$0xff]  ;;  %v11570_v63 = vld [vmem:[#allocation10_spill] sm:$0xff] }
 0x3b9   :  { %1661 = vmatprep.subr.mxu0 %v7349_v47  ;;  %4916 = vmatprep.subr.mxu1 %v11335_v62  ;;  %v11571_v47 = vld [vmem:[#allocation12_spill] sm:$0xff] }
 0x3ba   :  { %1662 = vmatpush1.msra.mxu0 %v7356_v48  ;;  %4917 = vmatpush3.msra.mxu1 %v7362_v0  ;;  %v11572_v48 = vld [vmem:[#allocation11_spill] sm:$0xff]  ;;  %v11573_v0 = vld [vmem:[#allocation13_spill] sm:$0xff] }
 0x3bb   :  { %1663 = vmatprep.subr.mxu0 %v7368_v1  ;;  %4918 = vmatprep.subr.mxu1 %v11335_v62  ;;  %v11574_v1 = vld [vmem:[#allocation14_spill] sm:$0xff] }
 0x3bc   :  { %1664 = vmatpush1.msra.mxu0 %v7375_v2  ;;  %4919 = vmatpush3.msra.mxu1 %v7381_v4  ;;  %v11575_v2 = vld [vmem:[#allocation15_spill] sm:$0xff]  ;;  %v11576_v4 = vld [vmem:[#allocation16_spill] sm:$0xff] }
 0x3bd   :  { %1665 = vmatprep.subr.mxu0 %v7387_v5  ;;  %4920 = vmatprep.subr.mxu1 %v11335_v62  ;;  %v11577_v5 = vld [vmem:[#allocation17_spill] sm:$0xff] }
 0x3be   :  { %1666 = vmatpush1.msra.mxu0 %v7394_v6  ;;  %4921 = vmatpush3.msra.mxu1 %v7400_v7  ;;  %v11578_v6 = vld [vmem:[#allocation18_spill] sm:$0xff]  ;;  %v11579_v7 = vld [vmem:[#allocation19_spill] sm:$0xff] }
 0x3bf   :  { %1667 = vmatprep.subr.mxu0 %v7406_v58  ;;  %4922 = vmatprep.subr.mxu1 %v11335_v62  ;;  %v11580_v58 = vld [vmem:[#allocation20_spill] sm:$0xff] }
 0x3c0   :  { %1668 = vmatpush1.msra.mxu0 %v7413_v10  ;;  %4923 = vmatpush3.msra.mxu1 %v7419_v49  ;;  %v11581_v10 = vld [vmem:[#allocation21_spill] sm:$0xff]  ;;  %v11582_v49 = vld [vmem:[#allocation22_spill] sm:$0xff] }
 0x3c1   :  { %1669 = vmatprep.subr.mxu0 %v7425_v11  ;;  %4924 = vmatprep.subr.mxu1 %v11335_v62  ;;  %v11583_v11 = vld [vmem:[#allocation23_spill] sm:$0xff] }
 0x3c2   :  { %1670 = vmatpush1.msra.mxu0 %v7432_v12  ;;  %4925 = vmatpush3.msra.mxu1 %v7438_v51  ;;  %v11584_v12 = vld [vmem:[#allocation24_spill] sm:$0xff]  ;;  %v11585_v51 = vld [vmem:[#allocation25_spill] sm:$0xff] }
 0x3c3   :  { %1671 = vmatprep.subr.mxu0 %v7444_v54  ;;  %4926 = vmatprep.subr.mxu1 %v11335_v62  ;;  %v11586_v54 = vld [vmem:[#allocation26_spill] sm:$0xff] }
 0x3c4   :  { %1672 = vmatpush1.msra.mxu0 %v7451_v50  ;;  %4927 = vmatpush3.msra.mxu1 %v7457_v59  ;;  %v11587_v50 = vld [vmem:[#allocation27_spill] sm:$0xff]  ;;  %v11588_v59 = vld [vmem:[#allocation28_spill] sm:$0xff] }
 0x3c5   :  { %1673 = vmatprep.subr.mxu0 %v7463_v60  ;;  %4928 = vmatprep.subr.mxu1 %v11335_v62  ;;  %v11589_v60 = vld [vmem:[#allocation29_spill] sm:$0xff] }
 0x3c6   :  { %1674 = vmatpush1.msra.mxu0 %v7470_v55  ;;  %4929 = vmatpush3.msra.mxu1 %v7476_v13  ;;  %v11590_v55 = vld [vmem:[#allocation30_spill] sm:$0xff]  ;;  %v11591_v13 = vld [vmem:[#allocation31_spill] sm:$0xff] }
 0x3c7   :  { %1675 = vmatprep.subr.mxu0 %v7482_v14  ;;  %4930 = vmatprep.subr.mxu1 %v11335_v62  ;;  %v11592_v14 = vld [vmem:[#allocation32_spill] sm:$0xff] }
 0x3c8   :  { %1676 = vmatpush1.msra.mxu0 %v7489_v15  ;;  %4931 = vmatpush3.msra.mxu1 %v7495_v16  ;;  %v11593_v15 = vld [vmem:[#allocation33_spill] sm:$0xff]  ;;  %v11594_v16 = vld [vmem:[#allocation34_spill] sm:$0xff] }
 0x3c9   :  { %1677 = vmatprep.subr.mxu0 %v7501_v17  ;;  %4932 = vmatprep.subr.mxu1 %v11335_v62  ;;  %v11595_v17 = vld [vmem:[#allocation35_spill] sm:$0xff] }
 0x3ca   :  { %1678 = vmatpush1.msra.mxu0 %v7508_v18  ;;  %4933 = vmatpush3.msra.mxu1 %v7514_v19  ;;  %v11596_v18 = vld [vmem:[#allocation36_spill] sm:$0xff]  ;;  %v11597_v19 = vld [vmem:[#allocation37_spill] sm:$0xff] }
 0x3cb   :  { %1679 = vmatprep.subr.mxu0 %v7520_v22  ;;  %4934 = vmatprep.subr.mxu1 %v11335_v62  ;;  %v11598_v22 = vld [vmem:[#allocation38_spill] sm:$0xff] }
 0x3cc   :  { %1680 = vmatpush1.msra.mxu0 %v7527_v23  ;;  %4935 = vmatpush3.msra.mxu1 %v7533_v24  ;;  %v11599_v23 = vld [vmem:[#allocation39_spill] sm:$0xff]  ;;  %v11600_v24 = vld [vmem:[#allocation40_spill] sm:$0xff] }
 0x3cd   :  { %1681 = vmatprep.subr.mxu0 %v7539_v25  ;;  %4936 = vmatprep.subr.mxu1 %v11335_v62  ;;  %v11601_v25 = vld [vmem:[#allocation41_spill] sm:$0xff] }
 0x3ce   :  { %1682 = vmatpush1.msra.mxu0 %v7546_v26  ;;  %4937 = vmatpush3.msra.mxu1 %v11565_v53  ;;  %v11602_v26 = vld [vmem:[#allocation42_spill] sm:$0xff] }
 0x3cf   :  { %1683 = vmatprep.subr.mxu0 %v11566_v3  ;;  %4938 = vmatprep.subr.mxu1 %v11335_v62  ;;  %v11606_v53 = vld [vmem:[#allocation46_spill] sm:$0xff]  ;;  %v11607_v3 = vld [vmem:[#allocation47_spill] sm:$0xff] }
 0x3d0   :  { %1684 = vmatpush1.msra.mxu0 %v11567_v56  ;;  %4939 = vmatpush3.msra.mxu1 %v11568_v57  ;;  %v11608_v56 = vld [vmem:[#allocation48_spill] sm:$0xff]  ;;  %v11609_v57 = vld [vmem:[#allocation49_spill] sm:$0xff] }
 0x3d1   :  { %1685 = vmatprep.subr.mxu0 %v11569_v61  ;;  %4940 = vmatprep.subr.mxu1 %v11335_v62  ;;  %v11610_v61 = vld [vmem:[#allocation50_spill] sm:$0xff] }
 0x3d2   :  { %1686 = vmatpush1.msra.mxu0 %v11570_v63  ;;  %4941 = vmatpush3.msra.mxu1 %v11571_v47  ;;  %v11611_v63 = vld [vmem:[#allocation51_spill] sm:$0xff]  ;;  %v11612_v47 = vld [vmem:[#allocation52_spill] sm:$0xff] }
 0x3d3   :  { %1687 = vmatprep.subr.mxu0 %v11572_v48  ;;  %4942 = vmatprep.subr.mxu1 %v11335_v62  ;;  %v11613_v48 = vld [vmem:[#allocation53_spill] sm:$0xff] }
 0x3d4   :  { %1688 = vmatpush1.msra.mxu0 %v11573_v0  ;;  %1721 = vmatprep.mubr.f32.mxu0 %v11335_v62  ;;  %v11614_v0 = vld [vmem:[#allocation54_spill] sm:$0xff] }
 0x3d5   :  { %4943 = vmatpush3.msra.mxu1 %v11574_v1  ;;  %4944 = vmatprep.mubr.msk.f32.mxu1 %vm6073_vm0, %v11335_v62  ;;  %v11615_v1 = vld [vmem:[#allocation55_spill] sm:$0xff] }
 0x3d6   :  { %1722 = vmatmul.mubr.f32.vlgmr.msra.gmra.mxu0 %v7953_v46  ;;  %4945 = vmatmul.mubr.f32.vlgmr.msra.gmra.mxu1 %v7953_v46 }
 0x3d7   :  { %1820 = vmatprep.subr.mxu0 %v11575_v2  ;;  %4947 = vmatprep.subr.mxu1 %v11335_v62  ;;  %v11616_v2 = vld [vmem:[#allocation56_spill] sm:$0xff] }
 0x3d8   :  { %1821 = vmatpush1.msra.mxu0 %v11576_v4  ;;  %4948 = vmatpush3.msra.mxu1 %v11577_v5  ;;  %v11617_v4 = vld [vmem:[#allocation57_spill] sm:$0xff]  ;;  %v11618_v5 = vld [vmem:[#allocation58_spill] sm:$0xff] }
 0x3d9   :  { %1822 = vmatprep.subr.mxu0 %v11578_v6  ;;  %4949 = vmatprep.subr.mxu1 %v11335_v62  ;;  %v11619_v6 = vld [vmem:[#allocation59_spill] sm:$0xff] }
 0x3da   :  { %1823 = vmatpush1.msra.mxu0 %v11579_v7  ;;  %4950 = vmatpush3.msra.mxu1 %v11580_v58  ;;  %v11620_v7 = vld [vmem:[#allocation60_spill] sm:$0xff]  ;;  %v11621_v58 = vld [vmem:[#allocation61_spill] sm:$0xff] }
 0x3db   :  { %1824 = vmatprep.subr.mxu0 %v11581_v10  ;;  %4951 = vmatprep.subr.mxu1 %v11335_v62  ;;  %v11622_v10 = vld [vmem:[#allocation62_spill] sm:$0xff] }
 0x3dc   :  { %1825 = vmatpush1.msra.mxu0 %v11582_v49  ;;  %4952 = vmatpush3.msra.mxu1 %v11583_v11  ;;  %v11623_v49 = vld [vmem:[#allocation63_spill] sm:$0xff] }
 0x3dd   :  { %1826 = vmatprep.subr.mxu0 %v11584_v12  ;;  %4953 = vmatprep.subr.mxu1 %v11335_v62 }
 0x3de   :  { %1827 = vmatpush1.msra.mxu0 %v11585_v51  ;;  %4954 = vmatpush3.msra.mxu1 %v11586_v54 }
 0x3df   :  { %1828 = vmatprep.subr.mxu0 %v11587_v50  ;;  %4955 = vmatprep.subr.mxu1 %v11335_v62  ;;  %v11624_v50 = vld [vmem:[#allocation4_spill] sm:$0xff] }
 0x3e0   :  { %1829 = vmatpush1.msra.mxu0 %v11588_v59  ;;  %4956 = vmatpush3.msra.mxu1 %v11589_v60 }
 0x3e1   :  { %1830 = vmatprep.subr.mxu0 %v11590_v55  ;;  %4957 = vmatprep.subr.mxu1 %v11335_v62 }
 0x3e2   :  { %1831 = vmatpush1.msra.mxu0 %v11591_v13  ;;  %4958 = vmatpush3.msra.mxu1 %v11592_v14 }
 0x3e3   :  { %1832 = vmatprep.subr.mxu0 %v11593_v15  ;;  %4959 = vmatprep.subr.mxu1 %v11335_v62 }
 0x3e4   :  { %1833 = vmatpush1.msra.mxu0 %v11594_v16  ;;  %4960 = vmatpush3.msra.mxu1 %v11595_v17 }
 0x3e5   :  { %1834 = vmatprep.subr.mxu0 %v11596_v18  ;;  %4961 = vmatprep.subr.mxu1 %v11335_v62 }
 0x3e6   :  { %1835 = vmatpush1.msra.mxu0 %v11597_v19  ;;  %4962 = vmatpush3.msra.mxu1 %v11598_v22  ;;  %v4139_v19 = vld [vmem:[%s10945_s0 + $0x60] sm:$0xff] }
 0x3e7   :  { %1836 = vmatprep.subr.mxu0 %v11599_v23  ;;  %4963 = vmatprep.subr.mxu1 %v11335_v62  ;;  %v8408_v22 = vld [vmem:[%s10948_s6] ss:$0 sm:$0xff] }
 0x3e8   :  { %1837 = vmatpush1.msra.mxu0 %v11600_v24  ;;  %4964 = vmatpush3.msra.mxu1 %v11601_v25 }
 0x3e9   :  { %1838 = vmatprep.subr.mxu0 %v11602_v26  ;;  %4965 = vmatprep.subr.mxu1 %v11335_v62 }
 0x3ea   :  { %1839 = vmatpush1.msra.mxu0 %v11603_v35  ;;  %4966 = vmatpush3.msra.mxu1 %v11604_v29 }
 0x3eb   :  { %1840 = vmatprep.subr.mxu0 %v11605_v34  ;;  %4967 = vmatprep.subr.mxu1 %v11335_v62 }
 0x3ec   :  { %1841 = vmatpush1.msra.mxu0 %v11606_v53  ;;  %4968 = vmatpush3.msra.mxu1 %v11607_v3 }
 0x3ed   :  { %1842 = vmatprep.subr.mxu0 %v11608_v56  ;;  %4969 = vmatprep.subr.mxu1 %v11335_v62 }
 0x3ee   :  { %1843 = vmatpush1.msra.mxu0 %v11609_v57  ;;  %4970 = vmatpush3.msra.mxu1 %v11610_v61  ;;  %v4140_v57 = vld [vmem:[%s10945_s0 + $0x68] sm:$0xff] }
 0x3ef   :  { %1844 = vmatprep.subr.mxu0 %v11611_v63  ;;  %4971 = vmatprep.subr.mxu1 %v11335_v62 }
 0x3f0   :  { %1845 = vmatpush1.msra.mxu0 %v11612_v47  ;;  %4972 = vmatpush3.msra.mxu1 %v11613_v48 }
 0x3f1   :  { %1846 = vmatprep.subr.mxu0 %v11614_v0  ;;  %4973 = vmatprep.subr.mxu1 %v11335_v62 }
 0x3f2   :  { %1847 = vmatpush1.msra.mxu0 %v11615_v1  ;;  %4974 = vmatpush3.msra.mxu1 %v11616_v2 }
 0x3f3   :  { %1848 = vmatprep.subr.mxu0 %v11617_v4  ;;  %4975 = vmatprep.subr.mxu1 %v11335_v62 }
 0x3f4   :  { %1849 = vmatpush1.msra.mxu0 %v11618_v5  ;;  %4976 = vmatpush3.msra.mxu1 %v11619_v6  ;;  %v4141_v6 = vld [vmem:[%s10945_s0 + $0x70] sm:$0xff] }
 0x3f5   :  { %1850 = vmatprep.subr.mxu0 %v11620_v7  ;;  %4977 = vmatprep.subr.mxu1 %v11335_v62 }
 0x3f6   :  { %1851 = vmatpush1.msra.mxu0 %v11621_v58  ;;  %4978 = vmatpush3.msra.mxu1 %v11622_v10 }
 0x3f7   :  { %1884 = vmatprep.mubr.f32.mxu0 %v11335_v62  ;;  %4979 = vmatprep.mubr.msk.f32.mxu1 %vm6073_vm0, %v11335_v62 }
 0x3f8   :  { %1961 = vmatprep.subr.mxu0 %v11623_v49  ;;  %4982 = vmatprep.subr.mxu1 %v11335_v62 }
 0x453   :  { %v1486_v11 = vpop.f32.mrf.mxu1  ;;  %v1415_v51 = vpop.f32.mrf.mxu0 }
 0x454   :  { %v1416_v59 = vadd.f32 %v1415_v51, %v11624_v50  ;;  %v1487_v35 = vadd.f32 %v1486_v11, %v7217_v21 }
 0x455   :  { %v4876_v12 = vpop.f32.mrf.mxu1  ;;  %v1417_v54 = vpop.f32.mrf.mxu0 }
 0x456   :  { %v1418_v58 = vadd.f32 %v1417_v54, %v7227_v43 }
 0x474   :  { %v1556_v60 = vpop.f32.mrf.mxu0  ;;  %v1627_v55 = vpop.f32.mrf.mxu1 }
 0x475   :  { %v1631_v13 = vadd.f32 %v1556_v60, %v1416_v59  ;;  %v1645_v23 = vadd.f32 %v8408_v22, %v1627_v55 }
 0x476   :  { %v4911_v14 = vpop.f32.mrf.mxu1  ;;  %v1558_v18 = vpop.f32.mrf.mxu0 }
 0x477   :  { %v4137_v15 = vmul.f32 -1.442695, %v1631_v13  ;;  %v1632_v49 = vadd.f32 %v1558_v18, %v1418_v58  ;;  %v11638_v13 = vld [vmem:[#allocation77_spill] sm:$0xff]  ;;  %v11639_v14 = vld [vmem:[#allocation78_spill] sm:$0xff] }
 0x478   :  { %v11643_v18 = vld [vmem:[#allocation82_spill] sm:$0xff] }
 0x479   :  { %5524 = vpow2.f32 %v4137_v15  ;;  %v4138_v11 = vmul.f32 -1.442695, %v1632_v49  ;;  %v11640_v15 = vld [vmem:[#allocation79_spill] sm:$0xff]  ;;  %v8568_v58 = vld [vmem:[%s10942_s1 + $0x130] sm:$0xff]  ;;  %v8581_v49 = vld [vmem:[%s10942_s1 + $0x108] sm:$0xff] }
 0x486   :  { %v5525_v16 = vpop.eup %5524 }
 0x487   :  { %v1639_v17 = vadd.f32 1.0, %v5525_v16  ;;  %v11641_v16 = vld [vmem:[#allocation80_spill] sm:$0xff] }
 0x489   :  { %5526 = vrcp.f32 %v1639_v17  ;;  %v11642_v17 = vld [vmem:[#allocation81_spill] sm:$0xff] }
 0x496   :  { %v5527_v24 = vpop.eup %5526  ;;  %v1723_v25 = vpop.f32.mrf.mxu0 }
 0x497   :  { %v1794_v26 = vpop.f32.mrf.mxu1  ;;  %v1646_v29 = vmul.f32 %v5527_v24, %v1645_v23  ;;  %v1798_v34 = vadd.f32 %v4139_v19, %v1723_v25  ;;  %v11644_v23 = vld [vmem:[#allocation83_spill] sm:$0xff]  ;;  %v11645_v24 = vld [vmem:[#allocation84_spill] sm:$0xff]  ;;  %v11646_v25 = vld [vmem:[#allocation85_spill] sm:$0xff] }
 0x498   :  { %v1725_v61 = vpop.f32.mrf.mxu0  ;;  %v1812_v4 = vadd.f32 %v7945_v9, %v1794_v26 }
 0x499   :  { %v4946_v53 = vpop.f32.mrf.mxu1  ;;  %v1647_v3 = vadd.f32 %v1646_v29, %v1487_v35  ;;  %v4142_v56 = vmul.f32 -1.442695, %v1798_v34  ;;  %v1799_v63 = vadd.f32 %v4140_v57, %v1725_v61  ;;  %v11647_v35 = vld [vmem:[#allocation86_spill] sm:$0xff]  ;;  %v11648_v29 = vld [vmem:[#allocation87_spill] sm:$0xff]  ;;  %v11649_v34 = vld [vmem:[#allocation88_spill] sm:$0xff] }
 0x49a   :  { %v11652_v61 = vld [vmem:[#allocation91_spill] sm:$0xff] }
 0x49b   :  { %5528 = vpow2.f32 %v4142_v56  ;;  %v4143_v47 = vmul.f32 -1.442695, %v1799_v63  ;;  %v11651_v56 = vld [vmem:[#allocation90_spill] sm:$0xff]  ;;  %v11653_v63 = vld [vmem:[#allocation92_spill] sm:$0xff] }
 0x49d   :  { %5530 = vpow2.f32 %v4143_v47  ;;  %v11654_v47 = vld [vmem:[#allocation93_spill] sm:$0xff] }
 0x4a8   :  { %v5529_v48 = vpop.eup %5528 }
 0x4a9   :  { %v1806_v0 = vadd.f32 1.0, %v5529_v48 }
 0x4aa   :  { %v5531_v1 = vpop.eup %5530 }
 0x4ab   :  { %5532 = vrcp.f32 %v1806_v0  ;;  %v1807_v2 = vadd.f32 1.0, %v5531_v1  ;;  %v8524_v0 = vld [vmem:[%s10942_s1 + $0x150] sm:$0xff]  ;;  %v8530_v1 = vld [vmem:[%s10942_s1 + $0x160] sm:$0xff] }
 0x4ad   :  { %5534 = vrcp.f32 %v1807_v2  ;;  %v8536_v2 = vld [vmem:[%s10942_s1 + $0x140] sm:$0xff] }
 0x4b8   :  { %v5533_v5 = vpop.eup %5532 }
 0x4b9   :  { %v1813_v7 = vmul.f32 %v5533_v5, %v1812_v4  ;;  %v8543_v4 = vld [vmem:[%s10942_s1 + $0x138] sm:$0xff]  ;;  %v8549_v5 = vld [vmem:[%s10942_s1 + $0x148] sm:$0xff] }
 0x4ba   :  { %v5535_v12 = vpop.eup %5534 }
 0x4bb   :  { %v1814_v10 = vadd.f32 %v4141_v6, %v1813_v7  ;;  %v1816_v51 = vsub.f32 1.0, %v5535_v12  ;;  %v1818_v9 = vmul.f32 %v5535_v12, %v7953_v46  ;;  %v8555_v6 = vld [vmem:[%s10942_s1 + $0x128] sm:$0xff]  ;;  %v8562_v7 = vld [vmem:[%s10942_s1 + $0x120] sm:$0xff]  ;;  %v8593_v12 = vld [vmem:[%s10942_s1 + $0xf8] sm:$0xff] }
 0x4bd   :  { %5536 = vtanh.f32 %v1814_v10  ;;  %v8574_v10 = vld [vmem:[%s10942_s1 + $0x110] sm:$0xff] }
 0x4be   :  { %5538 = vpow2.f32 %v4138_v11  ;;  %v8587_v11 = vld [vmem:[%s10942_s1 + $0x118] sm:$0xff] }
 0x4ca   :  { %v5537_v59 = vpop.eup %5536 }
 0x4cb   :  { %v1817_v60 = vmul.f32 %v5537_v59, %v1816_v51  ;;  %v5539_v54 = vpop.eup %5538  ;;  %v8600_v51 = vld [vmem:[%s10942_s1 + $0xf0] sm:$0xff]  ;;  %v8606_v59 = vld [vmem:[%s10942_s1 + $0x100] sm:$0xff] }
 0x4cc   :  { %v1640_v46 = vadd.f32 1.0, %v5539_v54  ;;  %v8625_v54 = vld [vmem:[%s10942_s1 + $0xe8] sm:$0xff] }
 0x4cd   :  { %v8421_v55 = vadd.f32 %v1818_v9, %v1817_v60  ;;  %v8612_v60 = vld [vmem:[%s10942_s1 + $0xe0] sm:$0xff]  ;;  %v8619_v9 = vld [vmem:[%s10942_s1 + $0xd8] sm:$0xff] }
 0x4ce   :  { %5540 = vrcp.f32 %v1640_v46  ;;  %v8631_v46 = vld [vmem:[%s10942_s1 + $0xc8] sm:$0xff] }
 0x4cf   :  { %1885 = vmatmul.mubr.f32.vlgmr.msra.gmra.mxu0 %v8421_v55  ;;  %4980 = vmatmul.mubr.f32.vlgmr.msra.gmra.mxu1 %v8421_v55  ;;  %5542 = vtanh.f32 %v1647_v3  ;;  %v11650_v3 = vld [vmem:[#allocation89_spill] sm:$0xff] }
 0x4d0   :  { %1962 = vmatpush1.msra.mxu0 %v7960_v40  ;;  %4983 = vmatpush3.msra.mxu1 %v7966_v32  ;;  %v11625_v40 = vld [vmem:[#allocation64_spill] sm:$0xff]  ;;  %v11626_v32 = vld [vmem:[#allocation65_spill] sm:$0xff] }
 0x4d1   :  { %1963 = vmatprep.subr.mxu0 %v7972_v20  ;;  %4984 = vmatprep.subr.mxu1 %v11335_v62  ;;  %v11627_v20 = vld [vmem:[#allocation66_spill] sm:$0xff] }
 0x4d2   :  { %1964 = vmatpush1.msra.mxu0 %v7979_v38  ;;  %4985 = vmatpush3.msra.mxu1 %v7985_v45  ;;  %v11628_v38 = vld [vmem:[#allocation67_spill] sm:$0xff]  ;;  %v11629_v45 = vld [vmem:[#allocation68_spill] sm:$0xff] }
 0x4d3   :  { %1965 = vmatprep.subr.mxu0 %v7991_v30  ;;  %4986 = vmatprep.subr.mxu1 %v11335_v62  ;;  %v11630_v30 = vld [vmem:[#allocation69_spill] sm:$0xff] }
 0x4d4   :  { %1966 = vmatpush1.msra.mxu0 %v7998_v44  ;;  %4987 = vmatpush3.msra.mxu1 %v8004_v42  ;;  %v11631_v44 = vld [vmem:[#allocation70_spill] sm:$0xff]  ;;  %v11632_v42 = vld [vmem:[#allocation71_spill] sm:$0xff] }
 0x4d5   :  { %1967 = vmatprep.subr.mxu0 %v8010_v28  ;;  %4988 = vmatprep.subr.mxu1 %v11335_v62  ;;  %v11633_v28 = vld [vmem:[#allocation72_spill] sm:$0xff] }
 0x4d6   :  { %1968 = vmatpush1.msra.mxu0 %v8017_v41  ;;  %4989 = vmatpush3.msra.mxu1 %v8023_v39  ;;  %v11634_v41 = vld [vmem:[#allocation73_spill] sm:$0xff]  ;;  %v11635_v39 = vld [vmem:[#allocation74_spill] sm:$0xff] }
 0x4d7   :  { %1969 = vmatprep.subr.mxu0 %v8029_v27  ;;  %4990 = vmatprep.subr.mxu1 %v11335_v62  ;;  %v11636_v27 = vld [vmem:[#allocation75_spill] sm:$0xff] }
 0x4d8   :  { %1970 = vmatpush1.msra.mxu0 %v8036_v36  ;;  %4991 = vmatpush3.msra.mxu1 %v11625_v40  ;;  %v11637_v36 = vld [vmem:[#allocation76_spill] sm:$0xff] }
 0x4d9   :  { %1971 = vmatprep.subr.mxu0 %v11626_v32  ;;  %4992 = vmatprep.subr.mxu1 %v11335_v62  ;;  %v8638_v40 = vld [vmem:[%s10942_s1 + $0xc0] sm:$0xff]  ;;  %v8644_v32 = vld [vmem:[%s10942_s1 + $0xd0] sm:$0xff] }
 0x4da   :  { %1972 = vmatpush1.msra.mxu0 %v11627_v20  ;;  %4993 = vmatpush3.msra.mxu1 %v11628_v38  ;;  %v8650_v20 = vld [vmem:[%s10942_s1 + $0xb0] sm:$0xff]  ;;  %v8657_v38 = vld [vmem:[%s10942_s1 + $0xa8] sm:$0xff] }
 0x4db   :  { %1973 = vmatprep.subr.mxu0 %v11629_v45  ;;  %4994 = vmatprep.subr.mxu1 %v11335_v62  ;;  %v5541_v19 = vpop.eup %5540  ;;  %v8663_v45 = vld [vmem:[%s10942_s1 + $0xb8] sm:$0xff] }
 0x4dc   :  { %1974 = vmatpush1.msra.mxu0 %v11630_v30  ;;  %4995 = vmatpush3.msra.mxu1 %v11631_v44  ;;  %v5543_v26 = vpop.eup %5542  ;;  %v1649_v53 = vsub.f32 1.0, %v5541_v19  ;;  %v1651_v48 = vmul.f32 %v5541_v19, %v8251_v33  ;;  %v8511_v33 = vld [vmem:[%s10942_s1 + $0x178] sm:$0xff]  ;;  %v8676_v44 = vld [vmem:[%s10942_s1 + $0x90] sm:$0xff]  ;;  %v8758_v19 = vld [vmem:[%s10942_s1 + $0x40] sm:$0xff] }
 0x4dd   :  { %1975 = vmatprep.subr.mxu0 %v11632_v42  ;;  %4996 = vmatprep.subr.mxu1 %v11335_v62  ;;  %v8669_v30 = vld [vmem:[%s10942_s1 + $0x98] sm:$0xff]  ;;  %v8682_v42 = vld [vmem:[%s10942_s1 + $0xa0] sm:$0xff]  ;;  %11658 = vst [vmem:[#allocation8_spill] sm:$0xff] %v8758_v19 }
 0x4de   :  { %1976 = vmatpush1.msra.mxu0 %v11633_v28  ;;  %4997 = vmatpush3.msra.mxu1 %v11634_v41  ;;  %v1650_v57 = vmul.f32 %v5543_v26, %v1649_v53  ;;  %v8688_v28 = vld [vmem:[%s10942_s1 + $0x80] sm:$0xff]  ;;  %v8695_v41 = vld [vmem:[%s10942_s1 + $0x78] sm:$0xff]  ;;  %v8783_v26 = vld [vmem:[%s10942_s1 + $0x8] sm:$0xff] }
 0x4df   :  { %1977 = vmatprep.subr.mxu0 %v11635_v39  ;;  %4998 = vmatprep.subr.mxu1 %v11335_v62  ;;  %v8701_v39 = vld [vmem:[%s10942_s1 + $0x88] sm:$0xff]  ;;  %11662 = vst [vmem:[#allocation11_spill] sm:$0xff] %v8783_v26 }
 0x4e0   :  { %1978 = vmatpush1.msra.mxu0 %v11636_v27  ;;  %4999 = vmatpush3.msra.mxu1 %v11637_v36  ;;  %v8707_v27 = vld [vmem:[%s10942_s1 + $0x68] sm:$0xff]  ;;  %v8714_v36 = vld [vmem:[%s10942_s1 + $0x60] sm:$0xff] }
 0x4e1   :  { %1979 = vmatprep.subr.mxu0 %v11638_v13  ;;  %5000 = vmatprep.subr.mxu1 %v11335_v62  ;;  %v8720_v13 = vld [vmem:[%s10942_s1 + $0x70] sm:$0xff]  ;;  %v8814_v53 = vld [vmem:[%s10943_s3 + $0x168] sm:$0xff] }
 0x4e2   :  { %1980 = vmatpush1.msra.mxu0 %v11639_v14  ;;  %5001 = vmatpush3.msra.mxu1 %v11640_v15  ;;  %v8726_v14 = vld [vmem:[%s10942_s1 + $0x50] sm:$0xff]  ;;  %v8733_v15 = vld [vmem:[%s10942_s1 + $0x48] sm:$0xff]  ;;  %11666 = vst [vmem:[#allocation16_spill] sm:$0xff] %v8814_v53 }
 0x4e3   :  { %1981 = vmatprep.subr.mxu0 %v11641_v16  ;;  %5002 = vmatprep.subr.mxu1 %v11335_v62  ;;  %v8739_v16 = vld [vmem:[%s10942_s1 + $0x58] sm:$0xff] }
 0x4e4   :  { %1982 = vmatpush1.msra.mxu0 %v11642_v17  ;;  %5003 = vmatpush3.msra.mxu1 %v11643_v18  ;;  %11655 = vst [vmem:[#allocation5_spill] sm:$0xff] %v8739_v16  ;;  %v8745_v17 = vld [vmem:[%s10942_s1 + $0x38] sm:$0xff]  ;;  %v8752_v18 = vld [vmem:[%s10942_s1 + $0x30] sm:$0xff] }
 0x4e5   :  { %1983 = vmatprep.subr.mxu0 %v11644_v23  ;;  %5004 = vmatprep.subr.mxu1 %v11335_v62  ;;  %11656 = vst [vmem:[#allocation6_spill] sm:$0xff] %v8745_v17  ;;  %11657 = vst [vmem:[#allocation7_spill] sm:$0xff] %v8752_v18  ;;  %v8764_v23 = vld [vmem:[%s10942_s1 + $0x20] sm:$0xff] }
 0x4e6   :  { %1984 = vmatpush1.msra.mxu0 %v11645_v24  ;;  %5005 = vmatpush3.msra.mxu1 %v11646_v25  ;;  %11659 = vst [vmem:[#allocation9_spill] sm:$0xff] %v8764_v23  ;;  %v8771_v24 = vld [vmem:[%s10942_s1 + $0x18] sm:$0xff]  ;;  %v8777_v25 = vld [vmem:[%s10942_s1 + $0x28] sm:$0xff] }
 0x4e7   :  { %1985 = vmatprep.subr.mxu0 %v11647_v35  ;;  %5006 = vmatprep.subr.mxu1 %v11335_v62  ;;  %11660 = vst [vmem:[#allocation10_spill] sm:$0xff] %v8771_v24  ;;  %11661 = vst [vmem:[#allocation12_spill] sm:$0xff] %v8777_v25  ;;  %v8790_v35 = vld [vmem:[%s10942_s1] sm:$0xff] }
 0x4e8   :  { %1986 = vmatpush1.msra.mxu0 %v11648_v29  ;;  %5007 = vmatpush3.msra.mxu1 %v11649_v34  ;;  %11663 = vst [vmem:[#allocation13_spill] sm:$0xff] %v8790_v35  ;;  %v8797_v29 = vld [vmem:[%s10942_s1 + $0x10] sm:$0xff] }
 0x4e9   :  { %1987 = vmatprep.subr.mxu0 %v11650_v3  ;;  %5008 = vmatprep.subr.mxu1 %v11335_v62  ;;  %11664 = vst [vmem:[#allocation14_spill] sm:$0xff] %v8797_v29  ;;  %v8807_v34 = vld [vmem:[%s10943_s3 + $0x170] sm:$0xff]  ;;  %v8820_v3 = vld [vmem:[%s10943_s3 + $0x178] sm:$0xff] }
 0x4ea   :  { %1988 = vmatpush1.msra.mxu0 %v11651_v56  ;;  %5009 = vmatpush3.msra.mxu1 %v8214_v31  ;;  %v8488_v31 = vadd.f32 %v1651_v48, %v1650_v57  ;;  %11665 = vst [vmem:[#allocation15_spill] sm:$0xff] %v8807_v34  ;;  %11667 = vst [vmem:[#allocation17_spill] sm:$0xff] %v8820_v3  ;;  %v8826_v56 = vld [vmem:[%s10943_s3 + $0x158] sm:$0xff]  ;;  %v8833_v57 = vld [vmem:[%s10943_s3 + $0x150] sm:$0xff] }
 0x4eb   :  { %1989 = vmatprep.subr.mxu0 %v11652_v61  ;;  %5010 = vmatprep.subr.mxu1 %v11335_v62  ;;  %11668 = vst [vmem:[#allocation18_spill] sm:$0xff] %v8826_v56  ;;  %11669 = vst [vmem:[#allocation19_spill] sm:$0xff] %v8833_v57  ;;  %v8839_v61 = vld [vmem:[%s10943_s3 + $0x160] sm:$0xff]  ;;  %v8858_v48 = vld [vmem:[%s10943_s3 + $0x148] sm:$0xff] }
 0x4ec   :  { %1990 = vmatpush1.msra.mxu0 %v11653_v63  ;;  %5011 = vmatpush3.msra.mxu1 %v11654_v47  ;;  %11670 = vst [vmem:[#allocation20_spill] sm:$0xff] %v8839_v61  ;;  %v8845_v63 = vld [vmem:[%s10943_s3 + $0x140] sm:$0xff]  ;;  %v8852_v47 = vld [vmem:[%s10943_s3 + $0x138] sm:$0xff]  ;;  %11673 = vst [vmem:[#allocation23_spill] sm:$0xff] %v8858_v48 }
 0x4ed   :  { %1991 = vmatprep.subr.mxu0 %v8240_v8  ;;  %5012 = vmatprep.subr.mxu1 %v11335_v62  ;;  %v8498_v8 = vld [vmem:[%s10942_s1 + $0x170] sm:$0xff]  ;;  %11671 = vst [vmem:[#allocation21_spill] sm:$0xff] %v8845_v63  ;;  %11672 = vst [vmem:[#allocation22_spill] sm:$0xff] %v8852_v47 }
 0x4ee   :  { %1992 = vmatpush1.msra.mxu0 %v8247_v37  ;;  %2025 = vmatprep.mubr.f32.mxu0 %v11335_v62  ;;  %v8505_v37 = vld [vmem:[%s10942_s1 + $0x168] sm:$0xff] }
 0x4ef   :  { %5013 = vmatpush3.msra.mxu1 %v8256_v52  ;;  %5014 = vmatprep.mubr.msk.f32.mxu1 %vm6073_vm0, %v11335_v62  ;;  %v8517_v52 = vld [vmem:[%s10942_s1 + $0x158] sm:$0xff] }
 0x4f0   :  { %2026 = vmatmul.mubr.f32.vlgmr.msra.gmra.mxu0 %v8488_v31  ;;  %5015 = vmatmul.mubr.f32.vlgmr.msra.gmra.mxu1 %v8488_v31 }
 0x4f1   :  { %2128 = vmatprep.subr.mxu0 %v8498_v8  ;;  %5017 = vmatprep.subr.mxu1 %v11335_v62 }
 0x4f2   :  { %2129 = vmatpush1.msra.mxu0 %v8505_v37  ;;  %5018 = vmatpush3.msra.mxu1 %v8511_v33 }
 0x4f3   :  { %2130 = vmatprep.subr.mxu0 %v8517_v52  ;;  %5019 = vmatprep.subr.mxu1 %v11335_v62 }
 0x4f4   :  { %2131 = vmatpush1.msra.mxu0 %v8524_v0  ;;  %5020 = vmatpush3.msra.mxu1 %v8530_v1 }
 0x4f5   :  { %2132 = vmatprep.subr.mxu0 %v8536_v2  ;;  %5021 = vmatprep.subr.mxu1 %v11335_v62 }
 0x4f6   :  { %2133 = vmatpush1.msra.mxu0 %v8543_v4  ;;  %5022 = vmatpush3.msra.mxu1 %v8549_v5 }
 0x4f7   :  { %2134 = vmatprep.subr.mxu0 %v8555_v6  ;;  %5023 = vmatprep.subr.mxu1 %v11335_v62 }
 0x4f8   :  { %2135 = vmatpush1.msra.mxu0 %v8562_v7  ;;  %5024 = vmatpush3.msra.mxu1 %v8568_v58 }
 0x4f9   :  { %2136 = vmatprep.subr.mxu0 %v8574_v10  ;;  %5025 = vmatprep.subr.mxu1 %v11335_v62 }
 0x4fa   :  { %2137 = vmatpush1.msra.mxu0 %v8581_v49  ;;  %5026 = vmatpush3.msra.mxu1 %v8587_v11 }
 0x4fb   :  { %2138 = vmatprep.subr.mxu0 %v8593_v12  ;;  %5027 = vmatprep.subr.mxu1 %v11335_v62 }
 0x4fc   :  { %2139 = vmatpush1.msra.mxu0 %v8600_v51  ;;  %5028 = vmatpush3.msra.mxu1 %v8606_v59 }
 0x4fd   :  { %2140 = vmatprep.subr.mxu0 %v8612_v60  ;;  %5029 = vmatprep.subr.mxu1 %v11335_v62 }
 0x4fe   :  { %2141 = vmatpush1.msra.mxu0 %v8619_v9  ;;  %5030 = vmatpush3.msra.mxu1 %v8625_v54 }
 0x4ff   :  { %2142 = vmatprep.subr.mxu0 %v8631_v46  ;;  %5031 = vmatprep.subr.mxu1 %v11335_v62 }
 0x500   :  { %2143 = vmatpush1.msra.mxu0 %v8638_v40  ;;  %5032 = vmatpush3.msra.mxu1 %v8644_v32 }
 0x501   :  { %2144 = vmatprep.subr.mxu0 %v8650_v20  ;;  %5033 = vmatprep.subr.mxu1 %v11335_v62 }
 0x502   :  { %2145 = vmatpush1.msra.mxu0 %v8657_v38  ;;  %5034 = vmatpush3.msra.mxu1 %v8663_v45 }
 0x503   :  { %2146 = vmatprep.subr.mxu0 %v8669_v30  ;;  %5035 = vmatprep.subr.mxu1 %v11335_v62 }
 0x504   :  { %2147 = vmatpush1.msra.mxu0 %v8676_v44  ;;  %5036 = vmatpush3.msra.mxu1 %v8682_v42 }
 0x505   :  { %2148 = vmatprep.subr.mxu0 %v8688_v28  ;;  %5037 = vmatprep.subr.mxu1 %v11335_v62 }
 0x506   :  { %2149 = vmatpush1.msra.mxu0 %v8695_v41  ;;  %5038 = vmatpush3.msra.mxu1 %v8701_v39 }
 0x507   :  { %2150 = vmatprep.subr.mxu0 %v8707_v27  ;;  %5039 = vmatprep.subr.mxu1 %v11335_v62 }
 0x508   :  { %2151 = vmatpush1.msra.mxu0 %v8714_v36  ;;  %5040 = vmatpush3.msra.mxu1 %v8720_v13 }
 0x509   :  { %2152 = vmatprep.subr.mxu0 %v8726_v14  ;;  %5041 = vmatprep.subr.mxu1 %v11335_v62 }
 0x50a   :  { %2153 = vmatpush1.msra.mxu0 %v8733_v15  ;;  %5042 = vmatpush3.msra.mxu1 %v8739_v16 }
 0x50b   :  { %2154 = vmatprep.subr.mxu0 %v8745_v17  ;;  %5043 = vmatprep.subr.mxu1 %v11335_v62 }
 0x50c   :  { %2155 = vmatpush1.msra.mxu0 %v8752_v18  ;;  %5044 = vmatpush3.msra.mxu1 %v8758_v19 }
 0x50d   :  { %2156 = vmatprep.subr.mxu0 %v8764_v23  ;;  %5045 = vmatprep.subr.mxu1 %v11335_v62 }
 0x50e   :  { %2157 = vmatpush1.msra.mxu0 %v8771_v24  ;;  %5046 = vmatpush3.msra.mxu1 %v8777_v25 }
 0x50f   :  { %2158 = vmatprep.subr.mxu0 %v8783_v26  ;;  %5047 = vmatprep.subr.mxu1 %v11335_v62 }
 0x510   :  { %2159 = vmatpush1.msra.mxu0 %v8790_v35  ;;  %2192 = vmatprep.mubr.f32.mxu0 %v11335_v62 }
 0x511   :  { %5048 = vmatpush3.msra.mxu1 %v8797_v29  ;;  %5049 = vmatprep.mubr.msk.f32.mxu1 %vm6073_vm0, %v11335_v62 }
 0x512   :  { %2193 = vmatmul.mubr.f32.vlgmr.msra.gmra.mxu0 %v8421_v55  ;;  %5050 = vmatmul.mubr.f32.vlgmr.msra.gmra.mxu1 %v8421_v55 }
 0x513   :  { %2291 = vmatprep.subr.mxu0 %v8807_v34  ;;  %5052 = vmatprep.subr.mxu1 %v11335_v62 }
 0x514   :  { %2292 = vmatpush1.msra.mxu0 %v8814_v53  ;;  %5053 = vmatpush3.msra.mxu1 %v8820_v3 }
 0x515   :  { %2293 = vmatprep.subr.mxu0 %v8826_v56  ;;  %5054 = vmatprep.subr.mxu1 %v11335_v62 }
 0x516   :  { %2294 = vmatpush1.msra.mxu0 %v8833_v57  ;;  %5055 = vmatpush3.msra.mxu1 %v8839_v61 }
 0x517   :  { %2295 = vmatprep.subr.mxu0 %v8845_v63  ;;  %5056 = vmatprep.subr.mxu1 %v11335_v62  ;;  %v8864_v63 = vld [vmem:[%s10943_s3 + $0x128] sm:$0xff] }
 0x518   :  { %2296 = vmatpush1.msra.mxu0 %v8852_v47  ;;  %5057 = vmatpush3.msra.mxu1 %v8858_v48  ;;  %11674 = vst [vmem:[#allocation24_spill] sm:$0xff] %v8864_v63  ;;  %v8871_v47 = vld [vmem:[%s10943_s3 + $0x120] sm:$0xff]  ;;  %v8877_v48 = vld [vmem:[%s10943_s3 + $0x130] sm:$0xff] }
 0x519   :  { %2297 = vmatprep.subr.mxu0 %v8864_v63  ;;  %5058 = vmatprep.subr.mxu1 %v11335_v62  ;;  %11675 = vst [vmem:[#allocation25_spill] sm:$0xff] %v8871_v47  ;;  %11676 = vst [vmem:[#allocation26_spill] sm:$0xff] %v8877_v48  ;;  %v8883_v63 = vld [vmem:[%s10943_s3 + $0x110] sm:$0xff] }
 0x51a   :  { %2298 = vmatpush1.msra.mxu0 %v8871_v47  ;;  %5059 = vmatpush3.msra.mxu1 %v8877_v48  ;;  %11677 = vst [vmem:[#allocation27_spill] sm:$0xff] %v8883_v63  ;;  %v8890_v47 = vld [vmem:[%s10943_s3 + $0x108] sm:$0xff]  ;;  %v8896_v48 = vld [vmem:[%s10943_s3 + $0x118] sm:$0xff] }
 0x51b   :  { %2299 = vmatprep.subr.mxu0 %v8883_v63  ;;  %5060 = vmatprep.subr.mxu1 %v11335_v62  ;;  %11678 = vst [vmem:[#allocation28_spill] sm:$0xff] %v8890_v47  ;;  %11679 = vst [vmem:[#allocation29_spill] sm:$0xff] %v8896_v48  ;;  %v8902_v63 = vld [vmem:[%s10943_s3 + $0xf8] sm:$0xff] }
 0x51c   :  { %2300 = vmatpush1.msra.mxu0 %v8890_v47  ;;  %5061 = vmatpush3.msra.mxu1 %v8896_v48  ;;  %11680 = vst [vmem:[#allocation30_spill] sm:$0xff] %v8902_v63  ;;  %v8909_v47 = vld [vmem:[%s10943_s3 + $0xf0] sm:$0xff]  ;;  %v8915_v48 = vld [vmem:[%s10943_s3 + $0x100] sm:$0xff] }
 0x51d   :  { %2301 = vmatprep.subr.mxu0 %v8902_v63  ;;  %5062 = vmatprep.subr.mxu1 %v11335_v62  ;;  %11681 = vst [vmem:[#allocation31_spill] sm:$0xff] %v8909_v47  ;;  %11682 = vst [vmem:[#allocation32_spill] sm:$0xff] %v8915_v48  ;;  %v8921_v63 = vld [vmem:[%s10943_s3 + $0xe0] sm:$0xff] }
 0x51e   :  { %2302 = vmatpush1.msra.mxu0 %v8909_v47  ;;  %5063 = vmatpush3.msra.mxu1 %v8915_v48  ;;  %11683 = vst [vmem:[#allocation33_spill] sm:$0xff] %v8921_v63  ;;  %v8928_v47 = vld [vmem:[%s10943_s3 + $0xd8] sm:$0xff]  ;;  %v8934_v48 = vld [vmem:[%s10943_s3 + $0xe8] sm:$0xff] }
 0x51f   :  { %2303 = vmatprep.subr.mxu0 %v8921_v63  ;;  %5064 = vmatprep.subr.mxu1 %v11335_v62  ;;  %11684 = vst [vmem:[#allocation34_spill] sm:$0xff] %v8928_v47  ;;  %11685 = vst [vmem:[#allocation35_spill] sm:$0xff] %v8934_v48  ;;  %v8940_v63 = vld [vmem:[%s10943_s3 + $0xc8] sm:$0xff] }
 0x520   :  { %2304 = vmatpush1.msra.mxu0 %v8928_v47  ;;  %5065 = vmatpush3.msra.mxu1 %v8934_v48  ;;  %11686 = vst [vmem:[#allocation36_spill] sm:$0xff] %v8940_v63  ;;  %v8947_v47 = vld [vmem:[%s10943_s3 + $0xc0] sm:$0xff]  ;;  %v8953_v48 = vld [vmem:[%s10943_s3 + $0xd0] sm:$0xff] }
 0x521   :  { %2305 = vmatprep.subr.mxu0 %v8940_v63  ;;  %5066 = vmatprep.subr.mxu1 %v11335_v62  ;;  %11687 = vst [vmem:[#allocation37_spill] sm:$0xff] %v8947_v47  ;;  %11688 = vst [vmem:[#allocation38_spill] sm:$0xff] %v8953_v48  ;;  %v8959_v63 = vld [vmem:[%s10943_s3 + $0xb0] sm:$0xff] }
 0x522   :  { %2306 = vmatpush1.msra.mxu0 %v8947_v47  ;;  %5067 = vmatpush3.msra.mxu1 %v8953_v48  ;;  %11689 = vst [vmem:[#allocation39_spill] sm:$0xff] %v8959_v63  ;;  %v8966_v47 = vld [vmem:[%s10943_s3 + $0xa8] sm:$0xff]  ;;  %v8972_v48 = vld [vmem:[%s10943_s3 + $0xb8] sm:$0xff] }
 0x523   :  { %2307 = vmatprep.subr.mxu0 %v8959_v63  ;;  %5068 = vmatprep.subr.mxu1 %v11335_v62  ;;  %11690 = vst [vmem:[#allocation40_spill] sm:$0xff] %v8966_v47  ;;  %11691 = vst [vmem:[#allocation41_spill] sm:$0xff] %v8972_v48  ;;  %v8978_v63 = vld [vmem:[%s10943_s3 + $0x98] sm:$0xff] }
 0x524   :  { %2308 = vmatpush1.msra.mxu0 %v8966_v47  ;;  %5069 = vmatpush3.msra.mxu1 %v8972_v48  ;;  %11692 = vst [vmem:[#allocation42_spill] sm:$0xff] %v8978_v63  ;;  %v8985_v47 = vld [vmem:[%s10943_s3 + $0x90] sm:$0xff]  ;;  %v8991_v48 = vld [vmem:[%s10943_s3 + $0xa0] sm:$0xff] }
 0x525   :  { %2309 = vmatprep.subr.mxu0 %v8978_v63  ;;  %5070 = vmatprep.subr.mxu1 %v11335_v62  ;;  %11693 = vst [vmem:[#allocation43_spill] sm:$0xff] %v8985_v47  ;;  %11694 = vst [vmem:[#allocation44_spill] sm:$0xff] %v8991_v48  ;;  %v8997_v63 = vld [vmem:[%s10943_s3 + $0x80] sm:$0xff] }
 0x526   :  { %2310 = vmatpush1.msra.mxu0 %v8985_v47  ;;  %5071 = vmatpush3.msra.mxu1 %v8991_v48  ;;  %11695 = vst [vmem:[#allocation45_spill] sm:$0xff] %v8997_v63  ;;  %v9004_v47 = vld [vmem:[%s10943_s3 + $0x78] sm:$0xff]  ;;  %v9010_v48 = vld [vmem:[%s10943_s3 + $0x88] sm:$0xff] }
 0x527   :  { %2311 = vmatprep.subr.mxu0 %v8997_v63  ;;  %5072 = vmatprep.subr.mxu1 %v11335_v62  ;;  %11696 = vst [vmem:[#allocation46_spill] sm:$0xff] %v9004_v47  ;;  %11697 = vst [vmem:[#allocation47_spill] sm:$0xff] %v9010_v48  ;;  %v9016_v63 = vld [vmem:[%s10943_s3 + $0x68] sm:$0xff] }
 0x528   :  { %2312 = vmatpush1.msra.mxu0 %v9004_v47  ;;  %5073 = vmatpush3.msra.mxu1 %v9010_v48  ;;  %11698 = vst [vmem:[#allocation48_spill] sm:$0xff] %v9016_v63  ;;  %v9023_v47 = vld [vmem:[%s10943_s3 + $0x60] sm:$0xff]  ;;  %v9029_v48 = vld [vmem:[%s10943_s3 + $0x70] sm:$0xff] }
 0x529   :  { %2313 = vmatprep.subr.mxu0 %v9016_v63  ;;  %5074 = vmatprep.subr.mxu1 %v11335_v62  ;;  %11699 = vst [vmem:[#allocation49_spill] sm:$0xff] %v9023_v47  ;;  %11700 = vst [vmem:[#allocation50_spill] sm:$0xff] %v9029_v48  ;;  %v9035_v63 = vld [vmem:[%s10943_s3 + $0x50] sm:$0xff] }
 0x52a   :  { %2314 = vmatpush1.msra.mxu0 %v9023_v47  ;;  %5075 = vmatpush3.msra.mxu1 %v9029_v48  ;;  %11701 = vst [vmem:[#allocation51_spill] sm:$0xff] %v9035_v63  ;;  %v9042_v47 = vld [vmem:[%s10943_s3 + $0x48] sm:$0xff]  ;;  %v9048_v48 = vld [vmem:[%s10943_s3 + $0x58] sm:$0xff] }
 0x52b   :  { %2315 = vmatprep.subr.mxu0 %v9035_v63  ;;  %5076 = vmatprep.subr.mxu1 %v11335_v62  ;;  %11702 = vst [vmem:[#allocation52_spill] sm:$0xff] %v9042_v47  ;;  %11703 = vst [vmem:[#allocation53_spill] sm:$0xff] %v9048_v48  ;;  %v9054_v63 = vld [vmem:[%s10943_s3 + $0x38] sm:$0xff] }
 0x52c   :  { %2316 = vmatpush1.msra.mxu0 %v9042_v47  ;;  %5077 = vmatpush3.msra.mxu1 %v9048_v48  ;;  %11704 = vst [vmem:[#allocation54_spill] sm:$0xff] %v9054_v63  ;;  %v9061_v47 = vld [vmem:[%s10943_s3 + $0x30] sm:$0xff]  ;;  %v9067_v48 = vld [vmem:[%s10943_s3 + $0x40] sm:$0xff] }
 0x52d   :  { %2317 = vmatprep.subr.mxu0 %v9054_v63  ;;  %5078 = vmatprep.subr.mxu1 %v11335_v62  ;;  %11705 = vst [vmem:[#allocation55_spill] sm:$0xff] %v9061_v47  ;;  %11706 = vst [vmem:[#allocation56_spill] sm:$0xff] %v9067_v48  ;;  %v9073_v63 = vld [vmem:[%s10943_s3 + $0x20] sm:$0xff] }
 0x52e   :  { %2318 = vmatpush1.msra.mxu0 %v9061_v47  ;;  %5079 = vmatpush3.msra.mxu1 %v9067_v48  ;;  %11707 = vst [vmem:[#allocation57_spill] sm:$0xff] %v9073_v63  ;;  %v9080_v47 = vld [vmem:[%s10943_s3 + $0x18] sm:$0xff]  ;;  %v9086_v48 = vld [vmem:[%s10943_s3 + $0x28] sm:$0xff] }
 0x52f   :  { %2319 = vmatprep.subr.mxu0 %v9073_v63  ;;  %5080 = vmatprep.subr.mxu1 %v11335_v62  ;;  %11708 = vst [vmem:[#allocation58_spill] sm:$0xff] %v9080_v47  ;;  %11709 = vst [vmem:[#allocation59_spill] sm:$0xff] %v9086_v48  ;;  %v9092_v63 = vld [vmem:[%s10943_s3 + $0x8] sm:$0xff] }
 0x530   :  { %2320 = vmatpush1.msra.mxu0 %v9080_v47  ;;  %5081 = vmatpush3.msra.mxu1 %v9086_v48  ;;  %11710 = vst [vmem:[#allocation60_spill] sm:$0xff] %v9092_v63  ;;  %v9099_v47 = vld [vmem:[%s10943_s3] sm:$0xff]  ;;  %v9105_v48 = vld [vmem:[%s10943_s3 + $0x10] sm:$0xff] }
 0x531   :  { %2321 = vmatprep.subr.mxu0 %v9092_v63  ;;  %5082 = vmatprep.subr.mxu1 %v11335_v62  ;;  %11711 = vst [vmem:[#allocation61_spill] sm:$0xff] %v9099_v47  ;;  %11712 = vst [vmem:[#allocation62_spill] sm:$0xff] %v9105_v48  ;;  %v9114_v63 = vld [vmem:[%s10944_s4 + $0x170] sm:$0xff] }
 0x532   :  { %2322 = vmatpush1.msra.mxu0 %v9099_v47  ;;  %5083 = vmatpush3.msra.mxu1 %v9105_v48  ;;  %11713 = vst [vmem:[#allocation63_spill] sm:$0xff] %v9114_v63 }
 0x533   :  { %2355 = vmatprep.mubr.f32.mxu0 %v11335_v62  ;;  %5084 = vmatprep.mubr.msk.f32.mxu1 %vm6073_vm0, %v11335_v62 }
 0x534   :  { %2432 = vmatprep.subr.mxu0 %v9114_v63  ;;  %5087 = vmatprep.subr.mxu1 %v11335_v62  ;;  %v4146_v63 = vld [vmem:[%s10945_s0 + $0x48] sm:$0xff] }
 0x58f   :  { %v1957_v47 = vpop.f32.mrf.mxu1  ;;  %v1886_v57 = vpop.f32.mrf.mxu0 }
 0x590   :  { %v1887_v48 = vadd.f32 %v1886_v57, %v11624_v50  ;;  %v1958_v57 = vadd.f32 %v1957_v47, %v7217_v21 }
 0x591   :  { %v4981_v61 = vpop.f32.mrf.mxu1  ;;  %v1888_v56 = vpop.f32.mrf.mxu0 }
 0x5b0   :  { %v2027_v3 = vpop.f32.mrf.mxu0  ;;  %v2098_v53 = vpop.f32.mrf.mxu1 }
 0x5b1   :  { %v2102_v34 = vadd.f32 %v2027_v3, %v1887_v48  ;;  %v2116_v61 = vadd.f32 %v8408_v22, %v2098_v53 }
 0x5b2   :  { %v5016_v29 = vpop.f32.mrf.mxu1  ;;  %v2029_v24 = vpop.f32.mrf.mxu0 }
 0x5b3   :  { %v4144_v35 = vmul.f32 -1.442695, %v2102_v34 }
 0x5b5   :  { %5544 = vpow2.f32 %v4144_v35 }
 0x5c2   :  { %v5545_v26 = vpop.eup %5544 }
 0x5c3   :  { %v2110_v25 = vadd.f32 1.0, %v5545_v26 }
 0x5c5   :  { %5546 = vrcp.f32 %v2110_v25  ;;  %v4147_v25 = vld [vmem:[%s10945_s0 + $0x50] sm:$0xff] }
 0x5d2   :  { %v5547_v23 = vpop.eup %5546  ;;  %v2194_v19 = vpop.f32.mrf.mxu0 }
 0x5d3   :  { %v2265_v18 = vpop.f32.mrf.mxu1  ;;  %v2117_v50 = vmul.f32 %v5547_v23, %v2116_v61  ;;  %v2269_v3 = vadd.f32 %v4146_v63, %v2194_v19  ;;  %v4148_v63 = vld [vmem:[%s10945_s0 + $0x58] sm:$0xff] }
 0x5d4   :  { %v2196_v26 = vpop.f32.mrf.mxu0 }
 0x5d5   :  { %v5051_v29 = vpop.f32.mrf.mxu1  ;;  %v9124_v34 = vadd.f32 %v2117_v50, %v1958_v57  ;;  %v4149_v35 = vmul.f32 -1.442695, %v2269_v3  ;;  %v2270_v48 = vadd.f32 %v4147_v25, %v2196_v26  ;;  %v9132_v50 = vld [vmem:[%s10946_s2] ss:$0 sm:$0xff] }
 0x5d6   :  { %v2283_v19 = vadd.f32 %v9132_v50, %v2265_v18 }
 0x5d7   :  { %5548 = vpow2.f32 %v4149_v35  ;;  %v4150_v17 = vmul.f32 -1.442695, %v2270_v48 }
 0x5d9   :  { %5550 = vpow2.f32 %v4150_v17  ;;  %v1889_v17 = vadd.f32 %v1888_v56, %v7227_v43  ;;  %v9147_v56 = vld [vmem:[%s10944_s4 + $0x168] sm:$0xff] }
 0x5db   :  { %v2103_v3 = vadd.f32 %v2029_v24, %v1889_v17  ;;  %v9153_v24 = vld [vmem:[%s10944_s4 + $0x178] sm:$0xff]  ;;  %v9197_v17 = vld [vmem:[%s10944_s4 + $0x128] sm:$0xff] }
 0x5e4   :  { %v5549_v22 = vpop.eup %5548 }
 0x5e5   :  { %v2277_v53 = vadd.f32 1.0, %v5549_v22  ;;  %v9159_v22 = vld [vmem:[%s10944_s4 + $0x158] sm:$0xff] }
 0x5e6   :  { %v5551_v16 = vpop.eup %5550 }
 0x5e7   :  { %5552 = vrcp.f32 %v2277_v53  ;;  %v2278_v47 = vadd.f32 1.0, %v5551_v16  ;;  %v4145_v16 = vmul.f32 -1.442695, %v2103_v3  ;;  %v9166_v53 = vld [vmem:[%s10944_s4 + $0x150] sm:$0xff] }
 0x5e8   :  { %v9210_v3 = vld [vmem:[%s10944_s4 + $0x130] sm:$0xff] }
 0x5e9   :  { %5554 = vrcp.f32 %v2278_v47  ;;  %v9172_v47 = vld [vmem:[%s10944_s4 + $0x160] sm:$0xff] }
 0x5f4   :  { %v5553_v23 = vpop.eup %5552 }
 0x5f5   :  { %v2284_v61 = vmul.f32 %v5553_v23, %v2283_v19  ;;  %v9178_v19 = vld [vmem:[%s10944_s4 + $0x140] sm:$0xff] }
 0x5f6   :  { %v5555_v29 = vpop.eup %5554 }
 0x5f7   :  { %v2285_v57 = vadd.f32 %v4148_v63, %v2284_v61  ;;  %v2287_v35 = vsub.f32 1.0, %v5555_v29  ;;  %v2289_v18 = vmul.f32 %v5555_v29, %v8421_v55  ;;  %v9185_v63 = vld [vmem:[%s10944_s4 + $0x138] sm:$0xff]  ;;  %v9191_v61 = vld [vmem:[%s10944_s4 + $0x148] sm:$0xff] }
 0x5f8   :  { %v9223_v29 = vld [vmem:[%s10944_s4 + $0x108] sm:$0xff] }
 0x5f9   :  { %5556 = vtanh.f32 %v2285_v57  ;;  %v9204_v57 = vld [vmem:[%s10944_s4 + $0x120] sm:$0xff] }
 0x5fa   :  { %5558 = vpow2.f32 %v4145_v16  ;;  %v9216_v16 = vld [vmem:[%s10944_s4 + $0x110] sm:$0xff] }
 0x606   :  { %v5557_v25 = vpop.eup %5556 }
 0x607   :  { %v2288_v26 = vmul.f32 %v5557_v25, %v2287_v35  ;;  %v5559_v55 = vpop.eup %5558  ;;  %v9229_v35 = vld [vmem:[%s10944_s4 + $0x118] sm:$0xff] }
 0x608   :  { %v2111_v23 = vadd.f32 1.0, %v5559_v55  ;;  %11714 = vst [vmem:[#allocation64_spill] sm:$0xff] %v9229_v35  ;;  %v9235_v25 = vld [vmem:[%s10944_s4 + $0xf8] sm:$0xff]  ;;  %v9255_v55 = vld [vmem:[%s10944_s4 + $0xe0] sm:$0xff] }
 0x609   :  { %v9140_v48 = vadd.f32 %v2289_v18, %v2288_v26  ;;  %11715 = vst [vmem:[#allocation65_spill] sm:$0xff] %v9235_v25  ;;  %v9243_v26 = vld [vmem:[%s10944_s4 + $0xf0] sm:$0xff]  ;;  %v9249_v18 = vld [vmem:[%s10944_s4 + $0x100] sm:$0xff]  ;;  %11718 = vst [vmem:[#allocation68_spill] sm:$0xff] %v9255_v55 }
 0x60a   :  { %5560 = vrcp.f32 %v2111_v23  ;;  %11716 = vst [vmem:[#allocation66_spill] sm:$0xff] %v9243_v26  ;;  %11717 = vst [vmem:[#allocation67_spill] sm:$0xff] %v9249_v18  ;;  %v9268_v23 = vld [vmem:[%s10944_s4 + $0xe8] sm:$0xff] }
 0x60b   :  { %2356 = vmatmul.mubr.f32.vlgmr.msra.gmra.mxu0 %v9140_v48  ;;  %5085 = vmatmul.mubr.f32.vlgmr.msra.gmra.mxu1 %v9140_v48  ;;  %5562 = vtanh.f32 %v9124_v34  ;;  %v9262_v34 = vld [vmem:[%s10944_s4 + $0xd8] sm:$0xff]  ;;  %11720 = vst [vmem:[#allocation70_spill] sm:$0xff] %v9268_v23 }
 0x60c   :  { %2433 = vmatpush1.msra.mxu0 %v9147_v56  ;;  %5088 = vmatpush3.msra.mxu1 %v9153_v24  ;;  %11719 = vst [vmem:[#allocation69_spill] sm:$0xff] %v9262_v34 }
 0x60d   :  { %2434 = vmatprep.subr.mxu0 %v9159_v22  ;;  %5089 = vmatprep.subr.mxu1 %v11335_v62 }
 0x60e   :  { %2435 = vmatpush1.msra.mxu0 %v9166_v53  ;;  %5090 = vmatpush3.msra.mxu1 %v9172_v47 }
 0x60f   :  { %2436 = vmatprep.subr.mxu0 %v9178_v19  ;;  %5091 = vmatprep.subr.mxu1 %v11335_v62 }
 0x610   :  { %2437 = vmatpush1.msra.mxu0 %v9185_v63  ;;  %5092 = vmatpush3.msra.mxu1 %v9191_v61 }
 0x611   :  { %2438 = vmatprep.subr.mxu0 %v9197_v17  ;;  %5093 = vmatprep.subr.mxu1 %v11335_v62 }
 0x612   :  { %2439 = vmatpush1.msra.mxu0 %v9204_v57  ;;  %5094 = vmatpush3.msra.mxu1 %v9210_v3 }
 0x613   :  { %2440 = vmatprep.subr.mxu0 %v9216_v16  ;;  %5095 = vmatprep.subr.mxu1 %v11335_v62 }
 0x614   :  { %2441 = vmatpush1.msra.mxu0 %v9223_v29  ;;  %5096 = vmatpush3.msra.mxu1 %v9229_v35 }
 0x615   :  { %2442 = vmatprep.subr.mxu0 %v9235_v25  ;;  %5097 = vmatprep.subr.mxu1 %v11335_v62 }
 0x616   :  { %2443 = vmatpush1.msra.mxu0 %v9243_v26  ;;  %5098 = vmatpush3.msra.mxu1 %v9249_v18 }
 0x617   :  { %2444 = vmatprep.subr.mxu0 %v9255_v55  ;;  %5099 = vmatprep.subr.mxu1 %v11335_v62  ;;  %v9274_v55 = vld [vmem:[%s10944_s4 + $0xc8] sm:$0xff]  ;;  %v5561_v18 = vpop.eup %5560 }
 0x618   :  { %2445 = vmatpush1.msra.mxu0 %v9262_v34  ;;  %5100 = vmatpush3.msra.mxu1 %v9268_v23  ;;  %11721 = vst [vmem:[#allocation71_spill] sm:$0xff] %v9274_v55  ;;  %v9281_v34 = vld [vmem:[%s10944_s4 + $0xc0] sm:$0xff]  ;;  %v9287_v23 = vld [vmem:[%s10944_s4 + $0xd0] sm:$0xff]  ;;  %v5563_v26 = vpop.eup %5562  ;;  %v2120_v25 = vsub.f32 1.0, %v5561_v18 }
 0x619   :  { %2446 = vmatprep.subr.mxu0 %v9274_v55  ;;  %5101 = vmatprep.subr.mxu1 %v11335_v62  ;;  %11722 = vst [vmem:[#allocation72_spill] sm:$0xff] %v9281_v34  ;;  %11723 = vst [vmem:[#allocation73_spill] sm:$0xff] %v9287_v23  ;;  %v9293_v55 = vld [vmem:[%s10944_s4 + $0xb0] sm:$0xff] }
 0x61a   :  { %2447 = vmatpush1.msra.mxu0 %v9281_v34  ;;  %5102 = vmatpush3.msra.mxu1 %v9287_v23  ;;  %11724 = vst [vmem:[#allocation74_spill] sm:$0xff] %v9293_v55  ;;  %v9300_v34 = vld [vmem:[%s10944_s4 + $0xa8] sm:$0xff]  ;;  %v9306_v23 = vld [vmem:[%s10944_s4 + $0xb8] sm:$0xff]  ;;  %v2121_v35 = vmul.f32 %v5563_v26, %v2120_v25  ;;  %v2122_v26 = vmul.f32 %v5561_v18, %v8488_v31  ;;  %v9443_v31 = vld [vmem:[%s10944_s4 + $0x10] sm:$0xff] }
 0x61b   :  { %2448 = vmatprep.subr.mxu0 %v9293_v55  ;;  %5103 = vmatprep.subr.mxu1 %v11335_v62  ;;  %11725 = vst [vmem:[#allocation75_spill] sm:$0xff] %v9300_v34  ;;  %11726 = vst [vmem:[#allocation76_spill] sm:$0xff] %v9306_v23  ;;  %v9312_v55 = vld [vmem:[%s10944_s4 + $0x98] sm:$0xff]  ;;  %v9420_v25 = vld [vmem:[%s10944_s4 + $0x28] sm:$0xff] }
 0x61c   :  { %2449 = vmatpush1.msra.mxu0 %v9300_v34  ;;  %5104 = vmatpush3.msra.mxu1 %v9306_v23  ;;  %11727 = vst [vmem:[#allocation77_spill] sm:$0xff] %v9312_v55  ;;  %v9319_v34 = vld [vmem:[%s10944_s4 + $0x90] sm:$0xff]  ;;  %v9325_v23 = vld [vmem:[%s10944_s4 + $0xa0] sm:$0xff]  ;;  %11743 = vst [vmem:[#allocation93_spill] sm:$0xff] %v9420_v25 }
 0x61d   :  { %2450 = vmatprep.subr.mxu0 %v9312_v55  ;;  %5105 = vmatprep.subr.mxu1 %v11335_v62  ;;  %11728 = vst [vmem:[#allocation78_spill] sm:$0xff] %v9319_v34  ;;  %11729 = vst [vmem:[#allocation79_spill] sm:$0xff] %v9325_v23  ;;  %v9331_v55 = vld [vmem:[%s10944_s4 + $0x80] sm:$0xff] }
 0x61e   :  { %2451 = vmatpush1.msra.mxu0 %v9319_v34  ;;  %5106 = vmatpush3.msra.mxu1 %v9325_v23  ;;  %11730 = vst [vmem:[#allocation80_spill] sm:$0xff] %v9331_v55  ;;  %v9338_v34 = vld [vmem:[%s10944_s4 + $0x78] sm:$0xff]  ;;  %v9344_v23 = vld [vmem:[%s10944_s4 + $0x88] sm:$0xff]  ;;  %v11783_v18 = vld [vmem:[#allocation44_spill] sm:$0xff] }
 0x61f   :  { %2452 = vmatprep.subr.mxu0 %v9331_v55  ;;  %5107 = vmatprep.subr.mxu1 %v11335_v62  ;;  %11731 = vst [vmem:[#allocation81_spill] sm:$0xff] %v9338_v34  ;;  %11732 = vst [vmem:[#allocation82_spill] sm:$0xff] %v9344_v23  ;;  %v9350_v55 = vld [vmem:[%s10944_s4 + $0x68] sm:$0xff] }
 0x620   :  { %2453 = vmatpush1.msra.mxu0 %v9338_v34  ;;  %5108 = vmatpush3.msra.mxu1 %v9344_v23  ;;  %11733 = vst [vmem:[#allocation83_spill] sm:$0xff] %v9350_v55  ;;  %v9357_v34 = vld [vmem:[%s10944_s4 + $0x60] sm:$0xff]  ;;  %v9363_v23 = vld [vmem:[%s10944_s4 + $0x70] sm:$0xff] }
 0x621   :  { %2454 = vmatprep.subr.mxu0 %v9350_v55  ;;  %5109 = vmatprep.subr.mxu1 %v11335_v62  ;;  %11734 = vst [vmem:[#allocation84_spill] sm:$0xff] %v9357_v34  ;;  %11735 = vst [vmem:[#allocation85_spill] sm:$0xff] %v9363_v23  ;;  %v9369_v55 = vld [vmem:[%s10944_s4 + $0x50] sm:$0xff] }
 0x622   :  { %2455 = vmatpush1.msra.mxu0 %v9357_v34  ;;  %5110 = vmatpush3.msra.mxu1 %v9363_v23  ;;  %11736 = vst [vmem:[#allocation86_spill] sm:$0xff] %v9369_v55  ;;  %v9376_v34 = vld [vmem:[%s10944_s4 + $0x48] sm:$0xff]  ;;  %v9382_v23 = vld [vmem:[%s10944_s4 + $0x58] sm:$0xff] }
 0x623   :  { %2456 = vmatprep.subr.mxu0 %v9369_v55  ;;  %5111 = vmatprep.subr.mxu1 %v11335_v62  ;;  %11737 = vst [vmem:[#allocation87_spill] sm:$0xff] %v9376_v34  ;;  %11738 = vst [vmem:[#allocation88_spill] sm:$0xff] %v9382_v23  ;;  %v9388_v55 = vld [vmem:[%s10944_s4 + $0x38] sm:$0xff] }
 0x624   :  { %2457 = vmatpush1.msra.mxu0 %v9376_v34  ;;  %5112 = vmatpush3.msra.mxu1 %v9382_v23  ;;  %11739 = vst [vmem:[#allocation89_spill] sm:$0xff] %v9388_v55  ;;  %v9395_v34 = vld [vmem:[%s10944_s4 + $0x30] sm:$0xff]  ;;  %v9401_v23 = vld [vmem:[%s10944_s4 + $0x40] sm:$0xff] }
 0x625   :  { %2458 = vmatprep.subr.mxu0 %v9388_v55  ;;  %5113 = vmatprep.subr.mxu1 %v11335_v62  ;;  %11740 = vst [vmem:[#allocation90_spill] sm:$0xff] %v9395_v34  ;;  %v9407_v55 = vld [vmem:[%s10944_s4 + $0x20] sm:$0xff] }
 0x626   :  { %2459 = vmatpush1.msra.mxu0 %v9395_v34  ;;  %5114 = vmatpush3.msra.mxu1 %v9401_v23  ;;  %11741 = vst [vmem:[#allocation91_spill] sm:$0xff] %v9407_v55  ;;  %v9414_v34 = vld [vmem:[%s10944_s4 + $0x18] sm:$0xff] }
 0x627   :  { %2460 = vmatprep.subr.mxu0 %v9407_v55  ;;  %5115 = vmatprep.subr.mxu1 %v11335_v62  ;;  %11742 = vst [vmem:[#allocation92_spill] sm:$0xff] %v9414_v34  ;;  %v9427_v55 = vld [vmem:[%s10944_s4 + $0x8] sm:$0xff] }
 0x628   :  { %2461 = vmatpush1.msra.mxu0 %v9414_v34  ;;  %5116 = vmatpush3.msra.mxu1 %v9420_v25  ;;  %v9434_v34 = vld [vmem:[%s10944_s4] sm:$0xff]  ;;  %v9438_v25 = vadd.f32 %v2122_v26, %v2121_v35  ;;  %v11782_v35 = vld [vmem:[#allocation43_spill] sm:$0xff]  ;;  %v11784_v26 = vld [vmem:[#allocation45_spill] sm:$0xff] }
 0x629   :  { %2462 = vmatprep.subr.mxu0 %v9427_v55  ;;  %5117 = vmatprep.subr.mxu1 %v11335_v62 }
 0x62a   :  { %2463 = vmatpush1.msra.mxu0 %v9434_v34  ;;  %2496 = vmatprep.mubr.f32.mxu0 %v11335_v62 }
 0x62b   :  { %5118 = vmatpush3.msra.mxu1 %v9443_v31  ;;  %5119 = vmatprep.mubr.msk.f32.mxu1 %vm6073_vm0, %v11335_v62 }
 0x62c   :  { %2497 = vmatmul.mubr.f32.vlgmr.msra.gmra.mxu0 %v9438_v25  ;;  %5120 = vmatmul.mubr.f32.vlgmr.msra.gmra.mxu1 %v9438_v25 }
 0x62d   :  { %2599 = vmatprep.subr.mxu0 %v8498_v8  ;;  %5122 = vmatprep.subr.mxu1 %v11335_v62  ;;  %v11744_v8 = vld [vmem:[#allocation5_spill] sm:$0xff] }
 0x62e   :  { %2600 = vmatpush1.msra.mxu0 %v8505_v37  ;;  %5123 = vmatpush3.msra.mxu1 %v8511_v33  ;;  %v11745_v37 = vld [vmem:[#allocation6_spill] sm:$0xff]  ;;  %v11746_v33 = vld [vmem:[#allocation7_spill] sm:$0xff] }
 0x62f   :  { %2601 = vmatprep.subr.mxu0 %v8517_v52  ;;  %5124 = vmatprep.subr.mxu1 %v11335_v62  ;;  %v11747_v52 = vld [vmem:[#allocation8_spill] sm:$0xff] }
 0x630   :  { %2602 = vmatpush1.msra.mxu0 %v8524_v0  ;;  %5125 = vmatpush3.msra.mxu1 %v8530_v1  ;;  %v11748_v0 = vld [vmem:[#allocation9_spill] sm:$0xff]  ;;  %v11749_v1 = vld [vmem:[#allocation10_spill] sm:$0xff] }
 0x631   :  { %2603 = vmatprep.subr.mxu0 %v8536_v2  ;;  %5126 = vmatprep.subr.mxu1 %v11335_v62  ;;  %v11750_v2 = vld [vmem:[#allocation12_spill] sm:$0xff] }
 0x632   :  { %2604 = vmatpush1.msra.mxu0 %v8543_v4  ;;  %5127 = vmatpush3.msra.mxu1 %v8549_v5  ;;  %v11751_v4 = vld [vmem:[#allocation11_spill] sm:$0xff]  ;;  %v11752_v5 = vld [vmem:[#allocation13_spill] sm:$0xff] }
 0x633   :  { %2605 = vmatprep.subr.mxu0 %v8555_v6  ;;  %5128 = vmatprep.subr.mxu1 %v11335_v62  ;;  %v11753_v6 = vld [vmem:[#allocation14_spill] sm:$0xff] }
 0x634   :  { %2606 = vmatpush1.msra.mxu0 %v8562_v7  ;;  %5129 = vmatpush3.msra.mxu1 %v8568_v58  ;;  %v11754_v7 = vld [vmem:[#allocation15_spill] sm:$0xff]  ;;  %v11755_v58 = vld [vmem:[#allocation16_spill] sm:$0xff] }
 0x635   :  { %2607 = vmatprep.subr.mxu0 %v8574_v10  ;;  %5130 = vmatprep.subr.mxu1 %v11335_v62  ;;  %v11756_v10 = vld [vmem:[#allocation17_spill] sm:$0xff] }
 0x636   :  { %2608 = vmatpush1.msra.mxu0 %v8581_v49  ;;  %5131 = vmatpush3.msra.mxu1 %v8587_v11  ;;  %v11757_v49 = vld [vmem:[#allocation18_spill] sm:$0xff]  ;;  %v11758_v11 = vld [vmem:[#allocation19_spill] sm:$0xff] }
 0x637   :  { %2609 = vmatprep.subr.mxu0 %v8593_v12  ;;  %5132 = vmatprep.subr.mxu1 %v11335_v62  ;;  %v11759_v12 = vld [vmem:[#allocation20_spill] sm:$0xff] }
 0x638   :  { %2610 = vmatpush1.msra.mxu0 %v8600_v51  ;;  %5133 = vmatpush3.msra.mxu1 %v8606_v59  ;;  %v11760_v51 = vld [vmem:[#allocation21_spill] sm:$0xff]  ;;  %v11761_v59 = vld [vmem:[#allocation22_spill] sm:$0xff] }
 0x639   :  { %2611 = vmatprep.subr.mxu0 %v8612_v60  ;;  %5134 = vmatprep.subr.mxu1 %v11335_v62  ;;  %v11762_v60 = vld [vmem:[#allocation23_spill] sm:$0xff] }
 0x63a   :  { %2612 = vmatpush1.msra.mxu0 %v8619_v9  ;;  %5135 = vmatpush3.msra.mxu1 %v8625_v54  ;;  %v11763_v9 = vld [vmem:[#allocation24_spill] sm:$0xff]  ;;  %v11764_v54 = vld [vmem:[#allocation25_spill] sm:$0xff] }
 0x63b   :  { %2613 = vmatprep.subr.mxu0 %v8631_v46  ;;  %5136 = vmatprep.subr.mxu1 %v11335_v62  ;;  %v11765_v46 = vld [vmem:[#allocation26_spill] sm:$0xff] }
 0x63c   :  { %2614 = vmatpush1.msra.mxu0 %v8638_v40  ;;  %5137 = vmatpush3.msra.mxu1 %v8644_v32  ;;  %v11766_v40 = vld [vmem:[#allocation27_spill] sm:$0xff]  ;;  %v11767_v32 = vld [vmem:[#allocation28_spill] sm:$0xff] }
 0x63d   :  { %2615 = vmatprep.subr.mxu0 %v8650_v20  ;;  %5138 = vmatprep.subr.mxu1 %v11335_v62  ;;  %v11768_v20 = vld [vmem:[#allocation29_spill] sm:$0xff] }
 0x63e   :  { %2616 = vmatpush1.msra.mxu0 %v8657_v38  ;;  %5139 = vmatpush3.msra.mxu1 %v8663_v45  ;;  %v11769_v38 = vld [vmem:[#allocation30_spill] sm:$0xff]  ;;  %v11770_v45 = vld [vmem:[#allocation31_spill] sm:$0xff] }
 0x63f   :  { %2617 = vmatprep.subr.mxu0 %v8669_v30  ;;  %5140 = vmatprep.subr.mxu1 %v11335_v62  ;;  %v11771_v30 = vld [vmem:[#allocation32_spill] sm:$0xff] }
 0x640   :  { %2618 = vmatpush1.msra.mxu0 %v8676_v44  ;;  %5141 = vmatpush3.msra.mxu1 %v8682_v42  ;;  %v11772_v44 = vld [vmem:[#allocation33_spill] sm:$0xff]  ;;  %v11773_v42 = vld [vmem:[#allocation34_spill] sm:$0xff] }
 0x641   :  { %2619 = vmatprep.subr.mxu0 %v8688_v28  ;;  %5142 = vmatprep.subr.mxu1 %v11335_v62  ;;  %v11774_v28 = vld [vmem:[#allocation35_spill] sm:$0xff] }
 0x642   :  { %2620 = vmatpush1.msra.mxu0 %v8695_v41  ;;  %5143 = vmatpush3.msra.mxu1 %v8701_v39  ;;  %v11775_v41 = vld [vmem:[#allocation36_spill] sm:$0xff]  ;;  %v11776_v39 = vld [vmem:[#allocation37_spill] sm:$0xff] }
 0x643   :  { %2621 = vmatprep.subr.mxu0 %v8707_v27  ;;  %5144 = vmatprep.subr.mxu1 %v11335_v62  ;;  %v11777_v27 = vld [vmem:[#allocation38_spill] sm:$0xff] }
 0x644   :  { %2622 = vmatpush1.msra.mxu0 %v8714_v36  ;;  %5145 = vmatpush3.msra.mxu1 %v8720_v13  ;;  %v11778_v36 = vld [vmem:[#allocation39_spill] sm:$0xff]  ;;  %v11779_v13 = vld [vmem:[#allocation40_spill] sm:$0xff] }
 0x645   :  { %2623 = vmatprep.subr.mxu0 %v8726_v14  ;;  %5146 = vmatprep.subr.mxu1 %v11335_v62  ;;  %v11780_v14 = vld [vmem:[#allocation41_spill] sm:$0xff] }
 0x646   :  { %2624 = vmatpush1.msra.mxu0 %v8733_v15  ;;  %5147 = vmatpush3.msra.mxu1 %v11744_v8  ;;  %v11781_v15 = vld [vmem:[#allocation42_spill] sm:$0xff] }
 0x647   :  { %2625 = vmatprep.subr.mxu0 %v11745_v37  ;;  %5148 = vmatprep.subr.mxu1 %v11335_v62  ;;  %v11785_v8 = vld [vmem:[#allocation46_spill] sm:$0xff]  ;;  %v11786_v37 = vld [vmem:[#allocation47_spill] sm:$0xff] }
 0x648   :  { %2626 = vmatpush1.msra.mxu0 %v11746_v33  ;;  %5149 = vmatpush3.msra.mxu1 %v11747_v52  ;;  %v11787_v33 = vld [vmem:[#allocation48_spill] sm:$0xff]  ;;  %v11788_v52 = vld [vmem:[#allocation49_spill] sm:$0xff] }
 0x649   :  { %2627 = vmatprep.subr.mxu0 %v11748_v0  ;;  %5150 = vmatprep.subr.mxu1 %v11335_v62  ;;  %v11789_v0 = vld [vmem:[#allocation50_spill] sm:$0xff] }
 0x64a   :  { %2628 = vmatpush1.msra.mxu0 %v11749_v1  ;;  %5151 = vmatpush3.msra.mxu1 %v11750_v2  ;;  %v11790_v1 = vld [vmem:[#allocation51_spill] sm:$0xff]  ;;  %v11791_v2 = vld [vmem:[#allocation52_spill] sm:$0xff] }
 0x64b   :  { %2629 = vmatprep.subr.mxu0 %v11751_v4  ;;  %5152 = vmatprep.subr.mxu1 %v11335_v62  ;;  %v11792_v4 = vld [vmem:[#allocation53_spill] sm:$0xff] }
 0x64c   :  { %2630 = vmatpush1.msra.mxu0 %v11752_v5  ;;  %2663 = vmatprep.mubr.f32.mxu0 %v11335_v62  ;;  %v11793_v5 = vld [vmem:[#allocation54_spill] sm:$0xff] }
 0x64d   :  { %5153 = vmatpush3.msra.mxu1 %v11753_v6  ;;  %5154 = vmatprep.mubr.msk.f32.mxu1 %vm6073_vm0, %v11335_v62  ;;  %v11794_v6 = vld [vmem:[#allocation55_spill] sm:$0xff] }
 0x64e   :  { %2664 = vmatmul.mubr.f32.vlgmr.msra.gmra.mxu0 %v9140_v48  ;;  %5155 = vmatmul.mubr.f32.vlgmr.msra.gmra.mxu1 %v9140_v48 }
 0x64f   :  { %2762 = vmatprep.subr.mxu0 %v11754_v7  ;;  %5157 = vmatprep.subr.mxu1 %v11335_v62  ;;  %v11795_v7 = vld [vmem:[#allocation56_spill] sm:$0xff] }
 0x650   :  { %2763 = vmatpush1.msra.mxu0 %v11755_v58  ;;  %5158 = vmatpush3.msra.mxu1 %v11756_v10  ;;  %v11796_v58 = vld [vmem:[#allocation57_spill] sm:$0xff]  ;;  %v11797_v10 = vld [vmem:[#allocation58_spill] sm:$0xff] }
 0x651   :  { %2764 = vmatprep.subr.mxu0 %v11757_v49  ;;  %5159 = vmatprep.subr.mxu1 %v11335_v62  ;;  %v11798_v49 = vld [vmem:[#allocation59_spill] sm:$0xff] }
 0x652   :  { %2765 = vmatpush1.msra.mxu0 %v11758_v11  ;;  %5160 = vmatpush3.msra.mxu1 %v11759_v12  ;;  %v11799_v11 = vld [vmem:[#allocation60_spill] sm:$0xff]  ;;  %v11800_v12 = vld [vmem:[#allocation61_spill] sm:$0xff] }
 0x653   :  { %2766 = vmatprep.subr.mxu0 %v11760_v51  ;;  %5161 = vmatprep.subr.mxu1 %v11335_v62  ;;  %v11801_v51 = vld [vmem:[#allocation62_spill] sm:$0xff] }
 0x654   :  { %2767 = vmatpush1.msra.mxu0 %v11761_v59  ;;  %5162 = vmatpush3.msra.mxu1 %v11762_v60  ;;  %v11802_v59 = vld [vmem:[#allocation63_spill] sm:$0xff] }
 0x655   :  { %2768 = vmatprep.subr.mxu0 %v11763_v9  ;;  %5163 = vmatprep.subr.mxu1 %v11335_v62 }
 0x656   :  { %2769 = vmatpush1.msra.mxu0 %v11764_v54  ;;  %5164 = vmatpush3.msra.mxu1 %v11765_v46 }
 0x657   :  { %2770 = vmatprep.subr.mxu0 %v11766_v40  ;;  %5165 = vmatprep.subr.mxu1 %v11335_v62  ;;  %v11803_v40 = vld [vmem:[#allocation4_spill] sm:$0xff] }
 0x658   :  { %2771 = vmatpush1.msra.mxu0 %v11767_v32  ;;  %5166 = vmatpush3.msra.mxu1 %v11768_v20 }
 0x659   :  { %2772 = vmatprep.subr.mxu0 %v11769_v38  ;;  %5167 = vmatprep.subr.mxu1 %v11335_v62 }
 0x65a   :  { %2773 = vmatpush1.msra.mxu0 %v11770_v45  ;;  %5168 = vmatpush3.msra.mxu1 %v11771_v30 }
 0x65b   :  { %2774 = vmatprep.subr.mxu0 %v11772_v44  ;;  %5169 = vmatprep.subr.mxu1 %v11335_v62 }
 0x65c   :  { %2775 = vmatpush1.msra.mxu0 %v11773_v42  ;;  %5170 = vmatpush3.msra.mxu1 %v11774_v28 }
 0x65d   :  { %2776 = vmatprep.subr.mxu0 %v11775_v41  ;;  %5171 = vmatprep.subr.mxu1 %v11335_v62 }
 0x65e   :  { %2777 = vmatpush1.msra.mxu0 %v11776_v39  ;;  %5172 = vmatpush3.msra.mxu1 %v11777_v27  ;;  %v4153_v39 = vld [vmem:[%s10945_s0 + $0x30] sm:$0xff]  ;;  %v9595_v27 = vld [vmem:[%s10948_s6] ss:$0 sm:$0xff] }
 0x65f   :  { %2778 = vmatprep.subr.mxu0 %v11778_v36  ;;  %5173 = vmatprep.subr.mxu1 %v11335_v62 }
 0x660   :  { %2779 = vmatpush1.msra.mxu0 %v11779_v13  ;;  %5174 = vmatpush3.msra.mxu1 %v11780_v14 }
 0x661   :  { %2780 = vmatprep.subr.mxu0 %v11781_v15  ;;  %5175 = vmatprep.subr.mxu1 %v11335_v62 }
 0x662   :  { %2781 = vmatpush1.msra.mxu0 %v11782_v35  ;;  %5176 = vmatpush3.msra.mxu1 %v11783_v18 }
 0x663   :  { %2782 = vmatprep.subr.mxu0 %v11784_v26  ;;  %5177 = vmatprep.subr.mxu1 %v11335_v62 }
 0x664   :  { %2783 = vmatpush1.msra.mxu0 %v11785_v8  ;;  %5178 = vmatpush3.msra.mxu1 %v11786_v37 }
 0x665   :  { %2784 = vmatprep.subr.mxu0 %v11787_v33  ;;  %5179 = vmatprep.subr.mxu1 %v11335_v62 }
 0x666   :  { %2785 = vmatpush1.msra.mxu0 %v11788_v52  ;;  %5180 = vmatpush3.msra.mxu1 %v11789_v0  ;;  %v4154_v52 = vld [vmem:[%s10945_s0 + $0x38] sm:$0xff] }
 0x667   :  { %2786 = vmatprep.subr.mxu0 %v11790_v1  ;;  %5181 = vmatprep.subr.mxu1 %v11335_v62 }
 0x668   :  { %2787 = vmatpush1.msra.mxu0 %v11791_v2  ;;  %5182 = vmatpush3.msra.mxu1 %v11792_v4 }
 0x669   :  { %2788 = vmatprep.subr.mxu0 %v11793_v5  ;;  %5183 = vmatprep.subr.mxu1 %v11335_v62 }
 0x66a   :  { %2789 = vmatpush1.msra.mxu0 %v11794_v6  ;;  %5184 = vmatpush3.msra.mxu1 %v11795_v7 }
 0x66b   :  { %2790 = vmatprep.subr.mxu0 %v11796_v58  ;;  %5185 = vmatprep.subr.mxu1 %v11335_v62 }
 0x66c   :  { %2791 = vmatpush1.msra.mxu0 %v11797_v10  ;;  %5186 = vmatpush3.msra.mxu1 %v11798_v49  ;;  %v4155_v49 = vld [vmem:[%s10945_s0 + $0x40] sm:$0xff] }
 0x66d   :  { %2792 = vmatprep.subr.mxu0 %v11799_v11  ;;  %5187 = vmatprep.subr.mxu1 %v11335_v62 }
 0x66e   :  { %2793 = vmatpush1.msra.mxu0 %v11800_v12  ;;  %5188 = vmatpush3.msra.mxu1 %v11801_v51 }
 0x66f   :  { %2826 = vmatprep.mubr.f32.mxu0 %v11335_v62  ;;  %5189 = vmatprep.mubr.msk.f32.mxu1 %vm6073_vm0, %v11335_v62 }
 0x670   :  { %2903 = vmatprep.subr.mxu0 %v11802_v59  ;;  %5192 = vmatprep.subr.mxu1 %v11335_v62 }
 0x6cb   :  { %v2428_v60 = vpop.f32.mrf.mxu1  ;;  %v2357_v54 = vpop.f32.mrf.mxu0 }
 0x6cc   :  { %v2358_v32 = vadd.f32 %v2357_v54, %v11803_v40  ;;  %v2429_v35 = vadd.f32 %v2428_v60, %v7217_v21 }
 0x6cd   :  { %v5086_v9 = vpop.f32.mrf.mxu1  ;;  %v2359_v46 = vpop.f32.mrf.mxu0 }
 0x6ce   :  { %v2360_v12 = vadd.f32 %v2359_v46, %v7227_v43 }
 0x6ec   :  { %v2498_v20 = vpop.f32.mrf.mxu0  ;;  %v2569_v38 = vpop.f32.mrf.mxu1 }
 0x6ed   :  { %v2573_v45 = vadd.f32 %v2498_v20, %v2358_v32  ;;  %v2587_v36 = vadd.f32 %v9595_v27, %v2569_v38 }
 0x6ee   :  { %v5121_v30 = vpop.f32.mrf.mxu1  ;;  %v2500_v41 = vpop.f32.mrf.mxu0 }
 0x6ef   :  { %v4151_v44 = vmul.f32 -1.442695, %v2573_v45  ;;  %v2574_v59 = vadd.f32 %v2500_v41, %v2360_v12  ;;  %v11817_v45 = vld [vmem:[#allocation77_spill] sm:$0xff]  ;;  %v11818_v30 = vld [vmem:[#allocation78_spill] sm:$0xff] }
 0x6f0   :  { %v11822_v41 = vld [vmem:[#allocation82_spill] sm:$0xff] }
 0x6f1   :  { %5564 = vpow2.f32 %v4151_v44  ;;  %v4152_v60 = vmul.f32 -1.442695, %v2574_v59  ;;  %v11819_v44 = vld [vmem:[#allocation79_spill] sm:$0xff]  ;;  %v9755_v12 = vld [vmem:[%s10942_s1 + $0x130] sm:$0xff]  ;;  %v9768_v59 = vld [vmem:[%s10942_s1 + $0x108] sm:$0xff] }
 0x6fe   :  { %v5565_v42 = vpop.eup %5564 }
 0x6ff   :  { %v2581_v28 = vadd.f32 1.0, %v5565_v42  ;;  %v11820_v42 = vld [vmem:[#allocation80_spill] sm:$0xff] }
 0x701   :  { %5566 = vrcp.f32 %v2581_v28  ;;  %v11821_v28 = vld [vmem:[#allocation81_spill] sm:$0xff] }
 0x70e   :  { %v5567_v13 = vpop.eup %5566  ;;  %v2665_v14 = vpop.f32.mrf.mxu0 }
 0x70f   :  { %v2736_v15 = vpop.f32.mrf.mxu1  ;;  %v2588_v18 = vmul.f32 %v5567_v13, %v2587_v36  ;;  %v2740_v26 = vadd.f32 %v4153_v39, %v2665_v14  ;;  %v11823_v36 = vld [vmem:[#allocation83_spill] sm:$0xff]  ;;  %v11824_v13 = vld [vmem:[#allocation84_spill] sm:$0xff]  ;;  %v11825_v14 = vld [vmem:[#allocation85_spill] sm:$0xff] }
 0x710   :  { %v2667_v0 = vpop.f32.mrf.mxu0  ;;  %v2754_v58 = vadd.f32 %v9132_v50, %v2736_v15 }
 0x711   :  { %v5156_v8 = vpop.f32.mrf.mxu1  ;;  %v2589_v37 = vadd.f32 %v2588_v18, %v2429_v35  ;;  %v4156_v33 = vmul.f32 -1.442695, %v2740_v26  ;;  %v2741_v1 = vadd.f32 %v4154_v52, %v2667_v0  ;;  %v11826_v35 = vld [vmem:[#allocation86_spill] sm:$0xff]  ;;  %v11827_v18 = vld [vmem:[#allocation87_spill] sm:$0xff]  ;;  %v11828_v26 = vld [vmem:[#allocation88_spill] sm:$0xff] }
 0x712   :  { %v11831_v0 = vld [vmem:[#allocation91_spill] sm:$0xff] }
 0x713   :  { %5568 = vpow2.f32 %v4156_v33  ;;  %v4157_v2 = vmul.f32 -1.442695, %v2741_v1  ;;  %v11830_v33 = vld [vmem:[#allocation90_spill] sm:$0xff]  ;;  %v11832_v1 = vld [vmem:[#allocation92_spill] sm:$0xff] }
 0x715   :  { %5570 = vpow2.f32 %v4157_v2  ;;  %v11833_v2 = vld [vmem:[#allocation93_spill] sm:$0xff] }
 0x720   :  { %v5569_v4 = vpop.eup %5568 }
 0x721   :  { %v2748_v5 = vadd.f32 1.0, %v5569_v4 }
 0x722   :  { %v5571_v6 = vpop.eup %5570 }
 0x723   :  { %5572 = vrcp.f32 %v2748_v5  ;;  %v2749_v7 = vadd.f32 1.0, %v5571_v6  ;;  %v9711_v5 = vld [vmem:[%s10942_s1 + $0x150] sm:$0xff]  ;;  %v9717_v6 = vld [vmem:[%s10942_s1 + $0x160] sm:$0xff] }
 0x725   :  { %5574 = vrcp.f32 %v2749_v7  ;;  %v9723_v7 = vld [vmem:[%s10942_s1 + $0x140] sm:$0xff] }
 0x730   :  { %v5573_v10 = vpop.eup %5572 }
 0x731   :  { %v2755_v11 = vmul.f32 %v5573_v10, %v2754_v58  ;;  %v9730_v58 = vld [vmem:[%s10942_s1 + $0x138] sm:$0xff]  ;;  %v9736_v10 = vld [vmem:[%s10942_s1 + $0x148] sm:$0xff] }
 0x732   :  { %v5575_v9 = vpop.eup %5574 }
 0x733   :  { %v2756_v51 = vadd.f32 %v4155_v49, %v2755_v11  ;;  %v2758_v54 = vsub.f32 1.0, %v5575_v9  ;;  %v2760_v50 = vmul.f32 %v5575_v9, %v9140_v48  ;;  %v9742_v49 = vld [vmem:[%s10942_s1 + $0x128] sm:$0xff]  ;;  %v9749_v11 = vld [vmem:[%s10942_s1 + $0x120] sm:$0xff]  ;;  %v9780_v9 = vld [vmem:[%s10942_s1 + $0xf8] sm:$0xff] }
 0x735   :  { %5576 = vtanh.f32 %v2756_v51  ;;  %v9761_v51 = vld [vmem:[%s10942_s1 + $0x110] sm:$0xff] }
 0x736   :  { %5578 = vpow2.f32 %v4152_v60  ;;  %v9774_v60 = vld [vmem:[%s10942_s1 + $0x118] sm:$0xff] }
 0x742   :  { %v5577_v32 = vpop.eup %5576 }
 0x743   :  { %v2759_v20 = vmul.f32 %v5577_v32, %v2758_v54  ;;  %v5579_v46 = vpop.eup %5578  ;;  %v9787_v54 = vld [vmem:[%s10942_s1 + $0xf0] sm:$0xff]  ;;  %v9793_v32 = vld [vmem:[%s10942_s1 + $0x100] sm:$0xff] }
 0x744   :  { %v2582_v48 = vadd.f32 1.0, %v5579_v46  ;;  %v9812_v46 = vld [vmem:[%s10942_s1 + $0xe8] sm:$0xff] }
 0x745   :  { %v9608_v38 = vadd.f32 %v2760_v50, %v2759_v20  ;;  %v9799_v20 = vld [vmem:[%s10942_s1 + $0xe0] sm:$0xff]  ;;  %v9806_v50 = vld [vmem:[%s10942_s1 + $0xd8] sm:$0xff] }
 0x746   :  { %5580 = vrcp.f32 %v2582_v48  ;;  %v9818_v48 = vld [vmem:[%s10942_s1 + $0xc8] sm:$0xff] }
 0x747   :  { %2827 = vmatmul.mubr.f32.vlgmr.msra.gmra.mxu0 %v9608_v38  ;;  %5190 = vmatmul.mubr.f32.vlgmr.msra.gmra.mxu1 %v9608_v38  ;;  %5582 = vtanh.f32 %v2589_v37  ;;  %v11829_v37 = vld [vmem:[#allocation89_spill] sm:$0xff] }
 0x748   :  { %2904 = vmatpush1.msra.mxu0 %v9147_v56  ;;  %5193 = vmatpush3.msra.mxu1 %v9153_v24  ;;  %v11804_v56 = vld [vmem:[#allocation64_spill] sm:$0xff]  ;;  %v11805_v24 = vld [vmem:[#allocation65_spill] sm:$0xff] }
 0x749   :  { %2905 = vmatprep.subr.mxu0 %v9159_v22  ;;  %5194 = vmatprep.subr.mxu1 %v11335_v62  ;;  %v11806_v22 = vld [vmem:[#allocation66_spill] sm:$0xff] }
 0x74a   :  { %2906 = vmatpush1.msra.mxu0 %v9166_v53  ;;  %5195 = vmatpush3.msra.mxu1 %v9172_v47  ;;  %v11807_v53 = vld [vmem:[#allocation67_spill] sm:$0xff]  ;;  %v11808_v47 = vld [vmem:[#allocation68_spill] sm:$0xff] }
 0x74b   :  { %2907 = vmatprep.subr.mxu0 %v9178_v19  ;;  %5196 = vmatprep.subr.mxu1 %v11335_v62  ;;  %v11809_v19 = vld [vmem:[#allocation69_spill] sm:$0xff] }
 0x74c   :  { %2908 = vmatpush1.msra.mxu0 %v9185_v63  ;;  %5197 = vmatpush3.msra.mxu1 %v9191_v61  ;;  %v11810_v63 = vld [vmem:[#allocation70_spill] sm:$0xff]  ;;  %v11811_v61 = vld [vmem:[#allocation71_spill] sm:$0xff] }
 0x74d   :  { %2909 = vmatprep.subr.mxu0 %v9197_v17  ;;  %5198 = vmatprep.subr.mxu1 %v11335_v62  ;;  %v11812_v17 = vld [vmem:[#allocation72_spill] sm:$0xff] }
 0x74e   :  { %2910 = vmatpush1.msra.mxu0 %v9204_v57  ;;  %5199 = vmatpush3.msra.mxu1 %v9210_v3  ;;  %v11813_v57 = vld [vmem:[#allocation73_spill] sm:$0xff]  ;;  %v11814_v3 = vld [vmem:[#allocation74_spill] sm:$0xff] }
 0x74f   :  { %2911 = vmatprep.subr.mxu0 %v9216_v16  ;;  %5200 = vmatprep.subr.mxu1 %v11335_v62  ;;  %v11815_v16 = vld [vmem:[#allocation75_spill] sm:$0xff] }
 0x750   :  { %2912 = vmatpush1.msra.mxu0 %v9223_v29  ;;  %5201 = vmatpush3.msra.mxu1 %v11804_v56  ;;  %v11816_v29 = vld [vmem:[#allocation76_spill] sm:$0xff] }
 0x751   :  { %2913 = vmatprep.subr.mxu0 %v11805_v24  ;;  %5202 = vmatprep.subr.mxu1 %v11335_v62  ;;  %v9825_v56 = vld [vmem:[%s10942_s1 + $0xc0] sm:$0xff]  ;;  %v9831_v24 = vld [vmem:[%s10942_s1 + $0xd0] sm:$0xff] }
 0x752   :  { %2914 = vmatpush1.msra.mxu0 %v11806_v22  ;;  %5203 = vmatpush3.msra.mxu1 %v11807_v53  ;;  %v9837_v22 = vld [vmem:[%s10942_s1 + $0xb0] sm:$0xff]  ;;  %v9844_v53 = vld [vmem:[%s10942_s1 + $0xa8] sm:$0xff] }
 0x753   :  { %2915 = vmatprep.subr.mxu0 %v11808_v47  ;;  %5204 = vmatprep.subr.mxu1 %v11335_v62  ;;  %v5581_v39 = vpop.eup %5580  ;;  %v9850_v47 = vld [vmem:[%s10942_s1 + $0xb8] sm:$0xff] }
 0x754   :  { %2916 = vmatpush1.msra.mxu0 %v11809_v19  ;;  %5205 = vmatpush3.msra.mxu1 %v11810_v63  ;;  %v5583_v15 = vpop.eup %5582  ;;  %v2591_v8 = vsub.f32 1.0, %v5581_v39  ;;  %v2593_v4 = vmul.f32 %v5581_v39, %v9438_v25  ;;  %v9698_v25 = vld [vmem:[%s10942_s1 + $0x178] sm:$0xff]  ;;  %v9863_v63 = vld [vmem:[%s10942_s1 + $0x90] sm:$0xff]  ;;  %v9945_v39 = vld [vmem:[%s10942_s1 + $0x40] sm:$0xff] }
 0x755   :  { %2917 = vmatprep.subr.mxu0 %v11811_v61  ;;  %5206 = vmatprep.subr.mxu1 %v11335_v62  ;;  %v9856_v19 = vld [vmem:[%s10942_s1 + $0x98] sm:$0xff]  ;;  %v9869_v61 = vld [vmem:[%s10942_s1 + $0xa0] sm:$0xff]  ;;  %11837 = vst [vmem:[#allocation8_spill] sm:$0xff] %v9945_v39 }
 0x756   :  { %2918 = vmatpush1.msra.mxu0 %v11812_v17  ;;  %5207 = vmatpush3.msra.mxu1 %v11813_v57  ;;  %v2592_v52 = vmul.f32 %v5583_v15, %v2591_v8  ;;  %v9875_v17 = vld [vmem:[%s10942_s1 + $0x80] sm:$0xff]  ;;  %v9882_v57 = vld [vmem:[%s10942_s1 + $0x78] sm:$0xff]  ;;  %v9970_v15 = vld [vmem:[%s10942_s1 + $0x8] sm:$0xff] }
 0x757   :  { %2919 = vmatprep.subr.mxu0 %v11814_v3  ;;  %5208 = vmatprep.subr.mxu1 %v11335_v62  ;;  %v9888_v3 = vld [vmem:[%s10942_s1 + $0x88] sm:$0xff]  ;;  %11841 = vst [vmem:[#allocation11_spill] sm:$0xff] %v9970_v15 }
 0x758   :  { %2920 = vmatpush1.msra.mxu0 %v11815_v16  ;;  %5209 = vmatpush3.msra.mxu1 %v11816_v29  ;;  %v9894_v16 = vld [vmem:[%s10942_s1 + $0x68] sm:$0xff]  ;;  %v9901_v29 = vld [vmem:[%s10942_s1 + $0x60] sm:$0xff] }
 0x759   :  { %2921 = vmatprep.subr.mxu0 %v11817_v45  ;;  %5210 = vmatprep.subr.mxu1 %v11335_v62  ;;  %v9907_v45 = vld [vmem:[%s10942_s1 + $0x70] sm:$0xff]  ;;  %v10001_v8 = vld [vmem:[%s10943_s3 + $0x168] sm:$0xff] }
 0x75a   :  { %2922 = vmatpush1.msra.mxu0 %v11818_v30  ;;  %5211 = vmatpush3.msra.mxu1 %v11819_v44  ;;  %v9913_v30 = vld [vmem:[%s10942_s1 + $0x50] sm:$0xff]  ;;  %v9920_v44 = vld [vmem:[%s10942_s1 + $0x48] sm:$0xff]  ;;  %11845 = vst [vmem:[#allocation16_spill] sm:$0xff] %v10001_v8 }
 0x75b   :  { %2923 = vmatprep.subr.mxu0 %v11820_v42  ;;  %5212 = vmatprep.subr.mxu1 %v11335_v62  ;;  %v9926_v42 = vld [vmem:[%s10942_s1 + $0x58] sm:$0xff] }
 0x75c   :  { %2924 = vmatpush1.msra.mxu0 %v11821_v28  ;;  %5213 = vmatpush3.msra.mxu1 %v11822_v41  ;;  %11834 = vst [vmem:[#allocation5_spill] sm:$0xff] %v9926_v42  ;;  %v9932_v28 = vld [vmem:[%s10942_s1 + $0x38] sm:$0xff]  ;;  %v9939_v41 = vld [vmem:[%s10942_s1 + $0x30] sm:$0xff] }
 0x75d   :  { %2925 = vmatprep.subr.mxu0 %v11823_v36  ;;  %5214 = vmatprep.subr.mxu1 %v11335_v62  ;;  %11835 = vst [vmem:[#allocation6_spill] sm:$0xff] %v9932_v28  ;;  %11836 = vst [vmem:[#allocation7_spill] sm:$0xff] %v9939_v41  ;;  %v9951_v36 = vld [vmem:[%s10942_s1 + $0x20] sm:$0xff] }
 0x75e   :  { %2926 = vmatpush1.msra.mxu0 %v11824_v13  ;;  %5215 = vmatpush3.msra.mxu1 %v11825_v14  ;;  %11838 = vst [vmem:[#allocation9_spill] sm:$0xff] %v9951_v36  ;;  %v9958_v13 = vld [vmem:[%s10942_s1 + $0x18] sm:$0xff]  ;;  %v9964_v14 = vld [vmem:[%s10942_s1 + $0x28] sm:$0xff] }
 0x75f   :  { %2927 = vmatprep.subr.mxu0 %v11826_v35  ;;  %5216 = vmatprep.subr.mxu1 %v11335_v62  ;;  %11839 = vst [vmem:[#allocation10_spill] sm:$0xff] %v9958_v13  ;;  %11840 = vst [vmem:[#allocation12_spill] sm:$0xff] %v9964_v14  ;;  %v9977_v35 = vld [vmem:[%s10942_s1] sm:$0xff] }
 0x760   :  { %2928 = vmatpush1.msra.mxu0 %v11827_v18  ;;  %5217 = vmatpush3.msra.mxu1 %v11828_v26  ;;  %11842 = vst [vmem:[#allocation13_spill] sm:$0xff] %v9977_v35  ;;  %v9984_v18 = vld [vmem:[%s10942_s1 + $0x10] sm:$0xff] }
 0x761   :  { %2929 = vmatprep.subr.mxu0 %v11829_v37  ;;  %5218 = vmatprep.subr.mxu1 %v11335_v62  ;;  %11843 = vst [vmem:[#allocation14_spill] sm:$0xff] %v9984_v18  ;;  %v9994_v26 = vld [vmem:[%s10943_s3 + $0x170] sm:$0xff]  ;;  %v10007_v37 = vld [vmem:[%s10943_s3 + $0x178] sm:$0xff] }
 0x762   :  { %2930 = vmatpush1.msra.mxu0 %v11830_v33  ;;  %5219 = vmatpush3.msra.mxu1 %v9401_v23  ;;  %v9675_v23 = vadd.f32 %v2593_v4, %v2592_v52  ;;  %11844 = vst [vmem:[#allocation15_spill] sm:$0xff] %v9994_v26  ;;  %11846 = vst [vmem:[#allocation17_spill] sm:$0xff] %v10007_v37  ;;  %v10013_v33 = vld [vmem:[%s10943_s3 + $0x158] sm:$0xff]  ;;  %v10020_v52 = vld [vmem:[%s10943_s3 + $0x150] sm:$0xff] }
 0x763   :  { %2931 = vmatprep.subr.mxu0 %v11831_v0  ;;  %5220 = vmatprep.subr.mxu1 %v11335_v62  ;;  %11847 = vst [vmem:[#allocation18_spill] sm:$0xff] %v10013_v33  ;;  %11848 = vst [vmem:[#allocation19_spill] sm:$0xff] %v10020_v52  ;;  %v10026_v0 = vld [vmem:[%s10943_s3 + $0x160] sm:$0xff]  ;;  %v10045_v4 = vld [vmem:[%s10943_s3 + $0x148] sm:$0xff] }
 0x764   :  { %2932 = vmatpush1.msra.mxu0 %v11832_v1  ;;  %5221 = vmatpush3.msra.mxu1 %v11833_v2  ;;  %11849 = vst [vmem:[#allocation20_spill] sm:$0xff] %v10026_v0  ;;  %v10032_v1 = vld [vmem:[%s10943_s3 + $0x140] sm:$0xff]  ;;  %v10039_v2 = vld [vmem:[%s10943_s3 + $0x138] sm:$0xff]  ;;  %11852 = vst [vmem:[#allocation23_spill] sm:$0xff] %v10045_v4 }
 0x765   :  { %2933 = vmatprep.subr.mxu0 %v9427_v55  ;;  %5222 = vmatprep.subr.mxu1 %v11335_v62  ;;  %v9685_v55 = vld [vmem:[%s10942_s1 + $0x170] sm:$0xff]  ;;  %11850 = vst [vmem:[#allocation21_spill] sm:$0xff] %v10032_v1  ;;  %11851 = vst [vmem:[#allocation22_spill] sm:$0xff] %v10039_v2 }
 0x766   :  { %2934 = vmatpush1.msra.mxu0 %v9434_v34  ;;  %2967 = vmatprep.mubr.f32.mxu0 %v11335_v62  ;;  %v9692_v34 = vld [vmem:[%s10942_s1 + $0x168] sm:$0xff] }
 0x767   :  { %5223 = vmatpush3.msra.mxu1 %v9443_v31  ;;  %5224 = vmatprep.mubr.msk.f32.mxu1 %vm6073_vm0, %v11335_v62  ;;  %v9704_v31 = vld [vmem:[%s10942_s1 + $0x158] sm:$0xff] }
 0x768   :  { %2968 = vmatmul.mubr.f32.vlgmr.msra.gmra.mxu0 %v9675_v23  ;;  %5225 = vmatmul.mubr.f32.vlgmr.msra.gmra.mxu1 %v9675_v23 }
 0x769   :  { %3070 = vmatprep.subr.mxu0 %v9685_v55  ;;  %5227 = vmatprep.subr.mxu1 %v11335_v62 }
 0x76a   :  { %3071 = vmatpush1.msra.mxu0 %v9692_v34  ;;  %5228 = vmatpush3.msra.mxu1 %v9698_v25 }
 0x76b   :  { %3072 = vmatprep.subr.mxu0 %v9704_v31  ;;  %5229 = vmatprep.subr.mxu1 %v11335_v62 }
 0x76c   :  { %3073 = vmatpush1.msra.mxu0 %v9711_v5  ;;  %5230 = vmatpush3.msra.mxu1 %v9717_v6 }
 0x76d   :  { %3074 = vmatprep.subr.mxu0 %v9723_v7  ;;  %5231 = vmatprep.subr.mxu1 %v11335_v62 }
 0x76e   :  { %3075 = vmatpush1.msra.mxu0 %v9730_v58  ;;  %5232 = vmatpush3.msra.mxu1 %v9736_v10 }
 0x76f   :  { %3076 = vmatprep.subr.mxu0 %v9742_v49  ;;  %5233 = vmatprep.subr.mxu1 %v11335_v62 }
 0x770   :  { %3077 = vmatpush1.msra.mxu0 %v9749_v11  ;;  %5234 = vmatpush3.msra.mxu1 %v9755_v12 }
 0x771   :  { %3078 = vmatprep.subr.mxu0 %v9761_v51  ;;  %5235 = vmatprep.subr.mxu1 %v11335_v62 }
 0x772   :  { %3079 = vmatpush1.msra.mxu0 %v9768_v59  ;;  %5236 = vmatpush3.msra.mxu1 %v9774_v60 }
 0x773   :  { %3080 = vmatprep.subr.mxu0 %v9780_v9  ;;  %5237 = vmatprep.subr.mxu1 %v11335_v62 }
 0x774   :  { %3081 = vmatpush1.msra.mxu0 %v9787_v54  ;;  %5238 = vmatpush3.msra.mxu1 %v9793_v32 }
 0x775   :  { %3082 = vmatprep.subr.mxu0 %v9799_v20  ;;  %5239 = vmatprep.subr.mxu1 %v11335_v62 }
 0x776   :  { %3083 = vmatpush1.msra.mxu0 %v9806_v50  ;;  %5240 = vmatpush3.msra.mxu1 %v9812_v46 }
 0x777   :  { %3084 = vmatprep.subr.mxu0 %v9818_v48  ;;  %5241 = vmatprep.subr.mxu1 %v11335_v62 }
 0x778   :  { %3085 = vmatpush1.msra.mxu0 %v9825_v56  ;;  %5242 = vmatpush3.msra.mxu1 %v9831_v24 }
 0x779   :  { %3086 = vmatprep.subr.mxu0 %v9837_v22  ;;  %5243 = vmatprep.subr.mxu1 %v11335_v62 }
 0x77a   :  { %3087 = vmatpush1.msra.mxu0 %v9844_v53  ;;  %5244 = vmatpush3.msra.mxu1 %v9850_v47 }
 0x77b   :  { %3088 = vmatprep.subr.mxu0 %v9856_v19  ;;  %5245 = vmatprep.subr.mxu1 %v11335_v62 }
 0x77c   :  { %3089 = vmatpush1.msra.mxu0 %v9863_v63  ;;  %5246 = vmatpush3.msra.mxu1 %v9869_v61 }
 0x77d   :  { %3090 = vmatprep.subr.mxu0 %v9875_v17  ;;  %5247 = vmatprep.subr.mxu1 %v11335_v62 }
 0x77e   :  { %3091 = vmatpush1.msra.mxu0 %v9882_v57  ;;  %5248 = vmatpush3.msra.mxu1 %v9888_v3 }
 0x77f   :  { %3092 = vmatprep.subr.mxu0 %v9894_v16  ;;  %5249 = vmatprep.subr.mxu1 %v11335_v62 }
 0x780   :  { %3093 = vmatpush1.msra.mxu0 %v9901_v29  ;;  %5250 = vmatpush3.msra.mxu1 %v9907_v45 }
 0x781   :  { %3094 = vmatprep.subr.mxu0 %v9913_v30  ;;  %5251 = vmatprep.subr.mxu1 %v11335_v62 }
 0x782   :  { %3095 = vmatpush1.msra.mxu0 %v9920_v44  ;;  %5252 = vmatpush3.msra.mxu1 %v9926_v42 }
 0x783   :  { %3096 = vmatprep.subr.mxu0 %v9932_v28  ;;  %5253 = vmatprep.subr.mxu1 %v11335_v62 }
 0x784   :  { %3097 = vmatpush1.msra.mxu0 %v9939_v41  ;;  %5254 = vmatpush3.msra.mxu1 %v9945_v39 }
 0x785   :  { %3098 = vmatprep.subr.mxu0 %v9951_v36  ;;  %5255 = vmatprep.subr.mxu1 %v11335_v62 }
 0x786   :  { %3099 = vmatpush1.msra.mxu0 %v9958_v13  ;;  %5256 = vmatpush3.msra.mxu1 %v9964_v14 }
 0x787   :  { %3100 = vmatprep.subr.mxu0 %v9970_v15  ;;  %5257 = vmatprep.subr.mxu1 %v11335_v62 }
 0x788   :  { %3101 = vmatpush1.msra.mxu0 %v9977_v35  ;;  %3134 = vmatprep.mubr.f32.mxu0 %v11335_v62 }
 0x789   :  { %5258 = vmatpush3.msra.mxu1 %v9984_v18  ;;  %5259 = vmatprep.mubr.msk.f32.mxu1 %vm6073_vm0, %v11335_v62 }
 0x78a   :  { %3135 = vmatmul.mubr.f32.vlgmr.msra.gmra.mxu0 %v9608_v38  ;;  %5260 = vmatmul.mubr.f32.vlgmr.msra.gmra.mxu1 %v9608_v38 }
 0x78b   :  { %3233 = vmatprep.subr.mxu0 %v9994_v26  ;;  %5262 = vmatprep.subr.mxu1 %v11335_v62 }
 0x78c   :  { %3234 = vmatpush1.msra.mxu0 %v10001_v8  ;;  %5263 = vmatpush3.msra.mxu1 %v10007_v37 }
 0x78d   :  { %3235 = vmatprep.subr.mxu0 %v10013_v33  ;;  %5264 = vmatprep.subr.mxu1 %v11335_v62 }
 0x78e   :  { %3236 = vmatpush1.msra.mxu0 %v10020_v52  ;;  %5265 = vmatpush3.msra.mxu1 %v10026_v0 }
 0x78f   :  { %3237 = vmatprep.subr.mxu0 %v10032_v1  ;;  %5266 = vmatprep.subr.mxu1 %v11335_v62  ;;  %v10051_v1 = vld [vmem:[%s10943_s3 + $0x128] sm:$0xff] }
 0x790   :  { %3238 = vmatpush1.msra.mxu0 %v10039_v2  ;;  %5267 = vmatpush3.msra.mxu1 %v10045_v4  ;;  %11853 = vst [vmem:[#allocation24_spill] sm:$0xff] %v10051_v1  ;;  %v10058_v2 = vld [vmem:[%s10943_s3 + $0x120] sm:$0xff]  ;;  %v10064_v4 = vld [vmem:[%s10943_s3 + $0x130] sm:$0xff] }
 0x791   :  { %3239 = vmatprep.subr.mxu0 %v10051_v1  ;;  %5268 = vmatprep.subr.mxu1 %v11335_v62  ;;  %11854 = vst [vmem:[#allocation25_spill] sm:$0xff] %v10058_v2  ;;  %11855 = vst [vmem:[#allocation26_spill] sm:$0xff] %v10064_v4  ;;  %v10070_v1 = vld [vmem:[%s10943_s3 + $0x110] sm:$0xff] }
 0x792   :  { %3240 = vmatpush1.msra.mxu0 %v10058_v2  ;;  %5269 = vmatpush3.msra.mxu1 %v10064_v4  ;;  %11856 = vst [vmem:[#allocation27_spill] sm:$0xff] %v10070_v1  ;;  %v10077_v2 = vld [vmem:[%s10943_s3 + $0x108] sm:$0xff]  ;;  %v10083_v4 = vld [vmem:[%s10943_s3 + $0x118] sm:$0xff] }
 0x793   :  { %3241 = vmatprep.subr.mxu0 %v10070_v1  ;;  %5270 = vmatprep.subr.mxu1 %v11335_v62  ;;  %11857 = vst [vmem:[#allocation28_spill] sm:$0xff] %v10077_v2  ;;  %11858 = vst [vmem:[#allocation29_spill] sm:$0xff] %v10083_v4  ;;  %v10089_v1 = vld [vmem:[%s10943_s3 + $0xf8] sm:$0xff] }
 0x794   :  { %3242 = vmatpush1.msra.mxu0 %v10077_v2  ;;  %5271 = vmatpush3.msra.mxu1 %v10083_v4  ;;  %11859 = vst [vmem:[#allocation30_spill] sm:$0xff] %v10089_v1  ;;  %v10096_v2 = vld [vmem:[%s10943_s3 + $0xf0] sm:$0xff]  ;;  %v10102_v4 = vld [vmem:[%s10943_s3 + $0x100] sm:$0xff] }
 0x795   :  { %3243 = vmatprep.subr.mxu0 %v10089_v1  ;;  %5272 = vmatprep.subr.mxu1 %v11335_v62  ;;  %11860 = vst [vmem:[#allocation31_spill] sm:$0xff] %v10096_v2  ;;  %11861 = vst [vmem:[#allocation32_spill] sm:$0xff] %v10102_v4  ;;  %v10108_v1 = vld [vmem:[%s10943_s3 + $0xe0] sm:$0xff] }
 0x796   :  { %3244 = vmatpush1.msra.mxu0 %v10096_v2  ;;  %5273 = vmatpush3.msra.mxu1 %v10102_v4  ;;  %11862 = vst [vmem:[#allocation33_spill] sm:$0xff] %v10108_v1  ;;  %v10115_v2 = vld [vmem:[%s10943_s3 + $0xd8] sm:$0xff]  ;;  %v10121_v4 = vld [vmem:[%s10943_s3 + $0xe8] sm:$0xff] }
 0x797   :  { %3245 = vmatprep.subr.mxu0 %v10108_v1  ;;  %5274 = vmatprep.subr.mxu1 %v11335_v62  ;;  %11863 = vst [vmem:[#allocation34_spill] sm:$0xff] %v10115_v2  ;;  %11864 = vst [vmem:[#allocation35_spill] sm:$0xff] %v10121_v4  ;;  %v10127_v1 = vld [vmem:[%s10943_s3 + $0xc8] sm:$0xff] }
 0x798   :  { %3246 = vmatpush1.msra.mxu0 %v10115_v2  ;;  %5275 = vmatpush3.msra.mxu1 %v10121_v4  ;;  %11865 = vst [vmem:[#allocation36_spill] sm:$0xff] %v10127_v1  ;;  %v10134_v2 = vld [vmem:[%s10943_s3 + $0xc0] sm:$0xff]  ;;  %v10140_v4 = vld [vmem:[%s10943_s3 + $0xd0] sm:$0xff] }
 0x799   :  { %3247 = vmatprep.subr.mxu0 %v10127_v1  ;;  %5276 = vmatprep.subr.mxu1 %v11335_v62  ;;  %11866 = vst [vmem:[#allocation37_spill] sm:$0xff] %v10134_v2  ;;  %11867 = vst [vmem:[#allocation38_spill] sm:$0xff] %v10140_v4  ;;  %v10146_v1 = vld [vmem:[%s10943_s3 + $0xb0] sm:$0xff] }
 0x79a   :  { %3248 = vmatpush1.msra.mxu0 %v10134_v2  ;;  %5277 = vmatpush3.msra.mxu1 %v10140_v4  ;;  %11868 = vst [vmem:[#allocation39_spill] sm:$0xff] %v10146_v1  ;;  %v10153_v2 = vld [vmem:[%s10943_s3 + $0xa8] sm:$0xff]  ;;  %v10159_v4 = vld [vmem:[%s10943_s3 + $0xb8] sm:$0xff] }
 0x79b   :  { %3249 = vmatprep.subr.mxu0 %v10146_v1  ;;  %5278 = vmatprep.subr.mxu1 %v11335_v62  ;;  %11869 = vst [vmem:[#allocation40_spill] sm:$0xff] %v10153_v2  ;;  %11870 = vst [vmem:[#allocation41_spill] sm:$0xff] %v10159_v4  ;;  %v10165_v1 = vld [vmem:[%s10943_s3 + $0x98] sm:$0xff] }
 0x79c   :  { %3250 = vmatpush1.msra.mxu0 %v10153_v2  ;;  %5279 = vmatpush3.msra.mxu1 %v10159_v4  ;;  %11871 = vst [vmem:[#allocation42_spill] sm:$0xff] %v10165_v1  ;;  %v10172_v2 = vld [vmem:[%s10943_s3 + $0x90] sm:$0xff]  ;;  %v10178_v4 = vld [vmem:[%s10943_s3 + $0xa0] sm:$0xff] }
 0x79d   :  { %3251 = vmatprep.subr.mxu0 %v10165_v1  ;;  %5280 = vmatprep.subr.mxu1 %v11335_v62  ;;  %11872 = vst [vmem:[#allocation43_spill] sm:$0xff] %v10172_v2  ;;  %11873 = vst [vmem:[#allocation44_spill] sm:$0xff] %v10178_v4  ;;  %v10184_v1 = vld [vmem:[%s10943_s3 + $0x80] sm:$0xff] }
 0x79e   :  { %3252 = vmatpush1.msra.mxu0 %v10172_v2  ;;  %5281 = vmatpush3.msra.mxu1 %v10178_v4  ;;  %11874 = vst [vmem:[#allocation45_spill] sm:$0xff] %v10184_v1  ;;  %v10191_v2 = vld [vmem:[%s10943_s3 + $0x78] sm:$0xff]  ;;  %v10197_v4 = vld [vmem:[%s10943_s3 + $0x88] sm:$0xff] }
 0x79f   :  { %3253 = vmatprep.subr.mxu0 %v10184_v1  ;;  %5282 = vmatprep.subr.mxu1 %v11335_v62  ;;  %11875 = vst [vmem:[#allocation46_spill] sm:$0xff] %v10191_v2  ;;  %11876 = vst [vmem:[#allocation47_spill] sm:$0xff] %v10197_v4  ;;  %v10203_v1 = vld [vmem:[%s10943_s3 + $0x68] sm:$0xff] }
 0x7a0   :  { %3254 = vmatpush1.msra.mxu0 %v10191_v2  ;;  %5283 = vmatpush3.msra.mxu1 %v10197_v4  ;;  %11877 = vst [vmem:[#allocation48_spill] sm:$0xff] %v10203_v1  ;;  %v10210_v2 = vld [vmem:[%s10943_s3 + $0x60] sm:$0xff]  ;;  %v10216_v4 = vld [vmem:[%s10943_s3 + $0x70] sm:$0xff] }
 0x7a1   :  { %3255 = vmatprep.subr.mxu0 %v10203_v1  ;;  %5284 = vmatprep.subr.mxu1 %v11335_v62  ;;  %11878 = vst [vmem:[#allocation49_spill] sm:$0xff] %v10210_v2  ;;  %11879 = vst [vmem:[#allocation50_spill] sm:$0xff] %v10216_v4  ;;  %v10222_v1 = vld [vmem:[%s10943_s3 + $0x50] sm:$0xff] }
 0x7a2   :  { %3256 = vmatpush1.msra.mxu0 %v10210_v2  ;;  %5285 = vmatpush3.msra.mxu1 %v10216_v4  ;;  %11880 = vst [vmem:[#allocation51_spill] sm:$0xff] %v10222_v1  ;;  %v10229_v2 = vld [vmem:[%s10943_s3 + $0x48] sm:$0xff]  ;;  %v10235_v4 = vld [vmem:[%s10943_s3 + $0x58] sm:$0xff] }
 0x7a3   :  { %3257 = vmatprep.subr.mxu0 %v10222_v1  ;;  %5286 = vmatprep.subr.mxu1 %v11335_v62  ;;  %11881 = vst [vmem:[#allocation52_spill] sm:$0xff] %v10229_v2  ;;  %11882 = vst [vmem:[#allocation53_spill] sm:$0xff] %v10235_v4  ;;  %v10241_v1 = vld [vmem:[%s10943_s3 + $0x38] sm:$0xff] }
 0x7a4   :  { %3258 = vmatpush1.msra.mxu0 %v10229_v2  ;;  %5287 = vmatpush3.msra.mxu1 %v10235_v4  ;;  %11883 = vst [vmem:[#allocation54_spill] sm:$0xff] %v10241_v1  ;;  %v10248_v2 = vld [vmem:[%s10943_s3 + $0x30] sm:$0xff]  ;;  %v10254_v4 = vld [vmem:[%s10943_s3 + $0x40] sm:$0xff] }
 0x7a5   :  { %3259 = vmatprep.subr.mxu0 %v10241_v1  ;;  %5288 = vmatprep.subr.mxu1 %v11335_v62  ;;  %11884 = vst [vmem:[#allocation55_spill] sm:$0xff] %v10248_v2  ;;  %11885 = vst [vmem:[#allocation56_spill] sm:$0xff] %v10254_v4  ;;  %v10260_v1 = vld [vmem:[%s10943_s3 + $0x20] sm:$0xff] }
 0x7a6   :  { %3260 = vmatpush1.msra.mxu0 %v10248_v2  ;;  %5289 = vmatpush3.msra.mxu1 %v10254_v4  ;;  %11886 = vst [vmem:[#allocation57_spill] sm:$0xff] %v10260_v1  ;;  %v10267_v2 = vld [vmem:[%s10943_s3 + $0x18] sm:$0xff]  ;;  %v10273_v4 = vld [vmem:[%s10943_s3 + $0x28] sm:$0xff] }
 0x7a7   :  { %3261 = vmatprep.subr.mxu0 %v10260_v1  ;;  %5290 = vmatprep.subr.mxu1 %v11335_v62  ;;  %11887 = vst [vmem:[#allocation58_spill] sm:$0xff] %v10267_v2  ;;  %11888 = vst [vmem:[#allocation59_spill] sm:$0xff] %v10273_v4  ;;  %v10279_v1 = vld [vmem:[%s10943_s3 + $0x8] sm:$0xff] }
 0x7a8   :  { %3262 = vmatpush1.msra.mxu0 %v10267_v2  ;;  %5291 = vmatpush3.msra.mxu1 %v10273_v4  ;;  %11889 = vst [vmem:[#allocation60_spill] sm:$0xff] %v10279_v1  ;;  %v10286_v2 = vld [vmem:[%s10943_s3] sm:$0xff]  ;;  %v10292_v4 = vld [vmem:[%s10943_s3 + $0x10] sm:$0xff] }
 0x7a9   :  { %3263 = vmatprep.subr.mxu0 %v10279_v1  ;;  %5292 = vmatprep.subr.mxu1 %v11335_v62  ;;  %11890 = vst [vmem:[#allocation61_spill] sm:$0xff] %v10286_v2  ;;  %11891 = vst [vmem:[#allocation62_spill] sm:$0xff] %v10292_v4  ;;  %v10301_v1 = vld [vmem:[%s10944_s4 + $0x170] sm:$0xff] }
 0x7aa   :  { %3264 = vmatpush1.msra.mxu0 %v10286_v2  ;;  %5293 = vmatpush3.msra.mxu1 %v10292_v4  ;;  %11892 = vst [vmem:[#allocation63_spill] sm:$0xff] %v10301_v1 }
 0x7ab   :  { %3297 = vmatprep.mubr.f32.mxu0 %v11335_v62  ;;  %5294 = vmatprep.mubr.msk.f32.mxu1 %vm6073_vm0, %v11335_v62 }
 0x7ac   :  { %3374 = vmatprep.subr.mxu0 %v10301_v1  ;;  %5297 = vmatprep.subr.mxu1 %v11335_v62  ;;  %v4160_v1 = vld [vmem:[%s10945_s0 + $0x18] sm:$0xff] }
 0x807   :  { %v2899_v2 = vpop.f32.mrf.mxu1  ;;  %v2828_v52 = vpop.f32.mrf.mxu0 }
 0x808   :  { %v2829_v4 = vadd.f32 %v2828_v52, %v11803_v40  ;;  %v2900_v52 = vadd.f32 %v2899_v2, %v7217_v21 }
 0x809   :  { %v5191_v0 = vpop.f32.mrf.mxu1  ;;  %v2830_v33 = vpop.f32.mrf.mxu0 }
 0x828   :  { %v2969_v37 = vpop.f32.mrf.mxu0  ;;  %v3040_v8 = vpop.f32.mrf.mxu1 }
 0x829   :  { %v3044_v26 = vadd.f32 %v2969_v37, %v2829_v4  ;;  %v3058_v0 = vadd.f32 %v9595_v27, %v3040_v8 }
 0x82a   :  { %v5226_v18 = vpop.f32.mrf.mxu1  ;;  %v2971_v13 = vpop.f32.mrf.mxu0 }
 0x82b   :  { %v4158_v35 = vmul.f32 -1.442695, %v3044_v26 }
 0x82d   :  { %5584 = vpow2.f32 %v4158_v35 }
 0x83a   :  { %v5585_v15 = vpop.eup %5584 }
 0x83b   :  { %v3052_v14 = vadd.f32 1.0, %v5585_v15 }
 0x83d   :  { %5586 = vrcp.f32 %v3052_v14  ;;  %v4161_v14 = vld [vmem:[%s10945_s0 + $0x20] sm:$0xff] }
 0x84a   :  { %v5587_v36 = vpop.eup %5586  ;;  %v3136_v39 = vpop.f32.mrf.mxu0 }
 0x84b   :  { %v3207_v41 = vpop.f32.mrf.mxu1  ;;  %v3059_v40 = vmul.f32 %v5587_v36, %v3058_v0  ;;  %v3211_v37 = vadd.f32 %v4160_v1, %v3136_v39  ;;  %v4162_v1 = vld [vmem:[%s10945_s0 + $0x28] sm:$0xff] }
 0x84c   :  { %v3138_v15 = vpop.f32.mrf.mxu0 }
 0x84d   :  { %v5261_v18 = vpop.f32.mrf.mxu1  ;;  %v10311_v26 = vadd.f32 %v3059_v40, %v2900_v52  ;;  %v4163_v35 = vmul.f32 -1.442695, %v3211_v37  ;;  %v3212_v4 = vadd.f32 %v4161_v14, %v3138_v15  ;;  %v10319_v40 = vld [vmem:[%s10946_s2] ss:$0 sm:$0xff] }
 0x84e   :  { %v3225_v39 = vadd.f32 %v10319_v40, %v3207_v41 }
 0x84f   :  { %5588 = vpow2.f32 %v4163_v35  ;;  %v4164_v28 = vmul.f32 -1.442695, %v3212_v4 }
 0x851   :  { %5590 = vpow2.f32 %v4164_v28  ;;  %v2831_v28 = vadd.f32 %v2830_v33, %v7227_v43  ;;  %v10334_v33 = vld [vmem:[%s10944_s4 + $0x168] sm:$0xff] }
 0x853   :  { %v3045_v37 = vadd.f32 %v2971_v13, %v2831_v28  ;;  %v10340_v13 = vld [vmem:[%s10944_s4 + $0x178] sm:$0xff]  ;;  %v10384_v28 = vld [vmem:[%s10944_s4 + $0x128] sm:$0xff] }
 0x85c   :  { %v5589_v27 = vpop.eup %5588 }
 0x85d   :  { %v3219_v8 = vadd.f32 1.0, %v5589_v27  ;;  %v10346_v27 = vld [vmem:[%s10944_s4 + $0x158] sm:$0xff] }
 0x85e   :  { %v5591_v42 = vpop.eup %5590 }
 0x85f   :  { %5592 = vrcp.f32 %v3219_v8  ;;  %v3220_v2 = vadd.f32 1.0, %v5591_v42  ;;  %v4159_v42 = vmul.f32 -1.442695, %v3045_v37  ;;  %v10353_v8 = vld [vmem:[%s10944_s4 + $0x150] sm:$0xff] }
 0x860   :  { %v10397_v37 = vld [vmem:[%s10944_s4 + $0x130] sm:$0xff] }
 0x861   :  { %5594 = vrcp.f32 %v3220_v2  ;;  %v10359_v2 = vld [vmem:[%s10944_s4 + $0x160] sm:$0xff] }
 0x86c   :  { %v5593_v36 = vpop.eup %5592 }
 0x86d   :  { %v3226_v0 = vmul.f32 %v5593_v36, %v3225_v39  ;;  %v10365_v39 = vld [vmem:[%s10944_s4 + $0x140] sm:$0xff] }
 0x86e   :  { %v5595_v18 = vpop.eup %5594 }
 0x86f   :  { %v3227_v52 = vadd.f32 %v4162_v1, %v3226_v0  ;;  %v3229_v35 = vsub.f32 1.0, %v5595_v18  ;;  %v3231_v41 = vmul.f32 %v5595_v18, %v9608_v38  ;;  %v10372_v1 = vld [vmem:[%s10944_s4 + $0x138] sm:$0xff]  ;;  %v10378_v0 = vld [vmem:[%s10944_s4 + $0x148] sm:$0xff] }
 0x870   :  { %v10410_v18 = vld [vmem:[%s10944_s4 + $0x108] sm:$0xff] }
 0x871   :  { %5596 = vtanh.f32 %v3227_v52  ;;  %v10391_v52 = vld [vmem:[%s10944_s4 + $0x120] sm:$0xff] }
 0x872   :  { %5598 = vpow2.f32 %v4159_v42  ;;  %v10403_v42 = vld [vmem:[%s10944_s4 + $0x110] sm:$0xff] }
 0x87e   :  { %v5597_v14 = vpop.eup %5596 }
 0x87f   :  { %v3230_v15 = vmul.f32 %v5597_v14, %v3229_v35  ;;  %v5599_v38 = vpop.eup %5598  ;;  %v10416_v35 = vld [vmem:[%s10944_s4 + $0x118] sm:$0xff] }
 0x880   :  { %v3053_v36 = vadd.f32 1.0, %v5599_v38  ;;  %11893 = vst [vmem:[#allocation64_spill] sm:$0xff] %v10416_v35  ;;  %v10422_v14 = vld [vmem:[%s10944_s4 + $0xf8] sm:$0xff]  ;;  %v10442_v38 = vld [vmem:[%s10944_s4 + $0xe0] sm:$0xff] }
 0x881   :  { %v10327_v4 = vadd.f32 %v3231_v41, %v3230_v15  ;;  %11894 = vst [vmem:[#allocation65_spill] sm:$0xff] %v10422_v14  ;;  %v10430_v15 = vld [vmem:[%s10944_s4 + $0xf0] sm:$0xff]  ;;  %v10436_v41 = vld [vmem:[%s10944_s4 + $0x100] sm:$0xff]  ;;  %11897 = vst [vmem:[#allocation68_spill] sm:$0xff] %v10442_v38 }
 0x882   :  { %5600 = vrcp.f32 %v3053_v36  ;;  %11895 = vst [vmem:[#allocation66_spill] sm:$0xff] %v10430_v15  ;;  %11896 = vst [vmem:[#allocation67_spill] sm:$0xff] %v10436_v41  ;;  %v10455_v36 = vld [vmem:[%s10944_s4 + $0xe8] sm:$0xff] }
 0x883   :  { %3298 = vmatmul.mubr.f32.vlgmr.msra.gmra.mxu0 %v10327_v4  ;;  %5295 = vmatmul.mubr.f32.vlgmr.msra.gmra.mxu1 %v10327_v4  ;;  %5602 = vtanh.f32 %v10311_v26  ;;  %v10449_v26 = vld [vmem:[%s10944_s4 + $0xd8] sm:$0xff]  ;;  %11899 = vst [vmem:[#allocation70_spill] sm:$0xff] %v10455_v36 }
 0x884   :  { %3375 = vmatpush1.msra.mxu0 %v10334_v33  ;;  %5298 = vmatpush3.msra.mxu1 %v10340_v13  ;;  %11898 = vst [vmem:[#allocation69_spill] sm:$0xff] %v10449_v26 }
 0x885   :  { %3376 = vmatprep.subr.mxu0 %v10346_v27  ;;  %5299 = vmatprep.subr.mxu1 %v11335_v62 }
 0x886   :  { %3377 = vmatpush1.msra.mxu0 %v10353_v8  ;;  %5300 = vmatpush3.msra.mxu1 %v10359_v2 }
 0x887   :  { %3378 = vmatprep.subr.mxu0 %v10365_v39  ;;  %5301 = vmatprep.subr.mxu1 %v11335_v62 }
 0x888   :  { %3379 = vmatpush1.msra.mxu0 %v10372_v1  ;;  %5302 = vmatpush3.msra.mxu1 %v10378_v0 }
 0x889   :  { %3380 = vmatprep.subr.mxu0 %v10384_v28  ;;  %5303 = vmatprep.subr.mxu1 %v11335_v62 }
 0x88a   :  { %3381 = vmatpush1.msra.mxu0 %v10391_v52  ;;  %5304 = vmatpush3.msra.mxu1 %v10397_v37 }
 0x88b   :  { %3382 = vmatprep.subr.mxu0 %v10403_v42  ;;  %5305 = vmatprep.subr.mxu1 %v11335_v62 }
 0x88c   :  { %3383 = vmatpush1.msra.mxu0 %v10410_v18  ;;  %5306 = vmatpush3.msra.mxu1 %v10416_v35 }
 0x88d   :  { %3384 = vmatprep.subr.mxu0 %v10422_v14  ;;  %5307 = vmatprep.subr.mxu1 %v11335_v62 }
 0x88e   :  { %3385 = vmatpush1.msra.mxu0 %v10430_v15  ;;  %5308 = vmatpush3.msra.mxu1 %v10436_v41 }
 0x88f   :  { %3386 = vmatprep.subr.mxu0 %v10442_v38  ;;  %5309 = vmatprep.subr.mxu1 %v11335_v62  ;;  %v10461_v38 = vld [vmem:[%s10944_s4 + $0xc8] sm:$0xff]  ;;  %v5601_v41 = vpop.eup %5600 }
 0x890   :  { %3387 = vmatpush1.msra.mxu0 %v10449_v26  ;;  %5310 = vmatpush3.msra.mxu1 %v10455_v36  ;;  %11900 = vst [vmem:[#allocation71_spill] sm:$0xff] %v10461_v38  ;;  %v10468_v26 = vld [vmem:[%s10944_s4 + $0xc0] sm:$0xff]  ;;  %v10474_v36 = vld [vmem:[%s10944_s4 + $0xd0] sm:$0xff]  ;;  %v5603_v15 = vpop.eup %5602  ;;  %v3062_v14 = vsub.f32 1.0, %v5601_v41 }
 0x891   :  { %3388 = vmatprep.subr.mxu0 %v10461_v38  ;;  %5311 = vmatprep.subr.mxu1 %v11335_v62  ;;  %11901 = vst [vmem:[#allocation72_spill] sm:$0xff] %v10468_v26  ;;  %11902 = vst [vmem:[#allocation73_spill] sm:$0xff] %v10474_v36  ;;  %v10480_v38 = vld [vmem:[%s10944_s4 + $0xb0] sm:$0xff] }
 0x892   :  { %3389 = vmatpush1.msra.mxu0 %v10468_v26  ;;  %5312 = vmatpush3.msra.mxu1 %v10474_v36  ;;  %11903 = vst [vmem:[#allocation74_spill] sm:$0xff] %v10480_v38  ;;  %v10487_v26 = vld [vmem:[%s10944_s4 + $0xa8] sm:$0xff]  ;;  %v10493_v36 = vld [vmem:[%s10944_s4 + $0xb8] sm:$0xff]  ;;  %v3063_v35 = vmul.f32 %v5603_v15, %v3062_v14  ;;  %v3064_v15 = vmul.f32 %v5601_v41, %v9675_v23  ;;  %v10630_v23 = vld [vmem:[%s10944_s4 + $0x10] sm:$0xff] }
 0x893   :  { %3390 = vmatprep.subr.mxu0 %v10480_v38  ;;  %5313 = vmatprep.subr.mxu1 %v11335_v62  ;;  %11904 = vst [vmem:[#allocation75_spill] sm:$0xff] %v10487_v26  ;;  %11905 = vst [vmem:[#allocation76_spill] sm:$0xff] %v10493_v36  ;;  %v10499_v38 = vld [vmem:[%s10944_s4 + $0x98] sm:$0xff]  ;;  %v10607_v14 = vld [vmem:[%s10944_s4 + $0x28] sm:$0xff] }
 0x894   :  { %3391 = vmatpush1.msra.mxu0 %v10487_v26  ;;  %5314 = vmatpush3.msra.mxu1 %v10493_v36  ;;  %11906 = vst [vmem:[#allocation77_spill] sm:$0xff] %v10499_v38  ;;  %v10506_v26 = vld [vmem:[%s10944_s4 + $0x90] sm:$0xff]  ;;  %v10512_v36 = vld [vmem:[%s10944_s4 + $0xa0] sm:$0xff]  ;;  %11922 = vst [vmem:[#allocation93_spill] sm:$0xff] %v10607_v14 }
 0x895   :  { %3392 = vmatprep.subr.mxu0 %v10499_v38  ;;  %5315 = vmatprep.subr.mxu1 %v11335_v62  ;;  %11907 = vst [vmem:[#allocation78_spill] sm:$0xff] %v10506_v26  ;;  %11908 = vst [vmem:[#allocation79_spill] sm:$0xff] %v10512_v36  ;;  %v10518_v38 = vld [vmem:[%s10944_s4 + $0x80] sm:$0xff] }
 0x896   :  { %3393 = vmatpush1.msra.mxu0 %v10506_v26  ;;  %5316 = vmatpush3.msra.mxu1 %v10512_v36  ;;  %11909 = vst [vmem:[#allocation80_spill] sm:$0xff] %v10518_v38  ;;  %v10525_v26 = vld [vmem:[%s10944_s4 + $0x78] sm:$0xff]  ;;  %v10531_v36 = vld [vmem:[%s10944_s4 + $0x88] sm:$0xff]  ;;  %v11962_v41 = vld [vmem:[#allocation44_spill] sm:$0xff] }
 0x897   :  { %3394 = vmatprep.subr.mxu0 %v10518_v38  ;;  %5317 = vmatprep.subr.mxu1 %v11335_v62  ;;  %11910 = vst [vmem:[#allocation81_spill] sm:$0xff] %v10525_v26  ;;  %11911 = vst [vmem:[#allocation82_spill] sm:$0xff] %v10531_v36  ;;  %v10537_v38 = vld [vmem:[%s10944_s4 + $0x68] sm:$0xff] }
 0x898   :  { %3395 = vmatpush1.msra.mxu0 %v10525_v26  ;;  %5318 = vmatpush3.msra.mxu1 %v10531_v36  ;;  %11912 = vst [vmem:[#allocation83_spill] sm:$0xff] %v10537_v38  ;;  %v10544_v26 = vld [vmem:[%s10944_s4 + $0x60] sm:$0xff]  ;;  %v10550_v36 = vld [vmem:[%s10944_s4 + $0x70] sm:$0xff] }
 0x899   :  { %3396 = vmatprep.subr.mxu0 %v10537_v38  ;;  %5319 = vmatprep.subr.mxu1 %v11335_v62  ;;  %11913 = vst [vmem:[#allocation84_spill] sm:$0xff] %v10544_v26  ;;  %11914 = vst [vmem:[#allocation85_spill] sm:$0xff] %v10550_v36  ;;  %v10556_v38 = vld [vmem:[%s10944_s4 + $0x50] sm:$0xff] }
 0x89a   :  { %3397 = vmatpush1.msra.mxu0 %v10544_v26  ;;  %5320 = vmatpush3.msra.mxu1 %v10550_v36  ;;  %11915 = vst [vmem:[#allocation86_spill] sm:$0xff] %v10556_v38  ;;  %v10563_v26 = vld [vmem:[%s10944_s4 + $0x48] sm:$0xff]  ;;  %v10569_v36 = vld [vmem:[%s10944_s4 + $0x58] sm:$0xff] }
 0x89b   :  { %3398 = vmatprep.subr.mxu0 %v10556_v38  ;;  %5321 = vmatprep.subr.mxu1 %v11335_v62  ;;  %11916 = vst [vmem:[#allocation87_spill] sm:$0xff] %v10563_v26  ;;  %11917 = vst [vmem:[#allocation88_spill] sm:$0xff] %v10569_v36  ;;  %v10575_v38 = vld [vmem:[%s10944_s4 + $0x38] sm:$0xff] }
 0x89c   :  { %3399 = vmatpush1.msra.mxu0 %v10563_v26  ;;  %5322 = vmatpush3.msra.mxu1 %v10569_v36  ;;  %11918 = vst [vmem:[#allocation89_spill] sm:$0xff] %v10575_v38  ;;  %v10582_v26 = vld [vmem:[%s10944_s4 + $0x30] sm:$0xff]  ;;  %v10588_v36 = vld [vmem:[%s10944_s4 + $0x40] sm:$0xff] }
 0x89d   :  { %3400 = vmatprep.subr.mxu0 %v10575_v38  ;;  %5323 = vmatprep.subr.mxu1 %v11335_v62  ;;  %11919 = vst [vmem:[#allocation90_spill] sm:$0xff] %v10582_v26  ;;  %v10594_v38 = vld [vmem:[%s10944_s4 + $0x20] sm:$0xff] }
 0x89e   :  { %3401 = vmatpush1.msra.mxu0 %v10582_v26  ;;  %5324 = vmatpush3.msra.mxu1 %v10588_v36  ;;  %11920 = vst [vmem:[#allocation91_spill] sm:$0xff] %v10594_v38  ;;  %v10601_v26 = vld [vmem:[%s10944_s4 + $0x18] sm:$0xff] }
 0x89f   :  { %3402 = vmatprep.subr.mxu0 %v10594_v38  ;;  %5325 = vmatprep.subr.mxu1 %v11335_v62  ;;  %11921 = vst [vmem:[#allocation92_spill] sm:$0xff] %v10601_v26  ;;  %v10614_v38 = vld [vmem:[%s10944_s4 + $0x8] sm:$0xff] }
 0x8a0   :  { %3403 = vmatpush1.msra.mxu0 %v10601_v26  ;;  %5326 = vmatpush3.msra.mxu1 %v10607_v14  ;;  %v10621_v26 = vld [vmem:[%s10944_s4] sm:$0xff]  ;;  %v10625_v14 = vadd.f32 %v3064_v15, %v3063_v35  ;;  %v11961_v35 = vld [vmem:[#allocation43_spill] sm:$0xff]  ;;  %v11963_v15 = vld [vmem:[#allocation45_spill] sm:$0xff] }
 0x8a1   :  { %3404 = vmatprep.subr.mxu0 %v10614_v38  ;;  %5327 = vmatprep.subr.mxu1 %v11335_v62 }
 0x8a2   :  { %3405 = vmatpush1.msra.mxu0 %v10621_v26  ;;  %3438 = vmatprep.mubr.f32.mxu0 %v11335_v62 }
 0x8a3   :  { %5328 = vmatpush3.msra.mxu1 %v10630_v23  ;;  %5329 = vmatprep.mubr.msk.f32.mxu1 %vm6073_vm0, %v11335_v62 }
 0x8a4   :  { %3439 = vmatmul.mubr.f32.vlgmr.msra.gmra.mxu0 %v10625_v14  ;;  %5330 = vmatmul.mubr.f32.vlgmr.msra.gmra.mxu1 %v10625_v14 }
 0x8a5   :  { %3540 = vmatprep.subr.mxu0 %v9685_v55  ;;  %5332 = vmatprep.subr.mxu1 %v11335_v62  ;;  %v11923_v55 = vld [vmem:[#allocation5_spill] sm:$0xff] }
 0x8a6   :  { %3541 = vmatpush1.msra.mxu0 %v9692_v34  ;;  %5333 = vmatpush3.msra.mxu1 %v9698_v25  ;;  %v11924_v34 = vld [vmem:[#allocation6_spill] sm:$0xff]  ;;  %v11925_v25 = vld [vmem:[#allocation7_spill] sm:$0xff] }
 0x8a7   :  { %3542 = vmatprep.subr.mxu0 %v9704_v31  ;;  %5334 = vmatprep.subr.mxu1 %v11335_v62  ;;  %v11926_v31 = vld [vmem:[#allocation8_spill] sm:$0xff] }
 0x8a8   :  { %3543 = vmatpush1.msra.mxu0 %v9711_v5  ;;  %5335 = vmatpush3.msra.mxu1 %v9717_v6  ;;  %v11927_v5 = vld [vmem:[#allocation9_spill] sm:$0xff]  ;;  %v11928_v6 = vld [vmem:[#allocation10_spill] sm:$0xff] }
 0x8a9   :  { %3544 = vmatprep.subr.mxu0 %v9723_v7  ;;  %5336 = vmatprep.subr.mxu1 %v11335_v62  ;;  %v11929_v7 = vld [vmem:[#allocation12_spill] sm:$0xff] }
 0x8aa   :  { %3545 = vmatpush1.msra.mxu0 %v9730_v58  ;;  %5337 = vmatpush3.msra.mxu1 %v9736_v10  ;;  %v11930_v58 = vld [vmem:[#allocation11_spill] sm:$0xff]  ;;  %v11931_v10 = vld [vmem:[#allocation13_spill] sm:$0xff] }
 0x8ab   :  { %3546 = vmatprep.subr.mxu0 %v9742_v49  ;;  %5338 = vmatprep.subr.mxu1 %v11335_v62  ;;  %v11932_v49 = vld [vmem:[#allocation14_spill] sm:$0xff] }
 0x8ac   :  { %3547 = vmatpush1.msra.mxu0 %v9749_v11  ;;  %5339 = vmatpush3.msra.mxu1 %v9755_v12  ;;  %v11933_v11 = vld [vmem:[#allocation15_spill] sm:$0xff]  ;;  %v11934_v12 = vld [vmem:[#allocation16_spill] sm:$0xff] }
 0x8ad   :  { %3548 = vmatprep.subr.mxu0 %v9761_v51  ;;  %5340 = vmatprep.subr.mxu1 %v11335_v62  ;;  %v11935_v51 = vld [vmem:[#allocation17_spill] sm:$0xff] }
 0x8ae   :  { %3549 = vmatpush1.msra.mxu0 %v9768_v59  ;;  %5341 = vmatpush3.msra.mxu1 %v9774_v60  ;;  %v11936_v59 = vld [vmem:[#allocation18_spill] sm:$0xff]  ;;  %v11937_v60 = vld [vmem:[#allocation19_spill] sm:$0xff] }
 0x8af   :  { %3550 = vmatprep.subr.mxu0 %v9780_v9  ;;  %5342 = vmatprep.subr.mxu1 %v11335_v62  ;;  %v11938_v9 = vld [vmem:[#allocation20_spill] sm:$0xff] }
 0x8b0   :  { %3551 = vmatpush1.msra.mxu0 %v9787_v54  ;;  %5343 = vmatpush3.msra.mxu1 %v9793_v32  ;;  %v11939_v54 = vld [vmem:[#allocation21_spill] sm:$0xff]  ;;  %v11940_v32 = vld [vmem:[#allocation22_spill] sm:$0xff] }
 0x8b1   :  { %3552 = vmatprep.subr.mxu0 %v9799_v20  ;;  %5344 = vmatprep.subr.mxu1 %v11335_v62  ;;  %v11941_v20 = vld [vmem:[#allocation23_spill] sm:$0xff] }
 0x8b2   :  { %3553 = vmatpush1.msra.mxu0 %v9806_v50  ;;  %5345 = vmatpush3.msra.mxu1 %v9812_v46  ;;  %v11942_v50 = vld [vmem:[#allocation24_spill] sm:$0xff]  ;;  %v11943_v46 = vld [vmem:[#allocation25_spill] sm:$0xff] }
 0x8b3   :  { %3554 = vmatprep.subr.mxu0 %v9818_v48  ;;  %5346 = vmatprep.subr.mxu1 %v11335_v62  ;;  %v11944_v48 = vld [vmem:[#allocation26_spill] sm:$0xff] }
 0x8b4   :  { %3555 = vmatpush1.msra.mxu0 %v9825_v56  ;;  %5347 = vmatpush3.msra.mxu1 %v9831_v24  ;;  %v11945_v56 = vld [vmem:[#allocation27_spill] sm:$0xff]  ;;  %v11946_v24 = vld [vmem:[#allocation28_spill] sm:$0xff] }
 0x8b5   :  { %3556 = vmatprep.subr.mxu0 %v9837_v22  ;;  %5348 = vmatprep.subr.mxu1 %v11335_v62  ;;  %v11947_v22 = vld [vmem:[#allocation29_spill] sm:$0xff] }
 0x8b6   :  { %3557 = vmatpush1.msra.mxu0 %v9844_v53  ;;  %5349 = vmatpush3.msra.mxu1 %v9850_v47  ;;  %v11948_v53 = vld [vmem:[#allocation30_spill] sm:$0xff]  ;;  %v11949_v47 = vld [vmem:[#allocation31_spill] sm:$0xff] }
 0x8b7   :  { %3558 = vmatprep.subr.mxu0 %v9856_v19  ;;  %5350 = vmatprep.subr.mxu1 %v11335_v62  ;;  %v11950_v19 = vld [vmem:[#allocation32_spill] sm:$0xff] }
 0x8b8   :  { %3559 = vmatpush1.msra.mxu0 %v9863_v63  ;;  %5351 = vmatpush3.msra.mxu1 %v9869_v61  ;;  %v11951_v63 = vld [vmem:[#allocation33_spill] sm:$0xff]  ;;  %v11952_v61 = vld [vmem:[#allocation34_spill] sm:$0xff] }
 0x8b9   :  { %3560 = vmatprep.subr.mxu0 %v9875_v17  ;;  %5352 = vmatprep.subr.mxu1 %v11335_v62  ;;  %v11953_v17 = vld [vmem:[#allocation35_spill] sm:$0xff] }
 0x8ba   :  { %3561 = vmatpush1.msra.mxu0 %v9882_v57  ;;  %5353 = vmatpush3.msra.mxu1 %v9888_v3  ;;  %v11954_v57 = vld [vmem:[#allocation36_spill] sm:$0xff]  ;;  %v11955_v3 = vld [vmem:[#allocation37_spill] sm:$0xff] }
 0x8bb   :  { %3562 = vmatprep.subr.mxu0 %v9894_v16  ;;  %5354 = vmatprep.subr.mxu1 %v11335_v62  ;;  %v11956_v16 = vld [vmem:[#allocation38_spill] sm:$0xff] }
 0x8bc   :  { %3563 = vmatpush1.msra.mxu0 %v9901_v29  ;;  %5355 = vmatpush3.msra.mxu1 %v9907_v45  ;;  %v11957_v29 = vld [vmem:[#allocation39_spill] sm:$0xff]  ;;  %v11958_v45 = vld [vmem:[#allocation40_spill] sm:$0xff] }
 0x8bd   :  { %3564 = vmatprep.subr.mxu0 %v9913_v30  ;;  %5356 = vmatprep.subr.mxu1 %v11335_v62  ;;  %v11959_v30 = vld [vmem:[#allocation41_spill] sm:$0xff] }
 0x8be   :  { %3565 = vmatpush1.msra.mxu0 %v9920_v44  ;;  %5357 = vmatpush3.msra.mxu1 %v11923_v55  ;;  %v11960_v44 = vld [vmem:[#allocation42_spill] sm:$0xff] }
 0x8bf   :  { %3566 = vmatprep.subr.mxu0 %v11924_v34  ;;  %5358 = vmatprep.subr.mxu1 %v11335_v62  ;;  %v11964_v55 = vld [vmem:[#allocation46_spill] sm:$0xff]  ;;  %v11965_v34 = vld [vmem:[#allocation47_spill] sm:$0xff] }
 0x8c0   :  { %3567 = vmatpush1.msra.mxu0 %v11925_v25  ;;  %5359 = vmatpush3.msra.mxu1 %v11926_v31  ;;  %v11966_v25 = vld [vmem:[#allocation48_spill] sm:$0xff]  ;;  %v11967_v31 = vld [vmem:[#allocation49_spill] sm:$0xff] }
 0x8c1   :  { %3568 = vmatprep.subr.mxu0 %v11927_v5  ;;  %5360 = vmatprep.subr.mxu1 %v11335_v62  ;;  %v11968_v5 = vld [vmem:[#allocation50_spill] sm:$0xff] }
 0x8c2   :  { %3569 = vmatpush1.msra.mxu0 %v11928_v6  ;;  %5361 = vmatpush3.msra.mxu1 %v11929_v7  ;;  %v11969_v6 = vld [vmem:[#allocation51_spill] sm:$0xff]  ;;  %v11970_v7 = vld [vmem:[#allocation52_spill] sm:$0xff] }
 0x8c3   :  { %3570 = vmatprep.subr.mxu0 %v11930_v58  ;;  %5362 = vmatprep.subr.mxu1 %v11335_v62  ;;  %v11971_v58 = vld [vmem:[#allocation53_spill] sm:$0xff] }
 0x8c4   :  { %3571 = vmatpush1.msra.mxu0 %v11931_v10  ;;  %3604 = vmatprep.mubr.f32.mxu0 %v11335_v62  ;;  %v11972_v10 = vld [vmem:[#allocation54_spill] sm:$0xff] }
 0x8c5   :  { %5363 = vmatpush3.msra.mxu1 %v11932_v49  ;;  %5364 = vmatprep.mubr.msk.f32.mxu1 %vm6073_vm0, %v11335_v62  ;;  %v11973_v49 = vld [vmem:[#allocation55_spill] sm:$0xff] }
 0x8c6   :  { %3605 = vmatmul.mubr.f32.vlgmr.msra.gmra.mxu0 %v10327_v4  ;;  %5365 = vmatmul.mubr.f32.vlgmr.msra.gmra.mxu1 %v10327_v4 }
 0x8c7   :  { %3703 = vmatprep.subr.mxu0 %v11933_v11  ;;  %5367 = vmatprep.subr.mxu1 %v11335_v62  ;;  %v11974_v11 = vld [vmem:[#allocation56_spill] sm:$0xff] }
 0x8c8   :  { %3704 = vmatpush1.msra.mxu0 %v11934_v12  ;;  %5368 = vmatpush3.msra.mxu1 %v11935_v51  ;;  %v11975_v12 = vld [vmem:[#allocation57_spill] sm:$0xff]  ;;  %v11976_v51 = vld [vmem:[#allocation58_spill] sm:$0xff] }
 0x8c9   :  { %3705 = vmatprep.subr.mxu0 %v11936_v59  ;;  %5369 = vmatprep.subr.mxu1 %v11335_v62  ;;  %v11977_v59 = vld [vmem:[#allocation59_spill] sm:$0xff] }
 0x8ca   :  { %3706 = vmatpush1.msra.mxu0 %v11937_v60  ;;  %5370 = vmatpush3.msra.mxu1 %v11938_v9  ;;  %v11978_v60 = vld [vmem:[#allocation60_spill] sm:$0xff]  ;;  %v11979_v9 = vld [vmem:[#allocation61_spill] sm:$0xff] }
 0x8cb   :  { %3707 = vmatprep.subr.mxu0 %v11939_v54  ;;  %5371 = vmatprep.subr.mxu1 %v11335_v62  ;;  %v11980_v54 = vld [vmem:[#allocation62_spill] sm:$0xff] }
 0x8cc   :  { %3708 = vmatpush1.msra.mxu0 %v11940_v32  ;;  %5372 = vmatpush3.msra.mxu1 %v11941_v20  ;;  %v11981_v32 = vld [vmem:[#allocation63_spill] sm:$0xff] }
 0x8cd   :  { %3709 = vmatprep.subr.mxu0 %v11942_v50  ;;  %5373 = vmatprep.subr.mxu1 %v11335_v62 }
 0x8ce   :  { %3710 = vmatpush1.msra.mxu0 %v11943_v46  ;;  %5374 = vmatpush3.msra.mxu1 %v11944_v48 }
 0x8cf   :  { %3711 = vmatprep.subr.mxu0 %v11945_v56  ;;  %5375 = vmatprep.subr.mxu1 %v11335_v62  ;;  %v11982_v56 = vld [vmem:[#allocation4_spill] sm:$0xff] }
 0x8d0   :  { %3712 = vmatpush1.msra.mxu0 %v11946_v24  ;;  %5376 = vmatpush3.msra.mxu1 %v11947_v22 }
 0x8d1   :  { %3713 = vmatprep.subr.mxu0 %v11948_v53  ;;  %5377 = vmatprep.subr.mxu1 %v11335_v62 }
 0x8d2   :  { %3714 = vmatpush1.msra.mxu0 %v11949_v47  ;;  %5378 = vmatpush3.msra.mxu1 %v11950_v19 }
 0x8d3   :  { %3715 = vmatprep.subr.mxu0 %v11951_v63  ;;  %5379 = vmatprep.subr.mxu1 %v11335_v62 }
 0x8d4   :  { %3716 = vmatpush1.msra.mxu0 %v11952_v61  ;;  %5380 = vmatpush3.msra.mxu1 %v11953_v17 }
 0x8d5   :  { %3717 = vmatprep.subr.mxu0 %v11954_v57  ;;  %5381 = vmatprep.subr.mxu1 %v11335_v62 }
 0x8d6   :  { %3718 = vmatpush1.msra.mxu0 %v11955_v3  ;;  %5382 = vmatpush3.msra.mxu1 %v11956_v16  ;;  %v3537_v3 = vld [vmem:[%s10945_s0] sm:$0xff] }
 0x8d7   :  { %3719 = vmatprep.subr.mxu0 %v11957_v29  ;;  %5383 = vmatprep.subr.mxu1 %v11335_v62  ;;  %v10782_v16 = vld [vmem:[%s10948_s6] ss:$0 sm:$0xff] }
 0x8d8   :  { %3720 = vmatpush1.msra.mxu0 %v11958_v45  ;;  %5384 = vmatpush3.msra.mxu1 %v11959_v30 }
 0x8d9   :  { %3721 = vmatprep.subr.mxu0 %v11960_v44  ;;  %5385 = vmatprep.subr.mxu1 %v11335_v62 }
 0x8da   :  { %3722 = vmatpush1.msra.mxu0 %v11961_v35  ;;  %5386 = vmatpush3.msra.mxu1 %v11962_v41 }
 0x8db   :  { %3723 = vmatprep.subr.mxu0 %v11963_v15  ;;  %5387 = vmatprep.subr.mxu1 %v11335_v62 }
 0x8dc   :  { %3724 = vmatpush1.msra.mxu0 %v11964_v55  ;;  %5388 = vmatpush3.msra.mxu1 %v11965_v34 }
 0x8dd   :  { %3725 = vmatprep.subr.mxu0 %v11966_v25  ;;  %5389 = vmatprep.subr.mxu1 %v11335_v62 }
 0x8de   :  { %3726 = vmatpush1.msra.mxu0 %v11967_v31  ;;  %5390 = vmatpush3.msra.mxu1 %v11968_v5  ;;  %v3538_v31 = vld [vmem:[%s10945_s0 + $0x8] sm:$0xff] }
 0x8df   :  { %3727 = vmatprep.subr.mxu0 %v11969_v6  ;;  %5391 = vmatprep.subr.mxu1 %v11335_v62 }
 0x8e0   :  { %3728 = vmatpush1.msra.mxu0 %v11970_v7  ;;  %5392 = vmatpush3.msra.mxu1 %v11971_v58 }
 0x8e1   :  { %3729 = vmatprep.subr.mxu0 %v11972_v10  ;;  %5393 = vmatprep.subr.mxu1 %v11335_v62 }
 0x8e2   :  { %3730 = vmatpush1.msra.mxu0 %v11973_v49  ;;  %5394 = vmatpush3.msra.mxu1 %v11974_v11 }
 0x8e3   :  { %3731 = vmatprep.subr.mxu0 %v11975_v12  ;;  %5395 = vmatprep.subr.mxu1 %v11335_v62 }
 0x8e4   :  { %3732 = vmatpush1.msra.mxu0 %v11976_v51  ;;  %5396 = vmatpush3.msra.mxu1 %v11977_v59  ;;  %v3539_v59 = vld [vmem:[%s10945_s0 + $0x10] sm:$0xff] }
 0x8e5   :  { %3733 = vmatprep.subr.mxu0 %v11978_v60  ;;  %5397 = vmatprep.subr.mxu1 %v11335_v62 }
 0x8e6   :  { %3734 = vmatpush1.msra.mxu0 %v11979_v9  ;;  %5398 = vmatpush3.msra.mxu1 %v11980_v54 }
 0x8e7   :  { %3767 = vmatprep.mubr.f32.mxu0 %v11335_v62  ;;  %5399 = vmatprep.mubr.msk.f32.mxu1 %vm6073_vm0, %v11335_v62 }
 0x8e8   :  { %3844 = vmatprep.subr.mxu0 %v11981_v32  ;;  %5402 = vmatprep.subr.mxu1 %v11335_v62 }
 0x943   :  { %v3370_v20 = vpop.f32.mrf.mxu1  ;;  %v3299_v46 = vpop.f32.mrf.mxu0 }
 0x944   :  { %v3300_v24 = vadd.f32 %v3299_v46, %v11982_v56  ;;  %v3371_v35 = vadd.f32 %v3370_v20, %v7217_v21 }
 0x945   :  { %v5296_v50 = vpop.f32.mrf.mxu1  ;;  %v3301_v48 = vpop.f32.mrf.mxu0 }
 0x946   :  { %v3302_v9 = vadd.f32 %v3301_v48, %v7227_v43  ;;  %v11996_v48 = vld [vmem:[#allocation77_spill] sm:$0xff] }
 0x964   :  { %v3440_v22 = vpop.f32.mrf.mxu0  ;;  %v3511_v53 = vpop.f32.mrf.mxu1 }
 0x965   :  { %v3515_v47 = vadd.f32 %v3440_v22, %v3300_v24  ;;  %v3529_v29 = vadd.f32 %v10782_v16, %v3511_v53 }
 0x966   :  { %v5331_v19 = vpop.f32.mrf.mxu1  ;;  %v3442_v57 = vpop.f32.mrf.mxu0 }
 0x967   :  { %v4165_v63 = vmul.f32 -1.442695, %v3515_v47  ;;  %v3516_v32 = vadd.f32 %v3442_v57, %v3302_v9  ;;  %v11997_v19 = vld [vmem:[#allocation78_spill] sm:$0xff]  ;;  %v4016_v9 = vld [vmem:[%s10949_s7 + $0x20] sm:$0xff] }
 0x968   :  { %v12001_v57 = vld [vmem:[#allocation82_spill] sm:$0xff] }
 0x969   :  { %5604 = vpow2.f32 %v4165_v63  ;;  %v4166_v20 = vmul.f32 -1.442695, %v3516_v32  ;;  %v11998_v63 = vld [vmem:[#allocation79_spill] sm:$0xff]  ;;  %v4014_v32 = vld [vmem:[%s10949_s7 + $0x10] sm:$0xff] }
 0x976   :  { %v5605_v61 = vpop.eup %5604 }
 0x977   :  { %v3523_v17 = vadd.f32 1.0, %v5605_v61  ;;  %v11999_v61 = vld [vmem:[#allocation80_spill] sm:$0xff] }
 0x979   :  { %5606 = vrcp.f32 %v3523_v17  ;;  %v12000_v17 = vld [vmem:[#allocation81_spill] sm:$0xff] }
 0x986   :  { %v5607_v45 = vpop.eup %5606  ;;  %v3606_v30 = vpop.f32.mrf.mxu0 }
 0x987   :  { %v3677_v44 = vpop.f32.mrf.mxu1  ;;  %v3530_v41 = vmul.f32 %v5607_v45, %v3529_v29  ;;  %v3681_v15 = vadd.f32 %v3606_v30, %v3537_v3  ;;  %v12002_v29 = vld [vmem:[#allocation83_spill] sm:$0xff]  ;;  %v12003_v45 = vld [vmem:[#allocation84_spill] sm:$0xff]  ;;  %v12004_v30 = vld [vmem:[#allocation85_spill] sm:$0xff] }
 0x988   :  { %v3608_v5 = vpop.f32.mrf.mxu0  ;;  %v3695_v12 = vadd.f32 %v10319_v40, %v3677_v44 }
 0x989   :  { %v5366_v55 = vpop.f32.mrf.mxu1  ;;  %v3531_v34 = vadd.f32 %v3530_v41, %v3371_v35  ;;  %v4167_v25 = vmul.f32 -1.442695, %v3681_v15  ;;  %v3682_v6 = vadd.f32 %v3608_v5, %v3538_v31  ;;  %v12005_v35 = vld [vmem:[#allocation86_spill] sm:$0xff]  ;;  %v12006_v41 = vld [vmem:[#allocation87_spill] sm:$0xff]  ;;  %v12007_v15 = vld [vmem:[#allocation88_spill] sm:$0xff] }
 0x98a   :  { %v12010_v5 = vld [vmem:[#allocation91_spill] sm:$0xff] }
 0x98b   :  { %5608 = vpow2.f32 %v4167_v25  ;;  %v4168_v7 = vmul.f32 -1.442695, %v3682_v6  ;;  %v12009_v25 = vld [vmem:[#allocation90_spill] sm:$0xff]  ;;  %v12011_v6 = vld [vmem:[#allocation92_spill] sm:$0xff] }
 0x98d   :  { %5610 = vpow2.f32 %v4168_v7  ;;  %v12012_v7 = vld [vmem:[#allocation93_spill] sm:$0xff] }
 0x998   :  { %v5609_v58 = vpop.eup %5608 }
 0x999   :  { %v3689_v10 = vadd.f32 1.0, %v5609_v58 }
 0x99a   :  { %v5611_v49 = vpop.eup %5610 }
 0x99b   :  { %5612 = vrcp.f32 %v3689_v10  ;;  %v3690_v11 = vadd.f32 1.0, %v5611_v49  ;;  %v4023_v10 = vld [vmem:[%s10949_s7 + $0x58] sm:$0xff]  ;;  %v4022_v49 = vld [vmem:[%s10949_s7 + $0x50] sm:$0xff] }
 0x99d   :  { %5614 = vrcp.f32 %v3690_v11  ;;  %v4021_v11 = vld [vmem:[%s10949_s7 + $0x48] sm:$0xff] }
 0x9a8   :  { %v5613_v51 = vpop.eup %5612 }
 0x9a9   :  { %v3696_v60 = vmul.f32 %v5613_v51, %v3695_v12  ;;  %v4020_v12 = vld [vmem:[%s10949_s7 + $0x40] sm:$0xff]  ;;  %v4019_v51 = vld [vmem:[%s10949_s7 + $0x38] sm:$0xff] }
 0x9aa   :  { %v5615_v50 = vpop.eup %5614 }
 0x9ab   :  { %v3697_v54 = vadd.f32 %v3696_v60, %v3539_v59  ;;  %v3699_v46 = vsub.f32 1.0, %v5615_v50  ;;  %v3701_v40 = vmul.f32 %v5615_v50, %v10327_v4  ;;  %v4018_v59 = vld [vmem:[%s10949_s7 + $0x30] sm:$0xff]  ;;  %v4017_v60 = vld [vmem:[%s10949_s7 + $0x28] sm:$0xff]  ;;  %v4012_v50 = vld [vmem:[%s10949_s7] sm:$0xff] }
 0x9ad   :  { %5616 = vtanh.f32 %v3697_v54  ;;  %v4015_v54 = vld [vmem:[%s10949_s7 + $0x18] sm:$0xff] }
 0x9ae   :  { %5618 = vpow2.f32 %v4166_v20  ;;  %v4013_v20 = vld [vmem:[%s10949_s7 + $0x8] sm:$0xff] }
 0x9ba   :  { %v5617_v24 = vpop.eup %5616 }
 0x9bb   :  { %v3700_v22 = vmul.f32 %v5617_v24, %v3699_v46  ;;  %v5619_v47 = vpop.eup %5618 }
 0x9bc   :  { %v3524_v4 = vadd.f32 1.0, %v5619_v47 }
 0x9bd   :  { %v3702_v53 = vadd.f32 %v3701_v40, %v3700_v22 }
 0x9be   :  { %5620 = vrcp.f32 %v3524_v4 }
 0x9bf   :  { %3768 = vmatmul.mubr.f32.vlgmr.msra.gmra.mxu0 %v3702_v53  ;;  %5400 = vmatmul.mubr.f32.vlgmr.msra.gmra.mxu1 %v3702_v53  ;;  %5622 = vtanh.f32 %v3531_v34  ;;  %v12008_v34 = vld [vmem:[#allocation89_spill] sm:$0xff] }
 0x9c0   :  { %3845 = vmatpush1.msra.mxu0 %v10334_v33  ;;  %5403 = vmatpush3.msra.mxu1 %v10340_v13  ;;  %v11983_v33 = vld [vmem:[#allocation64_spill] sm:$0xff]  ;;  %v11984_v13 = vld [vmem:[#allocation65_spill] sm:$0xff] }
 0x9c1   :  { %3846 = vmatprep.subr.mxu0 %v10346_v27  ;;  %5404 = vmatprep.subr.mxu1 %v11335_v62  ;;  %v11985_v27 = vld [vmem:[#allocation66_spill] sm:$0xff] }
 0x9c2   :  { %3847 = vmatpush1.msra.mxu0 %v10353_v8  ;;  %5405 = vmatpush3.msra.mxu1 %v10359_v2  ;;  %v11986_v8 = vld [vmem:[#allocation67_spill] sm:$0xff]  ;;  %v11987_v2 = vld [vmem:[#allocation68_spill] sm:$0xff] }
 0x9c3   :  { %3848 = vmatprep.subr.mxu0 %v10365_v39  ;;  %5406 = vmatprep.subr.mxu1 %v11335_v62  ;;  %v11988_v39 = vld [vmem:[#allocation69_spill] sm:$0xff] }
 0x9c4   :  { %3849 = vmatpush1.msra.mxu0 %v10372_v1  ;;  %5407 = vmatpush3.msra.mxu1 %v10378_v0  ;;  %v11989_v1 = vld [vmem:[#allocation70_spill] sm:$0xff]  ;;  %v11990_v0 = vld [vmem:[#allocation71_spill] sm:$0xff] }
 0x9c5   :  { %3850 = vmatprep.subr.mxu0 %v10384_v28  ;;  %5408 = vmatprep.subr.mxu1 %v11335_v62  ;;  %v11991_v28 = vld [vmem:[#allocation72_spill] sm:$0xff] }
 0x9c6   :  { %3851 = vmatpush1.msra.mxu0 %v10391_v52  ;;  %5409 = vmatpush3.msra.mxu1 %v10397_v37  ;;  %v11992_v52 = vld [vmem:[#allocation73_spill] sm:$0xff]  ;;  %v11993_v37 = vld [vmem:[#allocation74_spill] sm:$0xff] }
 0x9c7   :  { %3852 = vmatprep.subr.mxu0 %v10403_v42  ;;  %5410 = vmatprep.subr.mxu1 %v11335_v62  ;;  %v11994_v42 = vld [vmem:[#allocation75_spill] sm:$0xff] }
 0x9c8   :  { %3853 = vmatpush1.msra.mxu0 %v10410_v18  ;;  %5411 = vmatpush3.msra.mxu1 %v11983_v33  ;;  %v11995_v18 = vld [vmem:[#allocation76_spill] sm:$0xff] }
 0x9c9   :  { %3854 = vmatprep.subr.mxu0 %v11984_v13  ;;  %5412 = vmatprep.subr.mxu1 %v11335_v62 }
 0x9ca   :  { %3855 = vmatpush1.msra.mxu0 %v11985_v27  ;;  %5413 = vmatpush3.msra.mxu1 %v11986_v8 }
 0x9cb   :  { %3856 = vmatprep.subr.mxu0 %v11987_v2  ;;  %5414 = vmatprep.subr.mxu1 %v11335_v62  ;;  %v5621_v3 = vpop.eup %5620 }
 0x9cc   :  { %3857 = vmatpush1.msra.mxu0 %v11988_v39  ;;  %5415 = vmatpush3.msra.mxu1 %v11989_v1  ;;  %v5623_v44 = vpop.eup %5622  ;;  %v3533_v55 = vsub.f32 1.0, %v5621_v3  ;;  %v3535_v58 = vmul.f32 %v5621_v3, %v10625_v14  ;;  %v4025_v14 = vld [vmem:[%s10949_s7 + $0x68] sm:$0xff]  ;;  %v4171_v3 = vld [vmem:[%s10950_s8] ss:$0 sm:$0xff] }
 0x9cd   :  { %3858 = vmatprep.subr.mxu0 %v11990_v0  ;;  %5416 = vmatprep.subr.mxu1 %v11335_v62 }
 0x9ce   :  { %3859 = vmatpush1.msra.mxu0 %v11991_v28  ;;  %5417 = vmatpush3.msra.mxu1 %v11992_v52  ;;  %v3534_v31 = vmul.f32 %v5623_v44, %v3533_v55 }
 0x9cf   :  { %3860 = vmatprep.subr.mxu0 %v11993_v37  ;;  %5418 = vmatprep.subr.mxu1 %v11335_v62 }
 0x9d0   :  { %3861 = vmatpush1.msra.mxu0 %v11994_v42  ;;  %5419 = vmatpush3.msra.mxu1 %v11995_v18 }
 0x9d1   :  { %3862 = vmatprep.subr.mxu0 %v11996_v48  ;;  %5420 = vmatprep.subr.mxu1 %v11335_v62 }
 0x9d2   :  { %3863 = vmatpush1.msra.mxu0 %v11997_v19  ;;  %5421 = vmatpush3.msra.mxu1 %v11998_v63 }
 0x9d3   :  { %3864 = vmatprep.subr.mxu0 %v11999_v61  ;;  %5422 = vmatprep.subr.mxu1 %v11335_v62 }
 0x9d4   :  { %3865 = vmatpush1.msra.mxu0 %v12000_v17  ;;  %5423 = vmatpush3.msra.mxu1 %v12001_v57 }
 0x9d5   :  { %3866 = vmatprep.subr.mxu0 %v12002_v29  ;;  %5424 = vmatprep.subr.mxu1 %v11335_v62 }
 0x9d6   :  { %3867 = vmatpush1.msra.mxu0 %v12003_v45  ;;  %5425 = vmatpush3.msra.mxu1 %v12004_v30 }
 0x9d7   :  { %3868 = vmatprep.subr.mxu0 %v12005_v35  ;;  %5426 = vmatprep.subr.mxu1 %v11335_v62 }
 0x9d8   :  { %3869 = vmatpush1.msra.mxu0 %v12006_v41  ;;  %5427 = vmatpush3.msra.mxu1 %v12007_v15 }
 0x9d9   :  { %3870 = vmatprep.subr.mxu0 %v12008_v34  ;;  %5428 = vmatprep.subr.mxu1 %v11335_v62 }
 0x9da   :  { %3871 = vmatpush1.msra.mxu0 %v12009_v25  ;;  %5429 = vmatpush3.msra.mxu1 %v10588_v36  ;;  %v10858_v36 = vadd.f32 %v3535_v58, %v3534_v31 }
 0x9db   :  { %3872 = vmatprep.subr.mxu0 %v12010_v5  ;;  %5430 = vmatprep.subr.mxu1 %v11335_v62 }
 0x9dc   :  { %3873 = vmatpush1.msra.mxu0 %v12011_v6  ;;  %5431 = vmatpush3.msra.mxu1 %v12012_v7 }
 0x9dd   :  { %3874 = vmatprep.subr.mxu0 %v10614_v38  ;;  %5432 = vmatprep.subr.mxu1 %v11335_v62  ;;  %v4027_v38 = vld [vmem:[%s10949_s7 + $0x78] sm:$0xff] }
 0x9de   :  { %3875 = vmatpush1.msra.mxu0 %v10621_v26  ;;  %3908 = vmatprep.mubr.f32.mxu0 %v11335_v62  ;;  %v4026_v26 = vld [vmem:[%s10949_s7 + $0x70] sm:$0xff] }
 0x9df   :  { %5433 = vmatpush3.msra.mxu1 %v10630_v23  ;;  %5434 = vmatprep.mubr.msk.f32.mxu1 %vm6073_vm0, %v11335_v62  ;;  %v4024_v23 = vld [vmem:[%s10949_s7 + $0x60] sm:$0xff] }
 0x9e0   :  { %3909 = vmatmul.mubr.f32.vlgmr.msra.gmra.mxu0 %v10858_v36  ;;  %5435 = vmatmul.mubr.f32.vlgmr.msra.gmra.mxu1 %v10858_v36 }
 0x9e1   :  { %5437 = vmatprep.subr.mxu0 %v11335_v62  ;;  %5469 = vmatprep.mubr.msk.f32.mxu0 %vm6073_vm0, %v11335_v62 }
 0x9e2   :  { %5438 = vmatpush3.msra.mxu0 %v4027_v38 }
 0x9e3   :  { %5439 = vmatprep.subr.mxu0 %v11335_v62 }
 0x9e4   :  { %5440 = vmatpush3.msra.mxu0 %v4026_v26 }
 0x9e5   :  { %5441 = vmatprep.subr.mxu0 %v11335_v62 }
 0x9e6   :  { %5442 = vmatpush3.msra.mxu0 %v4025_v14 }
 0x9e7   :  { %5443 = vmatprep.subr.mxu0 %v11335_v62 }
 0x9e8   :  { %5444 = vmatpush3.msra.mxu0 %v4024_v23 }
 0x9e9   :  { %5445 = vmatprep.subr.mxu0 %v11335_v62 }
 0x9ea   :  { %5446 = vmatpush3.msra.mxu0 %v4023_v10 }
 0x9eb   :  { %5447 = vmatprep.subr.mxu0 %v11335_v62 }
 0x9ec   :  { %5448 = vmatpush3.msra.mxu0 %v4022_v49 }
 0x9ed   :  { %5449 = vmatprep.subr.mxu0 %v11335_v62 }
 0x9ee   :  { %5450 = vmatpush3.msra.mxu0 %v4021_v11 }
 0x9ef   :  { %5451 = vmatprep.subr.mxu0 %v11335_v62 }
 0x9f0   :  { %5452 = vmatpush3.msra.mxu0 %v4020_v12 }
 0x9f1   :  { %5453 = vmatprep.subr.mxu0 %v11335_v62 }
 0x9f2   :  { %5454 = vmatpush3.msra.mxu0 %v4019_v51 }
 0x9f3   :  { %5455 = vmatprep.subr.mxu0 %v11335_v62 }
 0x9f4   :  { %5456 = vmatpush3.msra.mxu0 %v4018_v59 }
 0x9f5   :  { %5457 = vmatprep.subr.mxu0 %v11335_v62 }
 0x9f6   :  { %5458 = vmatpush3.msra.mxu0 %v4017_v60 }
 0x9f7   :  { %5459 = vmatprep.subr.mxu0 %v11335_v62 }
 0x9f8   :  { %5460 = vmatpush3.msra.mxu0 %v4016_v9 }
 0x9f9   :  { %5461 = vmatprep.subr.mxu0 %v11335_v62 }
 0x9fa   :  { %5462 = vmatpush3.msra.mxu0 %v4015_v54 }
 0x9fb   :  { %5463 = vmatprep.subr.mxu0 %v11335_v62 }
 0x9fc   :  { %5464 = vmatpush3.msra.mxu0 %v4014_v32 }
 0x9fd   :  { %5465 = vmatprep.subr.mxu0 %v11335_v62 }
 0x9fe   :  { %5466 = vmatpush3.msra.mxu0 %v4013_v20 }
 0x9ff   :  { %5467 = vmatprep.subr.mxu0 %v11335_v62 }
 0xa00   :  { %5468 = vmatpush3.msra.mxu0 %v4012_v50 }
 0xa7f   :  { %v3840_v46 = vpop.f32.mrf.mxu1  ;;  %v3769_v22 = vpop.f32.mrf.mxu0 }
 0xa80   :  { %v3770_v53 = vadd.f32 %v3769_v22, %v11982_v56  ;;  %v3841_v42 = vadd.f32 %v3840_v46, %v7217_v21 }
 0xa81   :  { %v5401_v24 = vpop.f32.mrf.mxu1  ;;  %v3771_v40 = vpop.f32.mrf.mxu0 }
 0xa82   :  { %v3772_v2 = vadd.f32 %v3771_v40, %v7227_v43 }
 0xaa0   :  { %v3910_v47 = vpop.f32.mrf.mxu0  ;;  %v3981_v4 = vpop.f32.mrf.mxu1 }
 0xaa1   :  { %v3985_v33 = vadd.f32 %v3910_v47, %v3770_v53  ;;  %v3999_v37 = vadd.f32 %v10782_v16, %v3981_v4 }
 0xaa2   :  { %v5436_v13 = vpop.f32.mrf.mxu1  ;;  %v3912_v8 = vpop.f32.mrf.mxu0 }
 0xaa3   :  { %v4169_v27 = vmul.f32 -1.442695, %v3985_v33  ;;  %v3986_v39 = vadd.f32 %v3912_v8, %v3772_v2 }
 0xaa5   :  { %5624 = vpow2.f32 %v4169_v27  ;;  %v4170_v1 = vmul.f32 -1.442695, %v3986_v39 }
 0xaa7   :  { %5626 = vpow2.f32 %v4170_v1 }
 0xab2   :  { %v5625_v62 = vpop.eup %5624 }
 0xab3   :  { %v3993_v0 = vadd.f32 1.0, %v5625_v62 }
 0xab4   :  { %v5627_v28 = vpop.eup %5626 }
 0xab5   :  { %5628 = vrcp.f32 %v3993_v0  ;;  %v3994_v52 = vadd.f32 1.0, %v5627_v28 }
 0xab7   :  { %5630 = vrcp.f32 %v3994_v52 }
 0xac2   :  { %v5629_v56 = vpop.eup %5628 }
 0xac3   :  { %v4000_v18 = vmul.f32 %v5629_v56, %v3999_v37 }
 0xac4   :  { %v5631_v19 = vpop.eup %5630 }
 0xac5   :  { %v4001_v48 = vadd.f32 %v4000_v18, %v3841_v42  ;;  %v4003_v43 = vsub.f32 1.0, %v5631_v19  ;;  %v4005_v17 = vmul.f32 %v5631_v19, %v10858_v36 }
 0xac7   :  { %5632 = vtanh.f32 %v4001_v48 }
 0xad4   :  { %v5633_v63 = vpop.eup %5632 }
 0xad5   :  { %v4004_v61 = vmul.f32 %v5633_v63, %v4003_v43 }
 0xad7   :  { %v4006_v57 = vadd.f32 %v4005_v17, %v4004_v61 }
 0xad9   :  { %5470 = vmatmul.mubr.f32.vlgmr.msra.gmra.mxu0 %v4006_v57 }
 0xb99   :  { %v4101_v16 = vpop.f32.mrf.mxu0 }
 0xb9a   :  { %v4102_v29 = vadd.f32 %v4171_v3, %v4101_v16 }
 0xb9b   :  { %v5471_v45 = vpop.f32.mrf.mxu0 }
 0xb9c   :  { %4105 = vst [vmem:[%s10951_s9] sm:$0xff] %v4102_v29 }

</bundles_post_ra>
